<compile_context>
chip_gen: v7x
topology: tpu7x:2x2x1
jax: 0.10.0
libtpu: 0.0.40
codegen_flags: <defaults>
</compile_context>

<pallas_src>
import math

import jax
import jax.numpy as jnp
from jax.experimental import pallas as pl
from jax.experimental.pallas import tpu as pltpu

# ----------------------------- small config ---------------------------------
IMG = 16          # img_size
PATCH = 4         # patch_size
CIN = 3           # in_channels
EMBED = 32        # embed_dim
ENC_DEPTH = 2
DEC_DEPTH = 2
HEADS = 4
MLP_RATIO = 4.0
BATCH = 2

NPATCH = (IMG // PATCH) ** 2            # 16
DFF = int(EMBED * MLP_RATIO)            # 128
HEAD_DIM = EMBED // HEADS               # 8
PATCH_DIM = PATCH * PATCH * CIN         # 48
LN_EPS = 1e-5                           # torch layer_norm default eps
LANE = 128                              # lane width of the packed slabs

_LOG2_NPATCH = NPATCH.bit_length() - 1
assert (1 << _LOG2_NPATCH) == NPATCH, "in-kernel mask assumes power-of-two NPATCH"


# --------------------- packed-parameter layout plan --------------------------
def _build_plans():
    wplan = [("pe_w", PATCH_DIM, EMBED)]
    bplan = [("pe_b", EMBED)]
    for l in range(ENC_DEPTH):
        p = f"enc{l}_"
        wplan += [(p + "wqkv", EMBED, 3 * EMBED), (p + "wo", EMBED, EMBED),
                  (p + "w1", EMBED, DFF), (p + "w2", DFF, EMBED)]
        bplan += [(p + "bqkv", 3 * EMBED), (p + "bo", EMBED),
                  (p + "b1", DFF), (p + "b2", EMBED),
                  (p + "ln1_g", EMBED), (p + "ln1_b", EMBED),
                  (p + "ln2_g", EMBED), (p + "ln2_b", EMBED)]
    for l in range(DEC_DEPTH):
        p = f"dec{l}_"
        wplan += [(p + "swqkv", EMBED, 3 * EMBED), (p + "swo", EMBED, EMBED),
                  (p + "cwq", EMBED, EMBED), (p + "cwkv", EMBED, 2 * EMBED),
                  (p + "cwo", EMBED, EMBED),
                  (p + "w1", EMBED, DFF), (p + "w2", DFF, EMBED)]
        bplan += [(p + "sbqkv", 3 * EMBED), (p + "sbo", EMBED),
                  (p + "cbq", EMBED), (p + "cbkv", 2 * EMBED), (p + "cbo", EMBED),
                  (p + "b1", DFF), (p + "b2", EMBED),
                  (p + "ln1_g", EMBED), (p + "ln1_b", EMBED),
                  (p + "ln2_g", EMBED), (p + "ln2_b", EMBED),
                  (p + "ln3_g", EMBED), (p + "ln3_b", EMBED)]
    wplan.append(("head_w", EMBED, PATCH_DIM))
    bplan.append(("head_b", PATCH_DIM))
    return wplan, bplan


_W_PLAN, _B_PLAN = _build_plans()

_W_OFF = {}
_row = 0
for _n, _r, _c in _W_PLAN:
    _W_OFF[_n] = (_row, _r, _c)
    _row += _r
_W_ROWS = _row                                   # total weight-slab rows

_B_OFF = {_n: (_i, _c) for _i, (_n, _c) in enumerate(_B_PLAN)}
_B_ROWS = len(_B_PLAN)


# ----------------------------- in-kernel math --------------------------------
def _gelu_erf(x):
    # (Near-)exact erf GELU: Abramowitz–Stegun 7.1.26 polynomial
    # (|erf error| < 1.5e-7), built only from exp/mul so it lowers in Mosaic —
    # keeps nn.GELU() (exact-erf) semantics inside the kernel.
    z = x * (1.0 / math.sqrt(2.0))
    az = jnp.abs(z)
    t = 1.0 / (1.0 + 0.3275911 * az)
    poly = t * (0.254829592 + t * (-0.284496736 + t * (1.421413741
               + t * (-1.453152027 + t * 1.061405429))))
    erf_abs = 1.0 - poly * jnp.exp(-az * az)
    erf_z = jnp.where(z >= 0.0, erf_abs, -erf_abs)
    return 0.5 * x * (1.0 + erf_z)


def _fused_vit_kernel(patches_ref, pos_ref, w_ref, b_ref, rec_ref, enc_out_ref):
    """Entire ViTAutoencoder forward; 4 whole-array VMEM operands, 2 outputs."""
    f32 = jnp.float32
    E = EMBED
    BN = patches_ref.shape[0]                     # B * NPATCH tokens
    scale = 1.0 / math.sqrt(HEAD_DIM)

    def W(name):                                  # (rows, 128), zero-padded cols
        off, rows, _ = _W_OFF[name]
        return w_ref[off:off + rows, :]

    def Bfull(name):                              # (1, 128), zero-padded cols
        off = _B_OFF[name][0]
        return b_ref[off:off + 1, :]

    def Bvec(name, width):
        return Bfull(name)[:, :width]

    # Block-diagonal batch mask (keeps attention within each batch element once
    # the (B, N) token axes are flattened), pre-stacked across heads so it can
    # be added once to the head-stacked score matrix.
    rtok = jax.lax.broadcasted_iota(jnp.int32, (BN, BN), 0)
    ctok = jax.lax.broadcasted_iota(jnp.int32, (BN, BN), 1)
    same = (rtok >> _LOG2_NPATCH) == (ctok >> _LOG2_NPATCH)
    mask_small = jnp.where(same, 0.0, -1e9).astype(f32)          # (BN, BN)
    mask = jnp.concatenate([mask_small] * HEADS, axis=0)         # (H*BN, BN)

    def layernorm(v, gname, bname):
        mean = jnp.mean(v, axis=-1, keepdims=True)
        c = v - mean
        var = jnp.mean(c * c, axis=-1, keepdims=True)
        return c * jax.lax.rsqrt(var + LN_EPS) * Bvec(gname, E) + Bvec(bname, E)

    def attn_core(q, k, v, wo_name, bo_name):
        """q,k,v: (BN, E) already projected (+bias); q already scaled."""
        # Per-head scores, stacked along sublanes -> ONE softmax over (H*BN, BN).
        s = jnp.concatenate(
            [jnp.dot(q[:, h * HEAD_DIM:(h + 1) * HEAD_DIM],
                     k[:, h * HEAD_DIM:(h + 1) * HEAD_DIM].T,
                     preferred_element_type=f32)
             for h in range(HEADS)], axis=0)
        s = s + mask
        s = s - jnp.max(s, axis=-1, keepdims=True)
        e = jnp.exp(s)
        p = e / jnp.sum(e, axis=-1, keepdims=True)               # exact divide
        # Heads re-concatenated along lanes -> ONE (E, E) output projection.
        o = jnp.concatenate(
            [jnp.dot(p[h * BN:(h + 1) * BN, :],
                     v[:, h * HEAD_DIM:(h + 1) * HEAD_DIM],
                     preferred_element_type=f32)
             for h in range(HEADS)], axis=-1)                    # (BN, E)
        out = jnp.dot(o, W(wo_name), preferred_element_type=f32) + Bfull(bo_name)
        return out[:, :E]

    def ffn(v, pre):
        h1 = jnp.dot(v, W(pre + "w1"), preferred_element_type=f32) + Bfull(pre + "b1")
        h1 = jnp.maximum(h1, 0.0)                                # relu (torch default)
        h2 = jnp.dot(h1, W(pre + "w2"), preferred_element_type=f32) + Bfull(pre + "b2")
        return h2[:, :E]

    # ---- patch embed: Conv2d(k=p, stride=p) == patches @ W, plus pos ----
    x = jnp.dot(patches_ref[...], W("pe_w"), preferred_element_type=f32) + Bfull("pe_b")
    x = x[:, :E] + pos_ref[...]

    # ---- encoder: post-norm TransformerEncoderLayer, dropout = identity ----
    for l in range(ENC_DEPTH):
        p = f"enc{l}_"
        qkv = jnp.dot(x, W(p + "wqkv"), preferred_element_type=f32) + Bfull(p + "bqkv")
        sa = attn_core(qkv[:, :E] * scale, qkv[:, E:2 * E], qkv[:, 2 * E:3 * E],
                       p + "wo", p + "bo")
        x = layernorm(x + sa, p + "ln1_g", p + "ln1_b")
        x = layernorm(x + ffn(x, p), p + "ln2_g", p + "ln2_b")
    enc_out_ref[...] = x.astype(enc_out_ref.dtype)

    # ---- decoder: query = pos_embed expanded, memory = encoder output ----
    d = pos_ref[...]
    for l in range(DEC_DEPTH):
        p = f"dec{l}_"
        qkv = jnp.dot(d, W(p + "swqkv"), preferred_element_type=f32) + Bfull(p + "sbqkv")
        sa = attn_core(qkv[:, :E] * scale, qkv[:, E:2 * E], qkv[:, 2 * E:3 * E],
                       p + "swo", p + "sbo")
        d = layernorm(d + sa, p + "ln1_g", p + "ln1_b")

        qc = (jnp.dot(d, W(p + "cwq"), preferred_element_type=f32) + Bfull(p + "cbq"))[:, :E]
        kv = jnp.dot(x, W(p + "cwkv"), preferred_element_type=f32) + Bfull(p + "cbkv")
        ca = attn_core(qc * scale, kv[:, :E], kv[:, E:2 * E], p + "cwo", p + "cbo")
        d = layernorm(d + ca, p + "ln2_g", p + "ln2_b")

        d = layernorm(d + ffn(d, p), p + "ln3_g", p + "ln3_b")

    # ---- reconstruction head: Linear + exact-erf GELU, lane-dense store ----
    rec = jnp.dot(d, W("head_w"), preferred_element_type=f32) + Bfull("head_b")
    rec_ref[...] = _gelu_erf(rec).astype(rec_ref.dtype)          # (BN, 128) padded


# ----------------------------- layout glue -----------------------------------
def patchify(x):
    """NCHW image -> (B, N, C*p*p); matches Conv2d(k=p, stride=p) patch order."""
    B, C, H, Wd = x.shape
    hh, ww = H // PATCH, Wd // PATCH
    x = x.reshape(B, C, hh, PATCH, ww, PATCH)
    x = x.transpose(0, 2, 4, 1, 3, 5)                  # (B, h, w, C, p, p)
    return x.reshape(B, hh * ww, C * PATCH * PATCH)


def unpatchify(patches):
    """Matches the PyTorch module's unpatchify exactly (reshape as (p,p,c))."""
    B, N, _ = patches.shape
    hh = ww = int(round(N ** 0.5))
    x = patches.reshape(B, hh, ww, PATCH, PATCH, CIN)
    x = jnp.einsum("nhwpqc->nchpwq", x)
    return x.reshape(B, CIN, hh * PATCH, ww * PATCH)


def pack_params(params):
    """Pack all weights / biases into two lane-dense (rows, 128) f32 slabs."""
    wblocks = []
    for name, rows, cols in _W_PLAN:
        a = jnp.asarray(params["weights"][name], jnp.float32)
        assert a.shape == (rows, cols), (name, a.shape)
        wblocks.append(jnp.pad(a, ((0, 0), (0, LANE - cols))))
    wslab = jnp.concatenate(wblocks, axis=0)                     # (_W_ROWS, 128)

    bblocks = []
    for name, cols in _B_PLAN:
        a = jnp.asarray(params["biases"][name], jnp.float32).reshape(1, cols)
        bblocks.append(jnp.pad(a, ((0, 0), (0, LANE - cols))))
    bslab = jnp.concatenate(bblocks, axis=0)                     # (_B_ROWS, 128)

    pos = jnp.asarray(params["pos"], jnp.float32)
    return wslab, bslab, pos


# ----------------------------- full forward ----------------------------------
def vit_autoencoder_forward(x, pos, wslab, bslab):
    B = x.shape[0]
    patches = patchify(x).reshape(B * NPATCH, PATCH_DIM)
    pos_bn = jnp.tile(pos, (B, 1))                               # (B*N, E)

    vmem = pl.BlockSpec(memory_space=pltpu.MemorySpace.VMEM)
    rec_pad, enc = pl.pallas_call(
        _fused_vit_kernel,
        in_specs=[vmem, vmem, vmem, vmem],
        out_specs=(vmem, vmem),
        out_shape=(
            jax.ShapeDtypeStruct((B * NPATCH, LANE), jnp.float32),   # lane-dense
            jax.ShapeDtypeStruct((B * NPATCH, EMBED), jnp.float32),
        ),
    )(patches, pos_bn, wslab, bslab)

    rec = rec_pad[:, :PATCH_DIM]
    out = unpatchify(rec.reshape(B, NPATCH, PATCH_DIM))
    encoded = enc.reshape(B, NPATCH, EMBED)
    return out, encoded


# ----------------------------- parameter init --------------------------------
def init_params(key):
    kw, kb = jax.random.split(key)
    wkeys = jax.random.split(kw, len(_W_PLAN))
    bkeys = jax.random.split(kb, len(_B_PLAN))

    weights = {n: 0.02 * jax.random.normal(k, (r, c), jnp.float32)
               for (n, r, c), k in zip(_W_PLAN, wkeys)}

    biases = {}
    for (n, c), k in zip(_B_PLAN, bkeys):
        if "ln" in n and n.endswith("_g"):
            biases[n] = jnp.ones((c,), jnp.float32)
        elif "ln" in n and n.endswith("_b"):
            biases[n] = jnp.zeros((c,), jnp.float32)
        else:
            biases[n] = 0.02 * jax.random.normal(k, (c,), jnp.float32)

    pos = jnp.zeros((NPATCH, EMBED), jnp.float32)    # torch zero-inits pos_embed
    return {"weights": weights, "biases": biases, "pos": pos}


# ----------------------------------- main -------------------------------------
if __name__ == "__main__":
    key = jax.random.PRNGKey(0)
    pkey, xkey = jax.random.split(key)
    params = init_params(pkey)
    wslab, bslab, pos = pack_params(params)          # packed once, outside jit
    x = jax.random.normal(xkey, (BATCH, CIN, IMG, IMG), dtype=jnp.float32)

    fwd = jax.jit(vit_autoencoder_forward)
    out, encoded = fwd(x, pos, wslab, bslab)
    jax.block_until_ready((out, encoded))

    assert out.shape == (BATCH, CIN, IMG, IMG), out.shape
    assert encoded.shape == (BATCH, NPATCH, EMBED), encoded.shape
    assert bool(jnp.all(jnp.isfinite(out))) and bool(jnp.all(jnp.isfinite(encoded)))
    print("KERNEL_OK")
</pallas_src>

<mosaic_0001>
module attributes {stable_mosaic.version = 11 : i64} {
  func.func @_fused_vit_kernel(%arg0: memref<32x48xf32, #tpu.memory_space<vmem>>, %arg1: memref<32x32xf32, #tpu.memory_space<vmem>>, %arg2: memref<1168x128xf32, #tpu.memory_space<vmem>>, %arg3: memref<44x128xf32, #tpu.memory_space<vmem>>, %arg4: memref<32x128xf32, #tpu.memory_space<vmem>>, %arg5: memref<32x32xf32, #tpu.memory_space<vmem>>) attributes {dimension_semantics = [], scalar_prefetch = 0 : i64, scratch_operands = 0 : i64, tpu.core_type = #tpu.core_type<tc>} {
    %0 = tpu.iota {dimensions = array<i32: 0>} : vector<32x32xi32>
    %1 = tpu.iota {dimensions = array<i32: 1>} : vector<32x32xi32>
    %c4_i32 = arith.constant 4 : i32
    %2 = vector.broadcast %c4_i32 : i32 to vector<32x32xi32>
    %3 = arith.shrsi %0, %2 : vector<32x32xi32>
    %c4_i32_0 = arith.constant 4 : i32
    %4 = vector.broadcast %c4_i32_0 : i32 to vector<32x32xi32>
    %5 = arith.shrsi %1, %4 : vector<32x32xi32>
    %6 = arith.cmpi eq, %3, %5 : vector<32x32xi32>
    %cst = arith.constant 0.000000e+00 : f32
    %cst_1 = arith.constant -1.000000e+09 : f32
    %7 = vector.broadcast %cst : f32 to vector<32x32xf32>
    %8 = vector.broadcast %cst_1 : f32 to vector<32x32xf32>
    %9 = arith.select %6, %7, %8 : vector<32x32xi1>, vector<32x32xf32>
    %10 = tpu.concatenate %9, %9, %9, %9 in 0 : vector<32x32xf32>, vector<32x32xf32>, vector<32x32xf32>, vector<32x32xf32> -> vector<128x32xf32>
    %c0 = arith.constant 0 : index
    %c0_2 = arith.constant 0 : index
    %11 = vector.load %arg0[%c0, %c0_2] : memref<32x48xf32, #tpu.memory_space<vmem>>, vector<32x48xf32>
    %c0_3 = arith.constant 0 : index
    %c0_4 = arith.constant 0 : index
    %12 = vector.load %arg2[%c0_3, %c0_4] : memref<1168x128xf32, #tpu.memory_space<vmem>>, vector<48x128xf32>
    %cst_5 = arith.constant dense<0.000000e+00> : vector<32x128xf32>
    %13 = tpu.matmul %11, %12, %cst_5 {dimension_numbers = #tpu.dot_dimension_numbers<[1], [0], [0], [1], [0, 0, 1, 1], [], []>} : vector<32x48xf32>, vector<48x128xf32>, vector<32x128xf32> -> vector<32x128xf32>
    %c0_6 = arith.constant 0 : index
    %c0_7 = arith.constant 0 : index
    %14 = vector.load %arg3[%c0_6, %c0_7] : memref<44x128xf32, #tpu.memory_space<vmem>>, vector<1x128xf32>
    %15 = vector.broadcast %14 : vector<1x128xf32> to vector<32x128xf32>
    %16 = arith.addf %13, %15 : vector<32x128xf32>
    %17 = vector.extract_strided_slice %16 {offsets = [0, 0], sizes = [32, 32], strides = [1, 1]} : vector<32x128xf32> to vector<32x32xf32>
    %c0_8 = arith.constant 0 : index
    %c0_9 = arith.constant 0 : index
    %18 = vector.load %arg1[%c0_8, %c0_9] : memref<32x32xf32, #tpu.memory_space<vmem>>, vector<32x32xf32>
    %19 = arith.addf %17, %18 : vector<32x32xf32>
    %c48 = arith.constant 48 : index
    %c0_10 = arith.constant 0 : index
    %20 = vector.load %arg2[%c48, %c0_10] : memref<1168x128xf32, #tpu.memory_space<vmem>>, vector<32x128xf32>
    %cst_11 = arith.constant dense<0.000000e+00> : vector<32x128xf32>
    %21 = tpu.matmul %19, %20, %cst_11 {dimension_numbers = #tpu.dot_dimension_numbers<[1], [0], [0], [1], [0, 0, 1, 1], [], []>} : vector<32x32xf32>, vector<32x128xf32>, vector<32x128xf32> -> vector<32x128xf32>
    %c1 = arith.constant 1 : index
    %c0_12 = arith.constant 0 : index
    %22 = vector.load %arg3[%c1, %c0_12] : memref<44x128xf32, #tpu.memory_space<vmem>>, vector<1x128xf32>
    %23 = vector.broadcast %22 : vector<1x128xf32> to vector<32x128xf32>
    %24 = arith.addf %21, %23 : vector<32x128xf32>
    %25 = vector.extract_strided_slice %24 {offsets = [0, 0], sizes = [32, 32], strides = [1, 1]} : vector<32x128xf32> to vector<32x32xf32>
    %cst_13 = arith.constant 0.353553385 : f32
    %26 = vector.broadcast %cst_13 : f32 to vector<32x32xf32>
    %27 = arith.mulf %25, %26 : vector<32x32xf32>
    %28 = vector.extract_strided_slice %24 {offsets = [0, 32], sizes = [32, 32], strides = [1, 1]} : vector<32x128xf32> to vector<32x32xf32>
    %29 = vector.extract_strided_slice %24 {offsets = [0, 64], sizes = [32, 32], strides = [1, 1]} : vector<32x128xf32> to vector<32x32xf32>
    %30 = vector.extract_strided_slice %27 {offsets = [0, 0], sizes = [32, 8], strides = [1, 1]} : vector<32x32xf32> to vector<32x8xf32>
    %31 = vector.extract_strided_slice %28 {offsets = [0, 0], sizes = [32, 8], strides = [1, 1]} : vector<32x32xf32> to vector<32x8xf32>
    %32 = tpu.transpose %31, [1, 0] : vector<32x8xf32> -> vector<8x32xf32>
    %cst_14 = arith.constant dense<0.000000e+00> : vector<32x32xf32>
    %33 = tpu.matmul %30, %32, %cst_14 {dimension_numbers = #tpu.dot_dimension_numbers<[1], [0], [0], [1], [0, 0, 1, 1], [], []>} : vector<32x8xf32>, vector<8x32xf32>, vector<32x32xf32> -> vector<32x32xf32>
    %34 = vector.extract_strided_slice %27 {offsets = [0, 8], sizes = [32, 8], strides = [1, 1]} : vector<32x32xf32> to vector<32x8xf32>
    %35 = vector.extract_strided_slice %28 {offsets = [0, 8], sizes = [32, 8], strides = [1, 1]} : vector<32x32xf32> to vector<32x8xf32>
    %36 = tpu.transpose %35, [1, 0] : vector<32x8xf32> -> vector<8x32xf32>
    %cst_15 = arith.constant dense<0.000000e+00> : vector<32x32xf32>
    %37 = tpu.matmul %34, %36, %cst_15 {dimension_numbers = #tpu.dot_dimension_numbers<[1], [0], [0], [1], [0, 0, 1, 1], [], []>} : vector<32x8xf32>, vector<8x32xf32>, vector<32x32xf32> -> vector<32x32xf32>
    %38 = vector.extract_strided_slice %27 {offsets = [0, 16], sizes = [32, 8], strides = [1, 1]} : vector<32x32xf32> to vector<32x8xf32>
    %39 = vector.extract_strided_slice %28 {offsets = [0, 16], sizes = [32, 8], strides = [1, 1]} : vector<32x32xf32> to vector<32x8xf32>
    %40 = tpu.transpose %39, [1, 0] : vector<32x8xf32> -> vector<8x32xf32>
    %cst_16 = arith.constant dense<0.000000e+00> : vector<32x32xf32>
    %41 = tpu.matmul %38, %40, %cst_16 {dimension_numbers = #tpu.dot_dimension_numbers<[1], [0], [0], [1], [0, 0, 1, 1], [], []>} : vector<32x8xf32>, vector<8x32xf32>, vector<32x32xf32> -> vector<32x32xf32>
    %42 = vector.extract_strided_slice %27 {offsets = [0, 24], sizes = [32, 8], strides = [1, 1]} : vector<32x32xf32> to vector<32x8xf32>
    %43 = vector.extract_strided_slice %28 {offsets = [0, 24], sizes = [32, 8], strides = [1, 1]} : vector<32x32xf32> to vector<32x8xf32>
    %44 = tpu.transpose %43, [1, 0] : vector<32x8xf32> -> vector<8x32xf32>
    %cst_17 = arith.constant dense<0.000000e+00> : vector<32x32xf32>
    %45 = tpu.matmul %42, %44, %cst_17 {dimension_numbers = #tpu.dot_dimension_numbers<[1], [0], [0], [1], [0, 0, 1, 1], [], []>} : vector<32x8xf32>, vector<8x32xf32>, vector<32x32xf32> -> vector<32x32xf32>
    %46 = tpu.concatenate %33, %37, %41, %45 in 0 : vector<32x32xf32>, vector<32x32xf32>, vector<32x32xf32>, vector<32x32xf32> -> vector<128x32xf32>
    %47 = arith.addf %46, %10 : vector<128x32xf32>
    %cst_18 = arith.constant dense<0xFF800000> : vector<128xf32>
    %48 = vector.multi_reduction <maximumf>, %47, %cst_18 [1] : vector<128x32xf32> to vector<128xf32>
    %49 = vector.shape_cast %48 : vector<128xf32> to vector<128x1xf32>
    %50 = vector.broadcast %49 : vector<128x1xf32> to vector<128x32xf32>
    %51 = arith.subf %47, %50 : vector<128x32xf32>
    %52 = math.exp %51 : vector<128x32xf32>
    %cst_19 = arith.constant dense<0.000000e+00> : vector<128xf32>
    %53 = vector.multi_reduction <add>, %52, %cst_19 [1] : vector<128x32xf32> to vector<128xf32>
    %54 = vector.shape_cast %53 : vector<128xf32> to vector<128x1xf32>
    %55 = vector.broadcast %54 : vector<128x1xf32> to vector<128x32xf32>
    %56 = arith.divf %52, %55 : vector<128x32xf32>
    %57 = vector.extract_strided_slice %56 {offsets = [0, 0], sizes = [32, 32], strides = [1, 1]} : vector<128x32xf32> to vector<32x32xf32>
    %58 = vector.extract_strided_slice %29 {offsets = [0, 0], sizes = [32, 8], strides = [1, 1]} : vector<32x32xf32> to vector<32x8xf32>
    %cst_20 = arith.constant dense<0.000000e+00> : vector<32x8xf32>
    %59 = tpu.matmul %57, %58, %cst_20 {dimension_numbers = #tpu.dot_dimension_numbers<[1], [0], [0], [1], [0, 0, 1, 1], [], []>} : vector<32x32xf32>, vector<32x8xf32>, vector<32x8xf32> -> vector<32x8xf32>
    %60 = vector.extract_strided_slice %56 {offsets = [32, 0], sizes = [32, 32], strides = [1, 1]} : vector<128x32xf32> to vector<32x32xf32>
    %61 = vector.extract_strided_slice %29 {offsets = [0, 8], sizes = [32, 8], strides = [1, 1]} : vector<32x32xf32> to vector<32x8xf32>
    %cst_21 = arith.constant dense<0.000000e+00> : vector<32x8xf32>
    %62 = tpu.matmul %60, %61, %cst_21 {dimension_numbers = #tpu.dot_dimension_numbers<[1], [0], [0], [1], [0, 0, 1, 1], [], []>} : vector<32x32xf32>, vector<32x8xf32>, vector<32x8xf32> -> vector<32x8xf32>
    %63 = vector.extract_strided_slice %56 {offsets = [64, 0], sizes = [32, 32], strides = [1, 1]} : vector<128x32xf32> to vector<32x32xf32>
    %64 = vector.extract_strided_slice %29 {offsets = [0, 16], sizes = [32, 8], strides = [1, 1]} : vector<32x32xf32> to vector<32x8xf32>
    %cst_22 = arith.constant dense<0.000000e+00> : vector<32x8xf32>
    %65 = tpu.matmul %63, %64, %cst_22 {dimension_numbers = #tpu.dot_dimension_numbers<[1], [0], [0], [1], [0, 0, 1, 1], [], []>} : vector<32x32xf32>, vector<32x8xf32>, vector<32x8xf32> -> vector<32x8xf32>
    %66 = vector.extract_strided_slice %56 {offsets = [96, 0], sizes = [32, 32], strides = [1, 1]} : vector<128x32xf32> to vector<32x32xf32>
    %67 = vector.extract_strided_slice %29 {offsets = [0, 24], sizes = [32, 8], strides = [1, 1]} : vector<32x32xf32> to vector<32x8xf32>
    %cst_23 = arith.constant dense<0.000000e+00> : vector<32x8xf32>
    %68 = tpu.matmul %66, %67, %cst_23 {dimension_numbers = #tpu.dot_dimension_numbers<[1], [0], [0], [1], [0, 0, 1, 1], [], []>} : vector<32x32xf32>, vector<32x8xf32>, vector<32x8xf32> -> vector<32x8xf32>
    %69 = tpu.concatenate %59, %62, %65, %68 in 1 : vector<32x8xf32>, vector<32x8xf32>, vector<32x8xf32>, vector<32x8xf32> -> vector<32x32xf32>
    %c80 = arith.constant 80 : index
    %c0_24 = arith.constant 0 : index
    %70 = vector.load %arg2[%c80, %c0_24] : memref<1168x128xf32, #tpu.memory_space<vmem>>, vector<32x128xf32>
    %cst_25 = arith.constant dense<0.000000e+00> : vector<32x128xf32>
    %71 = tpu.matmul %69, %70, %cst_25 {dimension_numbers = #tpu.dot_dimension_numbers<[1], [0], [0], [1], [0, 0, 1, 1], [], []>} : vector<32x32xf32>, vector<32x128xf32>, vector<32x128xf32> -> vector<32x128xf32>
    %c2 = arith.constant 2 : index
    %c0_26 = arith.constant 0 : index
    %72 = vector.load %arg3[%c2, %c0_26] : memref<44x128xf32, #tpu.memory_space<vmem>>, vector<1x128xf32>
    %73 = vector.broadcast %72 : vector<1x128xf32> to vector<32x128xf32>
    %74 = arith.addf %71, %73 : vector<32x128xf32>
    %75 = vector.extract_strided_slice %74 {offsets = [0, 0], sizes = [32, 32], strides = [1, 1]} : vector<32x128xf32> to vector<32x32xf32>
    %76 = arith.addf %19, %75 : vector<32x32xf32>
    %cst_27 = arith.constant dense<0.000000e+00> : vector<32xf32>
    %77 = vector.multi_reduction <add>, %76, %cst_27 [1] : vector<32x32xf32> to vector<32xf32>
    %78 = vector.shape_cast %77 : vector<32xf32> to vector<32x1xf32>
    %cst_28 = arith.constant 3.200000e+01 : f32
    %79 = vector.broadcast %cst_28 : f32 to vector<32x1xf32>
    %80 = arith.divf %78, %79 : vector<32x1xf32>
    %81 = vector.broadcast %80 : vector<32x1xf32> to vector<32x32xf32>
    %82 = arith.subf %76, %81 : vector<32x32xf32>
    %83 = arith.mulf %82, %82 : vector<32x32xf32>
    %cst_29 = arith.constant dense<0.000000e+00> : vector<32xf32>
    %84 = vector.multi_reduction <add>, %83, %cst_29 [1] : vector<32x32xf32> to vector<32xf32>
    %85 = vector.shape_cast %84 : vector<32xf32> to vector<32x1xf32>
    %cst_30 = arith.constant 3.200000e+01 : f32
    %86 = vector.broadcast %cst_30 : f32 to vector<32x1xf32>
    %87 = arith.divf %85, %86 : vector<32x1xf32>
    %cst_31 = arith.constant 9.99999974E-6 : f32
    %88 = vector.broadcast %cst_31 : f32 to vector<32x1xf32>
    %89 = arith.addf %87, %88 : vector<32x1xf32>
    %90 = math.rsqrt %89 : vector<32x1xf32>
    %91 = vector.broadcast %90 : vector<32x1xf32> to vector<32x32xf32>
    %92 = arith.mulf %82, %91 : vector<32x32xf32>
    %c5 = arith.constant 5 : index
    %c0_32 = arith.constant 0 : index
    %93 = vector.load %arg3[%c5, %c0_32] : memref<44x128xf32, #tpu.memory_space<vmem>>, vector<1x128xf32>
    %94 = vector.extract_strided_slice %93 {offsets = [0, 0], sizes = [1, 32], strides = [1, 1]} : vector<1x128xf32> to vector<1x32xf32>
    %95 = vector.broadcast %94 : vector<1x32xf32> to vector<32x32xf32>
    %96 = arith.mulf %92, %95 : vector<32x32xf32>
    %c6 = arith.constant 6 : index
    %c0_33 = arith.constant 0 : index
    %97 = vector.load %arg3[%c6, %c0_33] : memref<44x128xf32, #tpu.memory_space<vmem>>, vector<1x128xf32>
    %98 = vector.extract_strided_slice %97 {offsets = [0, 0], sizes = [1, 32], strides = [1, 1]} : vector<1x128xf32> to vector<1x32xf32>
    %99 = vector.broadcast %98 : vector<1x32xf32> to vector<32x32xf32>
    %100 = arith.addf %96, %99 : vector<32x32xf32>
    %c112 = arith.constant 112 : index
    %c0_34 = arith.constant 0 : index
    %101 = vector.load %arg2[%c112, %c0_34] : memref<1168x128xf32, #tpu.memory_space<vmem>>, vector<32x128xf32>
    %cst_35 = arith.constant dense<0.000000e+00> : vector<32x128xf32>
    %102 = tpu.matmul %100, %101, %cst_35 {dimension_numbers = #tpu.dot_dimension_numbers<[1], [0], [0], [1], [0, 0, 1, 1], [], []>} : vector<32x32xf32>, vector<32x128xf32>, vector<32x128xf32> -> vector<32x128xf32>
    %c3 = arith.constant 3 : index
    %c0_36 = arith.constant 0 : index
    %103 = vector.load %arg3[%c3, %c0_36] : memref<44x128xf32, #tpu.memory_space<vmem>>, vector<1x128xf32>
    %104 = vector.broadcast %103 : vector<1x128xf32> to vector<32x128xf32>
    %105 = arith.addf %102, %104 : vector<32x128xf32>
    %cst_37 = arith.constant 0.000000e+00 : f32
    %106 = vector.broadcast %cst_37 : f32 to vector<32x128xf32>
    %107 = arith.maximumf %105, %106 : vector<32x128xf32>
    %c144 = arith.constant 144 : index
    %c0_38 = arith.constant 0 : index
    %108 = vector.load %arg2[%c144, %c0_38] : memref<1168x128xf32, #tpu.memory_space<vmem>>, vector<128x128xf32>
    %cst_39 = arith.constant dense<0.000000e+00> : vector<32x128xf32>
    %109 = tpu.matmul %107, %108, %cst_39 {dimension_numbers = #tpu.dot_dimension_numbers<[1], [0], [0], [1], [0, 0, 1, 1], [], []>} : vector<32x128xf32>, vector<128x128xf32>, vector<32x128xf32> -> vector<32x128xf32>
    %c4 = arith.constant 4 : index
    %c0_40 = arith.constant 0 : index
    %110 = vector.load %arg3[%c4, %c0_40] : memref<44x128xf32, #tpu.memory_space<vmem>>, vector<1x128xf32>
    %111 = vector.broadcast %110 : vector<1x128xf32> to vector<32x128xf32>
    %112 = arith.addf %109, %111 : vector<32x128xf32>
    %113 = vector.extract_strided_slice %112 {offsets = [0, 0], sizes = [32, 32], strides = [1, 1]} : vector<32x128xf32> to vector<32x32xf32>
    %114 = arith.addf %100, %113 : vector<32x32xf32>
    %cst_41 = arith.constant dense<0.000000e+00> : vector<32xf32>
    %115 = vector.multi_reduction <add>, %114, %cst_41 [1] : vector<32x32xf32> to vector<32xf32>
    %116 = vector.shape_cast %115 : vector<32xf32> to vector<32x1xf32>
    %cst_42 = arith.constant 3.200000e+01 : f32
    %117 = vector.broadcast %cst_42 : f32 to vector<32x1xf32>
    %118 = arith.divf %116, %117 : vector<32x1xf32>
    %119 = vector.broadcast %118 : vector<32x1xf32> to vector<32x32xf32>
    %120 = arith.subf %114, %119 : vector<32x32xf32>
    %121 = arith.mulf %120, %120 : vector<32x32xf32>
    %cst_43 = arith.constant dense<0.000000e+00> : vector<32xf32>
    %122 = vector.multi_reduction <add>, %121, %cst_43 [1] : vector<32x32xf32> to vector<32xf32>
    %123 = vector.shape_cast %122 : vector<32xf32> to vector<32x1xf32>
    %cst_44 = arith.constant 3.200000e+01 : f32
    %124 = vector.broadcast %cst_44 : f32 to vector<32x1xf32>
    %125 = arith.divf %123, %124 : vector<32x1xf32>
    %cst_45 = arith.constant 9.99999974E-6 : f32
    %126 = vector.broadcast %cst_45 : f32 to vector<32x1xf32>
    %127 = arith.addf %125, %126 : vector<32x1xf32>
    %128 = math.rsqrt %127 : vector<32x1xf32>
    %129 = vector.broadcast %128 : vector<32x1xf32> to vector<32x32xf32>
    %130 = arith.mulf %120, %129 : vector<32x32xf32>
    %c7 = arith.constant 7 : index
    %c0_46 = arith.constant 0 : index
    %131 = vector.load %arg3[%c7, %c0_46] : memref<44x128xf32, #tpu.memory_space<vmem>>, vector<1x128xf32>
    %132 = vector.extract_strided_slice %131 {offsets = [0, 0], sizes = [1, 32], strides = [1, 1]} : vector<1x128xf32> to vector<1x32xf32>
    %133 = vector.broadcast %132 : vector<1x32xf32> to vector<32x32xf32>
    %134 = arith.mulf %130, %133 : vector<32x32xf32>
    %c8 = arith.constant 8 : index
    %c0_47 = arith.constant 0 : index
    %135 = vector.load %arg3[%c8, %c0_47] : memref<44x128xf32, #tpu.memory_space<vmem>>, vector<1x128xf32>
    %136 = vector.extract_strided_slice %135 {offsets = [0, 0], sizes = [1, 32], strides = [1, 1]} : vector<1x128xf32> to vector<1x32xf32>
    %137 = vector.broadcast %136 : vector<1x32xf32> to vector<32x32xf32>
    %138 = arith.addf %134, %137 : vector<32x32xf32>
    %c272 = arith.constant 272 : index
    %c0_48 = arith.constant 0 : index
    %139 = vector.load %arg2[%c272, %c0_48] : memref<1168x128xf32, #tpu.memory_space<vmem>>, vector<32x128xf32>
    %cst_49 = arith.constant dense<0.000000e+00> : vector<32x128xf32>
    %140 = tpu.matmul %138, %139, %cst_49 {dimension_numbers = #tpu.dot_dimension_numbers<[1], [0], [0], [1], [0, 0, 1, 1], [], []>} : vector<32x32xf32>, vector<32x128xf32>, vector<32x128xf32> -> vector<32x128xf32>
    %c9 = arith.constant 9 : index
    %c0_50 = arith.constant 0 : index
    %141 = vector.load %arg3[%c9, %c0_50] : memref<44x128xf32, #tpu.memory_space<vmem>>, vector<1x128xf32>
    %142 = vector.broadcast %141 : vector<1x128xf32> to vector<32x128xf32>
    %143 = arith.addf %140, %142 : vector<32x128xf32>
    %144 = vector.extract_strided_slice %143 {offsets = [0, 0], sizes = [32, 32], strides = [1, 1]} : vector<32x128xf32> to vector<32x32xf32>
    %cst_51 = arith.constant 0.353553385 : f32
    %145 = vector.broadcast %cst_51 : f32 to vector<32x32xf32>
    %146 = arith.mulf %144, %145 : vector<32x32xf32>
    %147 = vector.extract_strided_slice %143 {offsets = [0, 32], sizes = [32, 32], strides = [1, 1]} : vector<32x128xf32> to vector<32x32xf32>
    %148 = vector.extract_strided_slice %143 {offsets = [0, 64], sizes = [32, 32], strides = [1, 1]} : vector<32x128xf32> to vector<32x32xf32>
    %149 = vector.extract_strided_slice %146 {offsets = [0, 0], sizes = [32, 8], strides = [1, 1]} : vector<32x32xf32> to vector<32x8xf32>
    %150 = vector.extract_strided_slice %147 {offsets = [0, 0], sizes = [32, 8], strides = [1, 1]} : vector<32x32xf32> to vector<32x8xf32>
    %151 = tpu.transpose %150, [1, 0] : vector<32x8xf32> -> vector<8x32xf32>
    %cst_52 = arith.constant dense<0.000000e+00> : vector<32x32xf32>
    %152 = tpu.matmul %149, %151, %cst_52 {dimension_numbers = #tpu.dot_dimension_numbers<[1], [0], [0], [1], [0, 0, 1, 1], [], []>} : vector<32x8xf32>, vector<8x32xf32>, vector<32x32xf32> -> vector<32x32xf32>
    %153 = vector.extract_strided_slice %146 {offsets = [0, 8], sizes = [32, 8], strides = [1, 1]} : vector<32x32xf32> to vector<32x8xf32>
    %154 = vector.extract_strided_slice %147 {offsets = [0, 8], sizes = [32, 8], strides = [1, 1]} : vector<32x32xf32> to vector<32x8xf32>
    %155 = tpu.transpose %154, [1, 0] : vector<32x8xf32> -> vector<8x32xf32>
    %cst_53 = arith.constant dense<0.000000e+00> : vector<32x32xf32>
    %156 = tpu.matmul %153, %155, %cst_53 {dimension_numbers = #tpu.dot_dimension_numbers<[1], [0], [0], [1], [0, 0, 1, 1], [], []>} : vector<32x8xf32>, vector<8x32xf32>, vector<32x32xf32> -> vector<32x32xf32>
    %157 = vector.extract_strided_slice %146 {offsets = [0, 16], sizes = [32, 8], strides = [1, 1]} : vector<32x32xf32> to vector<32x8xf32>
    %158 = vector.extract_strided_slice %147 {offsets = [0, 16], sizes = [32, 8], strides = [1, 1]} : vector<32x32xf32> to vector<32x8xf32>
    %159 = tpu.transpose %158, [1, 0] : vector<32x8xf32> -> vector<8x32xf32>
    %cst_54 = arith.constant dense<0.000000e+00> : vector<32x32xf32>
    %160 = tpu.matmul %157, %159, %cst_54 {dimension_numbers = #tpu.dot_dimension_numbers<[1], [0], [0], [1], [0, 0, 1, 1], [], []>} : vector<32x8xf32>, vector<8x32xf32>, vector<32x32xf32> -> vector<32x32xf32>
    %161 = vector.extract_strided_slice %146 {offsets = [0, 24], sizes = [32, 8], strides = [1, 1]} : vector<32x32xf32> to vector<32x8xf32>
    %162 = vector.extract_strided_slice %147 {offsets = [0, 24], sizes = [32, 8], strides = [1, 1]} : vector<32x32xf32> to vector<32x8xf32>
    %163 = tpu.transpose %162, [1, 0] : vector<32x8xf32> -> vector<8x32xf32>
    %cst_55 = arith.constant dense<0.000000e+00> : vector<32x32xf32>
    %164 = tpu.matmul %161, %163, %cst_55 {dimension_numbers = #tpu.dot_dimension_numbers<[1], [0], [0], [1], [0, 0, 1, 1], [], []>} : vector<32x8xf32>, vector<8x32xf32>, vector<32x32xf32> -> vector<32x32xf32>
    %165 = tpu.concatenate %152, %156, %160, %164 in 0 : vector<32x32xf32>, vector<32x32xf32>, vector<32x32xf32>, vector<32x32xf32> -> vector<128x32xf32>
    %166 = arith.addf %165, %10 : vector<128x32xf32>
    %cst_56 = arith.constant dense<0xFF800000> : vector<128xf32>
    %167 = vector.multi_reduction <maximumf>, %166, %cst_56 [1] : vector<128x32xf32> to vector<128xf32>
    %168 = vector.shape_cast %167 : vector<128xf32> to vector<128x1xf32>
    %169 = vector.broadcast %168 : vector<128x1xf32> to vector<128x32xf32>
    %170 = arith.subf %166, %169 : vector<128x32xf32>
    %171 = math.exp %170 : vector<128x32xf32>
    %cst_57 = arith.constant dense<0.000000e+00> : vector<128xf32>
    %172 = vector.multi_reduction <add>, %171, %cst_57 [1] : vector<128x32xf32> to vector<128xf32>
    %173 = vector.shape_cast %172 : vector<128xf32> to vector<128x1xf32>
    %174 = vector.broadcast %173 : vector<128x1xf32> to vector<128x32xf32>
    %175 = arith.divf %171, %174 : vector<128x32xf32>
    %176 = vector.extract_strided_slice %175 {offsets = [0, 0], sizes = [32, 32], strides = [1, 1]} : vector<128x32xf32> to vector<32x32xf32>
    %177 = vector.extract_strided_slice %148 {offsets = [0, 0], sizes = [32, 8], strides = [1, 1]} : vector<32x32xf32> to vector<32x8xf32>
    %cst_58 = arith.constant dense<0.000000e+00> : vector<32x8xf32>
    %178 = tpu.matmul %176, %177, %cst_58 {dimension_numbers = #tpu.dot_dimension_numbers<[1], [0], [0], [1], [0, 0, 1, 1], [], []>} : vector<32x32xf32>, vector<32x8xf32>, vector<32x8xf32> -> vector<32x8xf32>
    %179 = vector.extract_strided_slice %175 {offsets = [32, 0], sizes = [32, 32], strides = [1, 1]} : vector<128x32xf32> to vector<32x32xf32>
    %180 = vector.extract_strided_slice %148 {offsets = [0, 8], sizes = [32, 8], strides = [1, 1]} : vector<32x32xf32> to vector<32x8xf32>
    %cst_59 = arith.constant dense<0.000000e+00> : vector<32x8xf32>
    %181 = tpu.matmul %179, %180, %cst_59 {dimension_numbers = #tpu.dot_dimension_numbers<[1], [0], [0], [1], [0, 0, 1, 1], [], []>} : vector<32x32xf32>, vector<32x8xf32>, vector<32x8xf32> -> vector<32x8xf32>
    %182 = vector.extract_strided_slice %175 {offsets = [64, 0], sizes = [32, 32], strides = [1, 1]} : vector<128x32xf32> to vector<32x32xf32>
    %183 = vector.extract_strided_slice %148 {offsets = [0, 16], sizes = [32, 8], strides = [1, 1]} : vector<32x32xf32> to vector<32x8xf32>
    %cst_60 = arith.constant dense<0.000000e+00> : vector<32x8xf32>
    %184 = tpu.matmul %182, %183, %cst_60 {dimension_numbers = #tpu.dot_dimension_numbers<[1], [0], [0], [1], [0, 0, 1, 1], [], []>} : vector<32x32xf32>, vector<32x8xf32>, vector<32x8xf32> -> vector<32x8xf32>
    %185 = vector.extract_strided_slice %175 {offsets = [96, 0], sizes = [32, 32], strides = [1, 1]} : vector<128x32xf32> to vector<32x32xf32>
    %186 = vector.extract_strided_slice %148 {offsets = [0, 24], sizes = [32, 8], strides = [1, 1]} : vector<32x32xf32> to vector<32x8xf32>
    %cst_61 = arith.constant dense<0.000000e+00> : vector<32x8xf32>
    %187 = tpu.matmul %185, %186, %cst_61 {dimension_numbers = #tpu.dot_dimension_numbers<[1], [0], [0], [1], [0, 0, 1, 1], [], []>} : vector<32x32xf32>, vector<32x8xf32>, vector<32x8xf32> -> vector<32x8xf32>
    %188 = tpu.concatenate %178, %181, %184, %187 in 1 : vector<32x8xf32>, vector<32x8xf32>, vector<32x8xf32>, vector<32x8xf32> -> vector<32x32xf32>
    %c304 = arith.constant 304 : index
    %c0_62 = arith.constant 0 : index
    %189 = vector.load %arg2[%c304, %c0_62] : memref<1168x128xf32, #tpu.memory_space<vmem>>, vector<32x128xf32>
    %cst_63 = arith.constant dense<0.000000e+00> : vector<32x128xf32>
    %190 = tpu.matmul %188, %189, %cst_63 {dimension_numbers = #tpu.dot_dimension_numbers<[1], [0], [0], [1], [0, 0, 1, 1], [], []>} : vector<32x32xf32>, vector<32x128xf32>, vector<32x128xf32> -> vector<32x128xf32>
    %c10 = arith.constant 10 : index
    %c0_64 = arith.constant 0 : index
    %191 = vector.load %arg3[%c10, %c0_64] : memref<44x128xf32, #tpu.memory_space<vmem>>, vector<1x128xf32>
    %192 = vector.broadcast %191 : vector<1x128xf32> to vector<32x128xf32>
    %193 = arith.addf %190, %192 : vector<32x128xf32>
    %194 = vector.extract_strided_slice %193 {offsets = [0, 0], sizes = [32, 32], strides = [1, 1]} : vector<32x128xf32> to vector<32x32xf32>
    %195 = arith.addf %138, %194 : vector<32x32xf32>
    %cst_65 = arith.constant dense<0.000000e+00> : vector<32xf32>
    %196 = vector.multi_reduction <add>, %195, %cst_65 [1] : vector<32x32xf32> to vector<32xf32>
    %197 = vector.shape_cast %196 : vector<32xf32> to vector<32x1xf32>
    %cst_66 = arith.constant 3.200000e+01 : f32
    %198 = vector.broadcast %cst_66 : f32 to vector<32x1xf32>
    %199 = arith.divf %197, %198 : vector<32x1xf32>
    %200 = vector.broadcast %199 : vector<32x1xf32> to vector<32x32xf32>
    %201 = arith.subf %195, %200 : vector<32x32xf32>
    %202 = arith.mulf %201, %201 : vector<32x32xf32>
    %cst_67 = arith.constant dense<0.000000e+00> : vector<32xf32>
    %203 = vector.multi_reduction <add>, %202, %cst_67 [1] : vector<32x32xf32> to vector<32xf32>
    %204 = vector.shape_cast %203 : vector<32xf32> to vector<32x1xf32>
    %cst_68 = arith.constant 3.200000e+01 : f32
    %205 = vector.broadcast %cst_68 : f32 to vector<32x1xf32>
    %206 = arith.divf %204, %205 : vector<32x1xf32>
    %cst_69 = arith.constant 9.99999974E-6 : f32
    %207 = vector.broadcast %cst_69 : f32 to vector<32x1xf32>
    %208 = arith.addf %206, %207 : vector<32x1xf32>
    %209 = math.rsqrt %208 : vector<32x1xf32>
    %210 = vector.broadcast %209 : vector<32x1xf32> to vector<32x32xf32>
    %211 = arith.mulf %201, %210 : vector<32x32xf32>
    %c13 = arith.constant 13 : index
    %c0_70 = arith.constant 0 : index
    %212 = vector.load %arg3[%c13, %c0_70] : memref<44x128xf32, #tpu.memory_space<vmem>>, vector<1x128xf32>
    %213 = vector.extract_strided_slice %212 {offsets = [0, 0], sizes = [1, 32], strides = [1, 1]} : vector<1x128xf32> to vector<1x32xf32>
    %214 = vector.broadcast %213 : vector<1x32xf32> to vector<32x32xf32>
    %215 = arith.mulf %211, %214 : vector<32x32xf32>
    %c14 = arith.constant 14 : index
    %c0_71 = arith.constant 0 : index
    %216 = vector.load %arg3[%c14, %c0_71] : memref<44x128xf32, #tpu.memory_space<vmem>>, vector<1x128xf32>
    %217 = vector.extract_strided_slice %216 {offsets = [0, 0], sizes = [1, 32], strides = [1, 1]} : vector<1x128xf32> to vector<1x32xf32>
    %218 = vector.broadcast %217 : vector<1x32xf32> to vector<32x32xf32>
    %219 = arith.addf %215, %218 : vector<32x32xf32>
    %c336 = arith.constant 336 : index
    %c0_72 = arith.constant 0 : index
    %220 = vector.load %arg2[%c336, %c0_72] : memref<1168x128xf32, #tpu.memory_space<vmem>>, vector<32x128xf32>
    %cst_73 = arith.constant dense<0.000000e+00> : vector<32x128xf32>
    %221 = tpu.matmul %219, %220, %cst_73 {dimension_numbers = #tpu.dot_dimension_numbers<[1], [0], [0], [1], [0, 0, 1, 1], [], []>} : vector<32x32xf32>, vector<32x128xf32>, vector<32x128xf32> -> vector<32x128xf32>
    %c11 = arith.constant 11 : index
    %c0_74 = arith.constant 0 : index
    %222 = vector.load %arg3[%c11, %c0_74] : memref<44x128xf32, #tpu.memory_space<vmem>>, vector<1x128xf32>
    %223 = vector.broadcast %222 : vector<1x128xf32> to vector<32x128xf32>
    %224 = arith.addf %221, %223 : vector<32x128xf32>
    %cst_75 = arith.constant 0.000000e+00 : f32
    %225 = vector.broadcast %cst_75 : f32 to vector<32x128xf32>
    %226 = arith.maximumf %224, %225 : vector<32x128xf32>
    %c368 = arith.constant 368 : index
    %c0_76 = arith.constant 0 : index
    %227 = vector.load %arg2[%c368, %c0_76] : memref<1168x128xf32, #tpu.memory_space<vmem>>, vector<128x128xf32>
    %cst_77 = arith.constant dense<0.000000e+00> : vector<32x128xf32>
    %228 = tpu.matmul %226, %227, %cst_77 {dimension_numbers = #tpu.dot_dimension_numbers<[1], [0], [0], [1], [0, 0, 1, 1], [], []>} : vector<32x128xf32>, vector<128x128xf32>, vector<32x128xf32> -> vector<32x128xf32>
    %c12 = arith.constant 12 : index
    %c0_78 = arith.constant 0 : index
    %229 = vector.load %arg3[%c12, %c0_78] : memref<44x128xf32, #tpu.memory_space<vmem>>, vector<1x128xf32>
    %230 = vector.broadcast %229 : vector<1x128xf32> to vector<32x128xf32>
    %231 = arith.addf %228, %230 : vector<32x128xf32>
    %232 = vector.extract_strided_slice %231 {offsets = [0, 0], sizes = [32, 32], strides = [1, 1]} : vector<32x128xf32> to vector<32x32xf32>
    %233 = arith.addf %219, %232 : vector<32x32xf32>
    %cst_79 = arith.constant dense<0.000000e+00> : vector<32xf32>
    %234 = vector.multi_reduction <add>, %233, %cst_79 [1] : vector<32x32xf32> to vector<32xf32>
    %235 = vector.shape_cast %234 : vector<32xf32> to vector<32x1xf32>
    %cst_80 = arith.constant 3.200000e+01 : f32
    %236 = vector.broadcast %cst_80 : f32 to vector<32x1xf32>
    %237 = arith.divf %235, %236 : vector<32x1xf32>
    %238 = vector.broadcast %237 : vector<32x1xf32> to vector<32x32xf32>
    %239 = arith.subf %233, %238 : vector<32x32xf32>
    %240 = arith.mulf %239, %239 : vector<32x32xf32>
    %cst_81 = arith.constant dense<0.000000e+00> : vector<32xf32>
    %241 = vector.multi_reduction <add>, %240, %cst_81 [1] : vector<32x32xf32> to vector<32xf32>
    %242 = vector.shape_cast %241 : vector<32xf32> to vector<32x1xf32>
    %cst_82 = arith.constant 3.200000e+01 : f32
    %243 = vector.broadcast %cst_82 : f32 to vector<32x1xf32>
    %244 = arith.divf %242, %243 : vector<32x1xf32>
    %cst_83 = arith.constant 9.99999974E-6 : f32
    %245 = vector.broadcast %cst_83 : f32 to vector<32x1xf32>
    %246 = arith.addf %244, %245 : vector<32x1xf32>
    %247 = math.rsqrt %246 : vector<32x1xf32>
    %248 = vector.broadcast %247 : vector<32x1xf32> to vector<32x32xf32>
    %249 = arith.mulf %239, %248 : vector<32x32xf32>
    %c15 = arith.constant 15 : index
    %c0_84 = arith.constant 0 : index
    %250 = vector.load %arg3[%c15, %c0_84] : memref<44x128xf32, #tpu.memory_space<vmem>>, vector<1x128xf32>
    %251 = vector.extract_strided_slice %250 {offsets = [0, 0], sizes = [1, 32], strides = [1, 1]} : vector<1x128xf32> to vector<1x32xf32>
    %252 = vector.broadcast %251 : vector<1x32xf32> to vector<32x32xf32>
    %253 = arith.mulf %249, %252 : vector<32x32xf32>
    %c16 = arith.constant 16 : index
    %c0_85 = arith.constant 0 : index
    %254 = vector.load %arg3[%c16, %c0_85] : memref<44x128xf32, #tpu.memory_space<vmem>>, vector<1x128xf32>
    %255 = vector.extract_strided_slice %254 {offsets = [0, 0], sizes = [1, 32], strides = [1, 1]} : vector<1x128xf32> to vector<1x32xf32>
    %256 = vector.broadcast %255 : vector<1x32xf32> to vector<32x32xf32>
    %257 = arith.addf %253, %256 : vector<32x32xf32>
    %c0_86 = arith.constant 0 : index
    %c0_87 = arith.constant 0 : index
    %258 = vector.load %arg5[%c0_86, %c0_87] : memref<32x32xf32, #tpu.memory_space<vmem>>, vector<32x32xf32>
    tpu.vector_store %arg5[%c0_86, %c0_87], %257 {strides = array<i32>} : memref<32x32xf32, #tpu.memory_space<vmem>>, vector<32x32xf32>,
    %c0_88 = arith.constant 0 : index
    %c0_89 = arith.constant 0 : index
    %259 = vector.load %arg1[%c0_88, %c0_89] : memref<32x32xf32, #tpu.memory_space<vmem>>, vector<32x32xf32>
    %c496 = arith.constant 496 : index
    %c0_90 = arith.constant 0 : index
    %260 = vector.load %arg2[%c496, %c0_90] : memref<1168x128xf32, #tpu.memory_space<vmem>>, vector<32x128xf32>
    %cst_91 = arith.constant dense<0.000000e+00> : vector<32x128xf32>
    %261 = tpu.matmul %259, %260, %cst_91 {dimension_numbers = #tpu.dot_dimension_numbers<[1], [0], [0], [1], [0, 0, 1, 1], [], []>} : vector<32x32xf32>, vector<32x128xf32>, vector<32x128xf32> -> vector<32x128xf32>
    %c17 = arith.constant 17 : index
    %c0_92 = arith.constant 0 : index
    %262 = vector.load %arg3[%c17, %c0_92] : memref<44x128xf32, #tpu.memory_space<vmem>>, vector<1x128xf32>
    %263 = vector.broadcast %262 : vector<1x128xf32> to vector<32x128xf32>
    %264 = arith.addf %261, %263 : vector<32x128xf32>
    %265 = vector.extract_strided_slice %264 {offsets = [0, 0], sizes = [32, 32], strides = [1, 1]} : vector<32x128xf32> to vector<32x32xf32>
    %cst_93 = arith.constant 0.353553385 : f32
    %266 = vector.broadcast %cst_93 : f32 to vector<32x32xf32>
    %267 = arith.mulf %265, %266 : vector<32x32xf32>
    %268 = vector.extract_strided_slice %264 {offsets = [0, 32], sizes = [32, 32], strides = [1, 1]} : vector<32x128xf32> to vector<32x32xf32>
    %269 = vector.extract_strided_slice %264 {offsets = [0, 64], sizes = [32, 32], strides = [1, 1]} : vector<32x128xf32> to vector<32x32xf32>
    %270 = vector.extract_strided_slice %267 {offsets = [0, 0], sizes = [32, 8], strides = [1, 1]} : vector<32x32xf32> to vector<32x8xf32>
    %271 = vector.extract_strided_slice %268 {offsets = [0, 0], sizes = [32, 8], strides = [1, 1]} : vector<32x32xf32> to vector<32x8xf32>
    %272 = tpu.transpose %271, [1, 0] : vector<32x8xf32> -> vector<8x32xf32>
    %cst_94 = arith.constant dense<0.000000e+00> : vector<32x32xf32>
    %273 = tpu.matmul %270, %272, %cst_94 {dimension_numbers = #tpu.dot_dimension_numbers<[1], [0], [0], [1], [0, 0, 1, 1], [], []>} : vector<32x8xf32>, vector<8x32xf32>, vector<32x32xf32> -> vector<32x32xf32>
    %274 = vector.extract_strided_slice %267 {offsets = [0, 8], sizes = [32, 8], strides = [1, 1]} : vector<32x32xf32> to vector<32x8xf32>
    %275 = vector.extract_strided_slice %268 {offsets = [0, 8], sizes = [32, 8], strides = [1, 1]} : vector<32x32xf32> to vector<32x8xf32>
    %276 = tpu.transpose %275, [1, 0] : vector<32x8xf32> -> vector<8x32xf32>
    %cst_95 = arith.constant dense<0.000000e+00> : vector<32x32xf32>
    %277 = tpu.matmul %274, %276, %cst_95 {dimension_numbers = #tpu.dot_dimension_numbers<[1], [0], [0], [1], [0, 0, 1, 1], [], []>} : vector<32x8xf32>, vector<8x32xf32>, vector<32x32xf32> -> vector<32x32xf32>
    %278 = vector.extract_strided_slice %267 {offsets = [0, 16], sizes = [32, 8], strides = [1, 1]} : vector<32x32xf32> to vector<32x8xf32>
    %279 = vector.extract_strided_slice %268 {offsets = [0, 16], sizes = [32, 8], strides = [1, 1]} : vector<32x32xf32> to vector<32x8xf32>
    %280 = tpu.transpose %279, [1, 0] : vector<32x8xf32> -> vector<8x32xf32>
    %cst_96 = arith.constant dense<0.000000e+00> : vector<32x32xf32>
    %281 = tpu.matmul %278, %280, %cst_96 {dimension_numbers = #tpu.dot_dimension_numbers<[1], [0], [0], [1], [0, 0, 1, 1], [], []>} : vector<32x8xf32>, vector<8x32xf32>, vector<32x32xf32> -> vector<32x32xf32>
    %282 = vector.extract_strided_slice %267 {offsets = [0, 24], sizes = [32, 8], strides = [1, 1]} : vector<32x32xf32> to vector<32x8xf32>
    %283 = vector.extract_strided_slice %268 {offsets = [0, 24], sizes = [32, 8], strides = [1, 1]} : vector<32x32xf32> to vector<32x8xf32>
    %284 = tpu.transpose %283, [1, 0] : vector<32x8xf32> -> vector<8x32xf32>
    %cst_97 = arith.constant dense<0.000000e+00> : vector<32x32xf32>
    %285 = tpu.matmul %282, %284, %cst_97 {dimension_numbers = #tpu.dot_dimension_numbers<[1], [0], [0], [1], [0, 0, 1, 1], [], []>} : vector<32x8xf32>, vector<8x32xf32>, vector<32x32xf32> -> vector<32x32xf32>
    %286 = tpu.concatenate %273, %277, %281, %285 in 0 : vector<32x32xf32>, vector<32x32xf32>, vector<32x32xf32>, vector<32x32xf32> -> vector<128x32xf32>
    %287 = arith.addf %286, %10 : vector<128x32xf32>
    %cst_98 = arith.constant dense<0xFF800000> : vector<128xf32>
    %288 = vector.multi_reduction <maximumf>, %287, %cst_98 [1] : vector<128x32xf32> to vector<128xf32>
    %289 = vector.shape_cast %288 : vector<128xf32> to vector<128x1xf32>
    %290 = vector.broadcast %289 : vector<128x1xf32> to vector<128x32xf32>
    %291 = arith.subf %287, %290 : vector<128x32xf32>
    %292 = math.exp %291 : vector<128x32xf32>
    %cst_99 = arith.constant dense<0.000000e+00> : vector<128xf32>
    %293 = vector.multi_reduction <add>, %292, %cst_99 [1] : vector<128x32xf32> to vector<128xf32>
    %294 = vector.shape_cast %293 : vector<128xf32> to vector<128x1xf32>
    %295 = vector.broadcast %294 : vector<128x1xf32> to vector<128x32xf32>
    %296 = arith.divf %292, %295 : vector<128x32xf32>
    %297 = vector.extract_strided_slice %296 {offsets = [0, 0], sizes = [32, 32], strides = [1, 1]} : vector<128x32xf32> to vector<32x32xf32>
    %298 = vector.extract_strided_slice %269 {offsets = [0, 0], sizes = [32, 8], strides = [1, 1]} : vector<32x32xf32> to vector<32x8xf32>
    %cst_100 = arith.constant dense<0.000000e+00> : vector<32x8xf32>
    %299 = tpu.matmul %297, %298, %cst_100 {dimension_numbers = #tpu.dot_dimension_numbers<[1], [0], [0], [1], [0, 0, 1, 1], [], []>} : vector<32x32xf32>, vector<32x8xf32>, vector<32x8xf32> -> vector<32x8xf32>
    %300 = vector.extract_strided_slice %296 {offsets = [32, 0], sizes = [32, 32], strides = [1, 1]} : vector<128x32xf32> to vector<32x32xf32>
    %301 = vector.extract_strided_slice %269 {offsets = [0, 8], sizes = [32, 8], strides = [1, 1]} : vector<32x32xf32> to vector<32x8xf32>
    %cst_101 = arith.constant dense<0.000000e+00> : vector<32x8xf32>
    %302 = tpu.matmul %300, %301, %cst_101 {dimension_numbers = #tpu.dot_dimension_numbers<[1], [0], [0], [1], [0, 0, 1, 1], [], []>} : vector<32x32xf32>, vector<32x8xf32>, vector<32x8xf32> -> vector<32x8xf32>
    %303 = vector.extract_strided_slice %296 {offsets = [64, 0], sizes = [32, 32], strides = [1, 1]} : vector<128x32xf32> to vector<32x32xf32>
    %304 = vector.extract_strided_slice %269 {offsets = [0, 16], sizes = [32, 8], strides = [1, 1]} : vector<32x32xf32> to vector<32x8xf32>
    %cst_102 = arith.constant dense<0.000000e+00> : vector<32x8xf32>
    %305 = tpu.matmul %303, %304, %cst_102 {dimension_numbers = #tpu.dot_dimension_numbers<[1], [0], [0], [1], [0, 0, 1, 1], [], []>} : vector<32x32xf32>, vector<32x8xf32>, vector<32x8xf32> -> vector<32x8xf32>
    %306 = vector.extract_strided_slice %296 {offsets = [96, 0], sizes = [32, 32], strides = [1, 1]} : vector<128x32xf32> to vector<32x32xf32>
    %307 = vector.extract_strided_slice %269 {offsets = [0, 24], sizes = [32, 8], strides = [1, 1]} : vector<32x32xf32> to vector<32x8xf32>
    %cst_103 = arith.constant dense<0.000000e+00> : vector<32x8xf32>
    %308 = tpu.matmul %306, %307, %cst_103 {dimension_numbers = #tpu.dot_dimension_numbers<[1], [0], [0], [1], [0, 0, 1, 1], [], []>} : vector<32x32xf32>, vector<32x8xf32>, vector<32x8xf32> -> vector<32x8xf32>
    %309 = tpu.concatenate %299, %302, %305, %308 in 1 : vector<32x8xf32>, vector<32x8xf32>, vector<32x8xf32>, vector<32x8xf32> -> vector<32x32xf32>
    %c528 = arith.constant 528 : index
    %c0_104 = arith.constant 0 : index
    %310 = vector.load %arg2[%c528, %c0_104] : memref<1168x128xf32, #tpu.memory_space<vmem>>, vector<32x128xf32>
    %cst_105 = arith.constant dense<0.000000e+00> : vector<32x128xf32>
    %311 = tpu.matmul %309, %310, %cst_105 {dimension_numbers = #tpu.dot_dimension_numbers<[1], [0], [0], [1], [0, 0, 1, 1], [], []>} : vector<32x32xf32>, vector<32x128xf32>, vector<32x128xf32> -> vector<32x128xf32>
    %c18 = arith.constant 18 : index
    %c0_106 = arith.constant 0 : index
    %312 = vector.load %arg3[%c18, %c0_106] : memref<44x128xf32, #tpu.memory_space<vmem>>, vector<1x128xf32>
    %313 = vector.broadcast %312 : vector<1x128xf32> to vector<32x128xf32>
    %314 = arith.addf %311, %313 : vector<32x128xf32>
    %315 = vector.extract_strided_slice %314 {offsets = [0, 0], sizes = [32, 32], strides = [1, 1]} : vector<32x128xf32> to vector<32x32xf32>
    %316 = arith.addf %259, %315 : vector<32x32xf32>
    %cst_107 = arith.constant dense<0.000000e+00> : vector<32xf32>
    %317 = vector.multi_reduction <add>, %316, %cst_107 [1] : vector<32x32xf32> to vector<32xf32>
    %318 = vector.shape_cast %317 : vector<32xf32> to vector<32x1xf32>
    %cst_108 = arith.constant 3.200000e+01 : f32
    %319 = vector.broadcast %cst_108 : f32 to vector<32x1xf32>
    %320 = arith.divf %318, %319 : vector<32x1xf32>
    %321 = vector.broadcast %320 : vector<32x1xf32> to vector<32x32xf32>
    %322 = arith.subf %316, %321 : vector<32x32xf32>
    %323 = arith.mulf %322, %322 : vector<32x32xf32>
    %cst_109 = arith.constant dense<0.000000e+00> : vector<32xf32>
    %324 = vector.multi_reduction <add>, %323, %cst_109 [1] : vector<32x32xf32> to vector<32xf32>
    %325 = vector.shape_cast %324 : vector<32xf32> to vector<32x1xf32>
    %cst_110 = arith.constant 3.200000e+01 : f32
    %326 = vector.broadcast %cst_110 : f32 to vector<32x1xf32>
    %327 = arith.divf %325, %326 : vector<32x1xf32>
    %cst_111 = arith.constant 9.99999974E-6 : f32
    %328 = vector.broadcast %cst_111 : f32 to vector<32x1xf32>
    %329 = arith.addf %327, %328 : vector<32x1xf32>
    %330 = math.rsqrt %329 : vector<32x1xf32>
    %331 = vector.broadcast %330 : vector<32x1xf32> to vector<32x32xf32>
    %332 = arith.mulf %322, %331 : vector<32x32xf32>
    %c24 = arith.constant 24 : index
    %c0_112 = arith.constant 0 : index
    %333 = vector.load %arg3[%c24, %c0_112] : memref<44x128xf32, #tpu.memory_space<vmem>>, vector<1x128xf32>
    %334 = vector.extract_strided_slice %333 {offsets = [0, 0], sizes = [1, 32], strides = [1, 1]} : vector<1x128xf32> to vector<1x32xf32>
    %335 = vector.broadcast %334 : vector<1x32xf32> to vector<32x32xf32>
    %336 = arith.mulf %332, %335 : vector<32x32xf32>
    %c25 = arith.constant 25 : index
    %c0_113 = arith.constant 0 : index
    %337 = vector.load %arg3[%c25, %c0_113] : memref<44x128xf32, #tpu.memory_space<vmem>>, vector<1x128xf32>
    %338 = vector.extract_strided_slice %337 {offsets = [0, 0], sizes = [1, 32], strides = [1, 1]} : vector<1x128xf32> to vector<1x32xf32>
    %339 = vector.broadcast %338 : vector<1x32xf32> to vector<32x32xf32>
    %340 = arith.addf %336, %339 : vector<32x32xf32>
    %c560 = arith.constant 560 : index
    %c0_114 = arith.constant 0 : index
    %341 = vector.load %arg2[%c560, %c0_114] : memref<1168x128xf32, #tpu.memory_space<vmem>>, vector<32x128xf32>
    %cst_115 = arith.constant dense<0.000000e+00> : vector<32x128xf32>
    %342 = tpu.matmul %340, %341, %cst_115 {dimension_numbers = #tpu.dot_dimension_numbers<[1], [0], [0], [1], [0, 0, 1, 1], [], []>} : vector<32x32xf32>, vector<32x128xf32>, vector<32x128xf32> -> vector<32x128xf32>
    %c19 = arith.constant 19 : index
    %c0_116 = arith.constant 0 : index
    %343 = vector.load %arg3[%c19, %c0_116] : memref<44x128xf32, #tpu.memory_space<vmem>>, vector<1x128xf32>
    %344 = vector.broadcast %343 : vector<1x128xf32> to vector<32x128xf32>
    %345 = arith.addf %342, %344 : vector<32x128xf32>
    %346 = vector.extract_strided_slice %345 {offsets = [0, 0], sizes = [32, 32], strides = [1, 1]} : vector<32x128xf32> to vector<32x32xf32>
    %c592 = arith.constant 592 : index
    %c0_117 = arith.constant 0 : index
    %347 = vector.load %arg2[%c592, %c0_117] : memref<1168x128xf32, #tpu.memory_space<vmem>>, vector<32x128xf32>
    %cst_118 = arith.constant dense<0.000000e+00> : vector<32x128xf32>
    %348 = tpu.matmul %257, %347, %cst_118 {dimension_numbers = #tpu.dot_dimension_numbers<[1], [0], [0], [1], [0, 0, 1, 1], [], []>} : vector<32x32xf32>, vector<32x128xf32>, vector<32x128xf32> -> vector<32x128xf32>
    %c20 = arith.constant 20 : index
    %c0_119 = arith.constant 0 : index
    %349 = vector.load %arg3[%c20, %c0_119] : memref<44x128xf32, #tpu.memory_space<vmem>>, vector<1x128xf32>
    %350 = vector.broadcast %349 : vector<1x128xf32> to vector<32x128xf32>
    %351 = arith.addf %348, %350 : vector<32x128xf32>
    %cst_120 = arith.constant 0.353553385 : f32
    %352 = vector.broadcast %cst_120 : f32 to vector<32x32xf32>
    %353 = arith.mulf %346, %352 : vector<32x32xf32>
    %354 = vector.extract_strided_slice %351 {offsets = [0, 0], sizes = [32, 32], strides = [1, 1]} : vector<32x128xf32> to vector<32x32xf32>
    %355 = vector.extract_strided_slice %351 {offsets = [0, 32], sizes = [32, 32], strides = [1, 1]} : vector<32x128xf32> to vector<32x32xf32>
    %356 = vector.extract_strided_slice %353 {offsets = [0, 0], sizes = [32, 8], strides = [1, 1]} : vector<32x32xf32> to vector<32x8xf32>
    %357 = vector.extract_strided_slice %354 {offsets = [0, 0], sizes = [32, 8], strides = [1, 1]} : vector<32x32xf32> to vector<32x8xf32>
    %358 = tpu.transpose %357, [1, 0] : vector<32x8xf32> -> vector<8x32xf32>
    %cst_121 = arith.constant dense<0.000000e+00> : vector<32x32xf32>
    %359 = tpu.matmul %356, %358, %cst_121 {dimension_numbers = #tpu.dot_dimension_numbers<[1], [0], [0], [1], [0, 0, 1, 1], [], []>} : vector<32x8xf32>, vector<8x32xf32>, vector<32x32xf32> -> vector<32x32xf32>
    %360 = vector.extract_strided_slice %353 {offsets = [0, 8], sizes = [32, 8], strides = [1, 1]} : vector<32x32xf32> to vector<32x8xf32>
    %361 = vector.extract_strided_slice %354 {offsets = [0, 8], sizes = [32, 8], strides = [1, 1]} : vector<32x32xf32> to vector<32x8xf32>
    %362 = tpu.transpose %361, [1, 0] : vector<32x8xf32> -> vector<8x32xf32>
    %cst_122 = arith.constant dense<0.000000e+00> : vector<32x32xf32>
    %363 = tpu.matmul %360, %362, %cst_122 {dimension_numbers = #tpu.dot_dimension_numbers<[1], [0], [0], [1], [0, 0, 1, 1], [], []>} : vector<32x8xf32>, vector<8x32xf32>, vector<32x32xf32> -> vector<32x32xf32>
    %364 = vector.extract_strided_slice %353 {offsets = [0, 16], sizes = [32, 8], strides = [1, 1]} : vector<32x32xf32> to vector<32x8xf32>
    %365 = vector.extract_strided_slice %354 {offsets = [0, 16], sizes = [32, 8], strides = [1, 1]} : vector<32x32xf32> to vector<32x8xf32>
    %366 = tpu.transpose %365, [1, 0] : vector<32x8xf32> -> vector<8x32xf32>
    %cst_123 = arith.constant dense<0.000000e+00> : vector<32x32xf32>
    %367 = tpu.matmul %364, %366, %cst_123 {dimension_numbers = #tpu.dot_dimension_numbers<[1], [0], [0], [1], [0, 0, 1, 1], [], []>} : vector<32x8xf32>, vector<8x32xf32>, vector<32x32xf32> -> vector<32x32xf32>
    %368 = vector.extract_strided_slice %353 {offsets = [0, 24], sizes = [32, 8], strides = [1, 1]} : vector<32x32xf32> to vector<32x8xf32>
    %369 = vector.extract_strided_slice %354 {offsets = [0, 24], sizes = [32, 8], strides = [1, 1]} : vector<32x32xf32> to vector<32x8xf32>
    %370 = tpu.transpose %369, [1, 0] : vector<32x8xf32> -> vector<8x32xf32>
    %cst_124 = arith.constant dense<0.000000e+00> : vector<32x32xf32>
    %371 = tpu.matmul %368, %370, %cst_124 {dimension_numbers = #tpu.dot_dimension_numbers<[1], [0], [0], [1], [0, 0, 1, 1], [], []>} : vector<32x8xf32>, vector<8x32xf32>, vector<32x32xf32> -> vector<32x32xf32>
    %372 = tpu.concatenate %359, %363, %367, %371 in 0 : vector<32x32xf32>, vector<32x32xf32>, vector<32x32xf32>, vector<32x32xf32> -> vector<128x32xf32>
    %373 = arith.addf %372, %10 : vector<128x32xf32>
    %cst_125 = arith.constant dense<0xFF800000> : vector<128xf32>
    %374 = vector.multi_reduction <maximumf>, %373, %cst_125 [1] : vector<128x32xf32> to vector<128xf32>
    %375 = vector.shape_cast %374 : vector<128xf32> to vector<128x1xf32>
    %376 = vector.broadcast %375 : vector<128x1xf32> to vector<128x32xf32>
    %377 = arith.subf %373, %376 : vector<128x32xf32>
    %378 = math.exp %377 : vector<128x32xf32>
    %cst_126 = arith.constant dense<0.000000e+00> : vector<128xf32>
    %379 = vector.multi_reduction <add>, %378, %cst_126 [1] : vector<128x32xf32> to vector<128xf32>
    %380 = vector.shape_cast %379 : vector<128xf32> to vector<128x1xf32>
    %381 = vector.broadcast %380 : vector<128x1xf32> to vector<128x32xf32>
    %382 = arith.divf %378, %381 : vector<128x32xf32>
    %383 = vector.extract_strided_slice %382 {offsets = [0, 0], sizes = [32, 32], strides = [1, 1]} : vector<128x32xf32> to vector<32x32xf32>
    %384 = vector.extract_strided_slice %355 {offsets = [0, 0], sizes = [32, 8], strides = [1, 1]} : vector<32x32xf32> to vector<32x8xf32>
    %cst_127 = arith.constant dense<0.000000e+00> : vector<32x8xf32>
    %385 = tpu.matmul %383, %384, %cst_127 {dimension_numbers = #tpu.dot_dimension_numbers<[1], [0], [0], [1], [0, 0, 1, 1], [], []>} : vector<32x32xf32>, vector<32x8xf32>, vector<32x8xf32> -> vector<32x8xf32>
    %386 = vector.extract_strided_slice %382 {offsets = [32, 0], sizes = [32, 32], strides = [1, 1]} : vector<128x32xf32> to vector<32x32xf32>
    %387 = vector.extract_strided_slice %355 {offsets = [0, 8], sizes = [32, 8], strides = [1, 1]} : vector<32x32xf32> to vector<32x8xf32>
    %cst_128 = arith.constant dense<0.000000e+00> : vector<32x8xf32>
    %388 = tpu.matmul %386, %387, %cst_128 {dimension_numbers = #tpu.dot_dimension_numbers<[1], [0], [0], [1], [0, 0, 1, 1], [], []>} : vector<32x32xf32>, vector<32x8xf32>, vector<32x8xf32> -> vector<32x8xf32>
    %389 = vector.extract_strided_slice %382 {offsets = [64, 0], sizes = [32, 32], strides = [1, 1]} : vector<128x32xf32> to vector<32x32xf32>
    %390 = vector.extract_strided_slice %355 {offsets = [0, 16], sizes = [32, 8], strides = [1, 1]} : vector<32x32xf32> to vector<32x8xf32>
    %cst_129 = arith.constant dense<0.000000e+00> : vector<32x8xf32>
    %391 = tpu.matmul %389, %390, %cst_129 {dimension_numbers = #tpu.dot_dimension_numbers<[1], [0], [0], [1], [0, 0, 1, 1], [], []>} : vector<32x32xf32>, vector<32x8xf32>, vector<32x8xf32> -> vector<32x8xf32>
    %392 = vector.extract_strided_slice %382 {offsets = [96, 0], sizes = [32, 32], strides = [1, 1]} : vector<128x32xf32> to vector<32x32xf32>
    %393 = vector.extract_strided_slice %355 {offsets = [0, 24], sizes = [32, 8], strides = [1, 1]} : vector<32x32xf32> to vector<32x8xf32>
    %cst_130 = arith.constant dense<0.000000e+00> : vector<32x8xf32>
    %394 = tpu.matmul %392, %393, %cst_130 {dimension_numbers = #tpu.dot_dimension_numbers<[1], [0], [0], [1], [0, 0, 1, 1], [], []>} : vector<32x32xf32>, vector<32x8xf32>, vector<32x8xf32> -> vector<32x8xf32>
    %395 = tpu.concatenate %385, %388, %391, %394 in 1 : vector<32x8xf32>, vector<32x8xf32>, vector<32x8xf32>, vector<32x8xf32> -> vector<32x32xf32>
    %c624 = arith.constant 624 : index
    %c0_131 = arith.constant 0 : index
    %396 = vector.load %arg2[%c624, %c0_131] : memref<1168x128xf32, #tpu.memory_space<vmem>>, vector<32x128xf32>
    %cst_132 = arith.constant dense<0.000000e+00> : vector<32x128xf32>
    %397 = tpu.matmul %395, %396, %cst_132 {dimension_numbers = #tpu.dot_dimension_numbers<[1], [0], [0], [1], [0, 0, 1, 1], [], []>} : vector<32x32xf32>, vector<32x128xf32>, vector<32x128xf32> -> vector<32x128xf32>
    %c21 = arith.constant 21 : index
    %c0_133 = arith.constant 0 : index
    %398 = vector.load %arg3[%c21, %c0_133] : memref<44x128xf32, #tpu.memory_space<vmem>>, vector<1x128xf32>
    %399 = vector.broadcast %398 : vector<1x128xf32> to vector<32x128xf32>
    %400 = arith.addf %397, %399 : vector<32x128xf32>
    %401 = vector.extract_strided_slice %400 {offsets = [0, 0], sizes = [32, 32], strides = [1, 1]} : vector<32x128xf32> to vector<32x32xf32>
    %402 = arith.addf %340, %401 : vector<32x32xf32>
    %cst_134 = arith.constant dense<0.000000e+00> : vector<32xf32>
    %403 = vector.multi_reduction <add>, %402, %cst_134 [1] : vector<32x32xf32> to vector<32xf32>
    %404 = vector.shape_cast %403 : vector<32xf32> to vector<32x1xf32>
    %cst_135 = arith.constant 3.200000e+01 : f32
    %405 = vector.broadcast %cst_135 : f32 to vector<32x1xf32>
    %406 = arith.divf %404, %405 : vector<32x1xf32>
    %407 = vector.broadcast %406 : vector<32x1xf32> to vector<32x32xf32>
    %408 = arith.subf %402, %407 : vector<32x32xf32>
    %409 = arith.mulf %408, %408 : vector<32x32xf32>
    %cst_136 = arith.constant dense<0.000000e+00> : vector<32xf32>
    %410 = vector.multi_reduction <add>, %409, %cst_136 [1] : vector<32x32xf32> to vector<32xf32>
    %411 = vector.shape_cast %410 : vector<32xf32> to vector<32x1xf32>
    %cst_137 = arith.constant 3.200000e+01 : f32
    %412 = vector.broadcast %cst_137 : f32 to vector<32x1xf32>
    %413 = arith.divf %411, %412 : vector<32x1xf32>
    %cst_138 = arith.constant 9.99999974E-6 : f32
    %414 = vector.broadcast %cst_138 : f32 to vector<32x1xf32>
    %415 = arith.addf %413, %414 : vector<32x1xf32>
    %416 = math.rsqrt %415 : vector<32x1xf32>
    %417 = vector.broadcast %416 : vector<32x1xf32> to vector<32x32xf32>
    %418 = arith.mulf %408, %417 : vector<32x32xf32>
    %c26 = arith.constant 26 : index
    %c0_139 = arith.constant 0 : index
    %419 = vector.load %arg3[%c26, %c0_139] : memref<44x128xf32, #tpu.memory_space<vmem>>, vector<1x128xf32>
    %420 = vector.extract_strided_slice %419 {offsets = [0, 0], sizes = [1, 32], strides = [1, 1]} : vector<1x128xf32> to vector<1x32xf32>
    %421 = vector.broadcast %420 : vector<1x32xf32> to vector<32x32xf32>
    %422 = arith.mulf %418, %421 : vector<32x32xf32>
    %c27 = arith.constant 27 : index
    %c0_140 = arith.constant 0 : index
    %423 = vector.load %arg3[%c27, %c0_140] : memref<44x128xf32, #tpu.memory_space<vmem>>, vector<1x128xf32>
    %424 = vector.extract_strided_slice %423 {offsets = [0, 0], sizes = [1, 32], strides = [1, 1]} : vector<1x128xf32> to vector<1x32xf32>
    %425 = vector.broadcast %424 : vector<1x32xf32> to vector<32x32xf32>
    %426 = arith.addf %422, %425 : vector<32x32xf32>
    %c656 = arith.constant 656 : index
    %c0_141 = arith.constant 0 : index
    %427 = vector.load %arg2[%c656, %c0_141] : memref<1168x128xf32, #tpu.memory_space<vmem>>, vector<32x128xf32>
    %cst_142 = arith.constant dense<0.000000e+00> : vector<32x128xf32>
    %428 = tpu.matmul %426, %427, %cst_142 {dimension_numbers = #tpu.dot_dimension_numbers<[1], [0], [0], [1], [0, 0, 1, 1], [], []>} : vector<32x32xf32>, vector<32x128xf32>, vector<32x128xf32> -> vector<32x128xf32>
    %c22 = arith.constant 22 : index
    %c0_143 = arith.constant 0 : index
    %429 = vector.load %arg3[%c22, %c0_143] : memref<44x128xf32, #tpu.memory_space<vmem>>, vector<1x128xf32>
    %430 = vector.broadcast %429 : vector<1x128xf32> to vector<32x128xf32>
    %431 = arith.addf %428, %430 : vector<32x128xf32>
    %cst_144 = arith.constant 0.000000e+00 : f32
    %432 = vector.broadcast %cst_144 : f32 to vector<32x128xf32>
    %433 = arith.maximumf %431, %432 : vector<32x128xf32>
    %c688 = arith.constant 688 : index
    %c0_145 = arith.constant 0 : index
    %434 = vector.load %arg2[%c688, %c0_145] : memref<1168x128xf32, #tpu.memory_space<vmem>>, vector<128x128xf32>
    %cst_146 = arith.constant dense<0.000000e+00> : vector<32x128xf32>
    %435 = tpu.matmul %433, %434, %cst_146 {dimension_numbers = #tpu.dot_dimension_numbers<[1], [0], [0], [1], [0, 0, 1, 1], [], []>} : vector<32x128xf32>, vector<128x128xf32>, vector<32x128xf32> -> vector<32x128xf32>
    %c23 = arith.constant 23 : index
    %c0_147 = arith.constant 0 : index
    %436 = vector.load %arg3[%c23, %c0_147] : memref<44x128xf32, #tpu.memory_space<vmem>>, vector<1x128xf32>
    %437 = vector.broadcast %436 : vector<1x128xf32> to vector<32x128xf32>
    %438 = arith.addf %435, %437 : vector<32x128xf32>
    %439 = vector.extract_strided_slice %438 {offsets = [0, 0], sizes = [32, 32], strides = [1, 1]} : vector<32x128xf32> to vector<32x32xf32>
    %440 = arith.addf %426, %439 : vector<32x32xf32>
    %cst_148 = arith.constant dense<0.000000e+00> : vector<32xf32>
    %441 = vector.multi_reduction <add>, %440, %cst_148 [1] : vector<32x32xf32> to vector<32xf32>
    %442 = vector.shape_cast %441 : vector<32xf32> to vector<32x1xf32>
    %cst_149 = arith.constant 3.200000e+01 : f32
    %443 = vector.broadcast %cst_149 : f32 to vector<32x1xf32>
    %444 = arith.divf %442, %443 : vector<32x1xf32>
    %445 = vector.broadcast %444 : vector<32x1xf32> to vector<32x32xf32>
    %446 = arith.subf %440, %445 : vector<32x32xf32>
    %447 = arith.mulf %446, %446 : vector<32x32xf32>
    %cst_150 = arith.constant dense<0.000000e+00> : vector<32xf32>
    %448 = vector.multi_reduction <add>, %447, %cst_150 [1] : vector<32x32xf32> to vector<32xf32>
    %449 = vector.shape_cast %448 : vector<32xf32> to vector<32x1xf32>
    %cst_151 = arith.constant 3.200000e+01 : f32
    %450 = vector.broadcast %cst_151 : f32 to vector<32x1xf32>
    %451 = arith.divf %449, %450 : vector<32x1xf32>
    %cst_152 = arith.constant 9.99999974E-6 : f32
    %452 = vector.broadcast %cst_152 : f32 to vector<32x1xf32>
    %453 = arith.addf %451, %452 : vector<32x1xf32>
    %454 = math.rsqrt %453 : vector<32x1xf32>
    %455 = vector.broadcast %454 : vector<32x1xf32> to vector<32x32xf32>
    %456 = arith.mulf %446, %455 : vector<32x32xf32>
    %c28 = arith.constant 28 : index
    %c0_153 = arith.constant 0 : index
    %457 = vector.load %arg3[%c28, %c0_153] : memref<44x128xf32, #tpu.memory_space<vmem>>, vector<1x128xf32>
    %458 = vector.extract_strided_slice %457 {offsets = [0, 0], sizes = [1, 32], strides = [1, 1]} : vector<1x128xf32> to vector<1x32xf32>
    %459 = vector.broadcast %458 : vector<1x32xf32> to vector<32x32xf32>
    %460 = arith.mulf %456, %459 : vector<32x32xf32>
    %c29 = arith.constant 29 : index
    %c0_154 = arith.constant 0 : index
    %461 = vector.load %arg3[%c29, %c0_154] : memref<44x128xf32, #tpu.memory_space<vmem>>, vector<1x128xf32>
    %462 = vector.extract_strided_slice %461 {offsets = [0, 0], sizes = [1, 32], strides = [1, 1]} : vector<1x128xf32> to vector<1x32xf32>
    %463 = vector.broadcast %462 : vector<1x32xf32> to vector<32x32xf32>
    %464 = arith.addf %460, %463 : vector<32x32xf32>
    %c816 = arith.constant 816 : index
    %c0_155 = arith.constant 0 : index
    %465 = vector.load %arg2[%c816, %c0_155] : memref<1168x128xf32, #tpu.memory_space<vmem>>, vector<32x128xf32>
    %cst_156 = arith.constant dense<0.000000e+00> : vector<32x128xf32>
    %466 = tpu.matmul %464, %465, %cst_156 {dimension_numbers = #tpu.dot_dimension_numbers<[1], [0], [0], [1], [0, 0, 1, 1], [], []>} : vector<32x32xf32>, vector<32x128xf32>, vector<32x128xf32> -> vector<32x128xf32>
    %c30 = arith.constant 30 : index
    %c0_157 = arith.constant 0 : index
    %467 = vector.load %arg3[%c30, %c0_157] : memref<44x128xf32, #tpu.memory_space<vmem>>, vector<1x128xf32>
    %468 = vector.broadcast %467 : vector<1x128xf32> to vector<32x128xf32>
    %469 = arith.addf %466, %468 : vector<32x128xf32>
    %470 = vector.extract_strided_slice %469 {offsets = [0, 0], sizes = [32, 32], strides = [1, 1]} : vector<32x128xf32> to vector<32x32xf32>
    %cst_158 = arith.constant 0.353553385 : f32
    %471 = vector.broadcast %cst_158 : f32 to vector<32x32xf32>
    %472 = arith.mulf %470, %471 : vector<32x32xf32>
    %473 = vector.extract_strided_slice %469 {offsets = [0, 32], sizes = [32, 32], strides = [1, 1]} : vector<32x128xf32> to vector<32x32xf32>
    %474 = vector.extract_strided_slice %469 {offsets = [0, 64], sizes = [32, 32], strides = [1, 1]} : vector<32x128xf32> to vector<32x32xf32>
    %475 = vector.extract_strided_slice %472 {offsets = [0, 0], sizes = [32, 8], strides = [1, 1]} : vector<32x32xf32> to vector<32x8xf32>
    %476 = vector.extract_strided_slice %473 {offsets = [0, 0], sizes = [32, 8], strides = [1, 1]} : vector<32x32xf32> to vector<32x8xf32>
    %477 = tpu.transpose %476, [1, 0] : vector<32x8xf32> -> vector<8x32xf32>
    %cst_159 = arith.constant dense<0.000000e+00> : vector<32x32xf32>
    %478 = tpu.matmul %475, %477, %cst_159 {dimension_numbers = #tpu.dot_dimension_numbers<[1], [0], [0], [1], [0, 0, 1, 1], [], []>} : vector<32x8xf32>, vector<8x32xf32>, vector<32x32xf32> -> vector<32x32xf32>
    %479 = vector.extract_strided_slice %472 {offsets = [0, 8], sizes = [32, 8], strides = [1, 1]} : vector<32x32xf32> to vector<32x8xf32>
    %480 = vector.extract_strided_slice %473 {offsets = [0, 8], sizes = [32, 8], strides = [1, 1]} : vector<32x32xf32> to vector<32x8xf32>
    %481 = tpu.transpose %480, [1, 0] : vector<32x8xf32> -> vector<8x32xf32>
    %cst_160 = arith.constant dense<0.000000e+00> : vector<32x32xf32>
    %482 = tpu.matmul %479, %481, %cst_160 {dimension_numbers = #tpu.dot_dimension_numbers<[1], [0], [0], [1], [0, 0, 1, 1], [], []>} : vector<32x8xf32>, vector<8x32xf32>, vector<32x32xf32> -> vector<32x32xf32>
    %483 = vector.extract_strided_slice %472 {offsets = [0, 16], sizes = [32, 8], strides = [1, 1]} : vector<32x32xf32> to vector<32x8xf32>
    %484 = vector.extract_strided_slice %473 {offsets = [0, 16], sizes = [32, 8], strides = [1, 1]} : vector<32x32xf32> to vector<32x8xf32>
    %485 = tpu.transpose %484, [1, 0] : vector<32x8xf32> -> vector<8x32xf32>
    %cst_161 = arith.constant dense<0.000000e+00> : vector<32x32xf32>
    %486 = tpu.matmul %483, %485, %cst_161 {dimension_numbers = #tpu.dot_dimension_numbers<[1], [0], [0], [1], [0, 0, 1, 1], [], []>} : vector<32x8xf32>, vector<8x32xf32>, vector<32x32xf32> -> vector<32x32xf32>
    %487 = vector.extract_strided_slice %472 {offsets = [0, 24], sizes = [32, 8], strides = [1, 1]} : vector<32x32xf32> to vector<32x8xf32>
    %488 = vector.extract_strided_slice %473 {offsets = [0, 24], sizes = [32, 8], strides = [1, 1]} : vector<32x32xf32> to vector<32x8xf32>
    %489 = tpu.transpose %488, [1, 0] : vector<32x8xf32> -> vector<8x32xf32>
    %cst_162 = arith.constant dense<0.000000e+00> : vector<32x32xf32>
    %490 = tpu.matmul %487, %489, %cst_162 {dimension_numbers = #tpu.dot_dimension_numbers<[1], [0], [0], [1], [0, 0, 1, 1], [], []>} : vector<32x8xf32>, vector<8x32xf32>, vector<32x32xf32> -> vector<32x32xf32>
    %491 = tpu.concatenate %478, %482, %486, %490 in 0 : vector<32x32xf32>, vector<32x32xf32>, vector<32x32xf32>, vector<32x32xf32> -> vector<128x32xf32>
    %492 = arith.addf %491, %10 : vector<128x32xf32>
    %cst_163 = arith.constant dense<0xFF800000> : vector<128xf32>
    %493 = vector.multi_reduction <maximumf>, %492, %cst_163 [1] : vector<128x32xf32> to vector<128xf32>
    %494 = vector.shape_cast %493 : vector<128xf32> to vector<128x1xf32>
    %495 = vector.broadcast %494 : vector<128x1xf32> to vector<128x32xf32>
    %496 = arith.subf %492, %495 : vector<128x32xf32>
    %497 = math.exp %496 : vector<128x32xf32>
    %cst_164 = arith.constant dense<0.000000e+00> : vector<128xf32>
    %498 = vector.multi_reduction <add>, %497, %cst_164 [1] : vector<128x32xf32> to vector<128xf32>
    %499 = vector.shape_cast %498 : vector<128xf32> to vector<128x1xf32>
    %500 = vector.broadcast %499 : vector<128x1xf32> to vector<128x32xf32>
    %501 = arith.divf %497, %500 : vector<128x32xf32>
    %502 = vector.extract_strided_slice %501 {offsets = [0, 0], sizes = [32, 32], strides = [1, 1]} : vector<128x32xf32> to vector<32x32xf32>
    %503 = vector.extract_strided_slice %474 {offsets = [0, 0], sizes = [32, 8], strides = [1, 1]} : vector<32x32xf32> to vector<32x8xf32>
    %cst_165 = arith.constant dense<0.000000e+00> : vector<32x8xf32>
    %504 = tpu.matmul %502, %503, %cst_165 {dimension_numbers = #tpu.dot_dimension_numbers<[1], [0], [0], [1], [0, 0, 1, 1], [], []>} : vector<32x32xf32>, vector<32x8xf32>, vector<32x8xf32> -> vector<32x8xf32>
    %505 = vector.extract_strided_slice %501 {offsets = [32, 0], sizes = [32, 32], strides = [1, 1]} : vector<128x32xf32> to vector<32x32xf32>
    %506 = vector.extract_strided_slice %474 {offsets = [0, 8], sizes = [32, 8], strides = [1, 1]} : vector<32x32xf32> to vector<32x8xf32>
    %cst_166 = arith.constant dense<0.000000e+00> : vector<32x8xf32>
    %507 = tpu.matmul %505, %506, %cst_166 {dimension_numbers = #tpu.dot_dimension_numbers<[1], [0], [0], [1], [0, 0, 1, 1], [], []>} : vector<32x32xf32>, vector<32x8xf32>, vector<32x8xf32> -> vector<32x8xf32>
    %508 = vector.extract_strided_slice %501 {offsets = [64, 0], sizes = [32, 32], strides = [1, 1]} : vector<128x32xf32> to vector<32x32xf32>
    %509 = vector.extract_strided_slice %474 {offsets = [0, 16], sizes = [32, 8], strides = [1, 1]} : vector<32x32xf32> to vector<32x8xf32>
    %cst_167 = arith.constant dense<0.000000e+00> : vector<32x8xf32>
    %510 = tpu.matmul %508, %509, %cst_167 {dimension_numbers = #tpu.dot_dimension_numbers<[1], [0], [0], [1], [0, 0, 1, 1], [], []>} : vector<32x32xf32>, vector<32x8xf32>, vector<32x8xf32> -> vector<32x8xf32>
    %511 = vector.extract_strided_slice %501 {offsets = [96, 0], sizes = [32, 32], strides = [1, 1]} : vector<128x32xf32> to vector<32x32xf32>
    %512 = vector.extract_strided_slice %474 {offsets = [0, 24], sizes = [32, 8], strides = [1, 1]} : vector<32x32xf32> to vector<32x8xf32>
    %cst_168 = arith.constant dense<0.000000e+00> : vector<32x8xf32>
    %513 = tpu.matmul %511, %512, %cst_168 {dimension_numbers = #tpu.dot_dimension_numbers<[1], [0], [0], [1], [0, 0, 1, 1], [], []>} : vector<32x32xf32>, vector<32x8xf32>, vector<32x8xf32> -> vector<32x8xf32>
    %514 = tpu.concatenate %504, %507, %510, %513 in 1 : vector<32x8xf32>, vector<32x8xf32>, vector<32x8xf32>, vector<32x8xf32> -> vector<32x32xf32>
    %c848 = arith.constant 848 : index
    %c0_169 = arith.constant 0 : index
    %515 = vector.load %arg2[%c848, %c0_169] : memref<1168x128xf32, #tpu.memory_space<vmem>>, vector<32x128xf32>
    %cst_170 = arith.constant dense<0.000000e+00> : vector<32x128xf32>
    %516 = tpu.matmul %514, %515, %cst_170 {dimension_numbers = #tpu.dot_dimension_numbers<[1], [0], [0], [1], [0, 0, 1, 1], [], []>} : vector<32x32xf32>, vector<32x128xf32>, vector<32x128xf32> -> vector<32x128xf32>
    %c31 = arith.constant 31 : index
    %c0_171 = arith.constant 0 : index
    %517 = vector.load %arg3[%c31, %c0_171] : memref<44x128xf32, #tpu.memory_space<vmem>>, vector<1x128xf32>
    %518 = vector.broadcast %517 : vector<1x128xf32> to vector<32x128xf32>
    %519 = arith.addf %516, %518 : vector<32x128xf32>
    %520 = vector.extract_strided_slice %519 {offsets = [0, 0], sizes = [32, 32], strides = [1, 1]} : vector<32x128xf32> to vector<32x32xf32>
    %521 = arith.addf %464, %520 : vector<32x32xf32>
    %cst_172 = arith.constant dense<0.000000e+00> : vector<32xf32>
    %522 = vector.multi_reduction <add>, %521, %cst_172 [1] : vector<32x32xf32> to vector<32xf32>
    %523 = vector.shape_cast %522 : vector<32xf32> to vector<32x1xf32>
    %cst_173 = arith.constant 3.200000e+01 : f32
    %524 = vector.broadcast %cst_173 : f32 to vector<32x1xf32>
    %525 = arith.divf %523, %524 : vector<32x1xf32>
    %526 = vector.broadcast %525 : vector<32x1xf32> to vector<32x32xf32>
    %527 = arith.subf %521, %526 : vector<32x32xf32>
    %528 = arith.mulf %527, %527 : vector<32x32xf32>
    %cst_174 = arith.constant dense<0.000000e+00> : vector<32xf32>
    %529 = vector.multi_reduction <add>, %528, %cst_174 [1] : vector<32x32xf32> to vector<32xf32>
    %530 = vector.shape_cast %529 : vector<32xf32> to vector<32x1xf32>
    %cst_175 = arith.constant 3.200000e+01 : f32
    %531 = vector.broadcast %cst_175 : f32 to vector<32x1xf32>
    %532 = arith.divf %530, %531 : vector<32x1xf32>
    %cst_176 = arith.constant 9.99999974E-6 : f32
    %533 = vector.broadcast %cst_176 : f32 to vector<32x1xf32>
    %534 = arith.addf %532, %533 : vector<32x1xf32>
    %535 = math.rsqrt %534 : vector<32x1xf32>
    %536 = vector.broadcast %535 : vector<32x1xf32> to vector<32x32xf32>
    %537 = arith.mulf %527, %536 : vector<32x32xf32>
    %c37 = arith.constant 37 : index
    %c0_177 = arith.constant 0 : index
    %538 = vector.load %arg3[%c37, %c0_177] : memref<44x128xf32, #tpu.memory_space<vmem>>, vector<1x128xf32>
    %539 = vector.extract_strided_slice %538 {offsets = [0, 0], sizes = [1, 32], strides = [1, 1]} : vector<1x128xf32> to vector<1x32xf32>
    %540 = vector.broadcast %539 : vector<1x32xf32> to vector<32x32xf32>
    %541 = arith.mulf %537, %540 : vector<32x32xf32>
    %c38 = arith.constant 38 : index
    %c0_178 = arith.constant 0 : index
    %542 = vector.load %arg3[%c38, %c0_178] : memref<44x128xf32, #tpu.memory_space<vmem>>, vector<1x128xf32>
    %543 = vector.extract_strided_slice %542 {offsets = [0, 0], sizes = [1, 32], strides = [1, 1]} : vector<1x128xf32> to vector<1x32xf32>
    %544 = vector.broadcast %543 : vector<1x32xf32> to vector<32x32xf32>
    %545 = arith.addf %541, %544 : vector<32x32xf32>
    %c880 = arith.constant 880 : index
    %c0_179 = arith.constant 0 : index
    %546 = vector.load %arg2[%c880, %c0_179] : memref<1168x128xf32, #tpu.memory_space<vmem>>, vector<32x128xf32>
    %cst_180 = arith.constant dense<0.000000e+00> : vector<32x128xf32>
    %547 = tpu.matmul %545, %546, %cst_180 {dimension_numbers = #tpu.dot_dimension_numbers<[1], [0], [0], [1], [0, 0, 1, 1], [], []>} : vector<32x32xf32>, vector<32x128xf32>, vector<32x128xf32> -> vector<32x128xf32>
    %c32 = arith.constant 32 : index
    %c0_181 = arith.constant 0 : index
    %548 = vector.load %arg3[%c32, %c0_181] : memref<44x128xf32, #tpu.memory_space<vmem>>, vector<1x128xf32>
    %549 = vector.broadcast %548 : vector<1x128xf32> to vector<32x128xf32>
    %550 = arith.addf %547, %549 : vector<32x128xf32>
    %551 = vector.extract_strided_slice %550 {offsets = [0, 0], sizes = [32, 32], strides = [1, 1]} : vector<32x128xf32> to vector<32x32xf32>
    %c912 = arith.constant 912 : index
    %c0_182 = arith.constant 0 : index
    %552 = vector.load %arg2[%c912, %c0_182] : memref<1168x128xf32, #tpu.memory_space<vmem>>, vector<32x128xf32>
    %cst_183 = arith.constant dense<0.000000e+00> : vector<32x128xf32>
    %553 = tpu.matmul %257, %552, %cst_183 {dimension_numbers = #tpu.dot_dimension_numbers<[1], [0], [0], [1], [0, 0, 1, 1], [], []>} : vector<32x32xf32>, vector<32x128xf32>, vector<32x128xf32> -> vector<32x128xf32>
    %c33 = arith.constant 33 : index
    %c0_184 = arith.constant 0 : index
    %554 = vector.load %arg3[%c33, %c0_184] : memref<44x128xf32, #tpu.memory_space<vmem>>, vector<1x128xf32>
    %555 = vector.broadcast %554 : vector<1x128xf32> to vector<32x128xf32>
    %556 = arith.addf %553, %555 : vector<32x128xf32>
    %cst_185 = arith.constant 0.353553385 : f32
    %557 = vector.broadcast %cst_185 : f32 to vector<32x32xf32>
    %558 = arith.mulf %551, %557 : vector<32x32xf32>
    %559 = vector.extract_strided_slice %556 {offsets = [0, 0], sizes = [32, 32], strides = [1, 1]} : vector<32x128xf32> to vector<32x32xf32>
    %560 = vector.extract_strided_slice %556 {offsets = [0, 32], sizes = [32, 32], strides = [1, 1]} : vector<32x128xf32> to vector<32x32xf32>
    %561 = vector.extract_strided_slice %558 {offsets = [0, 0], sizes = [32, 8], strides = [1, 1]} : vector<32x32xf32> to vector<32x8xf32>
    %562 = vector.extract_strided_slice %559 {offsets = [0, 0], sizes = [32, 8], strides = [1, 1]} : vector<32x32xf32> to vector<32x8xf32>
    %563 = tpu.transpose %562, [1, 0] : vector<32x8xf32> -> vector<8x32xf32>
    %cst_186 = arith.constant dense<0.000000e+00> : vector<32x32xf32>
    %564 = tpu.matmul %561, %563, %cst_186 {dimension_numbers = #tpu.dot_dimension_numbers<[1], [0], [0], [1], [0, 0, 1, 1], [], []>} : vector<32x8xf32>, vector<8x32xf32>, vector<32x32xf32> -> vector<32x32xf32>
    %565 = vector.extract_strided_slice %558 {offsets = [0, 8], sizes = [32, 8], strides = [1, 1]} : vector<32x32xf32> to vector<32x8xf32>
    %566 = vector.extract_strided_slice %559 {offsets = [0, 8], sizes = [32, 8], strides = [1, 1]} : vector<32x32xf32> to vector<32x8xf32>
    %567 = tpu.transpose %566, [1, 0] : vector<32x8xf32> -> vector<8x32xf32>
    %cst_187 = arith.constant dense<0.000000e+00> : vector<32x32xf32>
    %568 = tpu.matmul %565, %567, %cst_187 {dimension_numbers = #tpu.dot_dimension_numbers<[1], [0], [0], [1], [0, 0, 1, 1], [], []>} : vector<32x8xf32>, vector<8x32xf32>, vector<32x32xf32> -> vector<32x32xf32>
    %569 = vector.extract_strided_slice %558 {offsets = [0, 16], sizes = [32, 8], strides = [1, 1]} : vector<32x32xf32> to vector<32x8xf32>
    %570 = vector.extract_strided_slice %559 {offsets = [0, 16], sizes = [32, 8], strides = [1, 1]} : vector<32x32xf32> to vector<32x8xf32>
    %571 = tpu.transpose %570, [1, 0] : vector<32x8xf32> -> vector<8x32xf32>
    %cst_188 = arith.constant dense<0.000000e+00> : vector<32x32xf32>
    %572 = tpu.matmul %569, %571, %cst_188 {dimension_numbers = #tpu.dot_dimension_numbers<[1], [0], [0], [1], [0, 0, 1, 1], [], []>} : vector<32x8xf32>, vector<8x32xf32>, vector<32x32xf32> -> vector<32x32xf32>
    %573 = vector.extract_strided_slice %558 {offsets = [0, 24], sizes = [32, 8], strides = [1, 1]} : vector<32x32xf32> to vector<32x8xf32>
    %574 = vector.extract_strided_slice %559 {offsets = [0, 24], sizes = [32, 8], strides = [1, 1]} : vector<32x32xf32> to vector<32x8xf32>
    %575 = tpu.transpose %574, [1, 0] : vector<32x8xf32> -> vector<8x32xf32>
    %cst_189 = arith.constant dense<0.000000e+00> : vector<32x32xf32>
    %576 = tpu.matmul %573, %575, %cst_189 {dimension_numbers = #tpu.dot_dimension_numbers<[1], [0], [0], [1], [0, 0, 1, 1], [], []>} : vector<32x8xf32>, vector<8x32xf32>, vector<32x32xf32> -> vector<32x32xf32>
    %577 = tpu.concatenate %564, %568, %572, %576 in 0 : vector<32x32xf32>, vector<32x32xf32>, vector<32x32xf32>, vector<32x32xf32> -> vector<128x32xf32>
    %578 = arith.addf %577, %10 : vector<128x32xf32>
    %cst_190 = arith.constant dense<0xFF800000> : vector<128xf32>
    %579 = vector.multi_reduction <maximumf>, %578, %cst_190 [1] : vector<128x32xf32> to vector<128xf32>
    %580 = vector.shape_cast %579 : vector<128xf32> to vector<128x1xf32>
    %581 = vector.broadcast %580 : vector<128x1xf32> to vector<128x32xf32>
    %582 = arith.subf %578, %581 : vector<128x32xf32>
    %583 = math.exp %582 : vector<128x32xf32>
    %cst_191 = arith.constant dense<0.000000e+00> : vector<128xf32>
    %584 = vector.multi_reduction <add>, %583, %cst_191 [1] : vector<128x32xf32> to vector<128xf32>
    %585 = vector.shape_cast %584 : vector<128xf32> to vector<128x1xf32>
    %586 = vector.broadcast %585 : vector<128x1xf32> to vector<128x32xf32>
    %587 = arith.divf %583, %586 : vector<128x32xf32>
    %588 = vector.extract_strided_slice %587 {offsets = [0, 0], sizes = [32, 32], strides = [1, 1]} : vector<128x32xf32> to vector<32x32xf32>
    %589 = vector.extract_strided_slice %560 {offsets = [0, 0], sizes = [32, 8], strides = [1, 1]} : vector<32x32xf32> to vector<32x8xf32>
    %cst_192 = arith.constant dense<0.000000e+00> : vector<32x8xf32>
    %590 = tpu.matmul %588, %589, %cst_192 {dimension_numbers = #tpu.dot_dimension_numbers<[1], [0], [0], [1], [0, 0, 1, 1], [], []>} : vector<32x32xf32>, vector<32x8xf32>, vector<32x8xf32> -> vector<32x8xf32>
    %591 = vector.extract_strided_slice %587 {offsets = [32, 0], sizes = [32, 32], strides = [1, 1]} : vector<128x32xf32> to vector<32x32xf32>
    %592 = vector.extract_strided_slice %560 {offsets = [0, 8], sizes = [32, 8], strides = [1, 1]} : vector<32x32xf32> to vector<32x8xf32>
    %cst_193 = arith.constant dense<0.000000e+00> : vector<32x8xf32>
    %593 = tpu.matmul %591, %592, %cst_193 {dimension_numbers = #tpu.dot_dimension_numbers<[1], [0], [0], [1], [0, 0, 1, 1], [], []>} : vector<32x32xf32>, vector<32x8xf32>, vector<32x8xf32> -> vector<32x8xf32>
    %594 = vector.extract_strided_slice %587 {offsets = [64, 0], sizes = [32, 32], strides = [1, 1]} : vector<128x32xf32> to vector<32x32xf32>
    %595 = vector.extract_strided_slice %560 {offsets = [0, 16], sizes = [32, 8], strides = [1, 1]} : vector<32x32xf32> to vector<32x8xf32>
    %cst_194 = arith.constant dense<0.000000e+00> : vector<32x8xf32>
    %596 = tpu.matmul %594, %595, %cst_194 {dimension_numbers = #tpu.dot_dimension_numbers<[1], [0], [0], [1], [0, 0, 1, 1], [], []>} : vector<32x32xf32>, vector<32x8xf32>, vector<32x8xf32> -> vector<32x8xf32>
    %597 = vector.extract_strided_slice %587 {offsets = [96, 0], sizes = [32, 32], strides = [1, 1]} : vector<128x32xf32> to vector<32x32xf32>
    %598 = vector.extract_strided_slice %560 {offsets = [0, 24], sizes = [32, 8], strides = [1, 1]} : vector<32x32xf32> to vector<32x8xf32>
    %cst_195 = arith.constant dense<0.000000e+00> : vector<32x8xf32>
    %599 = tpu.matmul %597, %598, %cst_195 {dimension_numbers = #tpu.dot_dimension_numbers<[1], [0], [0], [1], [0, 0, 1, 1], [], []>} : vector<32x32xf32>, vector<32x8xf32>, vector<32x8xf32> -> vector<32x8xf32>
    %600 = tpu.concatenate %590, %593, %596, %599 in 1 : vector<32x8xf32>, vector<32x8xf32>, vector<32x8xf32>, vector<32x8xf32> -> vector<32x32xf32>
    %c944 = arith.constant 944 : index
    %c0_196 = arith.constant 0 : index
    %601 = vector.load %arg2[%c944, %c0_196] : memref<1168x128xf32, #tpu.memory_space<vmem>>, vector<32x128xf32>
    %cst_197 = arith.constant dense<0.000000e+00> : vector<32x128xf32>
    %602 = tpu.matmul %600, %601, %cst_197 {dimension_numbers = #tpu.dot_dimension_numbers<[1], [0], [0], [1], [0, 0, 1, 1], [], []>} : vector<32x32xf32>, vector<32x128xf32>, vector<32x128xf32> -> vector<32x128xf32>
    %c34 = arith.constant 34 : index
    %c0_198 = arith.constant 0 : index
    %603 = vector.load %arg3[%c34, %c0_198] : memref<44x128xf32, #tpu.memory_space<vmem>>, vector<1x128xf32>
    %604 = vector.broadcast %603 : vector<1x128xf32> to vector<32x128xf32>
    %605 = arith.addf %602, %604 : vector<32x128xf32>
    %606 = vector.extract_strided_slice %605 {offsets = [0, 0], sizes = [32, 32], strides = [1, 1]} : vector<32x128xf32> to vector<32x32xf32>
    %607 = arith.addf %545, %606 : vector<32x32xf32>
    %cst_199 = arith.constant dense<0.000000e+00> : vector<32xf32>
    %608 = vector.multi_reduction <add>, %607, %cst_199 [1] : vector<32x32xf32> to vector<32xf32>
    %609 = vector.shape_cast %608 : vector<32xf32> to vector<32x1xf32>
    %cst_200 = arith.constant 3.200000e+01 : f32
    %610 = vector.broadcast %cst_200 : f32 to vector<32x1xf32>
    %611 = arith.divf %609, %610 : vector<32x1xf32>
    %612 = vector.broadcast %611 : vector<32x1xf32> to vector<32x32xf32>
    %613 = arith.subf %607, %612 : vector<32x32xf32>
    %614 = arith.mulf %613, %613 : vector<32x32xf32>
    %cst_201 = arith.constant dense<0.000000e+00> : vector<32xf32>
    %615 = vector.multi_reduction <add>, %614, %cst_201 [1] : vector<32x32xf32> to vector<32xf32>
    %616 = vector.shape_cast %615 : vector<32xf32> to vector<32x1xf32>
    %cst_202 = arith.constant 3.200000e+01 : f32
    %617 = vector.broadcast %cst_202 : f32 to vector<32x1xf32>
    %618 = arith.divf %616, %617 : vector<32x1xf32>
    %cst_203 = arith.constant 9.99999974E-6 : f32
    %619 = vector.broadcast %cst_203 : f32 to vector<32x1xf32>
    %620 = arith.addf %618, %619 : vector<32x1xf32>
    %621 = math.rsqrt %620 : vector<32x1xf32>
    %622 = vector.broadcast %621 : vector<32x1xf32> to vector<32x32xf32>
    %623 = arith.mulf %613, %622 : vector<32x32xf32>
    %c39 = arith.constant 39 : index
    %c0_204 = arith.constant 0 : index
    %624 = vector.load %arg3[%c39, %c0_204] : memref<44x128xf32, #tpu.memory_space<vmem>>, vector<1x128xf32>
    %625 = vector.extract_strided_slice %624 {offsets = [0, 0], sizes = [1, 32], strides = [1, 1]} : vector<1x128xf32> to vector<1x32xf32>
    %626 = vector.broadcast %625 : vector<1x32xf32> to vector<32x32xf32>
    %627 = arith.mulf %623, %626 : vector<32x32xf32>
    %c40 = arith.constant 40 : index
    %c0_205 = arith.constant 0 : index
    %628 = vector.load %arg3[%c40, %c0_205] : memref<44x128xf32, #tpu.memory_space<vmem>>, vector<1x128xf32>
    %629 = vector.extract_strided_slice %628 {offsets = [0, 0], sizes = [1, 32], strides = [1, 1]} : vector<1x128xf32> to vector<1x32xf32>
    %630 = vector.broadcast %629 : vector<1x32xf32> to vector<32x32xf32>
    %631 = arith.addf %627, %630 : vector<32x32xf32>
    %c976 = arith.constant 976 : index
    %c0_206 = arith.constant 0 : index
    %632 = vector.load %arg2[%c976, %c0_206] : memref<1168x128xf32, #tpu.memory_space<vmem>>, vector<32x128xf32>
    %cst_207 = arith.constant dense<0.000000e+00> : vector<32x128xf32>
    %633 = tpu.matmul %631, %632, %cst_207 {dimension_numbers = #tpu.dot_dimension_numbers<[1], [0], [0], [1], [0, 0, 1, 1], [], []>} : vector<32x32xf32>, vector<32x128xf32>, vector<32x128xf32> -> vector<32x128xf32>
    %c35 = arith.constant 35 : index
    %c0_208 = arith.constant 0 : index
    %634 = vector.load %arg3[%c35, %c0_208] : memref<44x128xf32, #tpu.memory_space<vmem>>, vector<1x128xf32>
    %635 = vector.broadcast %634 : vector<1x128xf32> to vector<32x128xf32>
    %636 = arith.addf %633, %635 : vector<32x128xf32>
    %cst_209 = arith.constant 0.000000e+00 : f32
    %637 = vector.broadcast %cst_209 : f32 to vector<32x128xf32>
    %638 = arith.maximumf %636, %637 : vector<32x128xf32>
    %c1008 = arith.constant 1008 : index
    %c0_210 = arith.constant 0 : index
    %639 = vector.load %arg2[%c1008, %c0_210] : memref<1168x128xf32, #tpu.memory_space<vmem>>, vector<128x128xf32>
    %cst_211 = arith.constant dense<0.000000e+00> : vector<32x128xf32>
    %640 = tpu.matmul %638, %639, %cst_211 {dimension_numbers = #tpu.dot_dimension_numbers<[1], [0], [0], [1], [0, 0, 1, 1], [], []>} : vector<32x128xf32>, vector<128x128xf32>, vector<32x128xf32> -> vector<32x128xf32>
    %c36 = arith.constant 36 : index
    %c0_212 = arith.constant 0 : index
    %641 = vector.load %arg3[%c36, %c0_212] : memref<44x128xf32, #tpu.memory_space<vmem>>, vector<1x128xf32>
    %642 = vector.broadcast %641 : vector<1x128xf32> to vector<32x128xf32>
    %643 = arith.addf %640, %642 : vector<32x128xf32>
    %644 = vector.extract_strided_slice %643 {offsets = [0, 0], sizes = [32, 32], strides = [1, 1]} : vector<32x128xf32> to vector<32x32xf32>
    %645 = arith.addf %631, %644 : vector<32x32xf32>
    %cst_213 = arith.constant dense<0.000000e+00> : vector<32xf32>
    %646 = vector.multi_reduction <add>, %645, %cst_213 [1] : vector<32x32xf32> to vector<32xf32>
    %647 = vector.shape_cast %646 : vector<32xf32> to vector<32x1xf32>
    %cst_214 = arith.constant 3.200000e+01 : f32
    %648 = vector.broadcast %cst_214 : f32 to vector<32x1xf32>
    %649 = arith.divf %647, %648 : vector<32x1xf32>
    %650 = vector.broadcast %649 : vector<32x1xf32> to vector<32x32xf32>
    %651 = arith.subf %645, %650 : vector<32x32xf32>
    %652 = arith.mulf %651, %651 : vector<32x32xf32>
    %cst_215 = arith.constant dense<0.000000e+00> : vector<32xf32>
    %653 = vector.multi_reduction <add>, %652, %cst_215 [1] : vector<32x32xf32> to vector<32xf32>
    %654 = vector.shape_cast %653 : vector<32xf32> to vector<32x1xf32>
    %cst_216 = arith.constant 3.200000e+01 : f32
    %655 = vector.broadcast %cst_216 : f32 to vector<32x1xf32>
    %656 = arith.divf %654, %655 : vector<32x1xf32>
    %cst_217 = arith.constant 9.99999974E-6 : f32
    %657 = vector.broadcast %cst_217 : f32 to vector<32x1xf32>
    %658 = arith.addf %656, %657 : vector<32x1xf32>
    %659 = math.rsqrt %658 : vector<32x1xf32>
    %660 = vector.broadcast %659 : vector<32x1xf32> to vector<32x32xf32>
    %661 = arith.mulf %651, %660 : vector<32x32xf32>
    %c41 = arith.constant 41 : index
    %c0_218 = arith.constant 0 : index
    %662 = vector.load %arg3[%c41, %c0_218] : memref<44x128xf32, #tpu.memory_space<vmem>>, vector<1x128xf32>
    %663 = vector.extract_strided_slice %662 {offsets = [0, 0], sizes = [1, 32], strides = [1, 1]} : vector<1x128xf32> to vector<1x32xf32>
    %664 = vector.broadcast %663 : vector<1x32xf32> to vector<32x32xf32>
    %665 = arith.mulf %661, %664 : vector<32x32xf32>
    %c42 = arith.constant 42 : index
    %c0_219 = arith.constant 0 : index
    %666 = vector.load %arg3[%c42, %c0_219] : memref<44x128xf32, #tpu.memory_space<vmem>>, vector<1x128xf32>
    %667 = vector.extract_strided_slice %666 {offsets = [0, 0], sizes = [1, 32], strides = [1, 1]} : vector<1x128xf32> to vector<1x32xf32>
    %668 = vector.broadcast %667 : vector<1x32xf32> to vector<32x32xf32>
    %669 = arith.addf %665, %668 : vector<32x32xf32>
    %c1136 = arith.constant 1136 : index
    %c0_220 = arith.constant 0 : index
    %670 = vector.load %arg2[%c1136, %c0_220] : memref<1168x128xf32, #tpu.memory_space<vmem>>, vector<32x128xf32>
    %cst_221 = arith.constant dense<0.000000e+00> : vector<32x128xf32>
    %671 = tpu.matmul %669, %670, %cst_221 {dimension_numbers = #tpu.dot_dimension_numbers<[1], [0], [0], [1], [0, 0, 1, 1], [], []>} : vector<32x32xf32>, vector<32x128xf32>, vector<32x128xf32> -> vector<32x128xf32>
    %c43 = arith.constant 43 : index
    %c0_222 = arith.constant 0 : index
    %672 = vector.load %arg3[%c43, %c0_222] : memref<44x128xf32, #tpu.memory_space<vmem>>, vector<1x128xf32>
    %673 = vector.broadcast %672 : vector<1x128xf32> to vector<32x128xf32>
    %674 = arith.addf %671, %673 : vector<32x128xf32>
    %cst_223 = arith.constant 0.707106769 : f32
    %675 = vector.broadcast %cst_223 : f32 to vector<32x128xf32>
    %676 = arith.mulf %674, %675 : vector<32x128xf32>
    %677 = math.absf %676 : vector<32x128xf32>
    %cst_224 = arith.constant 0.327591091 : f32
    %678 = vector.broadcast %cst_224 : f32 to vector<32x128xf32>
    %679 = arith.mulf %678, %677 : vector<32x128xf32>
    %cst_225 = arith.constant 1.000000e+00 : f32
    %680 = vector.broadcast %cst_225 : f32 to vector<32x128xf32>
    %681 = arith.addf %680, %679 : vector<32x128xf32>
    %cst_226 = arith.constant 1.000000e+00 : f32
    %682 = vector.broadcast %cst_226 : f32 to vector<32x128xf32>
    %683 = arith.divf %682, %681 : vector<32x128xf32>
    %cst_227 = arith.constant 1.06140542 : f32
    %684 = vector.broadcast %cst_227 : f32 to vector<32x128xf32>
    %685 = arith.mulf %683, %684 : vector<32x128xf32>
    %cst_228 = arith.constant -1.45315206 : f32
    %686 = vector.broadcast %cst_228 : f32 to vector<32x128xf32>
    %687 = arith.addf %686, %685 : vector<32x128xf32>
    %688 = arith.mulf %683, %687 : vector<32x128xf32>
    %cst_229 = arith.constant 1.42141378 : f32
    %689 = vector.broadcast %cst_229 : f32 to vector<32x128xf32>
    %690 = arith.addf %689, %688 : vector<32x128xf32>
    %691 = arith.mulf %683, %690 : vector<32x128xf32>
    %cst_230 = arith.constant -0.284496725 : f32
    %692 = vector.broadcast %cst_230 : f32 to vector<32x128xf32>
    %693 = arith.addf %692, %691 : vector<32x128xf32>
    %694 = arith.mulf %683, %693 : vector<32x128xf32>
    %cst_231 = arith.constant 0.254829586 : f32
    %695 = vector.broadcast %cst_231 : f32 to vector<32x128xf32>
    %696 = arith.addf %695, %694 : vector<32x128xf32>
    %697 = arith.mulf %683, %696 : vector<32x128xf32>
    %cst_232 = arith.constant 0.000000e+00 : f32
    %698 = vector.broadcast %cst_232 : f32 to vector<32x128xf32>
    %699 = arith.subf %698, %677 : vector<32x128xf32>
    %700 = arith.mulf %699, %677 : vector<32x128xf32>
    %701 = math.exp %700 : vector<32x128xf32>
    %702 = arith.mulf %697, %701 : vector<32x128xf32>
    %cst_233 = arith.constant 1.000000e+00 : f32
    %703 = vector.broadcast %cst_233 : f32 to vector<32x128xf32>
    %704 = arith.subf %703, %702 : vector<32x128xf32>
    %cst_234 = arith.constant 0.000000e+00 : f32
    %705 = vector.broadcast %cst_234 : f32 to vector<32x128xf32>
    %706 = arith.cmpf oge, %676, %705 : vector<32x128xf32>
    %cst_235 = arith.constant 0.000000e+00 : f32
    %707 = vector.broadcast %cst_235 : f32 to vector<32x128xf32>
    %708 = arith.subf %707, %704 : vector<32x128xf32>
    %709 = arith.select %706, %704, %708 : vector<32x128xi1>, vector<32x128xf32>
    %cst_236 = arith.constant 5.000000e-01 : f32
    %710 = vector.broadcast %cst_236 : f32 to vector<32x128xf32>
    %711 = arith.mulf %710, %674 : vector<32x128xf32>
    %cst_237 = arith.constant 1.000000e+00 : f32
    %712 = vector.broadcast %cst_237 : f32 to vector<32x128xf32>
    %713 = arith.addf %712, %709 : vector<32x128xf32>
    %714 = arith.mulf %711, %713 : vector<32x128xf32>
    %c0_238 = arith.constant 0 : index
    %c0_239 = arith.constant 0 : index
    %715 = vector.load %arg4[%c0_238, %c0_239] : memref<32x128xf32, #tpu.memory_space<vmem>>, vector<32x128xf32>
    tpu.vector_store %arg4[%c0_238, %c0_239], %714 {strides = array<i32>} : memref<32x128xf32, #tpu.memory_space<vmem>>, vector<32x128xf32>,
    return
  }
}

</mosaic_0001>

<bundles_post_ra>
// kernel: vit_autoencoder_forward.1
= control target key start
LH: loop header
LB: loop body
LE: loop exit
PB: predicated region body
PF: predicated region fallthrough
CT: control target
= control target key end

     0   :  { %vm55_vm0 = vcmask 392192   ;;  %s17431_s0 = inlined_call_operand.vmem [shape: f32[32,48], index: 0, kind: input, shape index: {}]   ;;  %s17432_s1 = inlined_call_operand.vmem [shape: f32[32,32], index: 1, kind: input, shape index: {}]   ;;  %s17433_s2 = inlined_call_operand.vmem [shape: f32[1168,128], index: 2, kind: input, shape index: {}]   ;;  %s17434_s3 = inlined_call_operand.vmem [shape: f32[44,128], index: 3, kind: input, shape index: {}]   ;;  %s17435_s4 = inlined_call_operand.vmem [shape: f32[32,128], index: 4, kind: output, shape index: {0}]   ;;  %s17436_s5 = inlined_call_operand.hbm [shape: f32[32,32], index: 5, kind: output, shape index: {1}]  }
   0x1   :  { %v44_v0 = vld [vmem:[%s17433_s2] sm:$0xff]  ;;  %v45_v1 = vld [vmem:[%s17433_s2 + $0x8] sm:$0xff]  ;;  %v46_v2 = vld [vmem:[%s17433_s2 + $0x10] sm:$0xff] }
   0x2   :  { %v12578_v3 = vpack.c.bf16 %v45_v1, %v44_v0  ;;  %v47_v4 = vld [vmem:[%s17433_s2 + $0x18] sm:$0xff]  ;;  %v48_v6 = vld [vmem:[%s17433_s2 + $0x20] sm:$0xff]  ;;  %v49_v7 = vld [vmem:[%s17433_s2 + $0x28] sm:$0xff] }
   0x3   :  { %v12582_v5 = vpack.c.bf16 %v47_v4, %v46_v2  ;;  %v40_v8 = vld [vmem:[%s17431_s0] sm:$0xff] }
   0x4   :  { %12579 = vmatprep.subr.bf16.mxu1 %v12578_v3  ;;  %11482 = vmatprep.mubr.msk.f32.mxu1 %vm55_vm0, %v40_v8 }
   0x5   :  { %12581 = vmatpush3.bf16.msra.mxu1 %v12578_v3 }
   0x6   :  { %11 = vsyncpa [#allocation3], 0  ;;  %12583 = vmatprep.subr.bf16.mxu1 %v12582_v5  ;;  %v12586_v9 = vpack.c.bf16 %v49_v7, %v48_v6  ;;  %v161_v10 = vld [vmem:[%s17433_s2 + $0x30] sm:$0xff]  ;;  %v162_v11 = vld [vmem:[%s17433_s2 + $0x38] sm:$0xff]  ;;  %vm170_vm1 = vcmask 261120   ;;  %vm284_vm2 = vcmask 64512  }
   0x7   :  { %v12590_v12 = vpack.c.bf16 %v162_v11, %v161_v10  ;;  %v41_v13 = vld [vmem:[%s17431_s0 + $0x8] sm:$0xff]  ;;  %v42_v14 = vld [vmem:[%s17431_s0 + $0x10] sm:$0xff]  ;;  %v43_v15 = vld [vmem:[%s17431_s0 + $0x18] sm:$0xff]  ;;  %s14335_s7 = smov 96   ;;  %s14336_s8 = smov 88   ;;  %vm1421_vm8 = vcmask 130048  }
   0x8   :  { %v163_v16 = vld [vmem:[%s17433_s2 + $0x40] sm:$0xff]  ;;  %v164_v17 = vld [vmem:[%s17433_s2 + $0x48] sm:$0xff]  ;;  %v156_v28 = vld [vmem:[%s17432_s1 + $0x18] sm:$0xff]  ;;  %s14337_s9 = smov 80   ;;  %s14338_s10 = smov 72   ;;  %vm1426_vm9 = vcmask 195584  }
   0x9   :  { %12585 = vmatpush3.bf16.msra.mxu1 %v12582_v5  ;;  %v12594_v18 = vpack.c.bf16 %v164_v17, %v163_v16  ;;  %v10432_v19 = vld [vmem:[%s17434_s3] ss:$0 sm:$0xff]  ;;  %v154_v24 = vld [vmem:[%s17432_s1 + $0x8] sm:$0xff]  ;;  %v155_v32 = vld [vmem:[%s17432_s1 + $0x10] sm:$0xff]  ;;  %s14339_s11 = smov 120   ;;  %s14340_s12 = smov 112  }
   0xa   :  { %12587 = vmatprep.subr.bf16.mxu1 %v12586_v9  ;;  %v153_v23 = vld [vmem:[%s17432_s1] sm:$0xff]  ;;  %s14341_s13 = smov 104   ;;  %s14342_s14 = smov 56   ;;  %vm14520_vm3 = vmpackc.low %vm284_vm2, %vm284_vm2 }
   0xb   :  { %v10437_v36 = vld [vmem:[%s17434_s3 + $0x1] ss:$0 sm:$0xff]  ;;  %s14343_s15 = smov 64   ;;  %s14345_s16 = smov 40  }
   0xc   :  { %s14346_s17 = smov 48   ;;  %s14347_s22 = smov 8  }
   0xd   :  { %12589 = vmatpush3.bf16.msra.mxu1 %v12586_v9  ;;  %s14348_s26 = smov 16   ;;  %s14349_s27 = smov 24  }
   0xe   :  { %12591 = vmatprep.subr.bf16.mxu1 %v12590_v12 }
  0x10   :  { %11483 = vmatmul.mubr.msk.f32.vlgmr.msra.gmra.mrb[0].mxu1 %vm55_vm0, %v41_v13 }
  0x11   :  { %11485 = vmatprep.mubr.msk.f32.mxu1 %vm55_vm0, %v42_v14  ;;  %12593 = vmatpush3.bf16.msra.mxu1 %v12590_v12 }
  0x12   :  { %12595 = vmatprep.subr.bf16.mxu1 %v12594_v18 }
  0x14   :  { %11486 = vmatmul.mubr.msk.f32.gmra.mrb[2].mxu1 %vm55_vm0, %v43_v15 }
  0x15   :  { %12597 = vmatpush3.bf16.msra.mxu1 %v12594_v18 }
  0xe3   :  { %v11484_v20 = vpop.f32.mrb[0].mxu1 }
  0xe4   :  { %v140_v21 = vadd.f32 %v11484_v20, %v10432_v19  ;;  %v134_v22 = vpop.f32.mrb[1].mxu1 }
  0xe5   :  { %v135_v25 = vadd.f32 %v10432_v19, %v134_v22 }
  0xe6   :  { %v14442_v29 = vadd.f32 %v154_v24, %v140_v21 }
  0xe7   :  { %v14437_v26 = vadd.f32 %v153_v23, %v135_v25  ;;  %v11487_v27 = vpop.f32.mrb[2].mxu1 }
  0xe8   :  { %v150_v30 = vadd.f32 %v11487_v27, %v10432_v19  ;;  %v144_v31 = vpop.f32.mrb[3].mxu1 }
  0xe9   :  { %v145_v33 = vadd.f32 %v10432_v19, %v144_v31  ;;  %11496 = vmatprep.mubr.msk.f32.mxu1 %vm170_vm1, %v14437_v26 }
  0xea   :  { %v14449_v34 = vadd.f32 %v156_v28, %v150_v30  ;;  %11497 = vmatmul.mubr.msk.f32.vlgmr.msra.gmra.mrb[4].mxu1 %vm170_vm1, %v14442_v29 }
  0xeb   :  { %v14453_v35 = vadd.f32 %v155_v32, %v145_v33 }
  0xed   :  { %11499 = vmatprep.mubr.msk.f32.mxu1 %vm170_vm1, %v14453_v35 }
  0xee   :  { %11500 = vmatmul.mubr.msk.f32.gmra.mrb[6].mxu1 %vm170_vm1, %v14449_v34 }
 0x1bd   :  { %v11498_v37 = vpop.f32.mrb[4].mxu1 }
 0x1be   :  { %v255_v38 = vadd.f32 %v11498_v37, %v10437_v36  ;;  %v249_v39 = vpop.f32.mrb[5].mxu1 }
 0x1bf   :  { %v250_v40 = vadd.f32 %v10437_v36, %v249_v39 }
 0x1c0   :  { %v14480_v48 = vmul.f32 0.35355338, %v255_v38 }
 0x1c1   :  { %v11501_v41 = vpop.f32.mrb[6].mxu1  ;;  %v14462_v42 = vpack.i.bf16 %v255_v38, %v250_v40  ;;  %v268_v43 = vmul.f32 0.35355338, %v250_v40 }
 0x1c2   :  { %v265_v44 = vadd.f32 %v11501_v41, %v10437_v36  ;;  %v259_v45 = vpop.f32.mrb[7].mxu1 }
 0x1c3   :  { %v260_v46 = vadd.f32 %v10437_v36, %v259_v45  ;;  %13368 = vrot.lane.b32.xlu0 %v14462_v42, %s14335_s7  ;;  %11510 = vmatprep.mubr.msk.f32.mxu1 %vm284_vm2, %v268_v43 }
 0x1c4   :  { %v14495_v50 = vmul.f32 0.35355338, %v265_v44 }
 0x1c5   :  { %v14467_v47 = vpack.i.bf16 %v265_v44, %v260_v46  ;;  %v14489_v49 = vmul.f32 0.35355338, %v260_v46 }
 0x1c7   :  { %13378 = vrot.lane.b32.xlu1 %v14467_v47, %s14335_s7  ;;  %13373 = vrot.lane.b32.xlu0 %v14462_v42, %s14336_s8 }
 0x1cb   :  { %13383 = vrot.lane.b32.xlu1 %v14467_v47, %s14336_s8  ;;  %13388 = vrot.lane.b32.xlu0 %v14462_v42, %s14337_s9 }
 0x1cf   :  { %13393 = vrot.lane.b32.xlu1 %v14462_v42, %s14338_s10  ;;  %390 = vrot.lane.b32.xlu0 %v268_v43, %s14339_s11 }
 0x1d3   :  { %392 = vrot.lane.b32.xlu1 %v14480_v48, %s14339_s11  ;;  %13398 = vrot.lane.b32.xlu0 %v14467_v47, %s14337_s9 }
 0x1d7   :  { %13403 = vrot.lane.b32.xlu1 %v14467_v47, %s14338_s10  ;;  %507 = vrot.lane.b32.xlu0 %v268_v43, %s14340_s12 }
 0x1db   :  { %509 = vrot.lane.b32.xlu1 %v14480_v48, %s14340_s12  ;;  %394 = vrot.lane.b32.xlu0 %v14489_v49, %s14339_s11 }
 0x1df   :  { %396 = vrot.lane.b32.xlu1 %v14495_v50, %s14339_s11  ;;  %624 = vrot.lane.b32.xlu0 %v268_v43, %s14341_s13 }
 0x1e3   :  { %626 = vrot.lane.b32.xlu1 %v14480_v48, %s14341_s13  ;;  %511 = vrot.lane.b32.xlu0 %v14489_v49, %s14340_s12 }
 0x1e7   :  { %513 = vrot.lane.b32.xlu1 %v14495_v50, %s14340_s12  ;;  %628 = vrot.lane.b32.xlu0 %v14489_v49, %s14341_s13 }
 0x1eb   :  { %630 = vrot.lane.b32.xlu1 %v14495_v50, %s14341_s13  ;;  %13413 = vrot.lane.b32.xlu0 %v14462_v42, %s14342_s14 }
 0x1ef   :  { %13408 = vrot.lane.b32.xlu1 %v14462_v42, %s14343_s15 }
 0x1f3   :  { %13418 = vrot.lane.b32.xlu1 %v14467_v47, %s14343_s15 }
 0x1f7   :  { %13423 = vrot.lane.b32.xlu1 %v14467_v47, %s14342_s14 }
 0x235   :  { %v13369_v51 = vpop.permute.xlu0 %13368 }
 0x236   :  { %v13371_v52 = vunpack.i.h.bf16 %v13369_v51  ;;  %v13370_v53 = vunpack.i.l.bf16 %v13369_v51 }
 0x238   :  { %v12598_v55 = vpack.c.bf16 %v13371_v52, %v13370_v53 }
 0x239   :  { %v13379_v56 = vpop.permute.xlu1 %13378  ;;  %v13374_v57 = vpop.permute.xlu0 %13373 }
 0x23a   :  { %v13381_v58 = vunpack.i.h.bf16 %v13379_v56  ;;  %v13380_v59 = vunpack.i.l.bf16 %v13379_v56  ;;  %12600 = vmatprep.subr.msk.bf16.mxu1 %vm14520_vm3, %v12598_v55  ;;  %v13376_v60 = vunpack.i.h.bf16 %v13374_v57  ;;  %v13375_v61 = vunpack.i.l.bf16 %v13374_v57 }
 0x23b   :  { %12603 = vmatpush3.bf16.xpose.msk.msra.mxu1 %vm14520_vm3, %v12598_v55  ;;  %v20_v55 = vlaneseq }
 0x23c   :  { %v12604_v62 = vpack.c.bf16 %v13381_v58, %v13380_v59  ;;  %v12610_v63 = vpack.c.bf16 %v13376_v60, %v13375_v61 }
 0x23d   :  { %v13384_v0 = vpop.permute.xlu1 %13383  ;;  %v13389_v1 = vpop.permute.xlu0 %13388  ;;  %v21_v56 = vshrl.u32 %v20_v55, 7  ;;  %v26_v58 = vand.u32 127, %v20_v55 }
 0x23e   :  { %v13386_v2 = vunpack.i.h.bf16 %v13384_v0  ;;  %v13385_v3 = vunpack.i.l.bf16 %v13384_v0  ;;  %v13391_v4 = vunpack.i.h.bf16 %v13389_v1  ;;  %v13390_v5 = vunpack.i.l.bf16 %v13389_v1  ;;  %12612 = vmatprep.subr.msk.bf16.mxu0 %vm14520_vm3, %v12610_v63  ;;  %12606 = vmatprep.subr.msk.bf16.mxu1 %vm14520_vm3, %v12604_v62 }
 0x23f   :  { %12615 = vmatpush3.bf16.xpose.msk.msra.mxu0 %vm14520_vm3, %v12610_v63  ;;  %v22_v57 = vadd.s32 8, %v21_v56  ;;  %v31_v60 = vshra.s32 %v26_v58, 4  ;;  %v23_v61 = vadd.s32 16, %v21_v56  ;;  %v27_v63 = vshra.s32 %v21_v56, 4 }
 0x240   :  { %v12616_v6 = vpack.c.bf16 %v13386_v2, %v13385_v3  ;;  %v12622_v9 = vpack.c.bf16 %v13391_v4, %v13390_v5  ;;  %v14344_v0 = vmov -1e+09   ;;  %v24_v5 = vadd.s32 24, %v21_v56 }
 0x241   :  { %v13394_v7 = vpop.permute.xlu1 %13393  ;;  %v391_v8 = vpop.permute.xlu0 %390  ;;  %v28_v59 = vshra.s32 %v22_v57, 4  ;;  %vm32_vm6 = vcmp.eq.s32.totalorder %v27_v63, %v31_v60 }
 0x242   :  { %v13396_v10 = vunpack.i.h.bf16 %v13394_v7  ;;  %v13395_v11 = vunpack.i.l.bf16 %v13394_v7  ;;  %12618 = vmatprep.subr.msk.bf16.mxu0 %vm14520_vm3, %v12616_v6  ;;  %11524 = vmatprep.mubr.msk.f32.mxu0 %vm284_vm2, %v391_v8  ;;  %v14583_v8 = vsel %vm32_vm6, 0.0, %v14344_v0 }
 0x243   :  { %12609 = vmatpush3.bf16.xpose.msk.msra.mxu1 %vm14520_vm3, %v12604_v62  ;;  %vm33_vm4 = vcmp.eq.s32.totalorder %v28_v59, %v31_v60  ;;  %v29_v62 = vshra.s32 %v23_v61, 4 }
 0x244   :  { %12624 = vmatprep.subr.msk.bf16.mxu1 %vm14520_vm3, %v12622_v9  ;;  %v12634_v14 = vpack.c.bf16 %v13396_v10, %v13395_v11  ;;  %v14574_v1 = vsel %vm33_vm4, 0.0, %v14344_v0  ;;  %v30_v11 = vshra.s32 %v24_v5, 4 }
 0x245   :  { %v393_v12 = vpop.permute.xlu1 %392  ;;  %v13399_v13 = vpop.permute.xlu0 %13398  ;;  %vm34_vm5 = vcmp.eq.s32.totalorder %v29_v62, %v31_v60 }
 0x246   :  { %v13401_v15 = vunpack.i.h.bf16 %v13399_v13  ;;  %v13400_v16 = vunpack.i.l.bf16 %v13399_v13  ;;  %v14581_v7 = vsel %vm34_vm5, 0.0, %v14344_v0  ;;  %vm35_vm7 = vcmp.eq.s32.totalorder %v30_v11, %v31_v60 }
 0x247   :  { %12621 = vmatpush3.bf16.xpose.msk.msra.mxu0 %vm14520_vm3, %v12616_v6 }
 0x248   :  { %12636 = vmatprep.subr.msk.bf16.mxu0 %vm14520_vm3, %v12634_v14  ;;  %v12628_v19 = vpack.c.bf16 %v13401_v15, %v13400_v16 }
 0x249   :  { %v13404_v17 = vpop.permute.xlu1 %13403  ;;  %v508_v18 = vpop.permute.xlu0 %507 }
 0x24a   :  { %11511 = vmatmul.mubr.msk.f32.vlgmr.msra.gmra.mrb[8].mxu1 %vm284_vm2, %v14480_v48  ;;  %v13406_v20 = vunpack.i.h.bf16 %v13404_v17  ;;  %v13405_v21 = vunpack.i.l.bf16 %v13404_v17 }
 0x24b   :  { %11513 = vmatprep.mubr.msk.f32.mxu1 %vm284_vm2, %v14489_v49  ;;  %12627 = vmatpush3.bf16.xpose.msk.msra.mxu1 %vm14520_vm3, %v12622_v9 }
 0x24c   :  { %12630 = vmatprep.subr.msk.bf16.mxu1 %vm14520_vm3, %v12628_v19  ;;  %v12640_v24 = vpack.c.bf16 %v13406_v20, %v13405_v21 }
 0x24d   :  { %v510_v22 = vpop.permute.xlu1 %509  ;;  %v395_v23 = vpop.permute.xlu0 %394 }
 0x24e   :  { %11514 = vmatmul.mubr.msk.f32.gmra.mrb[10].mxu1 %vm284_vm2, %v14495_v50  ;;  %11525 = vmatmul.mubr.msk.f32.vlgmr.msra.gmra.mrb[0].mxu0 %vm284_vm2, %v393_v12 }
 0x24f   :  { %11527 = vmatprep.mubr.msk.f32.mxu0 %vm284_vm2, %v395_v23  ;;  %11538 = vmatprep.mubr.msk.f32.mxu1 %vm284_vm2, %v508_v18 }
 0x250   :  { %12639 = vmatpush3.bf16.xpose.msk.msra.mxu0 %vm14520_vm3, %v12634_v14 }
 0x251   :  { %12642 = vmatprep.subr.msk.bf16.mxu0 %vm14520_vm3, %v12640_v24  ;;  %v397_v25 = vpop.permute.xlu1 %396  ;;  %v625_v27 = vpop.permute.xlu0 %624 }
 0x252   :  { %11528 = vmatmul.mubr.msk.f32.gmra.mrb[2].mxu0 %vm284_vm2, %v397_v25 }
 0x253   :  { %12633 = vmatpush3.bf16.xpose.msk.msra.mxu1 %vm14520_vm3, %v12628_v19  ;;  %11552 = vmatprep.mubr.msk.f32.mxu0 %vm284_vm2, %v625_v27 }
 0x255   :  { %v627_v28 = vpop.permute.xlu1 %626  ;;  %v512_v30 = vpop.permute.xlu0 %511 }
 0x258   :  { %12645 = vmatpush3.bf16.xpose.msk.msra.mxu0 %vm14520_vm3, %v12640_v24  ;;  %v14606_v24 = vsel %vm35_vm7, 0.0, %v14344_v0 }
 0x259   :  { %v514_v31 = vpop.permute.xlu1 %513  ;;  %v629_v32 = vpop.permute.xlu0 %628 }
 0x25a   :  { %11539 = vmatmul.mubr.msk.f32.vlgmr.msra.gmra.mrb[12].mxu1 %vm284_vm2, %v510_v22 }
 0x25b   :  { %11541 = vmatprep.mubr.msk.f32.mxu1 %vm284_vm2, %v512_v30 }
 0x25d   :  { %v631_v33 = vpop.permute.xlu1 %630  ;;  %v13414_v36 = vpop.permute.xlu0 %13413 }
 0x25e   :  { %v13416_v37 = vunpack.i.h.bf16 %v13414_v36  ;;  %v13415_v38 = vunpack.i.l.bf16 %v13414_v36  ;;  %11542 = vmatmul.mubr.msk.f32.gmra.mrb[14].mxu1 %vm284_vm2, %v514_v31 }
 0x25f   :  { %11553 = vmatmul.mubr.msk.f32.vlgmr.msra.gmra.mrb[4].mxu0 %vm284_vm2, %v627_v28 }
 0x260   :  { %11555 = vmatprep.mubr.msk.f32.mxu0 %vm284_vm2, %v629_v32  ;;  %v12654_v39 = vpack.c.bf16 %v13416_v37, %v13415_v38 }
 0x261   :  { %v13409_v40 = vpop.permute.xlu1 %13408 }
 0x262   :  { %v13411_v41 = vunpack.i.h.bf16 %v13409_v40  ;;  %v13410_v43 = vunpack.i.l.bf16 %v13409_v40  ;;  %12655 = vmatprep.subr.bf16.mxu0 %v12654_v39 }
 0x263   :  { %11556 = vmatmul.mubr.msk.f32.gmra.mrb[6].mxu0 %vm284_vm2, %v631_v33 }
 0x264   :  { %12657 = vmatpush3.bf16.msra.mxu0 %v12654_v39  ;;  %v12646_v44 = vpack.c.bf16 %v13411_v41, %v13410_v43 }
 0x265   :  { %v13419_v45 = vpop.permute.xlu1 %13418 }
 0x266   :  { %v13421_v46 = vunpack.i.h.bf16 %v13419_v45  ;;  %v13420_v48 = vunpack.i.l.bf16 %v13419_v45  ;;  %12647 = vmatprep.subr.bf16.mxu1 %v12646_v44 }
 0x267   :  { %12649 = vmatpush3.bf16.msra.mxu1 %v12646_v44 }
 0x268   :  { %v12650_v49 = vpack.c.bf16 %v13421_v46, %v13420_v48 }
 0x269   :  { %v13424_v50 = vpop.permute.xlu1 %13423 }
 0x26a   :  { %v13426_v51 = vunpack.i.h.bf16 %v13424_v50  ;;  %v13425_v52 = vunpack.i.l.bf16 %v13424_v50  ;;  %12651 = vmatprep.subr.bf16.mxu1 %v12650_v49 }
 0x26b   :  { %12653 = vmatpush3.bf16.msra.mxu1 %v12650_v49 }
 0x26c   :  { %v12658_v53 = vpack.c.bf16 %v13426_v51, %v13425_v52 }
 0x26e   :  { %12659 = vmatprep.subr.bf16.mxu0 %v12658_v53 }
 0x26f   :  { %12661 = vmatpush3.bf16.msra.mxu0 %v12658_v53 }
 0x31d   :  { %v11512_v2 = vpop.f32.mrb[8].mxu1 }
 0x31e   :  { %v14577_v3 = vadd.f32 %v11512_v2, %v14574_v1  ;;  %v371_v4 = vpop.f32.mrb[9].mxu1 }
 0x31f   :  { %v14592_v16 = vadd.f32 %v371_v4, %v14583_v8 }
 0x320   :  { %v760_v6 = vsel %vm170_vm1, %v14577_v3, -inf }
 0x321   :  { %v11515_v9 = vpop.f32.mrb[10].mxu1  ;;  %v11526_v10 = vpop.f32.mrb[0].mxu0  ;;  %761 = vmax.xlane.f32.xlu1 %v760_v6  ;;  %v757_v23 = vsel %vm170_vm1, %v14592_v16, -inf }
 0x322   :  { %v14586_v12 = vadd.f32 %v11526_v10, %v14574_v1  ;;  %v381_v13 = vpop.f32.mrb[11].mxu1  ;;  %v488_v14 = vpop.f32.mrb[1].mxu0  ;;  %v14611_v27 = vadd.f32 %v11515_v9, %v14606_v24 }
 0x323   :  { %v14589_v15 = vadd.f32 %v381_v13, %v14581_v7  ;;  %v14602_v22 = vadd.f32 %v488_v14, %v14583_v8 }
 0x324   :  { %v772_v17 = vsel %vm170_vm1, %v14586_v12, -inf  ;;  %v766_v36 = vsel %vm170_vm1, %v14611_v27, -inf }
 0x325   :  { %v11529_v18 = vpop.f32.mrb[2].mxu0  ;;  %773 = vmax.xlane.f32.xlu0 %v772_v17  ;;  %v763_v19 = vsel %vm170_vm1, %v14589_v15, -inf  ;;  %v769_v28 = vsel %vm170_vm1, %v14602_v22, -inf }
 0x326   :  { %v498_v20 = vpop.f32.mrb[3].mxu0  ;;  %764 = vmax.xlane.f32.xlu1 %v763_v19  ;;  %v14619_v33 = vadd.f32 %v11529_v18, %v14606_v24 }
 0x327   :  { %v14599_v21 = vadd.f32 %v498_v20, %v14581_v7 }
 0x328   :  { %v778_v45 = vsel %vm170_vm1, %v14619_v33, -inf }
 0x329   :  { %758 = vmax.xlane.f32.xlu0 %v757_v23  ;;  %v775_v25 = vsel %vm170_vm1, %v14599_v21, -inf }
 0x32a   :  { %776 = vmax.xlane.f32.xlu1 %v775_v25 }
 0x32d   :  { %v11540_v30 = vpop.f32.mrb[12].mxu1  ;;  %770 = vmax.xlane.f32.xlu0 %v769_v28 }
 0x32e   :  { %v605_v31 = vpop.f32.mrb[13].mxu1  ;;  %v14626_v43 = vadd.f32 %v11540_v30, %v14574_v1 }
 0x32f   :  { %v14616_v32 = vadd.f32 %v605_v31, %v14583_v8 }
 0x330   :  { %v784_v52 = vsel %vm170_vm1, %v14626_v43, -inf }
 0x331   :  { %v11543_v37 = vpop.f32.mrb[14].mxu1  ;;  %767 = vmax.xlane.f32.xlu0 %v766_v36  ;;  %v781_v38 = vsel %vm170_vm1, %v14616_v32, -inf }
 0x332   :  { %v11554_v39 = vpop.f32.mrb[4].mxu0  ;;  %v615_v40 = vpop.f32.mrb[15].mxu1  ;;  %782 = vmax.xlane.f32.xlu1 %v781_v38  ;;  %v14649_v56 = vadd.f32 %v11543_v37, %v14606_v24 }
 0x333   :  { %v722_v41 = vpop.f32.mrb[5].mxu0  ;;  %v14634_v46 = vadd.f32 %v615_v40, %v14581_v7  ;;  %v14639_v51 = vadd.f32 %v11554_v39, %v14574_v1 }
 0x334   :  { %v14629_v44 = vadd.f32 %v722_v41, %v14583_v8  ;;  %v790_v60 = vsel %vm170_vm1, %v14649_v56, -inf }
 0x335   :  { %779 = vmax.xlane.f32.xlu0 %v778_v45  ;;  %v787_v55 = vsel %vm170_vm1, %v14634_v46, -inf  ;;  %v796_v57 = vsel %vm170_vm1, %v14639_v51, -inf }
 0x336   :  { %v11557_v48 = vpop.f32.mrb[6].mxu0  ;;  %v793_v49 = vsel %vm170_vm1, %v14629_v44, -inf }
 0x337   :  { %v732_v50 = vpop.f32.mrb[7].mxu0  ;;  %794 = vmax.xlane.f32.xlu1 %v793_v49  ;;  %v14656_v59 = vadd.f32 %v11557_v48, %v14606_v24 }
 0x338   :  { %v14644_v53 = vadd.f32 %v732_v50, %v14581_v7 }
 0x339   :  { %785 = vmax.xlane.f32.xlu0 %v784_v52  ;;  %v802_v61 = vsel %vm170_vm1, %v14656_v59, -inf }
 0x33a   :  { %v799_v58 = vsel %vm170_vm1, %v14644_v53, -inf }
 0x33b   :  { %788 = vmax.xlane.f32.xlu1 %v787_v55 }
 0x33d   :  { %797 = vmax.xlane.f32.xlu0 %v796_v57 }
 0x33f   :  { %800 = vmax.xlane.f32.xlu1 %v799_v58 }
 0x341   :  { %791 = vmax.xlane.f32.xlu0 %v790_v60 }
 0x345   :  { %803 = vmax.xlane.f32.xlu0 %v802_v61 }
 0x350   :  { %13433 = vrot.lane.b32.xlu1 %v14462_v42, %s14345_s16 }
 0x35b   :  { %13428 = vrot.lane.b32.xlu0 %v14462_v42, %s14346_s17 }
 0x3ae   :  { %v762_v62 = vpop.xlane.xlu1 %761 }
 0x3af   :  { %v806_v63 = vsub.f32 %v14577_v3, %v762_v62 }
 0x3b1   :  { %v823_v0 = vmul.f32 1.442695, %v806_v63 }
 0x3b2   :  { %v774_v2 = vpop.xlane.xlu0 %773 }
 0x3b3   :  { %13827 = vpow2.f32 %v823_v0  ;;  %v810_v4 = vsub.f32 %v14586_v12, %v774_v2  ;;  %v765_v5 = vpop.xlane.xlu1 %764 }
 0x3b4   :  { %v807_v11 = vsub.f32 %v14589_v15, %v765_v5 }
 0x3b5   :  { %v831_v6 = vmul.f32 1.442695, %v810_v4 }
 0x3b6   :  { %v759_v9 = vpop.xlane.xlu0 %758  ;;  %v825_v3 = vmul.f32 1.442695, %v807_v11 }
 0x3b7   :  { %13829 = vpow2.f32 %v831_v6  ;;  %v805_v10 = vsub.f32 %v14592_v16, %v759_v9  ;;  %v777_v14 = vpop.xlane.xlu1 %776 }
 0x3b8   :  { %v811_v19 = vsub.f32 %v14599_v21, %v777_v14 }
 0x3b9   :  { %v821_v13 = vmul.f32 1.442695, %v805_v10 }
 0x3ba   :  { %v771_v17 = vpop.xlane.xlu0 %770  ;;  %v833_v28 = vmul.f32 1.442695, %v811_v19 }
 0x3bb   :  { %13831 = vpow2.f32 %v821_v13  ;;  %v809_v42 = vsub.f32 %v14602_v22, %v771_v17 }
 0x3bd   :  { %v14671_v18 = vpop.eup %13827  ;;  %v829_v12 = vmul.f32 1.442695, %v809_v42 }
 0x3be   :  { %v768_v20 = vpop.xlane.xlu0 %767  ;;  %v856_v23 = vsel %vm170_vm1, %v14671_v18, 0.0 }
 0x3bf   :  { %13833 = vpow2.f32 %v829_v12  ;;  %v808_v16 = vsub.f32 %v14611_v27, %v768_v20  ;;  %857 = vadd.xlane.f32.xlu0 %v856_v23  ;;  %v783_v15 = vpop.xlane.xlu1 %782 }
 0x3c0   :  { %13835 = vpow2.f32 %v825_v3  ;;  %v813_v30 = vsub.f32 %v14616_v32, %v783_v15 }
 0x3c1   :  { %v14677_v25 = vpop.eup %13829  ;;  %v827_v22 = vmul.f32 1.442695, %v808_v16 }
 0x3c2   :  { %v780_v31 = vpop.xlane.xlu0 %779  ;;  %v868_v21 = vsel %vm170_vm1, %v14677_v25, 0.0  ;;  %v837_v27 = vmul.f32 1.442695, %v813_v30 }
 0x3c3   :  { %13837 = vpow2.f32 %v827_v22  ;;  %v812_v36 = vsub.f32 %v14619_v33, %v780_v31  ;;  %869 = vadd.xlane.f32.xlu0 %v868_v21 }
 0x3c4   :  { %v795_v37 = vpop.xlane.xlu1 %794  ;;  %13839 = vpow2.f32 %v833_v28 }
 0x3c5   :  { %v14683_v38 = vpop.eup %13831  ;;  %v835_v39 = vmul.f32 1.442695, %v812_v36  ;;  %v817_v40 = vsub.f32 %v14629_v44, %v795_v37 }
 0x3c6   :  { %v786_v41 = vpop.xlane.xlu0 %785  ;;  %v853_v32 = vsel %vm170_vm1, %v14683_v38, 0.0 }
 0x3c7   :  { %13841 = vpow2.f32 %v835_v39  ;;  %v814_v45 = vsub.f32 %v14626_v43, %v786_v41  ;;  %854 = vadd.xlane.f32.xlu1 %v853_v32  ;;  %v845_v52 = vmul.f32 1.442695, %v817_v40 }
 0x3c8   :  { %v789_v48 = vpop.xlane.xlu1 %788  ;;  %13843 = vpow2.f32 %v837_v27 }
 0x3c9   :  { %v14689_v49 = vpop.eup %13833  ;;  %v839_v33 = vmul.f32 1.442695, %v814_v45  ;;  %v815_v55 = vsub.f32 %v14634_v46, %v789_v48 }
 0x3ca   :  { %v14691_v50 = vpop.eup %13835  ;;  %v798_v57 = vpop.xlane.xlu0 %797  ;;  %v865_v44 = vsel %vm170_vm1, %v14689_v49, 0.0 }
 0x3cb   :  { %13845 = vpow2.f32 %v839_v33  ;;  %v818_v58 = vsub.f32 %v14639_v51, %v798_v57  ;;  %866 = vadd.xlane.f32.xlu1 %v865_v44  ;;  %v859_v62 = vsel %vm170_vm1, %v14691_v50, 0.0  ;;  %v841_v63 = vmul.f32 1.442695, %v815_v55 }
 0x3cc   :  { %v801_v43 = vpop.xlane.xlu1 %800  ;;  %13847 = vpow2.f32 %v845_v52 }
 0x3cd   :  { %v14697_v60 = vpop.eup %13837  ;;  %v847_v61 = vmul.f32 1.442695, %v818_v58  ;;  %v819_v0 = vsub.f32 %v14644_v53, %v801_v43 }
 0x3ce   :  { %v792_v46 = vpop.xlane.xlu0 %791  ;;  %v862_v2 = vsel %vm170_vm1, %v14697_v60, 0.0  ;;  %v14704_v4 = vpop.eup %13839 }
 0x3cf   :  { %13849 = vpow2.f32 %v847_v61  ;;  %v816_v51 = vsub.f32 %v14649_v56, %v792_v46  ;;  %863 = vadd.xlane.f32.xlu0 %v862_v2  ;;  %860 = vadd.xlane.f32.xlu1 %v859_v62  ;;  %v849_v13 = vmul.f32 1.442695, %v819_v0  ;;  %v871_v17 = vsel %vm170_vm1, %v14704_v4, 0.0 }
 0x3d0   :  { %v13434_v5 = vpop.permute.xlu1 %13433  ;;  %13851 = vpow2.f32 %v841_v63 }
 0x3d1   :  { %v14707_v6 = vpop.eup %13841  ;;  %v843_v9 = vmul.f32 1.442695, %v816_v51  ;;  %v13436_v10 = vunpack.i.h.bf16 %v13434_v5  ;;  %v13435_v11 = vunpack.i.l.bf16 %v13434_v5 }
 0x3d2   :  { %v804_v53 = vpop.xlane.xlu0 %803  ;;  %v874_v14 = vsel %vm170_vm1, %v14707_v6, 0.0  ;;  %v14713_v42 = vpop.eup %13843 }
 0x3d3   :  { %13853 = vpow2.f32 %v843_v9  ;;  %v820_v56 = vsub.f32 %v14656_v59, %v804_v53  ;;  %875 = vadd.xlane.f32.xlu0 %v874_v14  ;;  %872 = vadd.xlane.f32.xlu1 %v871_v17  ;;  %v14716_v3 = vpack.c.bf16 %v13436_v10, %v13435_v11  ;;  %v877_v16 = vsel %vm170_vm1, %v14713_v42, 0.0 }
 0x3d4   :  { %13855 = vpow2.f32 %v849_v13 }
 0x3d5   :  { %v14718_v19 = vpop.eup %13845  ;;  %v851_v12 = vmul.f32 1.442695, %v820_v56  ;;  %12671 = vmatprep.subr.bf16.mxu0 %v14716_v3 }
 0x3d6   :  { %v13429_v20 = vpop.permute.xlu0 %13428  ;;  %v880_v23 = vsel %vm170_vm1, %v14718_v19, 0.0  ;;  %v14725_v28 = vpop.eup %13847 }
 0x3d7   :  { %13857 = vpow2.f32 %v851_v12  ;;  %v13431_v15 = vunpack.i.h.bf16 %v13429_v20  ;;  %v13430_v59 = vunpack.i.l.bf16 %v13429_v20  ;;  %881 = vadd.xlane.f32.xlu0 %v880_v23  ;;  %878 = vadd.xlane.f32.xlu1 %v877_v16  ;;  %v889_v21 = vsel %vm170_vm1, %v14725_v28, 0.0 }
 0x3d9   :  { %v14727_v22 = vpop.eup %13849  ;;  %v12662_v30 = vpack.c.bf16 %v13431_v15, %v13430_v59 }
 0x3da   :  { %v892_v31 = vsel %vm170_vm1, %v14727_v22, 0.0  ;;  %v14733_v36 = vpop.eup %13851 }
 0x3db   :  { %12663 = vmatprep.subr.bf16.mxu1 %v12662_v30  ;;  %893 = vadd.xlane.f32.xlu0 %v892_v31  ;;  %v883_v39 = vsel %vm170_vm1, %v14733_v36, 0.0 }
 0x3dc   :  { %890 = vadd.xlane.f32.xlu1 %v889_v21 }
 0x3dd   :  { %v14735_v37 = vpop.eup %13853 }
 0x3de   :  { %v886_v27 = vsel %vm170_vm1, %v14735_v37, 0.0  ;;  %v14741_v40 = vpop.eup %13855 }
 0x3df   :  { %887 = vadd.xlane.f32.xlu0 %v886_v27  ;;  %v895_v45 = vsel %vm170_vm1, %v14741_v40, 0.0 }
 0x3e0   :  { %884 = vadd.xlane.f32.xlu1 %v883_v39 }
 0x3e1   :  { %v14743_v41 = vpop.eup %13857 }
 0x3e2   :  { %v898_v32 = vsel %vm170_vm1, %v14743_v41, 0.0 }
 0x3e3   :  { %899 = vadd.xlane.f32.xlu0 %v898_v32 }
 0x3e4   :  { %896 = vadd.xlane.f32.xlu1 %v895_v45 }
 0x3f5   :  { %13443 = vrot.lane.b32.xlu1 %v14467_v47, %s14345_s16 }
 0x3f9   :  { %13438 = vrot.lane.b32.xlu0 %v14467_v47, %s14346_s17 }
 0x44c   :  { %v858_v48 = vpop.xlane.xlu0 %857 }
 0x44d   :  { %13859 = vrcp.f32 %v858_v48 }
 0x450   :  { %v870_v52 = vpop.xlane.xlu0 %869 }
 0x454   :  { %v855_v33 = vpop.xlane.xlu1 %854 }
 0x455   :  { %13861 = vrcp.f32 %v855_v33 }
 0x456   :  { %13863 = vrcp.f32 %v870_v52 }
 0x457   :  { %v13860_v58 = vpop.eup %13859 }
 0x458   :  { %v867_v55 = vpop.xlane.xlu1 %866  ;;  %v904_v47 = vmul.f32 %v13860_v58, %v14671_v18  ;;  %v1432_v58 = vld [vmem:[%s17433_s2 + $0x58] sm:$0xff] }
 0x459   :  { %13865 = vrcp.f32 %v867_v55 }
 0x45c   :  { %v864_v57 = vpop.xlane.xlu0 %863  ;;  %v861_v44 = vpop.xlane.xlu1 %860 }
 0x45d   :  { %13867 = vrcp.f32 %v864_v57 }
 0x45e   :  { %13869 = vrcp.f32 %v861_v44 }
 0x45f   :  { %v13862_v43 = vpop.eup %13861 }
 0x460   :  { %v876_v61 = vpop.xlane.xlu0 %875  ;;  %v873_v62 = vpop.xlane.xlu1 %872  ;;  %v902_v63 = vmul.f32 %v13862_v43, %v14683_v38 }
 0x461   :  { %13871 = vrcp.f32 %v876_v61  ;;  %v13864_v0 = vpop.eup %13863 }
 0x462   :  { %13873 = vrcp.f32 %v873_v62  ;;  %11566 = vmatprep.mubr.msk.f32.mxu1 %vm170_vm1, %v902_v63  ;;  %v912_v9 = vmul.f32 %v13864_v0, %v14677_v25  ;;  %v1433_v0 = vld [vmem:[%s17433_s2 + $0x60] sm:$0xff] }
 0x463   :  { %v13866_v46 = vpop.eup %13865  ;;  %11567 = vmatmul.mubr.msk.f32.vlgmr.msra.gmra.mrb[16].mxu1 %vm170_vm1, %v904_v47 }
 0x464   :  { %12665 = vmatpush3.bf16.msra.mxu1 %v12662_v30  ;;  %v882_v2 = vpop.xlane.xlu0 %881  ;;  %v879_v51 = vpop.xlane.xlu1 %878  ;;  %v910_v5 = vmul.f32 %v13866_v46, %v14689_v49  ;;  %v1434_v46 = vld [vmem:[%s17433_s2 + $0x68] sm:$0xff] }
 0x465   :  { %13875 = vrcp.f32 %v879_v51 }
 0x466   :  { %11580 = vmatprep.mubr.msk.f32.mxu0 %vm170_vm1, %v910_v5 }
 0x467   :  { %v13868_v38 = vpop.eup %13867  ;;  %11581 = vmatmul.mubr.msk.f32.vlgmr.msra.gmra.mrb[8].mxu0 %vm170_vm1, %v912_v9 }
 0x468   :  { %v13870_v18 = vpop.eup %13869  ;;  %12673 = vmatpush3.bf16.msra.mxu0 %v14716_v3  ;;  %v894_v10 = vpop.xlane.xlu0 %893  ;;  %v908_v11 = vmul.f32 %v13868_v38, %v14697_v60 }
 0x469   :  { %v891_v13 = vpop.xlane.xlu1 %890  ;;  %v906_v53 = vmul.f32 %v13870_v18, %v14691_v50 }
 0x46a   :  { %13877 = vrcp.f32 %v891_v13 }
 0x46b   :  { %v13872_v14 = vpop.eup %13871  ;;  %11569 = vmatprep.mubr.msk.f32.mxu1 %vm170_vm1, %v906_v53  ;;  %13879 = vrcp.f32 %v882_v2  ;;  %v12682_v2 = vpack.c.bf16 %v1434_v46, %v1433_v0 }
 0x46c   :  { %v13874_v25 = vpop.eup %13873  ;;  %11570 = vmatmul.mubr.msk.f32.gmra.mrb[18].mxu1 %vm170_vm1, %v908_v11  ;;  %v888_v49 = vpop.xlane.xlu0 %887  ;;  %v916_v17 = vmul.f32 %v13872_v14, %v14707_v6  ;;  %13881 = vrcp.f32 %v894_v10 }
 0x46d   :  { %v885_v56 = vpop.xlane.xlu1 %884  ;;  %v914_v3 = vmul.f32 %v13874_v25, %v14704_v4 }
 0x46e   :  { %13883 = vrcp.f32 %v885_v56 }
 0x46f   :  { %11583 = vmatprep.mubr.msk.f32.mxu0 %vm170_vm1, %v914_v3  ;;  %v13876_v60 = vpop.eup %13875  ;;  %13885 = vrcp.f32 %v888_v49 }
 0x470   :  { %11584 = vmatmul.mubr.msk.f32.gmra.mrb[10].mxu0 %vm170_vm1, %v916_v17  ;;  %v900_v50 = vpop.xlane.xlu0 %899  ;;  %v918_v20 = vmul.f32 %v13876_v60, %v14713_v42 }
 0x471   :  { %v897_v12 = vpop.xlane.xlu1 %896 }
 0x472   :  { %13887 = vrcp.f32 %v897_v12  ;;  %11594 = vmatprep.mubr.msk.f32.mxu1 %vm170_vm1, %v918_v20 }
 0x473   :  { %13889 = vrcp.f32 %v900_v50 }
 0x474   :  { %v13878_v6 = vpop.eup %13877  ;;  %v13439_v23 = vpop.permute.xlu0 %13438 }
 0x475   :  { %v13441_v16 = vunpack.i.h.bf16 %v13439_v23  ;;  %v13440_v4 = vunpack.i.l.bf16 %v13439_v23  ;;  %v13444_v15 = vpop.permute.xlu1 %13443  ;;  %v926_v59 = vmul.f32 %v13878_v6, %v14725_v28  ;;  %v13880_v21 = vpop.eup %13879 }
 0x476   :  { %v13446_v30 = vunpack.i.h.bf16 %v13444_v15  ;;  %v13445_v31 = vunpack.i.l.bf16 %v13444_v15  ;;  %v13882_v39 = vpop.eup %13881  ;;  %v920_v48 = vmul.f32 %v13880_v21, %v14718_v19 }
 0x477   :  { %11608 = vmatprep.mubr.msk.f32.mxu0 %vm170_vm1, %v926_v59  ;;  %v12666_v27 = vpack.c.bf16 %v13441_v16, %v13440_v4  ;;  %v928_v52 = vmul.f32 %v13882_v39, %v14727_v22 }
 0x478   :  { %v12674_v32 = vpack.c.bf16 %v13446_v30, %v13445_v31  ;;  %v13884_v42 = vpop.eup %13883 }
 0x479   :  { %12667 = vmatprep.subr.bf16.mxu1 %v12666_v27  ;;  %v13886_v45 = vpop.eup %13885  ;;  %v922_v28 = vmul.f32 %v13884_v42, %v14733_v36 }
 0x47a   :  { %12675 = vmatprep.subr.bf16.mxu0 %v12674_v32  ;;  %12669 = vmatpush3.bf16.msra.mxu1 %v12666_v27  ;;  %v924_v44 = vmul.f32 %v13886_v45, %v14735_v37  ;;  %v10490_v45 = vld [vmem:[%s17434_s3 + $0x2] ss:$0 sm:$0xff] }
 0x47b   :  { %12677 = vmatpush3.bf16.msra.mxu0 %v12674_v32 }
 0x47c   :  { %v13888_v33 = vpop.eup %13887 }
 0x47d   :  { %v13890_v55 = vpop.eup %13889  ;;  %11595 = vmatmul.mubr.msk.f32.vlgmr.msra.gmra.mrb[20].mxu1 %vm170_vm1, %v920_v48  ;;  %v930_v57 = vmul.f32 %v13888_v33, %v14741_v40  ;;  %v1431_v40 = vld [vmem:[%s17433_s2 + $0x50] sm:$0xff] }
 0x47e   :  { %11609 = vmatmul.mubr.msk.f32.vlgmr.msra.gmra.mrb[12].mxu0 %vm170_vm1, %v928_v52  ;;  %11597 = vmatprep.mubr.msk.f32.mxu1 %vm170_vm1, %v922_v28  ;;  %v932_v19 = vmul.f32 %v13890_v55, %v14743_v41  ;;  %v12678_v43 = vpack.c.bf16 %v1432_v58, %v1431_v40 }
 0x47f   :  { %11611 = vmatprep.mubr.msk.f32.mxu0 %vm170_vm1, %v930_v57 }
 0x480   :  { %12679 = vmatprep.subr.bf16.mxu1 %v12678_v43 }
 0x481   :  { %11598 = vmatmul.mubr.msk.f32.gmra.mrb[22].mxu1 %vm170_vm1, %v924_v44 }
 0x482   :  { %11612 = vmatmul.mubr.msk.f32.gmra.mrb[14].mxu0 %vm170_vm1, %v932_v19  ;;  %12681 = vmatpush3.bf16.msra.mxu1 %v12678_v43 }
 0x483   :  { %12683 = vmatprep.subr.bf16.mxu1 %v12682_v2 }
 0x486   :  { %12685 = vmatpush3.bf16.msra.mxu1 %v12682_v2 }
 0x536   :  { %v11568_v22 = vpop.f32.mrb[16].mxu1 }
 0x537   :  { %v1023_v36 = vpop.f32.mrb[17].mxu1 }
 0x53a   :  { %v11582_v61 = vpop.f32.mrb[8].mxu0 }
 0x53b   :  { %1375 = vrot.lane.b32.xlu1 %v11582_v61, %s14347_s22  ;;  %v1132_v37 = vpop.f32.mrb[9].mxu0 }
 0x53c   :  { %1373 = vrot.lane.b32.xlu0 %v1132_v37, %s14347_s22 }
 0x53f   :  { %v11571_v41 = vpop.f32.mrb[18].mxu1 }
 0x540   :  { %v1033_v62 = vpop.f32.mrb[19].mxu1 }
 0x543   :  { %v11585_v63 = vpop.f32.mrb[10].mxu0 }
 0x544   :  { %1379 = vrot.lane.b32.xlu1 %v11585_v63, %s14347_s22  ;;  %v1142_v47 = vpop.f32.mrb[11].mxu0 }
 0x545   :  { %1377 = vrot.lane.b32.xlu0 %v1142_v47, %s14347_s22 }
 0x550   :  { %v11596_v51 = vpop.f32.mrb[20].mxu1 }
 0x551   :  { %v11610_v5 = vpop.f32.mrb[12].mxu0  ;;  %1391 = vrot.lane.b32.xlu1 %v11596_v51, %s14348_s26  ;;  %v1241_v9 = vpop.f32.mrb[21].mxu1 }
 0x552   :  { %v1350_v38 = vpop.f32.mrb[13].mxu0  ;;  %1389 = vrot.lane.b32.xlu0 %v1241_v9, %s14348_s26 }
 0x554   :  { %v11599_v18 = vpop.f32.mrb[22].mxu1 }
 0x555   :  { %v11613_v10 = vpop.f32.mrb[14].mxu0  ;;  %v1251_v11 = vpop.f32.mrb[23].mxu1  ;;  %1407 = vrot.lane.b32.xlu1 %v11610_v5, %s14349_s27 }
 0x556   :  { %v1360_v13 = vpop.f32.mrb[15].mxu0  ;;  %1405 = vrot.lane.b32.xlu0 %v1350_v38, %s14349_s27 }
 0x559   :  { %1395 = vrot.lane.b32.xlu1 %v11599_v18, %s14348_s26 }
 0x55a   :  { %1393 = vrot.lane.b32.xlu0 %v1251_v11, %s14348_s26 }
 0x55d   :  { %1411 = vrot.lane.b32.xlu1 %v11613_v10, %s14349_s27 }
 0x55e   :  { %1409 = vrot.lane.b32.xlu0 %v1360_v13, %s14349_s27 }
 0x5ad   :  { %v1376_v53 = vpop.permute.xlu1 %1375 }
 0x5ae   :  { %v1374_v14 = vpop.permute.xlu0 %1373  ;;  %v1418_v50 = vsel %vm284_vm2, %v11568_v22, %v1376_v53 }
 0x5af   :  { %v1417_v3 = vsel %vm284_vm2, %v1023_v36, %v1374_v14 }
 0x5b6   :  { %v1380_v25 = vpop.permute.xlu1 %1379 }
 0x5b7   :  { %v1378_v49 = vpop.permute.xlu0 %1377  ;;  %v1420_v31 = vsel %vm284_vm2, %v11571_v41, %v1380_v25  ;;  %v1612_v25 = vld [vmem:[%s17433_s2 + $0x70] sm:$0xff] }
 0x5b8   :  { %v1419_v59 = vsel %vm284_vm2, %v1033_v62, %v1378_v49  ;;  %v1613_v49 = vld [vmem:[%s17433_s2 + $0x78] sm:$0xff] }
 0x5c3   :  { %v1392_v17 = vpop.permute.xlu1 %1391 }
 0x5c4   :  { %v1390_v56 = vpop.permute.xlu0 %1389  ;;  %v1423_v6 = vsel %vm1421_vm8, %v1418_v50, %v1392_v17  ;;  %v12686_v17 = vpack.c.bf16 %v1613_v49, %v1612_v25  ;;  %v1722_v50 = vld [vmem:[%s17433_s2 + $0x90] sm:$0xff]  ;;  %v1736_v25 = vld [vmem:[%s17433_s2 + $0x100] sm:$0xff]  ;;  %v1737_v49 = vld [vmem:[%s17433_s2 + $0x108] sm:$0xff] }
 0x5c5   :  { %v1422_v12 = vsel %vm1421_vm8, %v1417_v3, %v1390_v56  ;;  %v1614_v56 = vld [vmem:[%s17433_s2 + $0x80] sm:$0xff]  ;;  %v1615_v3 = vld [vmem:[%s17433_s2 + $0x88] sm:$0xff] }
 0x5c6   :  { %12687 = vmatprep.subr.bf16.mxu0 %v12686_v17 }
 0x5c7   :  { %v1408_v60 = vpop.permute.xlu1 %1407  ;;  %12689 = vmatpush3.bf16.msra.mxu0 %v12686_v17 }
 0x5c8   :  { %v1406_v20 = vpop.permute.xlu0 %1405  ;;  %v1428_v16 = vsel %vm1426_vm9, %v1423_v6, %v1408_v60  ;;  %v12690_v60 = vpack.c.bf16 %v1615_v3, %v1614_v56 }
 0x5c9   :  { %v1427_v23 = vsel %vm1426_vm9, %v1422_v12, %v1406_v20  ;;  %v1723_v12 = vld [vmem:[%s17433_s2 + $0x98] sm:$0xff]  ;;  %v1724_v20 = vld [vmem:[%s17433_s2 + $0xa0] sm:$0xff] }
 0x5ca   :  { %11622 = vmatprep.mubr.msk.f32.mxu1 %vm170_vm1, %v1427_v23  ;;  %12691 = vmatprep.subr.bf16.mxu0 %v12690_v60  ;;  %v12694_v6 = vpack.c.bf16 %v1723_v12, %v1722_v50  ;;  %v1725_v23 = vld [vmem:[%s17433_s2 + $0xa8] sm:$0xff] }
 0x5cb   :  { %v1396_v4 = vpop.permute.xlu1 %1395  ;;  %11623 = vmatmul.mubr.msk.f32.vlgmr.msra.gmra.mrb[24].mxu1 %vm170_vm1, %v1428_v16  ;;  %12693 = vmatpush3.bf16.msra.mxu0 %v12690_v60  ;;  %v12698_v16 = vpack.c.bf16 %v1725_v23, %v1724_v20 }
 0x5cc   :  { %v1394_v15 = vpop.permute.xlu0 %1393  ;;  %v1425_v39 = vsel %vm1421_vm8, %v1420_v31, %v1396_v4  ;;  %v1726_v4 = vld [vmem:[%s17433_s2 + $0xb0] sm:$0xff]  ;;  %12695 = vmatprep.subr.bf16.mxu1 %v12694_v6  ;;  %v1729_v31 = vld [vmem:[%s17433_s2 + $0xc8] sm:$0xff] }
 0x5cd   :  { %v1424_v21 = vsel %vm1421_vm8, %v1419_v59, %v1394_v15  ;;  %v1727_v15 = vld [vmem:[%s17433_s2 + $0xb8] sm:$0xff]  ;;  %12697 = vmatpush3.bf16.msra.mxu1 %v12694_v6 }
 0x5ce   :  { %12699 = vmatprep.subr.bf16.mxu1 %v12698_v16  ;;  %v12702_v59 = vpack.c.bf16 %v1727_v15, %v1726_v4 }
 0x5cf   :  { %v1412_v30 = vpop.permute.xlu1 %1411 }
 0x5d0   :  { %v1410_v27 = vpop.permute.xlu0 %1409  ;;  %v1430_v42 = vsel %vm1426_vm9, %v1425_v39, %v1412_v30  ;;  %v1728_v30 = vld [vmem:[%s17433_s2 + $0xc0] sm:$0xff]  ;;  %v1731_v39 = vld [vmem:[%s17433_s2 + $0xd8] sm:$0xff] }
 0x5d1   :  { %v1429_v32 = vsel %vm1426_vm9, %v1424_v21, %v1410_v27  ;;  %12701 = vmatpush3.bf16.msra.mxu1 %v12698_v16  ;;  %v12706_v21 = vpack.c.bf16 %v1729_v31, %v1728_v30  ;;  %v1730_v27 = vld [vmem:[%s17433_s2 + $0xd0] sm:$0xff] }
 0x5d2   :  { %11625 = vmatprep.mubr.msk.f32.mxu1 %vm170_vm1, %v1429_v32  ;;  %12703 = vmatprep.subr.bf16.mxu1 %v12702_v59  ;;  %v12710_v32 = vpack.c.bf16 %v1731_v39, %v1730_v27 }
 0x5d3   :  { %11626 = vmatmul.mubr.msk.f32.gmra.mrb[26].mxu1 %vm170_vm1, %v1430_v42  ;;  %v1732_v42 = vld [vmem:[%s17433_s2 + $0xe0] sm:$0xff] }
 0x5d5   :  { %12705 = vmatpush3.bf16.msra.mxu1 %v12702_v59  ;;  %v10502_v59 = vld [vmem:[%s17434_s3 + $0x4] ss:$0 sm:$0xff] }
 0x5d6   :  { %12707 = vmatprep.subr.bf16.mxu1 %v12706_v21 }
 0x5d9   :  { %12709 = vmatpush3.bf16.msra.mxu1 %v12706_v21 }
 0x5da   :  { %12711 = vmatprep.subr.bf16.mxu1 %v12710_v32 }
 0x5dd   :  { %12713 = vmatpush3.bf16.msra.mxu1 %v12710_v32 }
 0x69e   :  { %v11624_v48 = vpop.f32.mrb[24].mxu1 }
 0x69f   :  { %v1524_v33 = vadd.f32 %v11624_v48, %v10490_v45  ;;  %v1518_v52 = vpop.f32.mrb[25].mxu1 }
 0x6a0   :  { %v1519_v28 = vadd.f32 %v10490_v45, %v1518_v52  ;;  %v1735_v52 = vld [vmem:[%s17433_s2 + $0xf8] sm:$0xff] }
 0x6a1   :  { %v1538_v55 = vadd.f32 %v1524_v33, %v14442_v29  ;;  %v1734_v33 = vld [vmem:[%s17433_s2 + $0xf0] sm:$0xff] }
 0x6a2   :  { %v1537_v57 = vadd.f32 %v1519_v28, %v14437_v26  ;;  %v12718_v28 = vpack.c.bf16 %v1735_v52, %v1734_v33 }
 0x6a3   :  { %v1544_v44 = vsel %vm170_vm1, %v1538_v55, 0.0 }
 0x6a4   :  { %1545 = vadd.xlane.f32.xlu1 %v1544_v44  ;;  %v1541_v19 = vsel %vm170_vm1, %v1537_v57, 0.0 }
 0x6a5   :  { %1542 = vadd.xlane.f32.xlu0 %v1541_v19 }
 0x6a6   :  { %v11627_v22 = vpop.f32.mrb[26].mxu1 }
 0x6a7   :  { %v1528_v36 = vpop.f32.mrb[27].mxu1  ;;  %v1534_v40 = vadd.f32 %v11627_v22, %v10490_v45 }
 0x6a8   :  { %v1529_v58 = vadd.f32 %v10490_v45, %v1528_v36  ;;  %v1733_v45 = vld [vmem:[%s17433_s2 + $0xe8] sm:$0xff] }
 0x6a9   :  { %v1540_v37 = vadd.f32 %v1534_v40, %v14449_v34  ;;  %v12714_v48 = vpack.c.bf16 %v1733_v45, %v1732_v42 }
 0x6aa   :  { %v1539_v43 = vadd.f32 %v1529_v58, %v14453_v35 }
 0x6ab   :  { %v1550_v29 = vsel %vm170_vm1, %v1540_v37, 0.0  ;;  %12715 = vmatprep.subr.bf16.mxu1 %v12714_v48 }
 0x6ac   :  { %v1547_v61 = vsel %vm170_vm1, %v1539_v43, 0.0  ;;  %12717 = vmatpush3.bf16.msra.mxu1 %v12714_v48 }
 0x6ad   :  { %1548 = vadd.xlane.f32.xlu0 %v1547_v61  ;;  %12719 = vmatprep.subr.bf16.mxu1 %v12718_v28 }
 0x6b0   :  { %12721 = vmatpush3.bf16.msra.mxu1 %v12718_v28 }
 0x6b1   :  { %1551 = vadd.xlane.f32.xlu0 %v1550_v29 }
 0x731   :  { %v1546_v26 = vpop.xlane.xlu1 %1545 }
 0x732   :  { %v1555_v41 = vmul.f32 0.03125, %v1546_v26  ;;  %v1543_v62 = vpop.xlane.xlu0 %1542  ;;  %v10495_v26 = vld [vmem:[%s17434_s3 + $0x5] ss:$0 sm:$0xff] }
 0x733   :  { %v1554_v63 = vmul.f32 0.03125, %v1543_v62 }
 0x734   :  { %v14837_v47 = vsub.f32 %v1538_v55, %v1555_v41 }
 0x735   :  { %v14839_v0 = vsub.f32 %v1537_v57, %v1554_v63 }
 0x736   :  { %v1563_v46 = vmul.f32 %v14837_v47, %v14837_v47 }
 0x737   :  { %v1562_v35 = vmul.f32 %v14839_v0, %v14839_v0 }
 0x738   :  { %v1569_v34 = vsel %vm170_vm1, %v1563_v46, 0.0 }
 0x739   :  { %1570 = vadd.xlane.f32.xlu0 %v1569_v34  ;;  %v1566_v2 = vsel %vm170_vm1, %v1562_v35, 0.0  ;;  %v10496_v34 = vld [vmem:[%s17434_s3 + $0x6] ss:$0 sm:$0xff] }
 0x73a   :  { %1567 = vadd.xlane.f32.xlu1 %v1566_v2  ;;  %v1549_v51 = vpop.xlane.xlu0 %1548 }
 0x73b   :  { %v1556_v5 = vmul.f32 0.03125, %v1549_v51 }
 0x73d   :  { %v14847_v9 = vsub.f32 %v1539_v43, %v1556_v5 }
 0x73e   :  { %v1552_v38 = vpop.xlane.xlu0 %1551 }
 0x73f   :  { %v1557_v18 = vmul.f32 0.03125, %v1552_v38  ;;  %v1564_v10 = vmul.f32 %v14847_v9, %v14847_v9 }
 0x741   :  { %v14851_v11 = vsub.f32 %v1540_v37, %v1557_v18  ;;  %v1572_v13 = vsel %vm170_vm1, %v1564_v10, 0.0 }
 0x742   :  { %1573 = vadd.xlane.f32.xlu1 %v1572_v13 }
 0x743   :  { %v1565_v53 = vmul.f32 %v14851_v11, %v14851_v11 }
 0x745   :  { %v1575_v14 = vsel %vm170_vm1, %v1565_v53, 0.0 }
 0x746   :  { %1576 = vadd.xlane.f32.xlu0 %v1575_v14 }
 0x7c6   :  { %v1571_v55 = vpop.xlane.xlu0 %1570 }
 0x7c7   :  { %v1579_v57 = vmul.f32 0.03125, %v1571_v55  ;;  %v1568_v44 = vpop.xlane.xlu1 %1567 }
 0x7c8   :  { %v1578_v19 = vmul.f32 0.03125, %v1568_v44 }
 0x7c9   :  { %v1583_v22 = vadd.f32 1e-05, %v1579_v57 }
 0x7ca   :  { %v1582_v36 = vadd.f32 1e-05, %v1578_v19 }
 0x7cb   :  { %13891 = vrsqrt.f32 %v1583_v22 }
 0x7cc   :  { %13893 = vrsqrt.f32 %v1582_v36 }
 0x7cf   :  { %v1574_v40 = vpop.xlane.xlu1 %1573 }
 0x7d0   :  { %v1580_v58 = vmul.f32 0.03125, %v1574_v40 }
 0x7d2   :  { %v1584_v43 = vadd.f32 1e-05, %v1580_v58 }
 0x7d3   :  { %v1577_v61 = vpop.xlane.xlu0 %1576 }
 0x7d4   :  { %13895 = vrsqrt.f32 %v1584_v43  ;;  %v1581_v37 = vmul.f32 0.03125, %v1577_v61 }
 0x7d5   :  { %v13892_v29 = vpop.eup %13891 }
 0x7d6   :  { %v13894_v41 = vpop.eup %13893  ;;  %v1591_v62 = vmul.f32 %v13892_v29, %v14837_v47  ;;  %v1585_v63 = vadd.f32 1e-05, %v1581_v37 }
 0x7d7   :  { %v1590_v46 = vmul.f32 %v13894_v41, %v14839_v0 }
 0x7d8   :  { %13897 = vrsqrt.f32 %v1585_v63  ;;  %v1600_v35 = vmul.f32 %v10495_v26, %v1591_v62 }
 0x7d9   :  { %v1599_v2 = vmul.f32 %v10495_v26, %v1590_v46 }
 0x7da   :  { %v1609_v5 = vadd.f32 %v10496_v34, %v1600_v35 }
 0x7db   :  { %v1608_v51 = vadd.f32 %v10496_v34, %v1599_v2 }
 0x7dd   :  { %11636 = vmatprep.mubr.msk.f32.mxu0 %vm170_vm1, %v1608_v51 }
 0x7de   :  { %v13896_v38 = vpop.eup %13895  ;;  %11637 = vmatmul.mubr.msk.f32.vlgmr.msra.gmra.mrb[16].mxu0 %vm170_vm1, %v1609_v5 }
 0x7df   :  { %v1592_v18 = vmul.f32 %v13896_v38, %v14847_v9  ;;  %v12722_v9 = vpack.c.bf16 %v1737_v49, %v1736_v25 }
 0x7e1   :  { %v1601_v47 = vmul.f32 %v10495_v26, %v1592_v18  ;;  %12723 = vmatprep.subr.bf16.mxu1 %v12722_v9 }
 0x7e2   :  { %v13898_v10 = vpop.eup %13897  ;;  %12725 = vmatpush3.bf16.msra.mxu1 %v12722_v9 }
 0x7e3   :  { %v1610_v13 = vadd.f32 %v10496_v34, %v1601_v47  ;;  %v1593_v0 = vmul.f32 %v13898_v10, %v14851_v11  ;;  %v10497_v11 = vld [vmem:[%s17434_s3 + $0x3] ss:$0 sm:$0xff]  ;;  %v1902_v47 = vld [vmem:[%s17433_s2 + $0x110] sm:$0xff]  ;;  %v1903_v10 = vld [vmem:[%s17433_s2 + $0x118] sm:$0xff] }
 0x7e5   :  { %11639 = vmatprep.mubr.msk.f32.mxu0 %vm170_vm1, %v1610_v13  ;;  %v1602_v53 = vmul.f32 %v10495_v26, %v1593_v0  ;;  %v1904_v0 = vld [vmem:[%s17433_s2 + $0x120] sm:$0xff] }
 0x7e7   :  { %v1611_v14 = vadd.f32 %v10496_v34, %v1602_v53  ;;  %v1905_v53 = vld [vmem:[%s17433_s2 + $0x128] sm:$0xff] }
 0x7e9   :  { %11640 = vmatmul.mubr.msk.f32.gmra.mrb[18].mxu0 %vm170_vm1, %v1611_v14 }
 0x8b1   :  { %v11638_v17 = vpop.f32.mrb[16].mxu0 }
 0x8b2   :  { %v1705_v56 = vadd.f32 %v11638_v17, %v10497_v11  ;;  %v1699_v3 = vpop.f32.mrb[17].mxu0 }
 0x8b3   :  { %v1700_v60 = vadd.f32 %v10497_v11, %v1699_v3 }
 0x8b4   :  { %v1719_v12 = vmax.f32 %v1705_v56, 0.0 }
 0x8b5   :  { %v1718_v50 = vmax.f32 %v1700_v60, 0.0 }
 0x8b7   :  { %11674 = vmatprep.mubr.f32.mxu1 %v1718_v50 }
 0x8b8   :  { %11675 = vmatmul.mubr.f32.vlgmr.msra.gmra.mrb[28].mxu1 %v1719_v12 }
 0x8bc   :  { %v11641_v20 = vpop.f32.mrb[18].mxu0 }
 0x8bd   :  { %v1715_v6 = vadd.f32 %v11641_v20, %v10497_v11  ;;  %v1709_v23 = vpop.f32.mrb[19].mxu0 }
 0x8be   :  { %v1710_v16 = vadd.f32 %v10497_v11, %v1709_v23 }
 0x8bf   :  { %v1721_v15 = vmax.f32 %v1715_v6, 0.0 }
 0x8c0   :  { %v1720_v4 = vmax.f32 %v1710_v16, 0.0  ;;  %v10503_v16 = vld [vmem:[%s17434_s3 + $0x7] ss:$0 sm:$0xff] }
 0x8c2   :  { %11677 = vmatprep.mubr.f32.mxu1 %v1720_v4 }
 0x8c3   :  { %11678 = vmatmul.mubr.f32.gmra.mrb[30].mxu1 %v1721_v15 }
 0x98b   :  { %v11676_v30 = vpop.f32.mrb[28].mxu1 }
 0x98c   :  { %v1815_v31 = vadd.f32 %v11676_v30, %v10502_v59  ;;  %v1809_v21 = vpop.f32.mrb[29].mxu1 }
 0x98d   :  { %v1810_v27 = vadd.f32 %v10502_v59, %v1809_v21 }
 0x98e   :  { %v1829_v39 = vadd.f32 %v1815_v31, %v1609_v5  ;;  %v10504_v31 = vld [vmem:[%s17434_s3 + $0x8] ss:$0 sm:$0xff] }
 0x98f   :  { %v1828_v32 = vadd.f32 %v1810_v27, %v1608_v51 }
 0x990   :  { %v1835_v42 = vsel %vm170_vm1, %v1829_v39, 0.0 }
 0x991   :  { %1836 = vadd.xlane.f32.xlu0 %v1835_v42  ;;  %v1832_v45 = vsel %vm170_vm1, %v1828_v32, 0.0 }
 0x992   :  { %1833 = vadd.xlane.f32.xlu1 %v1832_v45 }
 0x996   :  { %v11679_v48 = vpop.f32.mrb[30].mxu1 }
 0x997   :  { %v1825_v33 = vadd.f32 %v11679_v48, %v10502_v59  ;;  %v1819_v52 = vpop.f32.mrb[31].mxu1 }
 0x998   :  { %v1820_v28 = vadd.f32 %v10502_v59, %v1819_v52 }
 0x999   :  { %v1831_v55 = vadd.f32 %v1825_v33, %v1611_v14  ;;  %v12730_v14 = vpack.c.bf16 %v1905_v53, %v1904_v0 }
 0x99a   :  { %v1830_v57 = vadd.f32 %v1820_v28, %v1610_v13  ;;  %v12726_v13 = vpack.c.bf16 %v1903_v10, %v1902_v47 }
 0x99b   :  { %v1841_v44 = vsel %vm170_vm1, %v1831_v55, 0.0 }
 0x99c   :  { %1842 = vadd.xlane.f32.xlu0 %v1841_v44  ;;  %v1838_v19 = vsel %vm170_vm1, %v1830_v57, 0.0  ;;  %12727 = vmatprep.subr.bf16.mxu0 %v12726_v13 }
 0x99d   :  { %1839 = vadd.xlane.f32.xlu1 %v1838_v19  ;;  %12729 = vmatpush3.bf16.msra.mxu0 %v12726_v13 }
 0x99e   :  { %12731 = vmatprep.subr.bf16.mxu0 %v12730_v14 }
 0x9a1   :  { %12733 = vmatpush3.bf16.msra.mxu0 %v12730_v14 }
 0xa1e   :  { %v1837_v22 = vpop.xlane.xlu0 %1836 }
 0xa1f   :  { %v1845_v36 = vmul.f32 0.03125, %v1837_v22  ;;  %v1834_v40 = vpop.xlane.xlu1 %1833 }
 0xa20   :  { %v1844_v58 = vmul.f32 0.03125, %v1834_v40 }
 0xa21   :  { %v1849_v43 = vsub.f32 %v1829_v39, %v1845_v36 }
 0xa22   :  { %v1848_v61 = vsub.f32 %v1828_v32, %v1844_v58 }
 0xa23   :  { %v1853_v37 = vmul.f32 %v1849_v43, %v1849_v43 }
 0xa24   :  { %v1852_v29 = vmul.f32 %v1848_v61, %v1848_v61 }
 0xa25   :  { %v1859_v26 = vsel %vm170_vm1, %v1853_v37, 0.0 }
 0xa26   :  { %1860 = vadd.xlane.f32.xlu0 %v1859_v26  ;;  %v1856_v41 = vsel %vm170_vm1, %v1852_v29, 0.0 }
 0xa27   :  { %1857 = vadd.xlane.f32.xlu1 %v1856_v41 }
 0xa29   :  { %v1843_v62 = vpop.xlane.xlu0 %1842 }
 0xa2a   :  { %v1847_v63 = vmul.f32 0.03125, %v1843_v62  ;;  %v1840_v46 = vpop.xlane.xlu1 %1839 }
 0xa2b   :  { %v1846_v35 = vmul.f32 0.03125, %v1840_v46 }
 0xa2c   :  { %v1851_v34 = vsub.f32 %v1831_v55, %v1847_v63 }
 0xa2d   :  { %v1850_v2 = vsub.f32 %v1830_v57, %v1846_v35  ;;  %v10505_v57 = vld [vmem:[%s17434_s3 + $0x9] ss:$0 sm:$0xff] }
 0xa2e   :  { %v1855_v51 = vmul.f32 %v1851_v34, %v1851_v34 }
 0xa2f   :  { %v1854_v5 = vmul.f32 %v1850_v2, %v1850_v2 }
 0xa30   :  { %v1865_v38 = vsel %vm170_vm1, %v1855_v51, 0.0 }
 0xa31   :  { %1866 = vadd.xlane.f32.xlu0 %v1865_v38  ;;  %v1862_v18 = vsel %vm170_vm1, %v1854_v5, 0.0 }
 0xa32   :  { %1863 = vadd.xlane.f32.xlu1 %v1862_v18 }
 0xab3   :  { %v1861_v25 = vpop.xlane.xlu0 %1860 }
 0xab4   :  { %v1869_v49 = vmul.f32 0.03125, %v1861_v25  ;;  %v1858_v9 = vpop.xlane.xlu1 %1857 }
 0xab5   :  { %v1868_v11 = vmul.f32 0.03125, %v1858_v9 }
 0xab6   :  { %v1873_v17 = vadd.f32 1e-05, %v1869_v49 }
 0xab7   :  { %v1872_v56 = vadd.f32 1e-05, %v1868_v11 }
 0xab8   :  { %13899 = vrsqrt.f32 %v1873_v17 }
 0xab9   :  { %13901 = vrsqrt.f32 %v1872_v56 }
 0xabe   :  { %v1867_v3 = vpop.xlane.xlu0 %1866 }
 0xabf   :  { %v1871_v60 = vmul.f32 0.03125, %v1867_v3  ;;  %v1864_v50 = vpop.xlane.xlu1 %1863 }
 0xac0   :  { %v1870_v12 = vmul.f32 0.03125, %v1864_v50 }
 0xac1   :  { %v1875_v20 = vadd.f32 1e-05, %v1871_v60 }
 0xac2   :  { %v13900_v6 = vpop.eup %13899  ;;  %v1874_v23 = vadd.f32 1e-05, %v1870_v12 }
 0xac3   :  { %v13902_v4 = vpop.eup %13901  ;;  %v1881_v15 = vmul.f32 %v13900_v6, %v1849_v43  ;;  %13903 = vrsqrt.f32 %v1875_v20 }
 0xac4   :  { %13905 = vrsqrt.f32 %v1874_v23  ;;  %v1880_v59 = vmul.f32 %v13902_v4, %v1848_v61 }
 0xac5   :  { %v1890_v30 = vmul.f32 %v10503_v16, %v1881_v15 }
 0xac6   :  { %v1889_v21 = vmul.f32 %v10503_v16, %v1880_v59 }
 0xac7   :  { %v14965_v39 = vadd.f32 %v10504_v31, %v1890_v30 }
 0xac8   :  { %v14963_v27 = vadd.f32 %v10504_v31, %v1889_v21 }
 0xaca   :  { %11688 = vmatprep.mubr.msk.f32.mxu0 %vm170_vm1, %v14963_v27 }
 0xacb   :  { %11689 = vmatmul.mubr.msk.f32.vlgmr.msra.gmra.mrb[20].mxu0 %vm170_vm1, %v14965_v39 }
 0xacd   :  { %v13904_v32 = vpop.eup %13903 }
 0xace   :  { %v13906_v42 = vpop.eup %13905  ;;  %v1883_v45 = vmul.f32 %v13904_v32, %v1851_v34 }
 0xacf   :  { %v1882_v48 = vmul.f32 %v13906_v42, %v1850_v2 }
 0xad0   :  { %v1892_v33 = vmul.f32 %v10503_v16, %v1883_v45 }
 0xad1   :  { %v1891_v52 = vmul.f32 %v10503_v16, %v1882_v48 }
 0xad2   :  { %v14973_v55 = vadd.f32 %v10504_v31, %v1892_v33 }
 0xad3   :  { %v14971_v28 = vadd.f32 %v10504_v31, %v1891_v52 }
 0xad5   :  { %11691 = vmatprep.mubr.msk.f32.mxu0 %vm170_vm1, %v14971_v28 }
 0xad6   :  { %11692 = vmatmul.mubr.msk.f32.gmra.mrb[22].mxu0 %vm170_vm1, %v14973_v55 }
 0xb9e   :  { %v11690_v44 = vpop.f32.mrb[20].mxu0 }
 0xb9f   :  { %v1995_v19 = vadd.f32 %v11690_v44, %v10505_v57  ;;  %v1989_v22 = vpop.f32.mrb[21].mxu0 }
 0xba0   :  { %v1990_v36 = vadd.f32 %v10505_v57, %v1989_v22 }
 0xba1   :  { %v2009_v41 = vmul.f32 0.35355338, %v1995_v19 }
 0xba2   :  { %v14982_v40 = vpack.i.bf16 %v1995_v19, %v1990_v36  ;;  %v2008_v58 = vmul.f32 0.35355338, %v1990_v36 }
 0xba4   :  { %13448 = vrot.lane.b32.xlu1 %v14982_v40, %s14335_s7  ;;  %11702 = vmatprep.mubr.msk.f32.mxu0 %vm284_vm2, %v2008_v58 }
 0xba8   :  { %13458 = vrot.lane.b32.xlu1 %v14982_v40, %s14336_s8 }
 0xba9   :  { %v11693_v43 = vpop.f32.mrb[22].mxu0 }
 0xbaa   :  { %v2005_v61 = vadd.f32 %v11693_v43, %v10505_v57  ;;  %v1999_v37 = vpop.f32.mrb[23].mxu0 }
 0xbab   :  { %v2000_v29 = vadd.f32 %v10505_v57, %v1999_v37 }
 0xbac   :  { %v2011_v62 = vmul.f32 0.35355338, %v2005_v61 }
 0xbad   :  { %v14989_v26 = vpack.i.bf16 %v2005_v61, %v2000_v29  ;;  %v2010_v63 = vmul.f32 0.35355338, %v2000_v29 }
 0xbaf   :  { %13468 = vrot.lane.b32.xlu1 %v14989_v26, %s14336_s8  ;;  %13453 = vrot.lane.b32.xlu0 %v14989_v26, %s14335_s7 }
 0xbb3   :  { %13473 = vrot.lane.b32.xlu1 %v14982_v40, %s14338_s10  ;;  %13463 = vrot.lane.b32.xlu0 %v14982_v40, %s14337_s9 }
 0xbb7   :  { %2131 = vrot.lane.b32.xlu1 %v2009_v41, %s14339_s11  ;;  %2129 = vrot.lane.b32.xlu0 %v2008_v58, %s14339_s11 }
 0xbbb   :  { %2248 = vrot.lane.b32.xlu1 %v2009_v41, %s14340_s12  ;;  %2246 = vrot.lane.b32.xlu0 %v2008_v58, %s14340_s12 }
 0xbbf   :  { %13483 = vrot.lane.b32.xlu1 %v14989_v26, %s14338_s10  ;;  %13478 = vrot.lane.b32.xlu0 %v14989_v26, %s14337_s9 }
 0xbc3   :  { %2365 = vrot.lane.b32.xlu1 %v2009_v41, %s14341_s13  ;;  %2363 = vrot.lane.b32.xlu0 %v2008_v58, %s14341_s13 }
 0xbc7   :  { %2135 = vrot.lane.b32.xlu1 %v2011_v62, %s14339_s11  ;;  %2133 = vrot.lane.b32.xlu0 %v2010_v63, %s14339_s11 }
 0xbcb   :  { %2252 = vrot.lane.b32.xlu1 %v2011_v62, %s14340_s12  ;;  %2250 = vrot.lane.b32.xlu0 %v2010_v63, %s14340_s12 }
 0xbcf   :  { %2369 = vrot.lane.b32.xlu1 %v2011_v62, %s14341_s13  ;;  %2367 = vrot.lane.b32.xlu0 %v2010_v63, %s14341_s13 }
 0xc16   :  { %v13449_v46 = vpop.permute.xlu1 %13448 }
 0xc17   :  { %v13451_v35 = vunpack.i.h.bf16 %v13449_v46  ;;  %v13450_v34 = vunpack.i.l.bf16 %v13449_v46 }
 0xc19   :  { %v12734_v2 = vpack.c.bf16 %v13451_v35, %v13450_v34 }
 0xc1a   :  { %v13459_v51 = vpop.permute.xlu1 %13458 }
 0xc1b   :  { %12736 = vmatprep.subr.msk.bf16.mxu0 %vm14520_vm3, %v12734_v2  ;;  %v13461_v18 = vunpack.i.h.bf16 %v13459_v51  ;;  %v13460_v47 = vunpack.i.l.bf16 %v13459_v51 }
 0xc1c   :  { %12739 = vmatpush3.bf16.xpose.msk.msra.mxu0 %vm14520_vm3, %v12734_v2 }
 0xc1d   :  { %v12746_v25 = vpack.c.bf16 %v13461_v18, %v13460_v47 }
 0xc21   :  { %v13469_v5 = vpop.permute.xlu1 %13468  ;;  %v13454_v38 = vpop.permute.xlu0 %13453 }
 0xc22   :  { %v13456_v10 = vunpack.i.h.bf16 %v13454_v38  ;;  %v13455_v13 = vunpack.i.l.bf16 %v13454_v38  ;;  %v13471_v3 = vunpack.i.h.bf16 %v13469_v5  ;;  %v13470_v60 = vunpack.i.l.bf16 %v13469_v5 }
 0xc24   :  { %v12740_v0 = vpack.c.bf16 %v13456_v10, %v13455_v13  ;;  %v12752_v20 = vpack.c.bf16 %v13471_v3, %v13470_v60 }
 0xc25   :  { %v13474_v53 = vpop.permute.xlu1 %13473  ;;  %v13464_v14 = vpop.permute.xlu0 %13463 }
 0xc26   :  { %v13466_v49 = vunpack.i.h.bf16 %v13464_v14  ;;  %v13465_v9 = vunpack.i.l.bf16 %v13464_v14  ;;  %12742 = vmatprep.subr.msk.bf16.mxu0 %vm14520_vm3, %v12740_v0  ;;  %v13476_v16 = vunpack.i.h.bf16 %v13474_v53  ;;  %v13475_v4 = vunpack.i.l.bf16 %v13474_v53 }
 0xc27   :  { %12745 = vmatpush3.bf16.xpose.msk.msra.mxu0 %vm14520_vm3, %v12740_v0 }
 0xc28   :  { %v12758_v11 = vpack.c.bf16 %v13466_v49, %v13465_v9  ;;  %12748 = vmatprep.subr.msk.bf16.mxu0 %vm14520_vm3, %v12746_v25  ;;  %v12770_v32 = vpack.c.bf16 %v13476_v16, %v13475_v4 }
 0xc29   :  { %v2132_v17 = vpop.permute.xlu1 %2131  ;;  %v2130_v56 = vpop.permute.xlu0 %2129 }
 0xc2a   :  { %12760 = vmatprep.subr.msk.bf16.mxu1 %vm14520_vm3, %v12758_v11 }
 0xc2b   :  { %12763 = vmatpush3.bf16.xpose.msk.msra.mxu1 %vm14520_vm3, %v12758_v11 }
 0xc2d   :  { %v2249_v50 = vpop.permute.xlu1 %2248  ;;  %v2247_v12 = vpop.permute.xlu0 %2246 }
 0xc2e   :  { %11703 = vmatmul.mubr.msk.f32.vlgmr.msra.gmra.mrb[24].mxu0 %vm284_vm2, %v2009_v41  ;;  %11730 = vmatprep.mubr.msk.f32.mxu1 %vm284_vm2, %v2247_v12 }
 0xc2f   :  { %11705 = vmatprep.mubr.msk.f32.mxu0 %vm284_vm2, %v2010_v63  ;;  %12751 = vmatpush3.bf16.xpose.msk.msra.mxu0 %vm14520_vm3, %v12746_v25 }
 0xc30   :  { %12754 = vmatprep.subr.msk.bf16.mxu0 %vm14520_vm3, %v12752_v20 }
 0xc31   :  { %v13484_v6 = vpop.permute.xlu1 %13483  ;;  %v13479_v23 = vpop.permute.xlu0 %13478 }
 0xc32   :  { %v13481_v15 = vunpack.i.h.bf16 %v13479_v23  ;;  %v13480_v59 = vunpack.i.l.bf16 %v13479_v23  ;;  %11706 = vmatmul.mubr.msk.f32.gmra.mrb[26].mxu0 %vm284_vm2, %v2011_v62  ;;  %v13486_v45 = vunpack.i.h.bf16 %v13484_v6  ;;  %v13485_v48 = vunpack.i.l.bf16 %v13484_v6 }
 0xc33   :  { %11716 = vmatprep.mubr.msk.f32.mxu0 %vm284_vm2, %v2130_v56 }
 0xc34   :  { %v12764_v30 = vpack.c.bf16 %v13481_v15, %v13480_v59  ;;  %v12776_v57 = vpack.c.bf16 %v13486_v45, %v13485_v48 }
 0xc35   :  { %v2366_v31 = vpop.permute.xlu1 %2365  ;;  %v2364_v21 = vpop.permute.xlu0 %2363 }
 0xc36   :  { %12766 = vmatprep.subr.msk.bf16.mxu1 %vm14520_vm3, %v12764_v30 }
 0xc37   :  { %12757 = vmatpush3.bf16.xpose.msk.msra.mxu0 %vm14520_vm3, %v12752_v20  ;;  %12769 = vmatpush3.bf16.xpose.msk.msra.mxu1 %vm14520_vm3, %v12764_v30 }
 0xc38   :  { %12772 = vmatprep.subr.msk.bf16.mxu0 %vm14520_vm3, %v12770_v32 }
 0xc39   :  { %v2134_v42 = vpop.permute.xlu0 %2133  ;;  %v2136_v33 = vpop.permute.xlu1 %2135 }
 0xc3d   :  { %v2251_v52 = vpop.permute.xlu0 %2250  ;;  %v2253_v44 = vpop.permute.xlu1 %2252 }
 0xc3e   :  { %11717 = vmatmul.mubr.msk.f32.vlgmr.msra.gmra.mrb[28].mxu0 %vm284_vm2, %v2132_v17  ;;  %11731 = vmatmul.mubr.msk.f32.vlgmr.msra.gmra.mrb[32].mxu1 %vm284_vm2, %v2249_v50 }
 0xc3f   :  { %11719 = vmatprep.mubr.msk.f32.mxu0 %vm284_vm2, %v2134_v42  ;;  %11733 = vmatprep.mubr.msk.f32.mxu1 %vm284_vm2, %v2251_v52 }
 0xc40   :  { %12775 = vmatpush3.bf16.xpose.msk.msra.mxu0 %vm14520_vm3, %v12770_v32 }
 0xc41   :  { %12778 = vmatprep.subr.msk.bf16.mxu0 %vm14520_vm3, %v12776_v57  ;;  %v2368_v19 = vpop.permute.xlu0 %2367  ;;  %v2370_v22 = vpop.permute.xlu1 %2369 }
 0xc42   :  { %11720 = vmatmul.mubr.msk.f32.gmra.mrb[30].mxu0 %vm284_vm2, %v2136_v33  ;;  %11734 = vmatmul.mubr.msk.f32.gmra.mrb[34].mxu1 %vm284_vm2, %v2253_v44 }
 0xc43   :  { %11744 = vmatprep.mubr.msk.f32.mxu0 %vm284_vm2, %v2364_v21 }
 0xc48   :  { %12781 = vmatpush3.bf16.xpose.msk.msra.mxu0 %vm14520_vm3, %v12776_v57 }
 0xc4f   :  { %11745 = vmatmul.mubr.msk.f32.vlgmr.msra.gmra.mrb[32].mxu0 %vm284_vm2, %v2366_v31 }
 0xc50   :  { %11747 = vmatprep.mubr.msk.f32.mxu0 %vm284_vm2, %v2368_v19 }
 0xc53   :  { %11748 = vmatmul.mubr.msk.f32.gmra.mrb[34].mxu0 %vm284_vm2, %v2370_v22 }
 0xd01   :  { %v11704_v36 = vpop.f32.mrb[24].mxu0 }
 0xd02   :  { %v15063_v58 = vadd.f32 %v11704_v36, %v14574_v1  ;;  %v2110_v43 = vpop.f32.mrb[25].mxu0 }
 0xd03   :  { %v15074_v2 = vadd.f32 %v2110_v43, %v14583_v8 }
 0xd04   :  { %v2499_v61 = vsel %vm170_vm1, %v15063_v58, -inf }
 0xd05   :  { %2500 = vmax.xlane.f32.xlu1 %v2499_v61  ;;  %v11707_v37 = vpop.f32.mrb[26].mxu0  ;;  %v2496_v53 = vsel %vm170_vm1, %v15074_v2, -inf }
 0xd06   :  { %v2120_v29 = vpop.f32.mrb[27].mxu0  ;;  %v15084_v0 = vadd.f32 %v11707_v37, %v14606_v24 }
 0xd07   :  { %v15094_v49 = vadd.f32 %v2120_v29, %v14581_v7 }
 0xd08   :  { %v2505_v9 = vsel %vm170_vm1, %v15084_v0, -inf }
 0xd09   :  { %v2502_v3 = vsel %vm170_vm1, %v15094_v49, -inf }
 0xd11   :  { %v11718_v41 = vpop.f32.mrb[28].mxu0  ;;  %v11732_v62 = vpop.f32.mrb[32].mxu1 }
 0xd12   :  { %v15068_v63 = vadd.f32 %v11732_v62, %v14574_v1  ;;  %v2227_v46 = vpop.f32.mrb[29].mxu0  ;;  %v2344_v35 = vpop.f32.mrb[33].mxu1  ;;  %v15111_v20 = vadd.f32 %v11718_v41, %v14574_v1 }
 0xd13   :  { %v15071_v34 = vadd.f32 %v2344_v35, %v14583_v8  ;;  %v15089_v14 = vadd.f32 %v2227_v46, %v14583_v8 }
 0xd14   :  { %v2523_v51 = vsel %vm170_vm1, %v15068_v63, -inf  ;;  %v2511_v30 = vsel %vm170_vm1, %v15111_v20, -inf }
 0xd15   :  { %2524 = vmax.xlane.f32.xlu0 %v2523_v51  ;;  %v11721_v5 = vpop.f32.mrb[30].mxu0  ;;  %v11735_v38 = vpop.f32.mrb[34].mxu1  ;;  %v2520_v18 = vsel %vm170_vm1, %v15071_v34, -inf  ;;  %v2508_v17 = vsel %vm170_vm1, %v15089_v14, -inf }
 0xd16   :  { %2521 = vmax.xlane.f32.xlu1 %v2520_v18  ;;  %v2237_v47 = vpop.f32.mrb[31].mxu0  ;;  %v2354_v10 = vpop.f32.mrb[35].mxu1  ;;  %v15104_v56 = vadd.f32 %v11735_v38, %v14606_v24  ;;  %v15121_v59 = vadd.f32 %v11721_v5, %v14606_v24 }
 0xd17   :  { %v15081_v13 = vadd.f32 %v2354_v10, %v14581_v7  ;;  %v15099_v11 = vadd.f32 %v2237_v47, %v14581_v7 }
 0xd18   :  { %v2529_v23 = vsel %vm170_vm1, %v15104_v56, -inf  ;;  %v2517_v21 = vsel %vm170_vm1, %v15121_v59, -inf }
 0xd19   :  { %2497 = vmax.xlane.f32.xlu0 %v2496_v53  ;;  %v2526_v25 = vsel %vm170_vm1, %v15081_v13, -inf  ;;  %v2514_v60 = vsel %vm170_vm1, %v15099_v11, -inf }
 0xd1a   :  { %2527 = vmax.xlane.f32.xlu1 %v2526_v25 }
 0xd1d   :  { %2506 = vmax.xlane.f32.xlu0 %v2505_v9 }
 0xd1e   :  { %2509 = vmax.xlane.f32.xlu1 %v2508_v17 }
 0xd21   :  { %2503 = vmax.xlane.f32.xlu0 %v2502_v3 }
 0xd22   :  { %v11746_v50 = vpop.f32.mrb[32].mxu0  ;;  %2515 = vmax.xlane.f32.xlu1 %v2514_v60 }
 0xd23   :  { %v2461_v12 = vpop.f32.mrb[33].mxu0  ;;  %v15126_v31 = vadd.f32 %v11746_v50, %v14574_v1 }
 0xd24   :  { %v15114_v6 = vadd.f32 %v2461_v12, %v14583_v8 }
 0xd25   :  { %2530 = vmax.xlane.f32.xlu0 %v2529_v23  ;;  %v2535_v42 = vsel %vm170_vm1, %v15126_v31, -inf }
 0xd26   :  { %v11749_v16 = vpop.f32.mrb[34].mxu0  ;;  %v2532_v4 = vsel %vm170_vm1, %v15114_v6, -inf }
 0xd27   :  { %2533 = vmax.xlane.f32.xlu1 %v2532_v4  ;;  %v2471_v15 = vpop.f32.mrb[35].mxu0  ;;  %v15131_v32 = vadd.f32 %v11749_v16, %v14606_v24 }
 0xd28   :  { %v15140_v48 = vadd.f32 %v2471_v15, %v14581_v7 }
 0xd29   :  { %2512 = vmax.xlane.f32.xlu0 %v2511_v30  ;;  %v2541_v45 = vsel %vm170_vm1, %v15131_v32, -inf }
 0xd2a   :  { %v2538_v33 = vsel %vm170_vm1, %v15140_v48, -inf }
 0xd2d   :  { %2518 = vmax.xlane.f32.xlu0 %v2517_v21 }
 0xd31   :  { %2536 = vmax.xlane.f32.xlu0 %v2535_v42 }
 0xd35   :  { %2542 = vmax.xlane.f32.xlu0 %v2541_v45 }
 0xd38   :  { %13488 = vrot.lane.b32.xlu1 %v14982_v40, %s14343_s15 }
 0xd5c   :  { %2539 = vmax.xlane.f32.xlu1 %v2538_v33 }
 0xd6d   :  { %13493 = vrot.lane.b32.xlu1 %v14989_v26, %s14343_s15 }
 0xd92   :  { %v2501_v52 = vpop.xlane.xlu1 %2500 }
 0xd93   :  { %v2545_v57 = vsub.f32 %v15063_v58, %v2501_v52 }
 0xd95   :  { %v2562_v44 = vmul.f32 1.442695, %v2545_v57 }
 0xd97   :  { %13907 = vpow2.f32 %v2562_v44 }
 0xda1   :  { %v15147_v19 = vpop.eup %13907 }
 0xda2   :  { %v2525_v22 = vpop.xlane.xlu0 %2524  ;;  %v2595_v36 = vsel %vm170_vm1, %v15147_v19, 0.0 }
 0xda3   :  { %v2553_v43 = vsub.f32 %v15068_v63, %v2525_v22  ;;  %v2522_v61 = vpop.xlane.xlu1 %2521  ;;  %2596 = vadd.xlane.f32.xlu0 %v2595_v36 }
 0xda4   :  { %v2552_v29 = vsub.f32 %v15071_v34, %v2522_v61 }
 0xda5   :  { %v2578_v37 = vmul.f32 1.442695, %v2553_v43 }
 0xda6   :  { %v2498_v41 = vpop.xlane.xlu0 %2497  ;;  %v2576_v46 = vmul.f32 1.442695, %v2552_v29 }
 0xda7   :  { %13909 = vpow2.f32 %v2578_v37  ;;  %v2544_v62 = vsub.f32 %v15074_v2, %v2498_v41  ;;  %v2528_v58 = vpop.xlane.xlu1 %2527 }
 0xda8   :  { %v2554_v53 = vsub.f32 %v15081_v13, %v2528_v58 }
 0xda9   :  { %v2560_v35 = vmul.f32 1.442695, %v2544_v62 }
 0xdaa   :  { %v2507_v51 = vpop.xlane.xlu0 %2506  ;;  %v2580_v60 = vmul.f32 1.442695, %v2554_v53 }
 0xdab   :  { %13911 = vpow2.f32 %v2560_v35  ;;  %v2547_v5 = vsub.f32 %v15084_v0, %v2507_v51  ;;  %v2510_v38 = vpop.xlane.xlu1 %2509 }
 0xdac   :  { %13913 = vpow2.f32 %v2576_v46  ;;  %v2548_v63 = vsub.f32 %v15089_v14, %v2510_v38 }
 0xdad   :  { %v2566_v18 = vmul.f32 1.442695, %v2547_v5 }
 0xdae   :  { %v2504_v47 = vpop.xlane.xlu0 %2503  ;;  %v2568_v25 = vmul.f32 1.442695, %v2548_v63 }
 0xdaf   :  { %13915 = vpow2.f32 %v2566_v18  ;;  %v2546_v34 = vsub.f32 %v15094_v49, %v2504_v47  ;;  %v2516_v10 = vpop.xlane.xlu1 %2515 }
 0xdb0   :  { %v2550_v17 = vsub.f32 %v15099_v11, %v2516_v10 }
 0xdb1   :  { %v15158_v2 = vpop.eup %13909  ;;  %v2564_v9 = vmul.f32 1.442695, %v2546_v34 }
 0xdb2   :  { %v2531_v3 = vpop.xlane.xlu0 %2530  ;;  %v2619_v0 = vsel %vm170_vm1, %v15158_v2, 0.0  ;;  %v2572_v13 = vmul.f32 1.442695, %v2550_v17 }
 0xdb3   :  { %13917 = vpow2.f32 %v2564_v9  ;;  %v2555_v14 = vsub.f32 %v15104_v56, %v2531_v3  ;;  %2620 = vadd.xlane.f32.xlu0 %v2619_v0 }
 0xdb4   :  { %v2534_v50 = vpop.xlane.xlu1 %2533  ;;  %13919 = vpow2.f32 %v2568_v25 }
 0xdb5   :  { %v15164_v49 = vpop.eup %13911  ;;  %v2582_v12 = vmul.f32 1.442695, %v2555_v14  ;;  %v2556_v23 = vsub.f32 %v15114_v6, %v2534_v50 }
 0xdb6   :  { %v2513_v16 = vpop.xlane.xlu0 %2512  ;;  %v2592_v11 = vsel %vm170_vm1, %v15164_v49, 0.0  ;;  %v15169_v4 = vpop.eup %13913 }
 0xdb7   :  { %13921 = vpow2.f32 %v2582_v12  ;;  %v2549_v15 = vsub.f32 %v15111_v20, %v2513_v16  ;;  %2593 = vadd.xlane.f32.xlu1 %v2592_v11  ;;  %v2584_v56 = vmul.f32 1.442695, %v2556_v23  ;;  %v2616_v57 = vsel %vm170_vm1, %v15169_v4, 0.0 }
 0xdb8   :  { %13923 = vpow2.f32 %v2580_v60  ;;  %v13489_v30 = vpop.permute.xlu1 %13488 }
 0xdb9   :  { %v15172_v21 = vpop.eup %13915  ;;  %13925 = vpow2.f32 %v2572_v13  ;;  %v2570_v42 = vmul.f32 1.442695, %v2549_v15  ;;  %v13491_v45 = vunpack.i.h.bf16 %v13489_v30  ;;  %v13490_v33 = vunpack.i.l.bf16 %v13489_v30 }
 0xdba   :  { %v2519_v6 = vpop.xlane.xlu0 %2518  ;;  %v2601_v52 = vsel %vm170_vm1, %v15172_v21, 0.0  ;;  %13927 = vpow2.f32 %v2584_v56 }
 0xdbb   :  { %v2551_v44 = vsub.f32 %v15121_v59, %v2519_v6  ;;  %2602 = vadd.xlane.f32.xlu0 %v2601_v52  ;;  %2617 = vadd.xlane.f32.xlu1 %v2616_v57  ;;  %v12782_v20 = vpack.c.bf16 %v13491_v45, %v13490_v33  ;;  %13929 = vpow2.f32 %v2570_v42 }
 0xdbd   :  { %v15179_v22 = vpop.eup %13917  ;;  %v2574_v36 = vmul.f32 1.442695, %v2551_v44  ;;  %12783 = vmatprep.subr.bf16.mxu1 %v12782_v20 }
 0xdbe   :  { %12785 = vmatpush3.bf16.msra.mxu1 %v12782_v20  ;;  %v2537_v43 = vpop.xlane.xlu0 %2536  ;;  %v2598_v61 = vsel %vm170_vm1, %v15179_v22, 0.0  ;;  %v15183_v37 = vpop.eup %13919 }
 0xdbf   :  { %v2557_v29 = vsub.f32 %v15126_v31, %v2537_v43  ;;  %2599 = vadd.xlane.f32.xlu1 %v2598_v61  ;;  %13931 = vpow2.f32 %v2574_v36  ;;  %v2604_v35 = vsel %vm170_vm1, %v15183_v37, 0.0 }
 0xdc1   :  { %v15186_v59 = vpop.eup %13921  ;;  %v2586_v41 = vmul.f32 1.442695, %v2557_v29 }
 0xdc2   :  { %v15188_v62 = vpop.eup %13923  ;;  %v2543_v58 = vpop.xlane.xlu0 %2542  ;;  %v2625_v46 = vsel %vm170_vm1, %v15186_v59, 0.0 }
 0xdc3   :  { %v15194_v51 = vpop.eup %13925  ;;  %v2559_v5 = vsub.f32 %v15131_v32, %v2543_v58  ;;  %2626 = vadd.xlane.f32.xlu0 %v2625_v46  ;;  %2605 = vadd.xlane.f32.xlu1 %v2604_v35  ;;  %13933 = vpow2.f32 %v2586_v41  ;;  %v2622_v18 = vsel %vm170_vm1, %v15188_v62, 0.0 }
 0xdc4   :  { %v15197_v38 = vpop.eup %13927  ;;  %v2610_v63 = vsel %vm170_vm1, %v15194_v51, 0.0 }
 0xdc5   :  { %v2590_v31 = vmul.f32 1.442695, %v2559_v5  ;;  %v15203_v47 = vpop.eup %13929  ;;  %v2628_v34 = vsel %vm170_vm1, %v15197_v38, 0.0 }
 0xdc6   :  { %v2607_v32 = vsel %vm170_vm1, %v15203_v47, 0.0 }
 0xdc7   :  { %2623 = vadd.xlane.f32.xlu0 %v2622_v18  ;;  %2611 = vadd.xlane.f32.xlu1 %v2610_v63  ;;  %13935 = vpow2.f32 %v2590_v31 }
 0xdc9   :  { %v15209_v10 = vpop.eup %13931 }
 0xdca   :  { %v2613_v53 = vsel %vm170_vm1, %v15209_v10, 0.0 }
 0xdcb   :  { %2608 = vadd.xlane.f32.xlu0 %v2607_v32  ;;  %2629 = vadd.xlane.f32.xlu1 %v2628_v34 }
 0xdcd   :  { %v15213_v25 = vpop.eup %13933 }
 0xdce   :  { %v2631_v9 = vsel %vm170_vm1, %v15213_v25, 0.0 }
 0xdcf   :  { %2614 = vadd.xlane.f32.xlu0 %v2613_v53 }
 0xdd1   :  { %v15217_v17 = vpop.eup %13935 }
 0xdd2   :  { %v2637_v3 = vsel %vm170_vm1, %v15217_v17, 0.0 }
 0xdd3   :  { %2632 = vadd.xlane.f32.xlu0 %v2631_v9 }
 0xdd7   :  { %2638 = vadd.xlane.f32.xlu0 %v2637_v3 }
 0xddc   :  { %13503 = vrot.lane.b32.xlu1 %v14989_v26, %s14342_s14 }
 0xde0   :  { %13508 = vrot.lane.b32.xlu1 %v14982_v40, %s14346_s17 }
 0xde4   :  { %13513 = vrot.lane.b32.xlu1 %v14982_v40, %s14345_s16 }
 0xde8   :  { %13518 = vrot.lane.b32.xlu1 %v14989_v26, %s14346_s17 }
 0xde9   :  { %v2540_v0 = vpop.xlane.xlu1 %2539 }
 0xdea   :  { %v2558_v14 = vsub.f32 %v15140_v48, %v2540_v0 }
 0xdec   :  { %v2588_v60 = vmul.f32 1.442695, %v2558_v14  ;;  %13523 = vrot.lane.b32.xlu1 %v14989_v26, %s14345_s16 }
 0xded   :  { %v13494_v50 = vpop.permute.xlu1 %13493 }
 0xdee   :  { %13937 = vpow2.f32 %v2588_v60  ;;  %v13496_v13 = vunpack.i.h.bf16 %v13494_v50  ;;  %v13495_v12 = vunpack.i.l.bf16 %v13494_v50 }
 0xdf0   :  { %v12786_v23 = vpack.c.bf16 %v13496_v13, %v13495_v12 }
 0xdf2   :  { %12787 = vmatprep.subr.bf16.mxu1 %v12786_v23 }
 0xdf3   :  { %12789 = vmatpush3.bf16.msra.mxu1 %v12786_v23 }
 0xdf8   :  { %v15232_v16 = vpop.eup %13937 }
 0xdf9   :  { %v2634_v11 = vsel %vm170_vm1, %v15232_v16, 0.0 }
 0xdfa   :  { %2635 = vadd.xlane.f32.xlu0 %v2634_v11 }
 0xe10   :  { %13498 = vrot.lane.b32.xlu0 %v14982_v40, %s14342_s14 }
 0xe30   :  { %v2597_v48 = vpop.xlane.xlu0 %2596 }
 0xe31   :  { %13939 = vrcp.f32 %v2597_v48 }
 0xe3b   :  { %v13940_v45 = vpop.eup %13939 }
 0xe3c   :  { %v2643_v57 = vmul.f32 %v13940_v45, %v15147_v19 }
 0xe40   :  { %v2621_v26 = vpop.xlane.xlu0 %2620 }
 0xe44   :  { %v2594_v15 = vpop.xlane.xlu1 %2593 }
 0xe45   :  { %13941 = vrcp.f32 %v2594_v15 }
 0xe48   :  { %v2618_v56 = vpop.xlane.xlu1 %2617  ;;  %v2603_v30 = vpop.xlane.xlu0 %2602 }
 0xe49   :  { %13943 = vrcp.f32 %v2618_v56 }
 0xe4a   :  { %13945 = vrcp.f32 %v2603_v30 }
 0xe4c   :  { %v2600_v42 = vpop.xlane.xlu1 %2599 }
 0xe4d   :  { %13947 = vrcp.f32 %v2600_v42 }
 0xe4f   :  { %v13942_v33 = vpop.eup %13941 }
 0xe50   :  { %v2606_v6 = vpop.xlane.xlu1 %2605  ;;  %v2641_v52 = vmul.f32 %v13942_v33, %v15164_v49  ;;  %v2627_v41 = vpop.xlane.xlu0 %2626 }
 0xe51   :  { %13949 = vrcp.f32 %v2606_v6 }
 0xe52   :  { %11758 = vmatprep.mubr.msk.f32.mxu1 %vm170_vm1, %v2641_v52  ;;  %13951 = vrcp.f32 %v2621_v26 }
 0xe53   :  { %11759 = vmatmul.mubr.msk.f32.vlgmr.msra.gmra.mrb[36].mxu1 %vm170_vm1, %v2643_v57  ;;  %v13944_v40 = vpop.eup %13943 }
 0xe54   :  { %v2612_v44 = vpop.xlane.xlu1 %2611  ;;  %v2657_v20 = vmul.f32 %v13944_v40, %v15169_v4  ;;  %v13946_v36 = vpop.eup %13945 }
 0xe55   :  { %v2647_v49 = vmul.f32 %v13946_v36, %v15172_v21  ;;  %v2624_v4 = vpop.xlane.xlu0 %2623 }
 0xe56   :  { %11786 = vmatprep.mubr.msk.f32.mxu0 %vm170_vm1, %v2657_v20  ;;  %13953 = vrcp.f32 %v2624_v4 }
 0xe57   :  { %v13948_v43 = vpop.eup %13947  ;;  %13955 = vrcp.f32 %v2627_v41 }
 0xe58   :  { %v2630_v61 = vpop.xlane.xlu1 %2629  ;;  %v2645_v29 = vmul.f32 %v13948_v43, %v15179_v22 }
 0xe59   :  { %v2609_v14 = vpop.xlane.xlu0 %2608 }
 0xe5a   :  { %11761 = vmatprep.mubr.msk.f32.mxu1 %vm170_vm1, %v2645_v29  ;;  %13957 = vrcp.f32 %v2609_v14 }
 0xe5b   :  { %11762 = vmatmul.mubr.msk.f32.gmra.mrb[38].mxu1 %vm170_vm1, %v2647_v49  ;;  %v13950_v19 = vpop.eup %13949  ;;  %13959 = vrcp.f32 %v2612_v44 }
 0xe5c   :  { %v13504_v58 = vpop.permute.xlu1 %13503  ;;  %v2649_v46 = vmul.f32 %v13950_v19, %v15183_v37  ;;  %v13952_v53 = vpop.eup %13951 }
 0xe5d   :  { %v2659_v37 = vmul.f32 %v13952_v53, %v15158_v2  ;;  %v2615_v50 = vpop.xlane.xlu0 %2614  ;;  %v13506_v2 = vunpack.i.h.bf16 %v13504_v58  ;;  %v13505_v48 = vunpack.i.l.bf16 %v13504_v58 }
 0xe5e   :  { %11772 = vmatprep.mubr.msk.f32.mxu1 %vm170_vm1, %v2649_v46  ;;  %13961 = vrcp.f32 %v2615_v50 }
 0xe5f   :  { %13963 = vrcp.f32 %v2630_v61 }
 0xe60   :  { %v13509_v35 = vpop.permute.xlu1 %13508  ;;  %v13954_v9 = vpop.eup %13953 }
 0xe61   :  { %v13511_v5 = vunpack.i.h.bf16 %v13509_v35  ;;  %v13510_v31 = vunpack.i.l.bf16 %v13509_v35  ;;  %v13956_v3 = vpop.eup %13955  ;;  %v2661_v0 = vmul.f32 %v13954_v9, %v15188_v62  ;;  %v2633_v13 = vpop.xlane.xlu0 %2632 }
 0xe62   :  { %v2663_v60 = vmul.f32 %v13956_v3, %v15186_v59  ;;  %v12794_v59 = vpack.c.bf16 %v13506_v2, %v13505_v48  ;;  %13965 = vrcp.f32 %v2633_v13 }
 0xe63   :  { %v12798_v22 = vpack.c.bf16 %v13511_v5, %v13510_v31  ;;  %v3169_v31 = vld [vmem:[%s17433_s2 + $0x138] sm:$0xff] }
 0xe64   :  { %v13514_v18 = vpop.permute.xlu1 %13513  ;;  %v13958_v45 = vpop.eup %13957 }
 0xe65   :  { %12799 = vmatprep.subr.bf16.mxu0 %v12798_v22  ;;  %v2639_v12 = vpop.xlane.xlu0 %2638  ;;  %v13516_v56 = vunpack.i.h.bf16 %v13514_v18  ;;  %v13515_v30 = vunpack.i.l.bf16 %v13514_v18  ;;  %v13960_v33 = vpop.eup %13959  ;;  %v2651_v40 = vmul.f32 %v13958_v45, %v15203_v47  ;;  %v3170_v18 = vld [vmem:[%s17433_s2 + $0x140] sm:$0xff] }
 0xe66   :  { %12801 = vmatpush3.bf16.msra.mxu0 %v12798_v22  ;;  %v2653_v20 = vmul.f32 %v13960_v33, %v15194_v51 }
 0xe67   :  { %v12806_v57 = vpack.c.bf16 %v13516_v56, %v13515_v30 }
 0xe68   :  { %v13519_v21 = vpop.permute.xlu1 %13518  ;;  %v13962_v44 = vpop.eup %13961 }
 0xe69   :  { %v13521_v63 = vunpack.i.h.bf16 %v13519_v21  ;;  %v13520_v32 = vunpack.i.l.bf16 %v13519_v21  ;;  %v13964_v36 = vpop.eup %13963  ;;  %v2655_v61 = vmul.f32 %v13962_v44, %v15209_v10  ;;  %v3171_v21 = vld [vmem:[%s17433_s2 + $0x148] sm:$0xff] }
 0xe6a   :  { %v2665_v49 = vmul.f32 %v13964_v36, %v15197_v38 }
 0xe6b   :  { %v12802_v34 = vpack.c.bf16 %v13521_v63, %v13520_v32  ;;  %v12818_v63 = vpack.c.bf16 %v3171_v21, %v3170_v18 }
 0xe6c   :  { %v13524_v42 = vpop.permute.xlu1 %13523  ;;  %v13966_v29 = vpop.eup %13965 }
 0xe6d   :  { %12803 = vmatprep.subr.bf16.mxu0 %v12802_v34  ;;  %v13526_v6 = vunpack.i.h.bf16 %v13524_v42  ;;  %v13525_v52 = vunpack.i.l.bf16 %v13524_v42  ;;  %v2667_v51 = vmul.f32 %v13966_v29, %v15213_v25 }
 0xe6e   :  { %12805 = vmatpush3.bf16.msra.mxu0 %v12802_v34 }
 0xe6f   :  { %v12810_v43 = vpack.c.bf16 %v13526_v6, %v13525_v52 }
 0xe71   :  { %11787 = vmatmul.mubr.msk.f32.vlgmr.msra.gmra.mrb[36].mxu0 %vm170_vm1, %v2659_v37 }
 0xe72   :  { %11789 = vmatprep.mubr.msk.f32.mxu0 %vm170_vm1, %v2661_v0 }
 0xe75   :  { %11790 = vmatmul.mubr.msk.f32.gmra.mrb[38].mxu0 %vm170_vm1, %v2663_v60 }
 0xe87   :  { %v2636_v23 = vpop.xlane.xlu0 %2635 }
 0xe88   :  { %13967 = vrcp.f32 %v2636_v23 }
 0xe89   :  { %13969 = vrcp.f32 %v2639_v12 }
 0xe8b   :  { %v13499_v11 = vpop.permute.xlu0 %13498 }
 0xe8c   :  { %v13501_v15 = vunpack.i.h.bf16 %v13499_v11  ;;  %v13500_v62 = vunpack.i.l.bf16 %v13499_v11 }
 0xe8e   :  { %v12790_v26 = vpack.c.bf16 %v13501_v15, %v13500_v62 }
 0xe90   :  { %12791 = vmatprep.subr.bf16.mxu1 %v12790_v26 }
 0xe91   :  { %12793 = vmatpush3.bf16.msra.mxu1 %v12790_v26 }
 0xe92   :  { %12795 = vmatprep.subr.bf16.mxu1 %v12794_v59  ;;  %v13968_v41 = vpop.eup %13967 }
 0xe93   :  { %v13970_v47 = vpop.eup %13969  ;;  %v2669_v19 = vmul.f32 %v13968_v41, %v15232_v16 }
 0xe94   :  { %v2671_v10 = vmul.f32 %v13970_v47, %v15217_v17  ;;  %v3168_v17 = vld [vmem:[%s17433_s2 + $0x130] sm:$0xff] }
 0xe95   :  { %12797 = vmatpush3.bf16.msra.mxu1 %v12794_v59  ;;  %v12814_v22 = vpack.c.bf16 %v3169_v31, %v3168_v17 }
 0xe96   :  { %12807 = vmatprep.subr.bf16.mxu1 %v12806_v57 }
 0xe97   :  { %12815 = vmatprep.subr.bf16.mxu0 %v12814_v22 }
 0xe98   :  { %11773 = vmatmul.mubr.msk.f32.vlgmr.msra.gmra.mrb[40].mxu1 %vm170_vm1, %v2651_v40  ;;  %12817 = vmatpush3.bf16.msra.mxu0 %v12814_v22 }
 0xe99   :  { %11775 = vmatprep.mubr.msk.f32.mxu1 %vm170_vm1, %v2653_v20  ;;  %12809 = vmatpush3.bf16.msra.mxu1 %v12806_v57 }
 0xe9a   :  { %12811 = vmatprep.subr.bf16.mxu1 %v12810_v43  ;;  %12819 = vmatprep.subr.bf16.mxu0 %v12818_v63 }
 0xe9c   :  { %11776 = vmatmul.mubr.msk.f32.gmra.mrb[42].mxu1 %vm170_vm1, %v2655_v61  ;;  %12821 = vmatpush3.bf16.msra.mxu0 %v12818_v63 }
 0xe9d   :  { %12813 = vmatpush3.bf16.msra.mxu1 %v12810_v43  ;;  %11800 = vmatprep.mubr.msk.f32.mxu1 %vm170_vm1, %v2665_v49  ;;  %v10558_v43 = vld [vmem:[%s17434_s3 + $0xa] ss:$0 sm:$0xff] }
 0xea0   :  { %11801 = vmatmul.mubr.msk.f32.vlgmr.msra.gmra.mrb[44].mxu1 %vm170_vm1, %v2667_v51 }
 0xea1   :  { %11803 = vmatprep.mubr.msk.f32.mxu1 %vm170_vm1, %v2669_v19 }
 0xea4   :  { %11804 = vmatmul.mubr.msk.f32.gmra.mrb[46].mxu1 %vm170_vm1, %v2671_v10 }
 0xf26   :  { %v11760_v38 = vpop.f32.mrb[36].mxu1 }
 0xf27   :  { %v2762_v58 = vpop.f32.mrb[37].mxu1 }
 0xf2e   :  { %v11763_v46 = vpop.f32.mrb[38].mxu1 }
 0xf2f   :  { %v2772_v4 = vpop.f32.mrb[39].mxu1 }
 0xf44   :  { %v11788_v35 = vpop.f32.mrb[36].mxu0 }
 0xf45   :  { %3130 = vrot.lane.b32.xlu1 %v11788_v35, %s14348_s26  ;;  %v2980_v5 = vpop.f32.mrb[37].mxu0 }
 0xf46   :  { %3128 = vrot.lane.b32.xlu0 %v2980_v5, %s14348_s26 }
 0xf48   :  { %v11791_v25 = vpop.f32.mrb[38].mxu0 }
 0xf49   :  { %3134 = vrot.lane.b32.xlu1 %v11791_v25, %s14348_s26  ;;  %v2990_v16 = vpop.f32.mrb[39].mxu0 }
 0xf4a   :  { %3132 = vrot.lane.b32.xlu0 %v2990_v16, %s14348_s26 }
 0xf6b   :  { %v11774_v32 = vpop.f32.mrb[40].mxu1 }
 0xf6c   :  { %3114 = vrot.lane.b32.xlu1 %v11774_v32, %s14347_s22  ;;  %v2871_v34 = vpop.f32.mrb[41].mxu1 }
 0xf6d   :  { %3112 = vrot.lane.b32.xlu0 %v2871_v34, %s14347_s22 }
 0xf6f   :  { %v11777_v53 = vpop.f32.mrb[42].mxu1 }
 0xf70   :  { %3118 = vrot.lane.b32.xlu1 %v11777_v53, %s14347_s22  ;;  %v2881_v9 = vpop.f32.mrb[43].mxu1 }
 0xf71   :  { %3116 = vrot.lane.b32.xlu0 %v2881_v9, %s14347_s22 }
 0xf73   :  { %v11802_v37 = vpop.f32.mrb[44].mxu1 }
 0xf74   :  { %3146 = vrot.lane.b32.xlu1 %v11802_v37, %s14349_s27  ;;  %v3089_v3 = vpop.f32.mrb[45].mxu1 }
 0xf75   :  { %3144 = vrot.lane.b32.xlu0 %v3089_v3, %s14349_s27 }
 0xf77   :  { %v11805_v0 = vpop.f32.mrb[46].mxu1 }
 0xf78   :  { %3150 = vrot.lane.b32.xlu1 %v11805_v0, %s14349_s27  ;;  %v3099_v14 = vpop.f32.mrb[47].mxu1 }
 0xf79   :  { %3148 = vrot.lane.b32.xlu0 %v3099_v14, %s14349_s27 }
 0xfb7   :  { %v3131_v60 = vpop.permute.xlu1 %3130 }
 0xfb8   :  { %v3129_v50 = vpop.permute.xlu0 %3128 }
 0xfbb   :  { %v3135_v13 = vpop.permute.xlu1 %3134 }
 0xfbc   :  { %v3133_v12 = vpop.permute.xlu0 %3132 }
 0xfde   :  { %v3115_v23 = vpop.permute.xlu1 %3114 }
 0xfdf   :  { %v3113_v11 = vpop.permute.xlu0 %3112  ;;  %v3157_v62 = vsel %vm284_vm2, %v11760_v38, %v3115_v23 }
 0xfe0   :  { %v3156_v15 = vsel %vm284_vm2, %v2762_v58, %v3113_v11  ;;  %v3161_v42 = vsel %vm1421_vm8, %v3157_v62, %v3131_v60  ;;  %v3350_v11 = vld [vmem:[%s17433_s2 + $0x160] sm:$0xff]  ;;  %v3647_v62 = vld [vmem:[%s17433_s2 + $0x1f8] sm:$0xff] }
 0xfe1   :  { %v3160_v56 = vsel %vm1421_vm8, %v3156_v15, %v3129_v50  ;;  %v3646_v15 = vld [vmem:[%s17433_s2 + $0x1f0] sm:$0xff] }
 0xfe2   :  { %v3119_v2 = vpop.permute.xlu1 %3118 }
 0xfe3   :  { %v3117_v48 = vpop.permute.xlu0 %3116  ;;  %v3159_v33 = vsel %vm284_vm2, %v11763_v46, %v3119_v2  ;;  %v3351_v2 = vld [vmem:[%s17433_s2 + $0x168] sm:$0xff] }
 0xfe4   :  { %v3158_v59 = vsel %vm284_vm2, %v2772_v4, %v3117_v48  ;;  %v3163_v44 = vsel %vm1421_vm8, %v3159_v33, %v3135_v13  ;;  %v3348_v13 = vld [vmem:[%s17433_s2 + $0x150] sm:$0xff]  ;;  %v12826_v48 = vpack.c.bf16 %v3351_v2, %v3350_v11 }
 0xfe5   :  { %v3162_v57 = vsel %vm1421_vm8, %v3158_v59, %v3133_v12  ;;  %v3349_v12 = vld [vmem:[%s17433_s2 + $0x158] sm:$0xff]  ;;  %v3460_v59 = vld [vmem:[%s17433_s2 + $0x180] sm:$0xff] }
 0xfe6   :  { %v3147_v26 = vpop.permute.xlu1 %3146  ;;  %v12822_v23 = vpack.c.bf16 %v3349_v12, %v3348_v13 }
 0xfe7   :  { %v3145_v30 = vpop.permute.xlu0 %3144  ;;  %v3165_v6 = vsel %vm1426_vm9, %v3161_v42, %v3147_v26  ;;  %v15359_v26 = vpack.c.bf16 %v3647_v62, %v3646_v15  ;;  %v3644_v15 = vld [vmem:[%s17432_s1 + $0x10] sm:$0xff]  ;;  %v3645_v62 = vld [vmem:[%s17432_s1 + $0x18] sm:$0xff] }
 0xfe8   :  { %v3164_v45 = vsel %vm1426_vm9, %v3160_v56, %v3145_v30  ;;  %12823 = vmatprep.subr.bf16.mxu1 %v12822_v23  ;;  %v3458_v56 = vld [vmem:[%s17433_s2 + $0x170] sm:$0xff]  ;;  %v3459_v30 = vld [vmem:[%s17433_s2 + $0x178] sm:$0xff] }
 0xfe9   :  { %11814 = vmatprep.mubr.msk.f32.mxu0 %vm170_vm1, %v3164_v45  ;;  %12825 = vmatpush3.bf16.msra.mxu1 %v12822_v23  ;;  %v12830_v42 = vpack.c.bf16 %v3459_v30, %v3458_v56  ;;  %v3461_v45 = vld [vmem:[%s17433_s2 + $0x188] sm:$0xff] }
 0xfea   :  { %11815 = vmatmul.mubr.msk.f32.vlgmr.msra.gmra.mrb[40].mxu0 %vm170_vm1, %v3165_v6  ;;  %v3151_v52 = vpop.permute.xlu1 %3150  ;;  %12827 = vmatprep.subr.bf16.mxu1 %v12826_v48  ;;  %v12834_v33 = vpack.c.bf16 %v3461_v45, %v3460_v59  ;;  %v3462_v6 = vld [vmem:[%s17433_s2 + $0x190] sm:$0xff]  ;;  %v3473_v56 = vld [vmem:[%s17433_s2 + $0x1e8] sm:$0xff] }
 0xfeb   :  { %v3149_v40 = vpop.permute.xlu0 %3148  ;;  %v3167_v36 = vsel %vm1426_vm9, %v3163_v44, %v3151_v52  ;;  %v3463_v52 = vld [vmem:[%s17433_s2 + $0x198] sm:$0xff]  ;;  %12831 = vmatprep.subr.bf16.mxu0 %v12830_v42  ;;  %v3465_v44 = vld [vmem:[%s17433_s2 + $0x1a8] sm:$0xff] }
 0xfec   :  { %v3166_v20 = vsel %vm1426_vm9, %v3162_v57, %v3149_v40  ;;  %12833 = vmatpush3.bf16.msra.mxu0 %v12830_v42  ;;  %v12838_v57 = vpack.c.bf16 %v3463_v52, %v3462_v6  ;;  %v3464_v40 = vld [vmem:[%s17433_s2 + $0x1a0] sm:$0xff]  ;;  %v10565_v59 = vld [vmem:[%s17434_s3 + $0xb] ss:$0 sm:$0xff] }
 0xfed   :  { %11817 = vmatprep.mubr.msk.f32.mxu0 %vm170_vm1, %v3166_v20  ;;  %12829 = vmatpush3.bf16.msra.mxu1 %v12826_v48  ;;  %v12842_v20 = vpack.c.bf16 %v3465_v44, %v3464_v40  ;;  %v3642_v48 = vld [vmem:[%s17432_s1] sm:$0xff] }
 0xfee   :  { %11818 = vmatmul.mubr.msk.f32.gmra.mrb[42].mxu0 %vm170_vm1, %v3167_v36  ;;  %12863 = vmatprep.subr.bf16.mxu1 %v15359_v26  ;;  %v3466_v36 = vld [vmem:[%s17433_s2 + $0x1b0] sm:$0xff] }
 0xfef   :  { %12835 = vmatprep.subr.bf16.mxu0 %v12834_v33 }
 0xff0   :  { %12837 = vmatpush3.bf16.msra.mxu0 %v12834_v33 }
 0xff1   :  { %12839 = vmatprep.subr.bf16.mxu0 %v12838_v57 }
 0xff4   :  { %12841 = vmatpush3.bf16.msra.mxu0 %v12838_v57 }
 0xff5   :  { %12843 = vmatprep.subr.bf16.mxu0 %v12842_v20 }
 0xff8   :  { %12845 = vmatpush3.bf16.msra.mxu0 %v12842_v20 }
0x10bd   :  { %v11816_v61 = vpop.f32.mrb[40].mxu0 }
0x10be   :  { %v3261_v29 = vadd.f32 %v11816_v61, %v10558_v43  ;;  %v3255_v49 = vpop.f32.mrb[41].mxu0 }
0x10bf   :  { %v3256_v41 = vadd.f32 %v10558_v43, %v3255_v49  ;;  %v3469_v49 = vld [vmem:[%s17433_s2 + $0x1c8] sm:$0xff] }
0x10c0   :  { %v3275_v51 = vadd.f32 %v3261_v29, %v14965_v39  ;;  %v3468_v29 = vld [vmem:[%s17433_s2 + $0x1c0] sm:$0xff] }
0x10c1   :  { %v3274_v47 = vadd.f32 %v3256_v41, %v14963_v27  ;;  %v11819_v19 = vpop.f32.mrb[42].mxu0  ;;  %v12850_v41 = vpack.c.bf16 %v3469_v49, %v3468_v29 }
0x10c2   :  { %v3265_v10 = vpop.f32.mrb[43].mxu0  ;;  %v3281_v38 = vsel %vm170_vm1, %v3275_v51, 0.0  ;;  %v3271_v58 = vadd.f32 %v11819_v19, %v10558_v43 }
0x10c3   :  { %v3266_v46 = vadd.f32 %v10558_v43, %v3265_v10  ;;  %3282 = vadd.xlane.f32.xlu1 %v3281_v38  ;;  %v3278_v4 = vsel %vm170_vm1, %v3274_v47, 0.0  ;;  %v3467_v43 = vld [vmem:[%s17433_s2 + $0x1b8] sm:$0xff] }
0x10c4   :  { %3279 = vadd.xlane.f32.xlu0 %v3278_v4  ;;  %v3277_v5 = vadd.f32 %v3271_v58, %v14973_v55  ;;  %v12846_v61 = vpack.c.bf16 %v3467_v43, %v3466_v36  ;;  %v10573_v43 = vld [vmem:[%s17434_s3 + $0x11] ss:$0 sm:$0xff] }
0x10c5   :  { %v3276_v35 = vadd.f32 %v3266_v46, %v14971_v28 }
0x10c6   :  { %v3287_v39 = vsel %vm170_vm1, %v3277_v5, 0.0  ;;  %12847 = vmatprep.subr.bf16.mxu0 %v12846_v61 }
0x10c7   :  { %v3284_v25 = vsel %vm170_vm1, %v3276_v35, 0.0  ;;  %12849 = vmatpush3.bf16.msra.mxu0 %v12846_v61 }
0x10c8   :  { %3285 = vadd.xlane.f32.xlu0 %v3284_v25  ;;  %12851 = vmatprep.subr.bf16.mxu0 %v12850_v41 }
0x10cb   :  { %12853 = vmatpush3.bf16.msra.mxu0 %v12850_v41 }
0x10cc   :  { %3288 = vadd.xlane.f32.xlu0 %v3287_v39 }
0x1150   :  { %v3283_v27 = vpop.xlane.xlu1 %3282 }
0x1151   :  { %v3291_v16 = vmul.f32 0.03125, %v3283_v27  ;;  %v3280_v17 = vpop.xlane.xlu0 %3279 }
0x1152   :  { %v3290_v31 = vmul.f32 0.03125, %v3280_v17 }
0x1153   :  { %v15321_v22 = vsub.f32 %v3275_v51, %v3291_v16  ;;  %v3470_v51 = vld [vmem:[%s17433_s2 + $0x1d0] sm:$0xff] }
0x1154   :  { %v15323_v18 = vsub.f32 %v3274_v47, %v3290_v31  ;;  %v3471_v47 = vld [vmem:[%s17433_s2 + $0x1d8] sm:$0xff] }
0x1155   :  { %v3286_v21 = vpop.xlane.xlu0 %3285  ;;  %v3299_v28 = vmul.f32 %v15321_v22, %v15321_v22  ;;  %v12854_v19 = vpack.c.bf16 %v3471_v47, %v3470_v51 }
0x1156   :  { %v3292_v63 = vmul.f32 0.03125, %v3286_v21  ;;  %v3298_v55 = vmul.f32 %v15323_v18, %v15323_v18  ;;  %v10563_v21 = vld [vmem:[%s17434_s3 + $0xd] ss:$0 sm:$0xff] }
0x1157   :  { %v3305_v32 = vsel %vm170_vm1, %v3299_v28, 0.0  ;;  %12855 = vmatprep.subr.bf16.mxu0 %v12854_v19 }
0x1158   :  { %v15330_v34 = vsub.f32 %v3276_v35, %v3292_v63  ;;  %3306 = vadd.xlane.f32.xlu0 %v3305_v32  ;;  %v3302_v53 = vsel %vm170_vm1, %v3298_v55, 0.0  ;;  %12857 = vmatpush3.bf16.msra.mxu0 %v12854_v19 }
0x1159   :  { %3303 = vadd.xlane.f32.xlu1 %v3302_v53  ;;  %v3289_v9 = vpop.xlane.xlu0 %3288  ;;  %v10564_v53 = vld [vmem:[%s17434_s3 + $0xe] ss:$0 sm:$0xff] }
0x115a   :  { %v3293_v37 = vmul.f32 0.03125, %v3289_v9  ;;  %v3300_v3 = vmul.f32 %v15330_v34, %v15330_v34 }
0x115c   :  { %v15335_v0 = vsub.f32 %v3277_v5, %v3293_v37  ;;  %v3308_v14 = vsel %vm170_vm1, %v3300_v3, 0.0  ;;  %v3648_v37 = vld [vmem:[%s17433_s2 + $0x200] sm:$0xff]  ;;  %v3649_v3 = vld [vmem:[%s17433_s2 + $0x208] sm:$0xff] }
0x115d   :  { %3309 = vadd.xlane.f32.xlu1 %v3308_v14 }
0x115e   :  { %v3301_v60 = vmul.f32 %v15335_v0, %v15335_v0 }
0x1160   :  { %v3311_v50 = vsel %vm170_vm1, %v3301_v60, 0.0 }
0x1161   :  { %3312 = vadd.xlane.f32.xlu0 %v3311_v50  ;;  %v12866_v50 = vpack.c.bf16 %v3649_v3, %v3648_v37 }
0x11e5   :  { %v3307_v10 = vpop.xlane.xlu0 %3306 }
0x11e6   :  { %v3315_v38 = vmul.f32 0.03125, %v3307_v10  ;;  %v3304_v58 = vpop.xlane.xlu1 %3303 }
0x11e7   :  { %v3314_v46 = vmul.f32 0.03125, %v3304_v58 }
0x11e8   :  { %v3319_v4 = vadd.f32 1e-05, %v3315_v38 }
0x11e9   :  { %v3318_v35 = vadd.f32 1e-05, %v3314_v46 }
0x11ea   :  { %13971 = vrsqrt.f32 %v3319_v4  ;;  %v3310_v5 = vpop.xlane.xlu1 %3309 }
0x11eb   :  { %13973 = vrsqrt.f32 %v3318_v35  ;;  %v3316_v25 = vmul.f32 0.03125, %v3310_v5 }
0x11ed   :  { %v3320_v39 = vadd.f32 1e-05, %v3316_v25 }
0x11ee   :  { %v3313_v27 = vpop.xlane.xlu0 %3312 }
0x11ef   :  { %13975 = vrsqrt.f32 %v3320_v39  ;;  %v3317_v16 = vmul.f32 0.03125, %v3313_v27 }
0x11f1   :  { %v3321_v17 = vadd.f32 1e-05, %v3317_v16 }
0x11f3   :  { %13977 = vrsqrt.f32 %v3321_v17 }
0x11f4   :  { %v13972_v31 = vpop.eup %13971 }
0x11f5   :  { %v13974_v28 = vpop.eup %13973  ;;  %v3327_v63 = vmul.f32 %v13972_v31, %v15321_v22 }
0x11f6   :  { %v3326_v55 = vmul.f32 %v13974_v28, %v15323_v18 }
0x11f7   :  { %v3336_v32 = vmul.f32 %v10563_v21, %v3327_v63 }
0x11f8   :  { %v3335_v9 = vmul.f32 %v10563_v21, %v3326_v55 }
0x11f9   :  { %v13976_v14 = vpop.eup %13975  ;;  %v15421_v18 = vadd.f32 %v10564_v53, %v3336_v32 }
0x11fa   :  { %v15418_v60 = vadd.f32 %v10564_v53, %v3335_v9  ;;  %v3328_v22 = vmul.f32 %v13976_v14, %v15330_v34 }
0x11fc   :  { %11828 = vmatprep.mubr.msk.f32.mxu1 %vm170_vm1, %v15418_v60  ;;  %v3337_v13 = vmul.f32 %v10563_v21, %v3328_v22 }
0x11fd   :  { %v13978_v12 = vpop.eup %13977  ;;  %11829 = vmatmul.mubr.msk.f32.vlgmr.msra.gmra.mrb[48].mxu1 %vm170_vm1, %v15421_v18 }
0x11fe   :  { %v15427_v23 = vadd.f32 %v10564_v53, %v3337_v13  ;;  %12865 = vmatpush3.bf16.msra.mxu1 %v15359_v26  ;;  %v3329_v11 = vmul.f32 %v13978_v12, %v15335_v0  ;;  %v3643_v0 = vld [vmem:[%s17432_s1 + $0x8] sm:$0xff]  ;;  %v3472_v26 = vld [vmem:[%s17433_s2 + $0x1e0] sm:$0xff] }
0x11ff   :  { %12867 = vmatprep.subr.bf16.mxu1 %v12866_v50  ;;  %v12858_v30 = vpack.c.bf16 %v3473_v56, %v3472_v26 }
0x1200   :  { %11831 = vmatprep.mubr.msk.f32.mxu1 %vm170_vm1, %v15427_v23  ;;  %v3338_v34 = vmul.f32 %v10563_v21, %v3329_v11 }
0x1201   :  { %12859 = vmatprep.subr.bf16.mxu0 %v12858_v30 }
0x1202   :  { %v15433_v2 = vadd.f32 %v10564_v53, %v3338_v34  ;;  %12869 = vmatpush3.bf16.msra.mxu1 %v12866_v50  ;;  %12861 = vmatpush3.bf16.msra.mxu0 %v12858_v30 }
0x1204   :  { %11832 = vmatmul.mubr.msk.f32.gmra.mrb[50].mxu1 %vm170_vm1, %v15433_v2 }
0x1205   :  { %11880 = vmatprep.mubr.msk.f32.mxu1 %vm170_vm1, %v3642_v48 }
0x1208   :  { %11881 = vmatmul.mubr.msk.f32.vlgmr.msra.gmra.mrb[52].mxu1 %vm170_vm1, %v3643_v0 }
0x1209   :  { %11883 = vmatprep.mubr.msk.f32.mxu1 %vm170_vm1, %v3644_v15 }
0x120c   :  { %11884 = vmatmul.mubr.msk.f32.gmra.mrb[54].mxu1 %vm170_vm1, %v3645_v62 }
0x12d0   :  { %v11830_v42 = vpop.f32.mrb[48].mxu1 }
0x12d1   :  { %v3441_v45 = vadd.f32 %v11830_v42, %v10565_v59  ;;  %v3435_v33 = vpop.f32.mrb[49].mxu1 }
0x12d2   :  { %v3436_v6 = vadd.f32 %v10565_v59, %v3435_v33 }
0x12d3   :  { %v3455_v57 = vmax.f32 %v3441_v45, 0.0 }
0x12d4   :  { %v3454_v52 = vmax.f32 %v3436_v6, 0.0 }
0x12d6   :  { %11866 = vmatprep.mubr.f32.mxu0 %v3454_v52 }
0x12d7   :  { %v11833_v40 = vpop.f32.mrb[50].mxu1  ;;  %11867 = vmatmul.mubr.f32.vlgmr.msra.gmra.mrb[44].mxu0 %v3455_v57 }
0x12d8   :  { %v3451_v44 = vadd.f32 %v11833_v40, %v10565_v59  ;;  %v3445_v20 = vpop.f32.mrb[51].mxu1 }
0x12d9   :  { %v3446_v36 = vadd.f32 %v10565_v59, %v3445_v20 }
0x12da   :  { %v3457_v49 = vmax.f32 %v3451_v44, 0.0 }
0x12db   :  { %v3456_v61 = vmax.f32 %v3446_v36, 0.0  ;;  %v11882_v29 = vpop.f32.mrb[52].mxu1 }
0x12dc   :  { %v3739_v41 = vadd.f32 %v11882_v29, %v10573_v43  ;;  %v3733_v51 = vpop.f32.mrb[53].mxu1 }
0x12dd   :  { %v3734_v47 = vadd.f32 %v10573_v43, %v3733_v51  ;;  %11869 = vmatprep.mubr.f32.mxu0 %v3456_v61 }
0x12de   :  { %11870 = vmatmul.mubr.f32.gmra.mrb[46].mxu0 %v3457_v49  ;;  %v3753_v5 = vmul.f32 0.35355338, %v3739_v41 }
0x12df   :  { %v11885_v19 = vpop.f32.mrb[54].mxu1  ;;  %v15465_v10 = vpack.i.bf16 %v3739_v41, %v3734_v47  ;;  %v3752_v38 = vmul.f32 0.35355338, %v3734_v47 }
0x12e0   :  { %v3749_v58 = vadd.f32 %v11885_v19, %v10573_v43  ;;  %v3743_v46 = vpop.f32.mrb[55].mxu1 }
0x12e1   :  { %v3744_v4 = vadd.f32 %v10573_v43, %v3743_v46  ;;  %13528 = vrot.lane.b32.xlu1 %v15465_v10, %s14335_s7  ;;  %11894 = vmatprep.mubr.msk.f32.mxu1 %vm284_vm2, %v3752_v38 }
0x12e2   :  { %v3755_v39 = vmul.f32 0.35355338, %v3749_v58 }
0x12e3   :  { %v15470_v35 = vpack.i.bf16 %v3749_v58, %v3744_v4  ;;  %v3754_v25 = vmul.f32 0.35355338, %v3744_v4 }
0x12e5   :  { %13533 = vrot.lane.b32.xlu0 %v15470_v35, %s14335_s7  ;;  %13538 = vrot.lane.b32.xlu1 %v15465_v10, %s14336_s8 }
0x12e9   :  { %13548 = vrot.lane.b32.xlu0 %v15465_v10, %s14337_s9  ;;  %13543 = vrot.lane.b32.xlu1 %v15470_v35, %s14336_s8 }
0x12ed   :  { %13553 = vrot.lane.b32.xlu1 %v15465_v10, %s14338_s10  ;;  %3873 = vrot.lane.b32.xlu0 %v3752_v38, %s14339_s11 }
0x12f1   :  { %3875 = vrot.lane.b32.xlu1 %v3753_v5, %s14339_s11  ;;  %13558 = vrot.lane.b32.xlu0 %v15470_v35, %s14337_s9 }
0x12f5   :  { %13563 = vrot.lane.b32.xlu1 %v15470_v35, %s14338_s10  ;;  %3990 = vrot.lane.b32.xlu0 %v3752_v38, %s14340_s12 }
0x12f9   :  { %3992 = vrot.lane.b32.xlu1 %v3753_v5, %s14340_s12  ;;  %3877 = vrot.lane.b32.xlu0 %v3754_v25, %s14339_s11 }
0x12fd   :  { %3879 = vrot.lane.b32.xlu1 %v3755_v39, %s14339_s11  ;;  %4107 = vrot.lane.b32.xlu0 %v3752_v38, %s14341_s13 }
0x1301   :  { %4109 = vrot.lane.b32.xlu1 %v3753_v5, %s14341_s13  ;;  %3994 = vrot.lane.b32.xlu0 %v3754_v25, %s14340_s12 }
0x1305   :  { %3996 = vrot.lane.b32.xlu1 %v3755_v39, %s14340_s12  ;;  %4111 = vrot.lane.b32.xlu0 %v3754_v25, %s14341_s13 }
0x1309   :  { %4113 = vrot.lane.b32.xlu1 %v3755_v39, %s14341_s13  ;;  %13573 = vrot.lane.b32.xlu0 %v15470_v35, %s14343_s15 }
0x130d   :  { %13568 = vrot.lane.b32.xlu1 %v15465_v10, %s14343_s15  ;;  %13578 = vrot.lane.b32.xlu0 %v15465_v10, %s14342_s14 }
0x1353   :  { %v13529_v27 = vpop.permute.xlu1 %13528 }
0x1354   :  { %v13531_v16 = vunpack.i.h.bf16 %v13529_v27  ;;  %v13530_v17 = vunpack.i.l.bf16 %v13529_v27 }
0x1356   :  { %v12870_v31 = vpack.c.bf16 %v13531_v16, %v13530_v17 }
0x1357   :  { %v13534_v21 = vpop.permute.xlu0 %13533  ;;  %v13539_v28 = vpop.permute.xlu1 %13538 }
0x1358   :  { %v13536_v63 = vunpack.i.h.bf16 %v13534_v21  ;;  %v13535_v55 = vunpack.i.l.bf16 %v13534_v21  ;;  %12872 = vmatprep.subr.msk.bf16.mxu1 %vm14520_vm3, %v12870_v31  ;;  %v13541_v37 = vunpack.i.h.bf16 %v13539_v28  ;;  %v13540_v3 = vunpack.i.l.bf16 %v13539_v28 }
0x1359   :  { %12875 = vmatpush3.bf16.xpose.msk.msra.mxu1 %vm14520_vm3, %v12870_v31 }
0x135a   :  { %v12876_v32 = vpack.c.bf16 %v13536_v63, %v13535_v55  ;;  %v12882_v11 = vpack.c.bf16 %v13541_v37, %v13540_v3 }
0x135b   :  { %v13549_v53 = vpop.permute.xlu0 %13548  ;;  %v13544_v9 = vpop.permute.xlu1 %13543 }
0x135c   :  { %v13551_v14 = vunpack.i.h.bf16 %v13549_v53  ;;  %v13550_v22 = vunpack.i.l.bf16 %v13549_v53  ;;  %12878 = vmatprep.subr.msk.bf16.mxu1 %vm14520_vm3, %v12876_v32  ;;  %v13546_v62 = vunpack.i.h.bf16 %v13544_v9  ;;  %v13545_v26 = vunpack.i.l.bf16 %v13544_v9 }
0x135e   :  { %v12894_v50 = vpack.c.bf16 %v13551_v14, %v13550_v22  ;;  %v12888_v42 = vpack.c.bf16 %v13546_v62, %v13545_v26 }
0x135f   :  { %v13554_v13 = vpop.permute.xlu1 %13553  ;;  %v3874_v12 = vpop.permute.xlu0 %3873 }
0x1360   :  { %12896 = vmatprep.subr.msk.bf16.mxu0 %vm14520_vm3, %v12894_v50  ;;  %v13556_v6 = vunpack.i.h.bf16 %v13554_v13  ;;  %v13555_v52 = vunpack.i.l.bf16 %v13554_v13 }
0x1361   :  { %12881 = vmatpush3.bf16.xpose.msk.msra.mxu1 %vm14520_vm3, %v12876_v32  ;;  %12899 = vmatpush3.bf16.xpose.msk.msra.mxu0 %vm14520_vm3, %v12894_v50 }
0x1362   :  { %12884 = vmatprep.subr.msk.bf16.mxu1 %vm14520_vm3, %v12882_v11  ;;  %v12906_v44 = vpack.c.bf16 %v13556_v6, %v13555_v52 }
0x1363   :  { %v3876_v34 = vpop.permute.xlu1 %3875  ;;  %v13559_v48 = vpop.permute.xlu0 %13558 }
0x1364   :  { %v13561_v0 = vunpack.i.h.bf16 %v13559_v48  ;;  %v13560_v15 = vunpack.i.l.bf16 %v13559_v48 }
0x1366   :  { %v12900_v56 = vpack.c.bf16 %v13561_v0, %v13560_v15 }
0x1367   :  { %v13564_v30 = vpop.permute.xlu1 %13563  ;;  %v3991_v59 = vpop.permute.xlu0 %3990 }
0x1368   :  { %11895 = vmatmul.mubr.msk.f32.vlgmr.msra.gmra.mrb[56].mxu1 %vm284_vm2, %v3753_v5  ;;  %12902 = vmatprep.subr.msk.bf16.mxu0 %vm14520_vm3, %v12900_v56  ;;  %v13566_v43 = vunpack.i.h.bf16 %v13564_v30  ;;  %v13565_v61 = vunpack.i.l.bf16 %v13564_v30 }
0x1369   :  { %11922 = vmatprep.mubr.msk.f32.mxu0 %vm284_vm2, %v3991_v59  ;;  %11897 = vmatprep.mubr.msk.f32.mxu1 %vm284_vm2, %v3754_v25 }
0x136a   :  { %12887 = vmatpush3.bf16.xpose.msk.msra.mxu1 %vm14520_vm3, %v12882_v11  ;;  %12905 = vmatpush3.bf16.xpose.msk.msra.mxu0 %vm14520_vm3, %v12900_v56  ;;  %v12912_v41 = vpack.c.bf16 %v13566_v43, %v13565_v61 }
0x136b   :  { %12890 = vmatprep.subr.msk.bf16.mxu1 %vm14520_vm3, %v12888_v42  ;;  %v3993_v45 = vpop.permute.xlu1 %3992  ;;  %v3878_v33 = vpop.permute.xlu0 %3877 }
0x136c   :  { %11898 = vmatmul.mubr.msk.f32.gmra.mrb[58].mxu1 %vm284_vm2, %v3755_v39 }
0x136d   :  { %11908 = vmatprep.mubr.msk.f32.mxu1 %vm284_vm2, %v3874_v12 }
0x136f   :  { %v3880_v57 = vpop.permute.xlu1 %3879  ;;  %v4108_v40 = vpop.permute.xlu0 %4107 }
0x1371   :  { %11923 = vmatmul.mubr.msk.f32.vlgmr.msra.gmra.mrb[48].mxu0 %vm284_vm2, %v3993_v45 }
0x1372   :  { %12893 = vmatpush3.bf16.xpose.msk.msra.mxu1 %vm14520_vm3, %v12888_v42 }
0x1373   :  { %12908 = vmatprep.subr.msk.bf16.mxu1 %vm14520_vm3, %v12906_v44  ;;  %v4110_v20 = vpop.permute.xlu1 %4109  ;;  %v3995_v36 = vpop.permute.xlu0 %3994 }
0x1374   :  { %11925 = vmatprep.mubr.msk.f32.mxu0 %vm284_vm2, %v3995_v36 }
0x1377   :  { %v3997_v29 = vpop.permute.xlu1 %3996  ;;  %v4112_v49 = vpop.permute.xlu0 %4111 }
0x1378   :  { %11926 = vmatmul.mubr.msk.f32.gmra.mrb[50].mxu0 %vm284_vm2, %v3997_v29 }
0x1379   :  { %11909 = vmatmul.mubr.msk.f32.vlgmr.msra.gmra.mrb[60].mxu1 %vm284_vm2, %v3876_v34 }
0x137a   :  { %11911 = vmatprep.mubr.msk.f32.mxu1 %vm284_vm2, %v3878_v33  ;;  %12911 = vmatpush3.bf16.xpose.msk.msra.mxu1 %vm14520_vm3, %v12906_v44 }
0x137b   :  { %12914 = vmatprep.subr.msk.bf16.mxu1 %vm14520_vm3, %v12912_v41  ;;  %v4114_v51 = vpop.permute.xlu1 %4113  ;;  %v13574_v47 = vpop.permute.xlu0 %13573 }
0x137c   :  { %v13576_v38 = vunpack.i.h.bf16 %v13574_v47  ;;  %v13575_v58 = vunpack.i.l.bf16 %v13574_v47 }
0x137d   :  { %11912 = vmatmul.mubr.msk.f32.gmra.mrb[62].mxu1 %vm284_vm2, %v3880_v57 }
0x137e   :  { %11936 = vmatprep.mubr.msk.f32.mxu1 %vm284_vm2, %v4108_v40  ;;  %v12922_v16 = vpack.c.bf16 %v13576_v38, %v13575_v58 }
0x137f   :  { %v13569_v19 = vpop.permute.xlu1 %13568  ;;  %v13579_v5 = vpop.permute.xlu0 %13578 }
0x1380   :  { %v13571_v46 = vunpack.i.h.bf16 %v13569_v19  ;;  %v13570_v4 = vunpack.i.l.bf16 %v13569_v19  ;;  %v13581_v39 = vunpack.i.h.bf16 %v13579_v5  ;;  %v13580_v27 = vunpack.i.l.bf16 %v13579_v5 }
0x1382   :  { %12917 = vmatpush3.bf16.xpose.msk.msra.mxu1 %vm14520_vm3, %v12912_v41  ;;  %v12918_v25 = vpack.c.bf16 %v13571_v46, %v13570_v4  ;;  %v15548_v17 = vpack.c.bf16 %v13581_v39, %v13580_v27 }
0x1384   :  { %12919 = vmatprep.subr.bf16.mxu0 %v12918_v25 }
0x1385   :  { %12921 = vmatpush3.bf16.msra.mxu0 %v12918_v25 }
0x1386   :  { %12923 = vmatprep.subr.bf16.mxu0 %v12922_v16 }
0x1389   :  { %11937 = vmatmul.mubr.msk.f32.vlgmr.msra.gmra.mrb[64].mxu1 %vm284_vm2, %v4110_v20  ;;  %12925 = vmatpush3.bf16.msra.mxu0 %v12922_v16 }
0x138a   :  { %11939 = vmatprep.mubr.msk.f32.mxu1 %vm284_vm2, %v4112_v49  ;;  %12927 = vmatprep.subr.bf16.mxu0 %v15548_v17 }
0x138d   :  { %11940 = vmatmul.mubr.msk.f32.gmra.mrb[66].mxu1 %vm284_vm2, %v4114_v51 }
0x13aa   :  { %v15554_v31 = vpop.f32.mrb[44].mxu0 }
0x13ab   :  { %v15556_v21 = vpop.f32.mrb[45].mxu0 }
0x13b1   :  { %v15558_v28 = vpop.f32.mrb[46].mxu0 }
0x13b2   :  { %v15560_v63 = vpop.f32.mrb[47].mxu0 }
0x143b   :  { %v11896_v55 = vpop.f32.mrb[56].mxu1 }
0x143c   :  { %v15563_v32 = vadd.f32 %v11896_v55, %v14574_v1  ;;  %v3854_v53 = vpop.f32.mrb[57].mxu1 }
0x143d   :  { %v15574_v12 = vadd.f32 %v3854_v53, %v14583_v8 }
0x143e   :  { %v4243_v9 = vsel %vm170_vm1, %v15563_v32, -inf }
0x143f   :  { %4244 = vmax.xlane.f32.xlu1 %v4243_v9  ;;  %v11899_v37 = vpop.f32.mrb[58].mxu1  ;;  %v4240_v0 = vsel %vm170_vm1, %v15574_v12, -inf }
0x1440   :  { %v3864_v3 = vpop.f32.mrb[59].mxu1  ;;  %v15581_v48 = vadd.f32 %v11899_v37, %v14606_v24 }
0x1441   :  { %v15599_v57 = vadd.f32 %v3864_v3, %v14581_v7 }
0x1442   :  { %v4249_v45 = vsel %vm170_vm1, %v15581_v48, -inf }
0x1443   :  { %v4246_v43 = vsel %vm170_vm1, %v15599_v57, -inf }
0x1444   :  { %v11924_v14 = vpop.f32.mrb[48].mxu0 }
0x1445   :  { %v15568_v22 = vadd.f32 %v11924_v14, %v14574_v1  ;;  %v4088_v50 = vpop.f32.mrb[49].mxu0 }
0x1446   :  { %v15571_v13 = vadd.f32 %v4088_v50, %v14583_v8 }
0x1447   :  { %v4267_v11 = vsel %vm170_vm1, %v15568_v22, -inf }
0x1448   :  { %4268 = vmax.xlane.f32.xlu0 %v4267_v11  ;;  %v4264_v34 = vsel %vm170_vm1, %v15571_v13, -inf }
0x1449   :  { %4265 = vmax.xlane.f32.xlu1 %v4264_v34 }
0x144b   :  { %v11927_v15 = vpop.f32.mrb[50].mxu0 }
0x144c   :  { %v11910_v62 = vpop.f32.mrb[60].mxu1  ;;  %4241 = vmax.xlane.f32.xlu0 %v4240_v0  ;;  %v4098_v26 = vpop.f32.mrb[51].mxu0  ;;  %v15589_v59 = vadd.f32 %v11927_v15, %v14606_v24 }
0x144d   :  { %v3971_v56 = vpop.f32.mrb[61].mxu1  ;;  %v15586_v30 = vadd.f32 %v4098_v26, %v14581_v7  ;;  %v15609_v36 = vadd.f32 %v11910_v62, %v14574_v1 }
0x144e   :  { %v15592_v42 = vadd.f32 %v3971_v56, %v14583_v8  ;;  %v4273_v44 = vsel %vm170_vm1, %v15589_v59, -inf }
0x144f   :  { %v4270_v33 = vsel %vm170_vm1, %v15586_v30, -inf  ;;  %v4255_v49 = vsel %vm170_vm1, %v15609_v36, -inf }
0x1450   :  { %v11913_v6 = vpop.f32.mrb[62].mxu1  ;;  %4250 = vmax.xlane.f32.xlu0 %v4249_v45  ;;  %4271 = vmax.xlane.f32.xlu1 %v4270_v33  ;;  %v4252_v20 = vsel %vm170_vm1, %v15592_v42, -inf }
0x1451   :  { %v3981_v52 = vpop.f32.mrb[63].mxu1  ;;  %v15616_v29 = vadd.f32 %v11913_v6, %v14606_v24 }
0x1452   :  { %v15602_v40 = vadd.f32 %v3981_v52, %v14581_v7 }
0x1453   :  { %v4261_v38 = vsel %vm170_vm1, %v15616_v29, -inf }
0x1454   :  { %4274 = vmax.xlane.f32.xlu0 %v4273_v44  ;;  %4253 = vmax.xlane.f32.xlu1 %v4252_v20  ;;  %v4258_v61 = vsel %vm170_vm1, %v15602_v40, -inf }
0x1458   :  { %4247 = vmax.xlane.f32.xlu0 %v4246_v43  ;;  %4259 = vmax.xlane.f32.xlu1 %v4258_v61 }
0x145c   :  { %v11938_v41 = vpop.f32.mrb[64].mxu1  ;;  %4256 = vmax.xlane.f32.xlu0 %v4255_v49 }
0x145d   :  { %v4205_v51 = vpop.f32.mrb[65].mxu1  ;;  %v15624_v19 = vadd.f32 %v11938_v41, %v14574_v1 }
0x145e   :  { %v15621_v47 = vadd.f32 %v4205_v51, %v14583_v8 }
0x145f   :  { %v4279_v25 = vsel %vm170_vm1, %v15624_v19, -inf }
0x1460   :  { %v11941_v58 = vpop.f32.mrb[66].mxu1  ;;  %4262 = vmax.xlane.f32.xlu0 %v4261_v38  ;;  %v4276_v46 = vsel %vm170_vm1, %v15621_v47, -inf }
0x1461   :  { %v4215_v4 = vpop.f32.mrb[67].mxu1  ;;  %4277 = vmax.xlane.f32.xlu1 %v4276_v46  ;;  %v15631_v5 = vadd.f32 %v11941_v58, %v14606_v24 }
0x1462   :  { %v15642_v27 = vadd.f32 %v4215_v4, %v14581_v7 }
0x1463   :  { %v4285_v39 = vsel %vm170_vm1, %v15631_v5, -inf }
0x1464   :  { %4280 = vmax.xlane.f32.xlu0 %v4279_v25  ;;  %v4282_v16 = vsel %vm170_vm1, %v15642_v27, -inf }
0x1468   :  { %4286 = vmax.xlane.f32.xlu0 %v4285_v39 }
0x1472   :  { %13588 = vrot.lane.b32.xlu1 %v15465_v10, %s14346_s17 }
0x147e   :  { %13583 = vrot.lane.b32.xlu0 %v15470_v35, %s14342_s14 }
0x1496   :  { %4283 = vmax.xlane.f32.xlu1 %v4282_v16 }
0x14a7   :  { %13593 = vrot.lane.b32.xlu1 %v15465_v10, %s14345_s16 }
0x14cc   :  { %v4245_v55 = vpop.xlane.xlu1 %4244 }
0x14cd   :  { %v4289_v53 = vsub.f32 %v15563_v32, %v4245_v55 }
0x14cf   :  { %v4306_v9 = vmul.f32 1.442695, %v4289_v53 }
0x14d1   :  { %13979 = vpow2.f32 %v4306_v9 }
0x14d5   :  { %v4269_v37 = vpop.xlane.xlu0 %4268 }
0x14d6   :  { %v4297_v3 = vsub.f32 %v15568_v22, %v4269_v37  ;;  %v4266_v14 = vpop.xlane.xlu1 %4265 }
0x14d7   :  { %v4296_v11 = vsub.f32 %v15571_v13, %v4266_v14 }
0x14d8   :  { %v4322_v50 = vmul.f32 1.442695, %v4297_v3 }
0x14d9   :  { %v4242_v34 = vpop.xlane.xlu0 %4241  ;;  %v4320_v62 = vmul.f32 1.442695, %v4296_v11 }
0x14da   :  { %13981 = vpow2.f32 %v4322_v50  ;;  %v4288_v0 = vsub.f32 %v15574_v12, %v4242_v34 }
0x14db   :  { %v15652_v15 = vpop.eup %13979 }
0x14dc   :  { %v4304_v10 = vmul.f32 1.442695, %v4288_v0  ;;  %v4339_v32 = vsel %vm170_vm1, %v15652_v15, 0.0 }
0x14dd   :  { %v4251_v26 = vpop.xlane.xlu0 %4250  ;;  %4340 = vadd.xlane.f32.xlu0 %v4339_v32  ;;  %v4272_v56 = vpop.xlane.xlu1 %4271 }
0x14de   :  { %13983 = vpow2.f32 %v4304_v10  ;;  %v4291_v22 = vsub.f32 %v15581_v48, %v4251_v26  ;;  %v4298_v52 = vsub.f32 %v15586_v30, %v4272_v56 }
0x14df   :  { %13985 = vpow2.f32 %v4320_v62 }
0x14e0   :  { %v4310_v45 = vmul.f32 1.442695, %v4291_v22  ;;  %v4324_v49 = vmul.f32 1.442695, %v4298_v52 }
0x14e1   :  { %v4275_v13 = vpop.xlane.xlu0 %4274  ;;  %v4254_v12 = vpop.xlane.xlu1 %4253 }
0x14e2   :  { %13987 = vpow2.f32 %v4310_v45  ;;  %v4299_v33 = vsub.f32 %v15589_v59, %v4275_v13  ;;  %v4292_v41 = vsub.f32 %v15592_v42, %v4254_v12 }
0x14e4   :  { %v15658_v6 = vpop.eup %13981  ;;  %v4326_v44 = vmul.f32 1.442695, %v4299_v33 }
0x14e5   :  { %v4248_v20 = vpop.xlane.xlu0 %4247  ;;  %v4363_v43 = vsel %vm170_vm1, %v15658_v6, 0.0  ;;  %v4260_v51 = vpop.xlane.xlu1 %4259 }
0x14e6   :  { %13989 = vpow2.f32 %v4326_v44  ;;  %v4290_v61 = vsub.f32 %v15599_v57, %v4248_v20  ;;  %4364 = vadd.xlane.f32.xlu0 %v4363_v43  ;;  %v4312_v57 = vmul.f32 1.442695, %v4292_v41  ;;  %v4294_v25 = vsub.f32 %v15602_v40, %v4260_v51 }
0x14e8   :  { %v15664_v48 = vpop.eup %13983  ;;  %v4308_v59 = vmul.f32 1.442695, %v4290_v61  ;;  %v4316_v37 = vmul.f32 1.442695, %v4294_v25 }
0x14e9   :  { %v4257_v38 = vpop.xlane.xlu0 %4256  ;;  %v4336_v30 = vsel %vm170_vm1, %v15664_v48, 0.0  ;;  %v15669_v58 = vpop.eup %13985 }
0x14ea   :  { %13991 = vpow2.f32 %v4308_v59  ;;  %v4293_v46 = vsub.f32 %v15609_v36, %v4257_v38  ;;  %4337 = vadd.xlane.f32.xlu1 %v4336_v30  ;;  %v4360_v55 = vsel %vm170_vm1, %v15669_v58, 0.0 }
0x14eb   :  { %13993 = vpow2.f32 %v4324_v49 }
0x14ec   :  { %v15672_v4 = vpop.eup %13987  ;;  %v4314_v39 = vmul.f32 1.442695, %v4293_v46 }
0x14ed   :  { %v4263_v42 = vpop.xlane.xlu0 %4262  ;;  %v4345_v16 = vsel %vm170_vm1, %v15672_v4, 0.0 }
0x14ee   :  { %13995 = vpow2.f32 %v4314_v39  ;;  %v4295_v53 = vsub.f32 %v15616_v29, %v4263_v42  ;;  %4346 = vadd.xlane.f32.xlu0 %v4345_v16  ;;  %4361 = vadd.xlane.f32.xlu1 %v4360_v55  ;;  %v4278_v36 = vpop.xlane.xlu1 %4277 }
0x14ef   :  { %13997 = vpow2.f32 %v4312_v57  ;;  %v4300_v40 = vsub.f32 %v15621_v47, %v4278_v36 }
0x14f0   :  { %v15680_v9 = vpop.eup %13989  ;;  %v4318_v3 = vmul.f32 1.442695, %v4295_v53 }
0x14f1   :  { %v4281_v14 = vpop.xlane.xlu0 %4280  ;;  %v4369_v50 = vsel %vm170_vm1, %v15680_v9, 0.0  ;;  %v4328_v10 = vmul.f32 1.442695, %v4300_v40 }
0x14f2   :  { %13999 = vpow2.f32 %v4318_v3  ;;  %v4301_v11 = vsub.f32 %v15624_v19, %v4281_v14  ;;  %4370 = vadd.xlane.f32.xlu0 %v4369_v50  ;;  %v13589_v34 = vpop.permute.xlu1 %13588 }
0x14f3   :  { %v13591_v29 = vunpack.i.h.bf16 %v13589_v34  ;;  %v13590_v0 = vunpack.i.l.bf16 %v13589_v34  ;;  %14001 = vpow2.f32 %v4316_v37 }
0x14f4   :  { %v15686_v62 = vpop.eup %13991  ;;  %v4330_v32 = vmul.f32 1.442695, %v4301_v11 }
0x14f5   :  { %v4287_v26 = vpop.xlane.xlu0 %4286  ;;  %v4342_v47 = vsel %vm170_vm1, %v15686_v62, 0.0  ;;  %v12934_v56 = vpack.c.bf16 %v13591_v29, %v13590_v0  ;;  %v15690_v22 = vpop.eup %13993 }
0x14f6   :  { %14003 = vpow2.f32 %v4330_v32  ;;  %v4303_v45 = vsub.f32 %v15631_v5, %v4287_v26  ;;  %4343 = vadd.xlane.f32.xlu1 %v4342_v47  ;;  %v4366_v12 = vsel %vm170_vm1, %v15690_v22, 0.0 }
0x14f7   :  { %12935 = vmatprep.subr.bf16.mxu1 %v12934_v56  ;;  %14005 = vpow2.f32 %v4328_v10 }
0x14f8   :  { %v15693_v19 = vpop.eup %13995  ;;  %v4334_v13 = vmul.f32 1.442695, %v4303_v45  ;;  %12937 = vmatpush3.bf16.msra.mxu1 %v12934_v56 }
0x14f9   :  { %v4351_v33 = vsel %vm170_vm1, %v15693_v19, 0.0  ;;  %v15699_v52 = vpop.eup %13997  ;;  %v13584_v16 = vpop.permute.xlu0 %13583 }
0x14fa   :  { %4352 = vadd.xlane.f32.xlu0 %v4351_v33  ;;  %4367 = vadd.xlane.f32.xlu1 %v4366_v12  ;;  %14007 = vpow2.f32 %v4334_v13  ;;  %v4348_v20 = vsel %vm170_vm1, %v15699_v52, 0.0  ;;  %v13586_v50 = vunpack.i.h.bf16 %v13584_v16  ;;  %v13585_v11 = vunpack.i.l.bf16 %v13584_v16 }
0x14fc   :  { %v15701_v44 = vpop.eup %13999  ;;  %v12930_v26 = vpack.c.bf16 %v13586_v50, %v13585_v11 }
0x14fd   :  { %v4357_v5 = vsel %vm170_vm1, %v15701_v44, 0.0  ;;  %v15707_v43 = vpop.eup %14001 }
0x14fe   :  { %4358 = vadd.xlane.f32.xlu0 %v4357_v5  ;;  %4349 = vadd.xlane.f32.xlu1 %v4348_v20  ;;  %v4354_v41 = vsel %vm170_vm1, %v15707_v43, 0.0 }
0x1500   :  { %v15709_v61 = vpop.eup %14003 }
0x1501   :  { %v4375_v49 = vsel %vm170_vm1, %v15709_v61, 0.0  ;;  %v15715_v59 = vpop.eup %14005 }
0x1502   :  { %4376 = vadd.xlane.f32.xlu0 %v4375_v49  ;;  %4355 = vadd.xlane.f32.xlu1 %v4354_v41  ;;  %v4372_v51 = vsel %vm170_vm1, %v15715_v59, 0.0 }
0x1504   :  { %v15719_v38 = vpop.eup %14007 }
0x1505   :  { %v4381_v30 = vsel %vm170_vm1, %v15719_v38, 0.0 }
0x1506   :  { %4373 = vadd.xlane.f32.xlu1 %v4372_v51 }
0x150a   :  { %4382 = vadd.xlane.f32.xlu1 %v4381_v30 }
0x1518   :  { %13598 = vrot.lane.b32.xlu0 %v15470_v35, %s14346_s17 }
0x1523   :  { %v4284_v46 = vpop.xlane.xlu1 %4283 }
0x1524   :  { %v4302_v57 = vsub.f32 %v15642_v27, %v4284_v46 }
0x1526   :  { %v4332_v25 = vmul.f32 1.442695, %v4302_v57 }
0x1527   :  { %v13594_v55 = vpop.permute.xlu1 %13593 }
0x1528   :  { %14009 = vpow2.f32 %v4332_v25  ;;  %v13596_v10 = vunpack.i.h.bf16 %v13594_v55  ;;  %v13595_v32 = vunpack.i.l.bf16 %v13594_v55 }
0x1532   :  { %v15726_v39 = vpop.eup %14009 }
0x1533   :  { %v4378_v42 = vsel %vm170_vm1, %v15726_v39, 0.0 }
0x1534   :  { %4379 = vadd.xlane.f32.xlu1 %v4378_v42 }
0x1545   :  { %13603 = vrot.lane.b32.xlu1 %v15470_v35, %s14345_s16 }
0x156a   :  { %v4341_v53 = vpop.xlane.xlu0 %4340 }
0x156b   :  { %14011 = vrcp.f32 %v4341_v53 }
0x1573   :  { %v4365_v37 = vpop.xlane.xlu0 %4364 }
0x1575   :  { %v14012_v40 = vpop.eup %14011 }
0x1576   :  { %v4387_v35 = vmul.f32 %v14012_v40, %v15652_v15 }
0x1577   :  { %v4338_v36 = vpop.xlane.xlu1 %4337 }
0x1578   :  { %14013 = vrcp.f32 %v4338_v36 }
0x157b   :  { %v4362_v3 = vpop.xlane.xlu1 %4361  ;;  %v4347_v27 = vpop.xlane.xlu0 %4346 }
0x157c   :  { %14015 = vrcp.f32 %v4362_v3 }
0x157d   :  { %14017 = vrcp.f32 %v4347_v27 }
0x157f   :  { %v4371_v34 = vpop.xlane.xlu0 %4370 }
0x1582   :  { %v14014_v14 = vpop.eup %14013 }
0x1583   :  { %v4344_v29 = vpop.xlane.xlu1 %4343  ;;  %v4385_v0 = vmul.f32 %v14014_v14, %v15664_v48  ;;  %v12942_v48 = vpack.c.bf16 %v13596_v10, %v13595_v32 }
0x1584   :  { %14019 = vrcp.f32 %v4344_v29 }
0x1585   :  { %11950 = vmatprep.mubr.msk.f32.mxu0 %vm170_vm1, %v4385_v0  ;;  %14021 = vrcp.f32 %v4365_v37 }
0x1586   :  { %11951 = vmatmul.mubr.msk.f32.vlgmr.msra.gmra.mrb[52].mxu0 %vm170_vm1, %v4387_v35  ;;  %v14016_v47 = vpop.eup %14015 }
0x1587   :  { %12929 = vmatpush3.bf16.msra.mxu0 %v15548_v17  ;;  %v4353_v56 = vpop.xlane.xlu0 %4352  ;;  %v4368_v45 = vpop.xlane.xlu1 %4367  ;;  %v4401_v13 = vmul.f32 %v14016_v47, %v15669_v58 }
0x1588   :  { %12931 = vmatprep.subr.bf16.mxu0 %v12930_v26  ;;  %14023 = vrcp.f32 %v4353_v56  ;;  %v14018_v12 = vpop.eup %14017 }
0x1589   :  { %11978 = vmatprep.mubr.msk.f32.mxu1 %vm170_vm1, %v4401_v13  ;;  %v4391_v58 = vmul.f32 %v14018_v12, %v15672_v4  ;;  %v4915_v13 = vld [vmem:[%s17433_s2 + $0x228] sm:$0xff] }
0x158b   :  { %12933 = vmatpush3.bf16.msra.mxu0 %v12930_v26  ;;  %v4359_v15 = vpop.xlane.xlu0 %4358  ;;  %v4350_v33 = vpop.xlane.xlu1 %4349 }
0x158c   :  { %12943 = vmatprep.subr.bf16.mxu0 %v12942_v48  ;;  %14025 = vrcp.f32 %v4350_v33 }
0x158d   :  { %14027 = vrcp.f32 %v4368_v45 }
0x158e   :  { %v14020_v5 = vpop.eup %14019  ;;  %14029 = vrcp.f32 %v4371_v34 }
0x158f   :  { %v4377_v17 = vpop.xlane.xlu0 %4376  ;;  %v4356_v20 = vpop.xlane.xlu1 %4355  ;;  %v4389_v49 = vmul.f32 %v14020_v5, %v15686_v62  ;;  %14031 = vrcp.f32 %v4359_v15 }
0x1590   :  { %14033 = vrcp.f32 %v4356_v20  ;;  %v14022_v57 = vpop.eup %14021 }
0x1591   :  { %11953 = vmatprep.mubr.msk.f32.mxu0 %vm170_vm1, %v4389_v49  ;;  %v4403_v37 = vmul.f32 %v14022_v57, %v15658_v6  ;;  %v10570_v57 = vld [vmem:[%s17434_s3 + $0xc] ss:$0 sm:$0xff] }
0x1592   :  { %11954 = vmatmul.mubr.msk.f32.gmra.mrb[54].mxu0 %vm170_vm1, %v4391_v58  ;;  %v14024_v25 = vpop.eup %14023 }
0x1593   :  { %v13599_v41 = vpop.permute.xlu0 %13598  ;;  %v4374_v51 = vpop.xlane.xlu1 %4373  ;;  %v4395_v4 = vmul.f32 %v14024_v25, %v15693_v19  ;;  %v3546_v25 = vadd.f32 %v10570_v57, %v15556_v21 }
0x1594   :  { %v13601_v30 = vunpack.i.h.bf16 %v13599_v41  ;;  %v13600_v46 = vunpack.i.l.bf16 %v13599_v41  ;;  %14035 = vrcp.f32 %v4374_v51 }
0x1595   :  { %14037 = vrcp.f32 %v4377_v17 }
0x1596   :  { %v12938_v42 = vpack.c.bf16 %v13601_v30, %v13600_v46  ;;  %v14026_v16 = vpop.eup %14025 }
0x1597   :  { %v14028_v55 = vpop.eup %14027  ;;  %v4393_v62 = vmul.f32 %v14026_v16, %v15699_v52  ;;  %v15799_v16 = vadd.f32 %v3546_v25, %v15418_v60 }
0x1598   :  { %12939 = vmatprep.subr.bf16.mxu1 %v12938_v42  ;;  %v14030_v53 = vpop.eup %14029  ;;  %v4405_v27 = vmul.f32 %v14028_v55, %v15690_v22  ;;  %v4383_v22 = vpop.xlane.xlu1 %4382  ;;  %v3556_v55 = vadd.f32 %v10570_v57, %v15560_v63 }
0x1599   :  { %12941 = vmatpush3.bf16.msra.mxu1 %v12938_v42  ;;  %v14032_v36 = vpop.eup %14031  ;;  %11964 = vmatprep.mubr.msk.f32.mxu0 %vm170_vm1, %v4393_v62  ;;  %v4407_v6 = vmul.f32 %v14030_v53, %v15680_v9  ;;  %v3551_v42 = vadd.f32 %v15554_v31, %v10570_v57  ;;  %v3561_v53 = vadd.f32 %v15558_v28, %v10570_v57 }
0x159a   :  { %v14034_v3 = vpop.eup %14033  ;;  %11965 = vmatmul.mubr.msk.f32.vlgmr.msra.gmra.mrb[56].mxu0 %vm170_vm1, %v4395_v4  ;;  %v4399_v19 = vmul.f32 %v14032_v36, %v15701_v44  ;;  %v15805_v4 = vadd.f32 %v3556_v55, %v15427_v23  ;;  %v3568_v36 = vsel %vm170_vm1, %v15799_v16, 0.0  ;;  %v14309_v55 = vld [vmem:[%s17432_s1 + $0x18] sm:$0xff] }
0x159b   :  { %12945 = vmatpush3.bf16.msra.mxu0 %v12942_v48  ;;  %v4397_v40 = vmul.f32 %v14034_v3, %v15707_v43  ;;  %v3565_v62 = vadd.f32 %v3551_v42, %v15421_v18  ;;  %v15810_v21 = vadd.f32 %v3561_v53, %v15433_v2 }
0x159c   :  { %11979 = vmatmul.mubr.msk.f32.vlgmr.msra.gmra.mrb[68].mxu1 %vm170_vm1, %v4403_v37  ;;  %v3574_v60 = vsel %vm170_vm1, %v15805_v4, 0.0 }
0x159d   :  { %11981 = vmatprep.mubr.msk.f32.mxu1 %vm170_vm1, %v4405_v27  ;;  %11967 = vmatprep.mubr.msk.f32.mxu0 %vm170_vm1, %v4397_v40  ;;  %v3571_v31 = vsel %vm170_vm1, %v3565_v62, 0.0  ;;  %v3577_v18 = vsel %vm170_vm1, %v15810_v21, 0.0 }
0x159e   :  { %v14036_v52 = vpop.eup %14035  ;;  %11968 = vmatmul.mubr.msk.f32.gmra.mrb[58].mxu0 %vm170_vm1, %v4399_v19 }
0x159f   :  { %v4409_v14 = vmul.f32 %v14036_v52, %v15715_v59  ;;  %v14038_v29 = vpop.eup %14037 }
0x15a0   :  { %11982 = vmatmul.mubr.msk.f32.gmra.mrb[70].mxu1 %vm170_vm1, %v4407_v6  ;;  %v4411_v0 = vmul.f32 %v14038_v29, %v15709_v61  ;;  %v4912_v61 = vld [vmem:[%s17433_s2 + $0x210] sm:$0xff] }
0x15a1   :  { %11992 = vmatprep.mubr.msk.f32.mxu0 %vm170_vm1, %v4409_v14 }
0x15c1   :  { %v4380_v43 = vpop.xlane.xlu1 %4379 }
0x15c2   :  { %14039 = vrcp.f32 %v4380_v43 }
0x15c3   :  { %14041 = vrcp.f32 %v4383_v22 }
0x15c5   :  { %v13604_v50 = vpop.permute.xlu1 %13603 }
0x15c6   :  { %v13606_v44 = vunpack.i.h.bf16 %v13604_v50  ;;  %v13605_v11 = vunpack.i.l.bf16 %v13604_v50 }
0x15c8   :  { %v12946_v34 = vpack.c.bf16 %v13606_v44, %v13605_v11 }
0x15ca   :  { %12947 = vmatprep.subr.bf16.mxu0 %v12946_v34 }
0x15cb   :  { %12949 = vmatpush3.bf16.msra.mxu0 %v12946_v34 }
0x15cc   :  { %v14040_v9 = vpop.eup %14039 }
0x15cd   :  { %v14042_v59 = vpop.eup %14041  ;;  %v4413_v35 = vmul.f32 %v14040_v9, %v15726_v39  ;;  %v4913_v39 = vld [vmem:[%s17433_s2 + $0x218] sm:$0xff] }
0x15ce   :  { %11993 = vmatmul.mubr.msk.f32.vlgmr.msra.gmra.mrb[60].mxu0 %vm170_vm1, %v4411_v0  ;;  %v4415_v10 = vmul.f32 %v14042_v59, %v15719_v38  ;;  %v4914_v38 = vld [vmem:[%s17433_s2 + $0x220] sm:$0xff]  ;;  %v12950_v45 = vpack.c.bf16 %v4913_v39, %v4912_v61 }
0x15cf   :  { %11995 = vmatprep.mubr.msk.f32.mxu0 %vm170_vm1, %v4413_v35  ;;  %v12954_v48 = vpack.c.bf16 %v4915_v13, %v4914_v38  ;;  %v14307_v38 = vld [vmem:[%s17432_s1 + $0x8] sm:$0xff] }
0x15d0   :  { %12951 = vmatprep.subr.bf16.mxu1 %v12950_v45 }
0x15d1   :  { %12953 = vmatpush3.bf16.msra.mxu1 %v12950_v45 }
0x15d2   :  { %11996 = vmatmul.mubr.msk.f32.gmra.mrb[62].mxu0 %vm170_vm1, %v4415_v10  ;;  %12955 = vmatprep.subr.bf16.mxu1 %v12954_v48 }
0x15d5   :  { %12957 = vmatpush3.bf16.msra.mxu1 %v12954_v48  ;;  %v14308_v48 = vld [vmem:[%s17432_s1] sm:$0xff] }
0x1659   :  { %v11952_v32 = vpop.f32.mrb[52].mxu0 }
0x165a   :  { %v4506_v26 = vpop.f32.mrb[53].mxu0 }
0x1665   :  { %v15765_v47 = vpop.f32.mrb[54].mxu0 }
0x1666   :  { %v15767_v56 = vpop.f32.mrb[55].mxu0 }
0x166d   :  { %v11966_v15 = vpop.f32.mrb[56].mxu0 }
0x166e   :  { %v4615_v33 = vpop.f32.mrb[57].mxu0 }
0x166f   :  { %v11980_v12 = vpop.f32.mrb[68].mxu1 }
0x1670   :  { %4874 = vrot.lane.b32.xlu1 %v11980_v12, %s14348_s26  ;;  %v4724_v5 = vpop.f32.mrb[69].mxu1 }
0x1671   :  { %4872 = vrot.lane.b32.xlu0 %v4724_v5, %s14348_s26  ;;  %v11969_v17 = vpop.f32.mrb[58].mxu0 }
0x1672   :  { %v4625_v20 = vpop.f32.mrb[59].mxu0 }
0x1673   :  { %v11983_v49 = vpop.f32.mrb[70].mxu1 }
0x1674   :  { %4858 = vrot.lane.b32.xlu1 %v11966_v15, %s14347_s22  ;;  %v4734_v58 = vpop.f32.mrb[71].mxu1 }
0x1675   :  { %4856 = vrot.lane.b32.xlu0 %v4615_v33, %s14347_s22 }
0x16a1   :  { %v11994_v41 = vpop.f32.mrb[60].mxu0 }
0x16a2   :  { %v4833_v51 = vpop.f32.mrb[61].mxu0  ;;  %4890 = vrot.lane.b32.xlu1 %v11994_v41, %s14349_s27 }
0x16a3   :  { %4888 = vrot.lane.b32.xlu0 %v4833_v51, %s14349_s27 }
0x16a5   :  { %v11997_v30 = vpop.f32.mrb[62].mxu0 }
0x16a6   :  { %v4843_v46 = vpop.f32.mrb[63].mxu0  ;;  %4862 = vrot.lane.b32.xlu1 %v11969_v17, %s14347_s22 }
0x16a7   :  { %4860 = vrot.lane.b32.xlu0 %v4625_v20, %s14347_s22 }
0x16aa   :  { %4878 = vrot.lane.b32.xlu1 %v11983_v49, %s14348_s26 }
0x16ab   :  { %4876 = vrot.lane.b32.xlu0 %v4734_v58, %s14348_s26 }
0x16ae   :  { %4894 = vrot.lane.b32.xlu1 %v11997_v30, %s14349_s27 }
0x16af   :  { %4892 = vrot.lane.b32.xlu0 %v4843_v46, %s14349_s27 }
0x16ce   :  { %3569 = vadd.xlane.f32.xlu0 %v3568_v36  ;;  %v14310_v36 = vld [vmem:[%s17432_s1 + $0x10] sm:$0xff]  ;;  %s14350_s1 = smov [#allocation2]  }
0x16cf   :  { %s10419_s30 = sshll.u32 %s14350_s1, 4  ;;  %s10420_s30 = int_to_ptr.vmem [resolvable:$true] %s10419_s30 }
0x16d0   :  { %s14311_s6 = scalar_lea.vmem %s10420_s30, 512  ;;  %p14316_p1 = scmp.lt.s32.totalorder %s10420_s30, %s10420_s30 }
0x16d1   :  { %p14312_p0 = scmp.ne.s32.totalorder %s10420_s30, %s14311_s6  ;;  %p14317_p2 = scmp.lt.s32.totalorder %s14311_s6, %s14311_s6 }
0x16d2   :  { %3572 = vadd.xlane.f32.xlu1 %v3571_v31  ;;  %3575 = vadd.xlane.f32.xlu0 %v3574_v60 }
0x16d3   :  { %p14318_p3 = por %p14317_p2, %p14316_p1 }
0x16d5   :  { %p14319_p4 = pnand %p14318_p3, %p14312_p0 }
0x16d6   :  { %3578 = vadd.xlane.f32.xlu0 %v3577_v18 }
0x16e2   :  { %v4875_v28 = vpop.permute.xlu1 %4874 }
0x16e3   :  { %v4873_v23 = vpop.permute.xlu0 %4872 }
0x16e6   :  { %v4859_v37 = vpop.permute.xlu1 %4858 }
0x16e7   :  { %v4857_v63 = vpop.permute.xlu0 %4856  ;;  %v4901_v2 = vsel %vm284_vm2, %v11952_v32, %v4859_v37 }
0x16e8   :  { %v4900_v3 = vsel %vm284_vm2, %v4506_v26, %v4857_v63  ;;  %v4905_v52 = vsel %vm1421_vm8, %v4901_v2, %v4875_v28  ;;  %v10626_v26 = vld [vmem:[%s17434_s3 + $0x12] ss:$0 sm:$0xff] }
0x16e9   :  { %v4904_v40 = vsel %vm1421_vm8, %v4900_v3, %v4873_v23 }
0x1714   :  { %v4891_v27 = vpop.permute.xlu1 %4890 }
0x1715   :  { %v4889_v19 = vpop.permute.xlu0 %4888  ;;  %v4909_v14 = vsel %vm1426_vm9, %v4905_v52, %v4891_v27  ;;  %v5198_v27 = vld [vmem:[%s17433_s2 + $0x250] sm:$0xff]  ;;  %v5200_v52 = vld [vmem:[%s17433_s2 + $0x260] sm:$0xff] }
0x1716   :  { %v4908_v6 = vsel %vm1426_vm9, %v4904_v40, %v4889_v19  ;;  %v5199_v40 = vld [vmem:[%s17433_s2 + $0x258] sm:$0xff] }
0x1717   :  { %12006 = vmatprep.mubr.msk.f32.mxu1 %vm170_vm1, %v4908_v6  ;;  %v12966_v19 = vpack.c.bf16 %v5199_v40, %v5198_v27  ;;  %v5201_v6 = vld [vmem:[%s17433_s2 + $0x268] sm:$0xff] }
0x1718   :  { %v4863_v22 = vpop.permute.xlu1 %4862  ;;  %12007 = vmatmul.mubr.msk.f32.vlgmr.msra.gmra.mrb[72].mxu1 %vm170_vm1, %v4909_v14  ;;  %v12970_v14 = vpack.c.bf16 %v5201_v6, %v5200_v52 }
0x1719   :  { %v4861_v43 = vpop.permute.xlu0 %4860  ;;  %v4903_v29 = vsel %vm284_vm2, %v15765_v47, %v4863_v22  ;;  %12967 = vmatprep.subr.bf16.mxu1 %v12966_v19 }
0x171a   :  { %v4902_v11 = vsel %vm284_vm2, %v15767_v56, %v4861_v43  ;;  %12969 = vmatpush3.bf16.msra.mxu1 %v12966_v19 }
0x171b   :  { %12971 = vmatprep.subr.bf16.mxu1 %v12970_v14 }
0x171c   :  { %v4879_v50 = vpop.permute.xlu1 %4878 }
0x171d   :  { %v4877_v44 = vpop.permute.xlu0 %4876  ;;  %v4907_v59 = vsel %vm1421_vm8, %v4903_v29, %v4879_v50 }
0x171e   :  { %v4906_v9 = vsel %vm1421_vm8, %v4902_v11, %v4877_v44  ;;  %12973 = vmatpush3.bf16.msra.mxu1 %v12970_v14 }
0x1720   :  { %v4895_v34 = vpop.permute.xlu1 %4894 }
0x1721   :  { %v4893_v0 = vpop.permute.xlu0 %4892  ;;  %v4911_v10 = vsel %vm1426_vm9, %v4907_v59, %v4895_v34 }
0x1722   :  { %v4910_v35 = vsel %vm1426_vm9, %v4906_v9, %v4893_v0 }
0x1723   :  { %12009 = vmatprep.mubr.msk.f32.mxu1 %vm170_vm1, %v4910_v35 }
0x1724   :  { %12010 = vmatmul.mubr.msk.f32.gmra.mrb[74].mxu1 %vm170_vm1, %v4911_v10 }
0x175b   :  { %v3570_v32 = vpop.xlane.xlu0 %3569 }
0x175c   :  { %v3580_v20 = vmul.f32 0.03125, %v3570_v32 }
0x175e   :  { %v15849_v57 = vsub.f32 %v15799_v16, %v3580_v20 }
0x175f   :  { %v3576_v13 = vpop.xlane.xlu0 %3575  ;;  %v3573_v12 = vpop.xlane.xlu1 %3572 }
0x1760   :  { %v3581_v17 = vmul.f32 0.03125, %v3573_v12  ;;  %v3582_v25 = vmul.f32 0.03125, %v3576_v13  ;;  %v3588_v28 = vmul.f32 %v15849_v57, %v15849_v57 }
0x1762   :  { %v15846_v41 = vsub.f32 %v3565_v62, %v3581_v17  ;;  %v15864_v18 = vsub.f32 %v15805_v4, %v3582_v25  ;;  %v3592_v37 = vsel %vm170_vm1, %v3588_v28, 0.0  ;;  %v10571_v25 = vld [vmem:[%s17434_s3 + $0xf] ss:$0 sm:$0xff] }
0x1763   :  { %v3579_v49 = vpop.xlane.xlu0 %3578 }
0x1764   :  { %v3583_v51 = vmul.f32 0.03125, %v3579_v49  ;;  %v3589_v16 = vmul.f32 %v15846_v41, %v15846_v41  ;;  %v3590_v3 = vmul.f32 %v15864_v18, %v15864_v18 }
0x1766   :  { %v15858_v62 = vsub.f32 %v15810_v21, %v3583_v51  ;;  %v3595_v63 = vsel %vm170_vm1, %v3589_v16, 0.0  ;;  %v3598_v2 = vsel %vm170_vm1, %v3590_v3, 0.0 }
0x1768   :  { %v3591_v21 = vmul.f32 %v15858_v62, %v15858_v62 }
0x176a   :  { %v3601_v4 = vsel %vm170_vm1, %v3591_v21, 0.0  ;;  %v5092_v21 = vld [vmem:[%s17433_s2 + $0x230] sm:$0xff] }
0x17eb   :  { %v12008_v56 = vpop.f32.mrb[72].mxu1 }
0x17ec   :  { %v5005_v47 = vadd.f32 %v12008_v56, %v10626_v26  ;;  %v4999_v61 = vpop.f32.mrb[73].mxu1 }
0x17ed   :  { %v5000_v39 = vadd.f32 %v10626_v26, %v4999_v61 }
0x17ee   :  { %v5019_v45 = vadd.f32 %v14307_v38, %v5005_v47 }
0x17ef   :  { %v5018_v15 = vadd.f32 %v14308_v48, %v5000_v39 }
0x17f0   :  { %v5025_v33 = vsel %vm170_vm1, %v5019_v45, 0.0 }
0x17f1   :  { %5026 = vadd.xlane.f32.xlu0 %v5025_v33  ;;  %v5022_v5 = vsel %vm170_vm1, %v5018_v15, 0.0 }
0x17f2   :  { %5023 = vadd.xlane.f32.xlu1 %v5022_v5 }
0x17f7   :  { %v12011_v58 = vpop.f32.mrb[74].mxu1 }
0x17f8   :  { %v5015_v30 = vadd.f32 %v12011_v58, %v10626_v26  ;;  %v5009_v46 = vpop.f32.mrb[75].mxu1 }
0x17f9   :  { %v5010_v42 = vadd.f32 %v10626_v26, %v5009_v46 }
0x17fa   :  { %v5021_v53 = vadd.f32 %v14309_v55, %v5015_v30 }
0x17fb   :  { %v5020_v31 = vadd.f32 %v14310_v36, %v5010_v42  ;;  %v10572_v36 = vld [vmem:[%s17434_s3 + $0x10] ss:$0 sm:$0xff] }
0x17fc   :  { %v5031_v60 = vsel %vm170_vm1, %v5021_v53, 0.0 }
0x17fd   :  { %5032 = vadd.xlane.f32.xlu0 %v5031_v60  ;;  %v5028_v23 = vsel %vm170_vm1, %v5020_v31, 0.0 }
0x17fe   :  { %5029 = vadd.xlane.f32.xlu1 %v5028_v23 }
0x1801   :  { %3596 = vadd.xlane.f32.xlu0 %v3595_v63 }
0x1802   :  { %3593 = vadd.xlane.f32.xlu1 %v3592_v37 }
0x1805   :  { %3602 = vadd.xlane.f32.xlu0 %v3601_v4 }
0x1806   :  { %3599 = vadd.xlane.f32.xlu1 %v3598_v2  ;;  %v5094_v2 = vld [vmem:[%s17433_s2 + $0x240] sm:$0xff] }
0x187e   :  { %v5027_v22 = vpop.xlane.xlu0 %5026 }
0x187f   :  { %v5035_v43 = vmul.f32 0.03125, %v5027_v22  ;;  %v5024_v50 = vpop.xlane.xlu1 %5023 }
0x1880   :  { %v5034_v44 = vmul.f32 0.03125, %v5024_v50 }
0x1881   :  { %v15889_v11 = vsub.f32 %v5019_v45, %v5035_v43 }
0x1882   :  { %v15891_v34 = vsub.f32 %v5018_v15, %v5034_v44 }
0x1883   :  { %v5043_v29 = vmul.f32 %v15889_v11, %v15889_v11 }
0x1884   :  { %v5042_v9 = vmul.f32 %v15891_v34, %v15891_v34 }
0x1885   :  { %v5049_v0 = vsel %vm170_vm1, %v5043_v29, 0.0 }
0x1886   :  { %5050 = vadd.xlane.f32.xlu0 %v5049_v0  ;;  %v5046_v59 = vsel %vm170_vm1, %v5042_v9, 0.0 }
0x1887   :  { %5047 = vadd.xlane.f32.xlu1 %v5046_v59 }
0x188a   :  { %v5033_v35 = vpop.xlane.xlu0 %5032 }
0x188b   :  { %v5037_v10 = vmul.f32 0.03125, %v5033_v35  ;;  %v5030_v32 = vpop.xlane.xlu1 %5029 }
0x188c   :  { %v5036_v26 = vmul.f32 0.03125, %v5030_v32 }
0x188d   :  { %v15899_v56 = vsub.f32 %v5021_v53, %v5037_v10  ;;  %v10631_v10 = vld [vmem:[%s17434_s3 + $0x18] ss:$0 sm:$0xff] }
0x188e   :  { %v15901_v47 = vsub.f32 %v5020_v31, %v5036_v26  ;;  %v3597_v61 = vpop.xlane.xlu0 %3596 }
0x188f   :  { %v3605_v39 = vmul.f32 0.03125, %v3597_v61  ;;  %v3594_v38 = vpop.xlane.xlu1 %3593  ;;  %v5045_v45 = vmul.f32 %v15899_v56, %v15899_v56 }
0x1890   :  { %v3604_v13 = vmul.f32 0.03125, %v3594_v38  ;;  %v5044_v48 = vmul.f32 %v15901_v47, %v15901_v47 }
0x1891   :  { %v3609_v15 = vadd.f32 1e-05, %v3605_v39  ;;  %v5055_v33 = vsel %vm170_vm1, %v5045_v45, 0.0  ;;  %v10632_v45 = vld [vmem:[%s17434_s3 + $0x19] ss:$0 sm:$0xff] }
0x1892   :  { %v3608_v12 = vadd.f32 1e-05, %v3604_v13  ;;  %5056 = vadd.xlane.f32.xlu0 %v5055_v33  ;;  %v3603_v5 = vpop.xlane.xlu0 %3602  ;;  %v5052_v17 = vsel %vm170_vm1, %v5044_v48, 0.0 }
0x1893   :  { %14043 = vrsqrt.f32 %v3609_v15  ;;  %v3607_v20 = vmul.f32 0.03125, %v3603_v5  ;;  %5053 = vadd.xlane.f32.xlu1 %v5052_v17  ;;  %v3600_v49 = vpop.xlane.xlu1 %3599 }
0x1894   :  { %14045 = vrsqrt.f32 %v3608_v12  ;;  %v3606_v58 = vmul.f32 0.03125, %v3600_v49 }
0x1895   :  { %v3611_v51 = vadd.f32 1e-05, %v3607_v20 }
0x1896   :  { %v3610_v30 = vadd.f32 1e-05, %v3606_v58  ;;  %v10638_v58 = vld [vmem:[%s17434_s3 + $0x14] ss:$0 sm:$0xff] }
0x1897   :  { %14047 = vrsqrt.f32 %v3611_v51 }
0x1898   :  { %14049 = vrsqrt.f32 %v3610_v30 }
0x189d   :  { %v14044_v46 = vpop.eup %14043 }
0x189e   :  { %v14046_v42 = vpop.eup %14045  ;;  %v3617_v55 = vmul.f32 %v14044_v46, %v15846_v41  ;;  %v5093_v41 = vld [vmem:[%s17433_s2 + $0x238] sm:$0xff] }
0x189f   :  { %v3616_v53 = vmul.f32 %v14046_v42, %v15849_v57  ;;  %v12958_v3 = vpack.c.bf16 %v5093_v41, %v5092_v21 }
0x18a0   :  { %v3626_v31 = vmul.f32 %v10571_v25, %v3617_v55 }
0x18a1   :  { %v14048_v60 = vpop.eup %14047  ;;  %v3625_v16 = vmul.f32 %v10571_v25, %v3616_v53  ;;  %12959 = vmatprep.subr.bf16.mxu0 %v12958_v3 }
0x18a2   :  { %v14050_v23 = vpop.eup %14049  ;;  %v15917_v28 = vadd.f32 %v10572_v36, %v3626_v31  ;;  %v3619_v63 = vmul.f32 %v14048_v60, %v15858_v62  ;;  %12961 = vmatpush3.bf16.msra.mxu0 %v12958_v3 }
0x18a3   :  { %v15926_v57 = vadd.f32 %v10572_v36, %v3625_v16  ;;  %v3618_v37 = vmul.f32 %v14050_v23, %v15864_v18  ;;  %v5095_v18 = vld [vmem:[%s17433_s2 + $0x248] sm:$0xff] }
0x18a4   :  { %3639 = vst.msk [vmem:[#allocation2 + $0x8] sm:$0xff] %vm170_vm1, %v15917_v28  ;;  %v3628_v4 = vmul.f32 %v10571_v25, %v3619_v63  ;;  %v12962_v40 = vpack.c.bf16 %v5095_v18, %v5094_v2 }
0x18a5   :  { %3638 = vst.msk [vmem:[#allocation2] sm:$0xff] %vm170_vm1, %v15926_v57  ;;  %12034 = vmatprep.mubr.msk.f32.mxu1 %vm170_vm1, %v15926_v57  ;;  %v3627_v62 = vmul.f32 %v10571_v25, %v3618_v37 }
0x18a6   :  { %12035 = vmatmul.mubr.msk.f32.vlgmr.msra.gmra.mrb[76].mxu1 %vm170_vm1, %v15917_v28  ;;  %v15943_v27 = vadd.f32 %v10572_v36, %v3628_v4  ;;  %12963 = vmatprep.subr.bf16.mxu0 %v12962_v40 }
0x18a7   :  { %v15945_v19 = vadd.f32 %v10572_v36, %v3627_v62  ;;  %12965 = vmatpush3.bf16.msra.mxu0 %v12962_v40 }
0x18a8   :  { %3641 = vst.msk [vmem:[#allocation2 + $0x18] sm:$0xff] %vm170_vm1, %v15943_v27 }
0x18a9   :  { %3640 = vst.msk [vmem:[#allocation2 + $0x10] sm:$0xff] %vm170_vm1, %v15945_v19  ;;  %12037 = vmatprep.mubr.msk.f32.mxu1 %vm170_vm1, %v15945_v19 }
0x18aa   :  { %12038 = vmatmul.mubr.msk.f32.gmra.mrb[78].mxu1 %vm170_vm1, %v15943_v27 }
0x1913   :  { %v5051_v52 = vpop.xlane.xlu0 %5050 }
0x1914   :  { %v5059_v6 = vmul.f32 0.03125, %v5051_v52  ;;  %v5048_v14 = vpop.xlane.xlu1 %5047 }
0x1915   :  { %v5058_v22 = vmul.f32 0.03125, %v5048_v14 }
0x1916   :  { %v5063_v43 = vadd.f32 1e-05, %v5059_v6 }
0x1917   :  { %v5062_v50 = vadd.f32 1e-05, %v5058_v22  ;;  %v10633_v22 = vld [vmem:[%s17434_s3 + $0x13] ss:$0 sm:$0xff] }
0x1918   :  { %14051 = vrsqrt.f32 %v5063_v43 }
0x1919   :  { %14053 = vrsqrt.f32 %v5062_v50 }
0x191f   :  { %v5057_v44 = vpop.xlane.xlu0 %5056 }
0x1920   :  { %v5061_v29 = vmul.f32 0.03125, %v5057_v44  ;;  %v5054_v9 = vpop.xlane.xlu1 %5053 }
0x1921   :  { %v5060_v0 = vmul.f32 0.03125, %v5054_v9 }
0x1922   :  { %v14052_v59 = vpop.eup %14051  ;;  %v5065_v35 = vadd.f32 1e-05, %v5061_v29 }
0x1923   :  { %v14054_v32 = vpop.eup %14053  ;;  %v5071_v26 = vmul.f32 %v14052_v59, %v15889_v11  ;;  %v5064_v61 = vadd.f32 1e-05, %v5060_v0 }
0x1924   :  { %14055 = vrsqrt.f32 %v5065_v35  ;;  %v5070_v39 = vmul.f32 %v14054_v32, %v15891_v34 }
0x1925   :  { %14057 = vrsqrt.f32 %v5064_v61  ;;  %v5080_v38 = vmul.f32 %v10631_v10, %v5071_v26 }
0x1926   :  { %v5079_v13 = vmul.f32 %v10631_v10, %v5070_v39 }
0x1927   :  { %v15965_v15 = vadd.f32 %v10632_v45, %v5080_v38 }
0x1928   :  { %v15963_v48 = vadd.f32 %v10632_v45, %v5079_v13 }
0x192a   :  { %12020 = vmatprep.mubr.msk.f32.mxu0 %vm170_vm1, %v15963_v48 }
0x192b   :  { %12021 = vmatmul.mubr.msk.f32.vlgmr.msra.gmra.mrb[64].mxu0 %vm170_vm1, %v15965_v15 }
0x192e   :  { %v14056_v11 = vpop.eup %14055 }
0x192f   :  { %v14058_v33 = vpop.eup %14057  ;;  %v5073_v34 = vmul.f32 %v14056_v11, %v15899_v56 }
0x1930   :  { %v5072_v12 = vmul.f32 %v14058_v33, %v15901_v47 }
0x1931   :  { %v5082_v5 = vmul.f32 %v10631_v10, %v5073_v34 }
0x1932   :  { %v5081_v17 = vmul.f32 %v10631_v10, %v5072_v12 }
0x1933   :  { %v15975_v49 = vadd.f32 %v10632_v45, %v5082_v5 }
0x1934   :  { %v15973_v20 = vadd.f32 %v10632_v45, %v5081_v17 }
0x1936   :  { %12023 = vmatprep.mubr.msk.f32.mxu0 %vm170_vm1, %v15973_v20 }
0x1937   :  { %12024 = vmatmul.mubr.msk.f32.gmra.mrb[66].mxu0 %vm170_vm1, %v15975_v49 }
0x1979   :  { %v12036_v51 = vpop.f32.mrb[76].mxu1 }
0x197a   :  { %v5291_v56 = vadd.f32 %v12036_v51, %v10638_v58  ;;  %v5285_v30 = vpop.f32.mrb[77].mxu1 }
0x197b   :  { %v5286_v47 = vadd.f32 %v10638_v58, %v5285_v30 }
0x197d   :  { %v12039_v46 = vpop.f32.mrb[78].mxu1  ;;  %v15984_v25 = vpack.i.bf16 %v5291_v56, %v5286_v47  ;;  %v12974_v42 = vpack.c.bf16 %v5291_v56, %v5286_v47 }
0x197e   :  { %v5301_v55 = vadd.f32 %v12039_v46, %v10638_v58  ;;  %v5295_v53 = vpop.f32.mrb[79].mxu1 }
0x197f   :  { %v5296_v36 = vadd.f32 %v10638_v58, %v5295_v53  ;;  %13608 = vrot.lane.b32.xlu1 %v15984_v25, %s14339_s11  ;;  %12976 = vmatprep.subr.msk.bf16.mxu0 %vm14520_vm3, %v12974_v42 }
0x1980   :  { %12979 = vmatpush3.bf16.xpose.msk.msra.mxu0 %vm14520_vm3, %v12974_v42 }
0x1981   :  { %v15992_v31 = vpack.i.bf16 %v5301_v55, %v5296_v36  ;;  %v12980_v60 = vpack.c.bf16 %v5301_v55, %v5296_v36 }
0x1983   :  { %13618 = vrot.lane.b32.xlu1 %v15984_v25, %s14340_s12  ;;  %13613 = vrot.lane.b32.xlu0 %v15992_v31, %s14339_s11 }
0x1984   :  { %12982 = vmatprep.subr.msk.bf16.mxu0 %vm14520_vm3, %v12980_v60 }
0x1987   :  { %13623 = vrot.lane.b32.xlu1 %v15984_v25, %s14341_s13 }
0x1988   :  { %12985 = vmatpush3.bf16.xpose.msk.msra.mxu0 %vm14520_vm3, %v12980_v60 }
0x19f1   :  { %v13609_v16 = vpop.permute.xlu1 %13608 }
0x19f2   :  { %v13611_v23 = vunpack.i.h.bf16 %v13609_v16  ;;  %v13610_v63 = vunpack.i.l.bf16 %v13609_v16 }
0x19f4   :  { %v12986_v21 = vpack.c.bf16 %v13611_v23, %v13610_v63 }
0x19f5   :  { %v13619_v41 = vpop.permute.xlu1 %13618  ;;  %v13614_v37 = vpop.permute.xlu0 %13613 }
0x19f6   :  { %v13621_v3 = vunpack.i.h.bf16 %v13619_v41  ;;  %v13620_v4 = vunpack.i.l.bf16 %v13619_v41  ;;  %v13616_v62 = vunpack.i.h.bf16 %v13614_v37  ;;  %v13615_v2 = vunpack.i.l.bf16 %v13614_v37  ;;  %12988 = vmatprep.subr.msk.bf16.mxu1 %vm14520_vm3, %v12986_v21 }
0x19f7   :  { %12991 = vmatpush3.bf16.xpose.msk.msra.mxu1 %vm14520_vm3, %v12986_v21 }
0x19f8   :  { %v12998_v18 = vpack.c.bf16 %v13621_v3, %v13620_v4  ;;  %v12992_v40 = vpack.c.bf16 %v13616_v62, %v13615_v2 }
0x19f9   :  { %v13624_v52 = vpop.permute.xlu1 %13623 }
0x19fa   :  { %v13626_v6 = vunpack.i.h.bf16 %v13624_v52  ;;  %v13625_v14 = vunpack.i.l.bf16 %v13624_v52  ;;  %12994 = vmatprep.subr.msk.bf16.mxu1 %vm14520_vm3, %v12992_v40  ;;  %13000 = vmatprep.subr.msk.bf16.mxu0 %vm14520_vm3, %v12998_v18 }
0x19fc   :  { %v13010_v43 = vpack.c.bf16 %v13626_v6, %v13625_v14 }
0x19fe   :  { %v12022_v50 = vpop.f32.mrb[64].mxu0 }
0x19ff   :  { %v5185_v44 = vadd.f32 %v12022_v50, %v10633_v22  ;;  %v5179_v29 = vpop.f32.mrb[65].mxu0  ;;  %12997 = vmatpush3.bf16.xpose.msk.msra.mxu1 %vm14520_vm3, %v12992_v40 }
0x1a00   :  { %v5180_v9 = vadd.f32 %v10633_v22, %v5179_v29  ;;  %13012 = vmatprep.subr.msk.bf16.mxu1 %vm14520_vm3, %v13010_v43 }
0x1a01   :  { %v5305_v0 = vmul.f32 0.35355338, %v5185_v44 }
0x1a02   :  { %v5304_v59 = vmul.f32 0.35355338, %v5180_v9 }
0x1a03   :  { %5419 = vrot.lane.b32.xlu1 %v5305_v0, %s14339_s11 }
0x1a04   :  { %5417 = vrot.lane.b32.xlu0 %v5304_v59, %s14339_s11  ;;  %12048 = vmatprep.mubr.msk.f32.mxu0 %vm284_vm2, %v5304_v59 }
0x1a05   :  { %12049 = vmatmul.mubr.msk.f32.vlgmr.msra.gmra.mrb[68].mxu0 %vm284_vm2, %v5305_v0 }
0x1a06   :  { %13003 = vmatpush3.bf16.xpose.msk.msra.mxu0 %vm14520_vm3, %v12998_v18 }
0x1a07   :  { %13633 = vrot.lane.b32.xlu1 %v15992_v31, %s14341_s13 }
0x1a08   :  { %13628 = vrot.lane.b32.xlu0 %v15992_v31, %s14340_s12 }
0x1a0a   :  { %v12025_v35 = vpop.f32.mrb[66].mxu0 }
0x1a0b   :  { %v5195_v10 = vadd.f32 %v12025_v35, %v10633_v22  ;;  %5536 = vrot.lane.b32.xlu1 %v5305_v0, %s14340_s12  ;;  %v5189_v32 = vpop.f32.mrb[67].mxu0 }
0x1a0c   :  { %v5190_v26 = vadd.f32 %v10633_v22, %v5189_v32  ;;  %5534 = vrot.lane.b32.xlu0 %v5304_v59, %s14340_s12 }
0x1a0d   :  { %v5307_v61 = vmul.f32 0.35355338, %v5195_v10 }
0x1a0e   :  { %v5306_v39 = vmul.f32 0.35355338, %v5190_v26 }
0x1a0f   :  { %5423 = vrot.lane.b32.xlu1 %v5307_v61, %s14339_s11 }
0x1a10   :  { %5421 = vrot.lane.b32.xlu0 %v5306_v39, %s14339_s11  ;;  %12051 = vmatprep.mubr.msk.f32.mxu0 %vm284_vm2, %v5306_v39 }
0x1a11   :  { %12052 = vmatmul.mubr.msk.f32.gmra.mrb[70].mxu0 %vm284_vm2, %v5307_v61 }
0x1a13   :  { %5653 = vrot.lane.b32.xlu1 %v5305_v0, %s14341_s13 }
0x1a14   :  { %5651 = vrot.lane.b32.xlu0 %v5304_v59, %s14341_s13 }
0x1a17   :  { %5540 = vrot.lane.b32.xlu1 %v5307_v61, %s14340_s12 }
0x1a18   :  { %5538 = vrot.lane.b32.xlu0 %v5306_v39, %s14340_s12 }
0x1a1b   :  { %5657 = vrot.lane.b32.xlu1 %v5307_v61, %s14341_s13 }
0x1a1c   :  { %5655 = vrot.lane.b32.xlu0 %v5306_v39, %s14341_s13 }
0x1a1f   :  { %13638 = vrot.lane.b32.xlu1 %v15984_v25, %s14335_s7 }
0x1a20   :  { %13643 = vrot.lane.b32.xlu0 %v15984_v25, %s14336_s8 }
0x1a23   :  { %13648 = vrot.lane.b32.xlu1 %v15992_v31, %s14335_s7 }
0x1a27   :  { %13653 = vrot.lane.b32.xlu1 %v15992_v31, %s14336_s8 }
0x1a75   :  { %v5420_v38 = vpop.permute.xlu1 %5419 }
0x1a76   :  { %v5418_v45 = vpop.permute.xlu0 %5417 }
0x1a77   :  { %12062 = vmatprep.mubr.msk.f32.mxu1 %vm284_vm2, %v5418_v45 }
0x1a78   :  { %12063 = vmatmul.mubr.msk.f32.vlgmr.msra.gmra.mrb[80].mxu1 %vm284_vm2, %v5420_v38 }
0x1a79   :  { %13015 = vmatpush3.bf16.xpose.msk.msra.mxu1 %vm14520_vm3, %v13010_v43  ;;  %v13634_v13 = vpop.permute.xlu1 %13633 }
0x1a7a   :  { %v13636_v11 = vunpack.i.h.bf16 %v13634_v13  ;;  %v13635_v33 = vunpack.i.l.bf16 %v13634_v13  ;;  %v13629_v34 = vpop.permute.xlu0 %13628 }
0x1a7b   :  { %v13631_v12 = vunpack.i.h.bf16 %v13629_v34  ;;  %v13630_v5 = vunpack.i.l.bf16 %v13629_v34 }
0x1a7c   :  { %v13016_v17 = vpack.c.bf16 %v13636_v11, %v13635_v33 }
0x1a7d   :  { %v13004_v58 = vpack.c.bf16 %v13631_v12, %v13630_v5  ;;  %v5537_v51 = vpop.permute.xlu1 %5536 }
0x1a7e   :  { %v5535_v56 = vpop.permute.xlu0 %5534  ;;  %13018 = vmatprep.subr.msk.bf16.mxu1 %vm14520_vm3, %v13016_v17 }
0x1a7f   :  { %13006 = vmatprep.subr.msk.bf16.mxu0 %vm14520_vm3, %v13004_v58  ;;  %12076 = vmatprep.mubr.msk.f32.mxu0 %vm284_vm2, %v5535_v56 }
0x1a80   :  { %13009 = vmatpush3.bf16.xpose.msk.msra.mxu0 %vm14520_vm3, %v13004_v58 }
0x1a81   :  { %13021 = vmatpush3.bf16.xpose.msk.msra.mxu1 %vm14520_vm3, %v13016_v17  ;;  %v5424_v30 = vpop.permute.xlu1 %5423 }
0x1a82   :  { %v5422_v47 = vpop.permute.xlu0 %5421 }
0x1a83   :  { %12065 = vmatprep.mubr.msk.f32.mxu1 %vm284_vm2, %v5422_v47 }
0x1a84   :  { %12066 = vmatmul.mubr.msk.f32.gmra.mrb[82].mxu1 %vm284_vm2, %v5424_v30 }
0x1a85   :  { %v5654_v46 = vpop.permute.xlu1 %5653 }
0x1a86   :  { %v5652_v42 = vpop.permute.xlu0 %5651 }
0x1a87   :  { %12077 = vmatmul.mubr.msk.f32.vlgmr.msra.gmra.mrb[72].mxu0 %vm284_vm2, %v5537_v51  ;;  %12090 = vmatprep.mubr.msk.f32.mxu1 %vm284_vm2, %v5652_v42 }
0x1a88   :  { %12091 = vmatmul.mubr.msk.f32.vlgmr.msra.gmra.mrb[84].mxu1 %vm284_vm2, %v5654_v46 }
0x1a89   :  { %v5541_v55 = vpop.permute.xlu1 %5540 }
0x1a8a   :  { %v5539_v53 = vpop.permute.xlu0 %5538 }
0x1a8b   :  { %12079 = vmatprep.mubr.msk.f32.mxu0 %vm284_vm2, %v5539_v53 }
0x1a8c   :  { %12080 = vmatmul.mubr.msk.f32.gmra.mrb[74].mxu0 %vm284_vm2, %v5541_v55 }
0x1a8d   :  { %v5658_v36 = vpop.permute.xlu1 %5657 }
0x1a8e   :  { %v5656_v60 = vpop.permute.xlu0 %5655 }
0x1a8f   :  { %12093 = vmatprep.mubr.msk.f32.mxu1 %vm284_vm2, %v5656_v60 }
0x1a90   :  { %12094 = vmatmul.mubr.msk.f32.gmra.mrb[86].mxu1 %vm284_vm2, %v5658_v36 }
0x1a91   :  { %v13639_v16 = vpop.permute.xlu1 %13638 }
0x1a92   :  { %v13641_v23 = vunpack.i.h.bf16 %v13639_v16  ;;  %v13640_v63 = vunpack.i.l.bf16 %v13639_v16  ;;  %v13644_v21 = vpop.permute.xlu0 %13643 }
0x1a93   :  { %v13646_v41 = vunpack.i.h.bf16 %v13644_v21  ;;  %v13645_v37 = vunpack.i.l.bf16 %v13644_v21 }
0x1a94   :  { %v13022_v3 = vpack.c.bf16 %v13641_v23, %v13640_v63 }
0x1a95   :  { %v13649_v4 = vpop.permute.xlu1 %13648  ;;  %v13030_v62 = vpack.c.bf16 %v13646_v41, %v13645_v37 }
0x1a96   :  { %v13651_v2 = vunpack.i.h.bf16 %v13649_v4  ;;  %v13650_v18 = vunpack.i.l.bf16 %v13649_v4  ;;  %13023 = vmatprep.subr.bf16.mxu0 %v13022_v3 }
0x1a97   :  { %13025 = vmatpush3.bf16.msra.mxu0 %v13022_v3  ;;  %13031 = vmatprep.subr.bf16.mxu1 %v13030_v62 }
0x1a98   :  { %13033 = vmatpush3.bf16.msra.mxu1 %v13030_v62  ;;  %v13026_v40 = vpack.c.bf16 %v13651_v2, %v13650_v18 }
0x1a99   :  { %v13654_v52 = vpop.permute.xlu1 %13653 }
0x1a9a   :  { %v13656_v6 = vunpack.i.h.bf16 %v13654_v52  ;;  %v13655_v14 = vunpack.i.l.bf16 %v13654_v52  ;;  %13027 = vmatprep.subr.bf16.mxu0 %v13026_v40 }
0x1a9b   :  { %13029 = vmatpush3.bf16.msra.mxu0 %v13026_v40 }
0x1a9c   :  { %v13034_v22 = vpack.c.bf16 %v13656_v6, %v13655_v14 }
0x1a9e   :  { %13035 = vmatprep.subr.bf16.mxu1 %v13034_v22 }
0x1a9f   :  { %13037 = vmatpush3.bf16.msra.mxu1 %v13034_v22 }
0x1ad8   :  { %v12050_v43 = vpop.f32.mrb[68].mxu0 }
0x1ad9   :  { %v16072_v50 = vadd.f32 %v12050_v43, %v14574_v1  ;;  %v5398_v44 = vpop.f32.mrb[69].mxu0 }
0x1ada   :  { %v16075_v29 = vadd.f32 %v5398_v44, %v14583_v8 }
0x1adb   :  { %v5787_v9 = vsel %vm170_vm1, %v16072_v50, -inf }
0x1adc   :  { %5788 = vmax.xlane.f32.xlu1 %v5787_v9  ;;  %v5784_v0 = vsel %vm170_vm1, %v16075_v29, -inf }
0x1add   :  { %5785 = vmax.xlane.f32.xlu0 %v5784_v0 }
0x1ae4   :  { %v12053_v59 = vpop.f32.mrb[70].mxu0 }
0x1ae5   :  { %v16082_v35 = vadd.f32 %v12053_v59, %v14606_v24  ;;  %v5408_v10 = vpop.f32.mrb[71].mxu0 }
0x1ae6   :  { %v16085_v32 = vadd.f32 %v5408_v10, %v14581_v7 }
0x1ae7   :  { %v5793_v26 = vsel %vm170_vm1, %v16082_v35, -inf }
0x1ae8   :  { %5794 = vmax.xlane.f32.xlu0 %v5793_v26  ;;  %v5790_v61 = vsel %vm170_vm1, %v16085_v32, -inf }
0x1ae9   :  { %5791 = vmax.xlane.f32.xlu1 %v5790_v61 }
0x1b4b   :  { %v12064_v39 = vpop.f32.mrb[80].mxu1 }
0x1b4c   :  { %v16092_v38 = vadd.f32 %v12064_v39, %v14574_v1  ;;  %v5515_v45 = vpop.f32.mrb[81].mxu1 }
0x1b4d   :  { %v16103_v56 = vadd.f32 %v5515_v45, %v14583_v8 }
0x1b4e   :  { %v5799_v13 = vsel %vm170_vm1, %v16092_v38, -inf }
0x1b4f   :  { %5800 = vmax.xlane.f32.xlu0 %v5799_v13  ;;  %v5796_v36 = vsel %vm170_vm1, %v16103_v56, -inf }
0x1b57   :  { %v12067_v11 = vpop.f32.mrb[82].mxu1 }
0x1b58   :  { %v5525_v33 = vpop.f32.mrb[83].mxu1  ;;  %v16113_v53 = vadd.f32 %v12067_v11, %v14606_v24 }
0x1b59   :  { %v16108_v47 = vadd.f32 %v5525_v33, %v14581_v7 }
0x1b5a   :  { %v12078_v34 = vpop.f32.mrb[72].mxu0  ;;  %v5805_v41 = vsel %vm170_vm1, %v16113_v53, -inf }
0x1b5b   :  { %v16097_v12 = vadd.f32 %v12078_v34, %v14574_v1  ;;  %v5632_v5 = vpop.f32.mrb[73].mxu0  ;;  %v12092_v17 = vpop.f32.mrb[84].mxu1  ;;  %v5802_v16 = vsel %vm170_vm1, %v16108_v47, -inf }
0x1b5c   :  { %v16100_v58 = vadd.f32 %v5632_v5, %v14583_v8  ;;  %v5749_v51 = vpop.f32.mrb[85].mxu1  ;;  %v16133_v4 = vadd.f32 %v12092_v17, %v14574_v1 }
0x1b5d   :  { %v5811_v30 = vsel %vm170_vm1, %v16097_v12, -inf  ;;  %v16128_v37 = vadd.f32 %v5749_v51, %v14583_v8 }
0x1b5e   :  { %5812 = vmax.xlane.f32.xlu0 %v5811_v30  ;;  %v5808_v46 = vsel %vm170_vm1, %v16100_v58, -inf  ;;  %v5823_v52 = vsel %vm170_vm1, %v16133_v4, -inf }
0x1b5f   :  { %5809 = vmax.xlane.f32.xlu1 %v5808_v46  ;;  %v12081_v42 = vpop.f32.mrb[74].mxu0  ;;  %v5820_v18 = vsel %vm170_vm1, %v16128_v37, -inf }
0x1b60   :  { %v5642_v55 = vpop.f32.mrb[75].mxu0  ;;  %v16123_v21 = vadd.f32 %v12081_v42, %v14606_v24 }
0x1b61   :  { %v16118_v60 = vadd.f32 %v5642_v55, %v14581_v7 }
0x1b62   :  { %5797 = vmax.xlane.f32.xlu0 %v5796_v36  ;;  %v5817_v62 = vsel %vm170_vm1, %v16123_v21, -inf }
0x1b63   :  { %5803 = vmax.xlane.f32.xlu1 %v5802_v16  ;;  %v12095_v23 = vpop.f32.mrb[86].mxu1  ;;  %v5814_v3 = vsel %vm170_vm1, %v16118_v60, -inf }
0x1b64   :  { %v5759_v63 = vpop.f32.mrb[87].mxu1  ;;  %v16143_v40 = vadd.f32 %v12095_v23, %v14606_v24 }
0x1b65   :  { %v16138_v2 = vadd.f32 %v5759_v63, %v14581_v7 }
0x1b66   :  { %5806 = vmax.xlane.f32.xlu0 %v5805_v41  ;;  %v5829_v14 = vsel %vm170_vm1, %v16143_v40, -inf }
0x1b67   :  { %5815 = vmax.xlane.f32.xlu1 %v5814_v3  ;;  %v5826_v6 = vsel %vm170_vm1, %v16138_v2, -inf }
0x1b69   :  { %v5789_v22 = vpop.xlane.xlu1 %5788 }
0x1b6a   :  { %5818 = vmax.xlane.f32.xlu0 %v5817_v62  ;;  %v5786_v43 = vpop.xlane.xlu0 %5785  ;;  %v5833_v0 = vsub.f32 %v16072_v50, %v5789_v22 }
0x1b6b   :  { %5821 = vmax.xlane.f32.xlu1 %v5820_v18  ;;  %v5832_v44 = vsub.f32 %v16075_v29, %v5786_v43 }
0x1b6c   :  { %v5850_v61 = vmul.f32 1.442695, %v5833_v0 }
0x1b6d   :  { %v5848_v59 = vmul.f32 1.442695, %v5832_v44 }
0x1b6e   :  { %5824 = vmax.xlane.f32.xlu0 %v5823_v52 }
0x1b6f   :  { %5827 = vmax.xlane.f32.xlu1 %v5826_v6  ;;  %14059 = vpow2.f32 %v5848_v59 }
0x1b70   :  { %14061 = vpow2.f32 %v5850_v61 }
0x1b72   :  { %5830 = vmax.xlane.f32.xlu0 %v5829_v14 }
0x1b75   :  { %v5795_v10 = vpop.xlane.xlu0 %5794 }
0x1b76   :  { %v5792_v9 = vpop.xlane.xlu1 %5791  ;;  %v5835_v39 = vsub.f32 %v16082_v35, %v5795_v10 }
0x1b77   :  { %v5834_v26 = vsub.f32 %v16085_v32, %v5792_v9 }
0x1b78   :  { %v5854_v13 = vmul.f32 1.442695, %v5835_v39 }
0x1b79   :  { %v5852_v45 = vmul.f32 1.442695, %v5834_v26 }
0x1b7b   :  { %14063 = vpow2.f32 %v5852_v45 }
0x1b7c   :  { %14065 = vpow2.f32 %v5854_v13 }
0x1b80   :  { %13663 = vrot.lane.b32.xlu1 %v15984_v25, %s14338_s10 }
0x1b88   :  { %13658 = vrot.lane.b32.xlu0 %v15984_v25, %s14337_s9  ;;  %v16159_v25 = vpop.eup %14059 }
0x1b89   :  { %v16161_v11 = vpop.eup %14061  ;;  %v5880_v50 = vsel %vm170_vm1, %v16159_v25, 0.0 }
0x1b8a   :  { %v16165_v29 = vpop.eup %14063  ;;  %v5883_v32 = vsel %vm170_vm1, %v16161_v11, 0.0 }
0x1b8b   :  { %v16169_v35 = vpop.eup %14065  ;;  %v5886_v33 = vsel %vm170_vm1, %v16165_v29, 0.0 }
0x1b8c   :  { %v5889_v34 = vsel %vm170_vm1, %v16169_v35, 0.0 }
0x1ba4   :  { %5881 = vadd.xlane.f32.xlu1 %v5880_v50 }
0x1ba7   :  { %5884 = vadd.xlane.f32.xlu0 %v5883_v32 }
0x1ba8   :  { %5887 = vadd.xlane.f32.xlu1 %v5886_v33 }
0x1bab   :  { %5890 = vadd.xlane.f32.xlu0 %v5889_v34 }
0x1bdc   :  { %v5801_v5 = vpop.xlane.xlu0 %5800 }
0x1bdd   :  { %v5837_v17 = vsub.f32 %v16092_v38, %v5801_v5 }
0x1bdf   :  { %v5858_v51 = vmul.f32 1.442695, %v5837_v17 }
0x1be1   :  { %14067 = vpow2.f32 %v5858_v51 }
0x1beb   :  { %v16176_v30 = vpop.eup %14067  ;;  %v5813_v46 = vpop.xlane.xlu0 %5812 }
0x1bec   :  { %v5841_v42 = vsub.f32 %v16097_v12, %v5813_v46  ;;  %v5810_v55 = vpop.xlane.xlu1 %5809  ;;  %v5895_v36 = vsel %vm170_vm1, %v16176_v30, 0.0 }
0x1bed   :  { %v5840_v16 = vsub.f32 %v16100_v58, %v5810_v55  ;;  %5896 = vadd.xlane.f32.xlu0 %v5895_v36 }
0x1bee   :  { %v5866_v23 = vmul.f32 1.442695, %v5841_v42 }
0x1bef   :  { %v5798_v63 = vpop.xlane.xlu0 %5797  ;;  %v5864_v3 = vmul.f32 1.442695, %v5840_v16 }
0x1bf0   :  { %14069 = vpow2.f32 %v5866_v23  ;;  %v5836_v41 = vsub.f32 %v16103_v56, %v5798_v63  ;;  %v5804_v38 = vpop.xlane.xlu1 %5803 }
0x1bf1   :  { %v5838_v18 = vsub.f32 %v16108_v47, %v5804_v38 }
0x1bf2   :  { %v5856_v62 = vmul.f32 1.442695, %v5836_v41 }
0x1bf3   :  { %v5807_v52 = vpop.xlane.xlu0 %5806  ;;  %v5860_v22 = vmul.f32 1.442695, %v5838_v18 }
0x1bf4   :  { %14071 = vpow2.f32 %v5856_v62  ;;  %v5839_v12 = vsub.f32 %v16113_v53, %v5807_v52  ;;  %v5816_v6 = vpop.xlane.xlu1 %5815 }
0x1bf5   :  { %14073 = vpow2.f32 %v5864_v3  ;;  %v5842_v58 = vsub.f32 %v16118_v60, %v5816_v6 }
0x1bf6   :  { %v5862_v14 = vmul.f32 1.442695, %v5839_v12 }
0x1bf7   :  { %v5819_v43 = vpop.xlane.xlu0 %5818  ;;  %v5868_v47 = vmul.f32 1.442695, %v5842_v58 }
0x1bf8   :  { %14075 = vpow2.f32 %v5862_v14  ;;  %v5843_v44 = vsub.f32 %v16123_v21, %v5819_v43  ;;  %v5822_v56 = vpop.xlane.xlu1 %5821 }
0x1bf9   :  { %14077 = vpow2.f32 %v5860_v22  ;;  %v5844_v59 = vsub.f32 %v16128_v37, %v5822_v56 }
0x1bfa   :  { %v16187_v9 = vpop.eup %14069  ;;  %v5870_v0 = vmul.f32 1.442695, %v5843_v44 }
0x1bfb   :  { %v5825_v10 = vpop.xlane.xlu0 %5824  ;;  %v5907_v53 = vsel %vm170_vm1, %v16187_v9, 0.0  ;;  %v5872_v45 = vmul.f32 1.442695, %v5844_v59 }
0x1bfc   :  { %14079 = vpow2.f32 %v5870_v0  ;;  %v5845_v26 = vsub.f32 %v16133_v4, %v5825_v10  ;;  %5908 = vadd.xlane.f32.xlu0 %v5907_v53  ;;  %v5828_v60 = vpop.xlane.xlu1 %5827 }
0x1bfd   :  { %14081 = vpow2.f32 %v5868_v47  ;;  %v5846_v13 = vsub.f32 %v16138_v2, %v5828_v60 }
0x1bfe   :  { %v16193_v61 = vpop.eup %14071  ;;  %v5874_v21 = vmul.f32 1.442695, %v5845_v26 }
0x1bff   :  { %v16195_v39 = vpop.eup %14073  ;;  %v5831_v50 = vpop.xlane.xlu0 %5830  ;;  %v5892_v37 = vsel %vm170_vm1, %v16193_v61, 0.0  ;;  %v5876_v46 = vmul.f32 1.442695, %v5846_v13 }
0x1c00   :  { %14083 = vpow2.f32 %v5874_v21  ;;  %v5847_v32 = vsub.f32 %v16143_v40, %v5831_v50  ;;  %5893 = vadd.xlane.f32.xlu1 %v5892_v37  ;;  %v13664_v4 = vpop.permute.xlu1 %13663  ;;  %v5904_v51 = vsel %vm170_vm1, %v16195_v39, 0.0 }
0x1c01   :  { %v13666_v33 = vunpack.i.h.bf16 %v13664_v4  ;;  %v13665_v34 = vunpack.i.l.bf16 %v13664_v4  ;;  %14085 = vpow2.f32 %v5872_v45 }
0x1c02   :  { %v16201_v5 = vpop.eup %14075  ;;  %v5878_v17 = vmul.f32 1.442695, %v5847_v32 }
0x1c03   :  { %v13659_v2 = vpop.permute.xlu0 %13658  ;;  %v5901_v42 = vsel %vm170_vm1, %v16201_v5, 0.0  ;;  %v16207_v55 = vpack.c.bf16 %v13666_v33, %v13665_v34  ;;  %v16209_v16 = vpop.eup %14077 }
0x1c04   :  { %14087 = vpow2.f32 %v5878_v17  ;;  %v13661_v40 = vunpack.i.h.bf16 %v13659_v2  ;;  %v13660_v36 = vunpack.i.l.bf16 %v13659_v2  ;;  %5902 = vadd.xlane.f32.xlu0 %v5901_v42  ;;  %5905 = vadd.xlane.f32.xlu1 %v5904_v51  ;;  %v5898_v38 = vsel %vm170_vm1, %v16209_v16, 0.0 }
0x1c05   :  { %13047 = vmatprep.subr.bf16.mxu1 %v16207_v55  ;;  %14089 = vpow2.f32 %v5876_v46 }
0x1c06   :  { %v16212_v23 = vpop.eup %14079  ;;  %v13038_v63 = vpack.c.bf16 %v13661_v40, %v13660_v36 }
0x1c07   :  { %v5913_v41 = vsel %vm170_vm1, %v16212_v23, 0.0  ;;  %v16218_v3 = vpop.eup %14081 }
0x1c08   :  { %5914 = vadd.xlane.f32.xlu0 %v5913_v41  ;;  %13039 = vmatprep.subr.bf16.mxu0 %v13038_v63  ;;  %v5910_v52 = vsel %vm170_vm1, %v16218_v3, 0.0 }
0x1c09   :  { %5899 = vadd.xlane.f32.xlu1 %v5898_v38 }
0x1c0a   :  { %v16220_v62 = vpop.eup %14083 }
0x1c0b   :  { %v5919_v18 = vsel %vm170_vm1, %v16220_v62, 0.0  ;;  %v16226_v12 = vpop.eup %14085 }
0x1c0c   :  { %5920 = vadd.xlane.f32.xlu0 %v5919_v18  ;;  %v5916_v22 = vsel %vm170_vm1, %v16226_v12, 0.0 }
0x1c0d   :  { %5911 = vadd.xlane.f32.xlu1 %v5910_v52 }
0x1c0e   :  { %v16228_v6 = vpop.eup %14087 }
0x1c0f   :  { %v5925_v14 = vsel %vm170_vm1, %v16228_v6, 0.0  ;;  %v16234_v58 = vpop.eup %14089 }
0x1c10   :  { %5926 = vadd.xlane.f32.xlu0 %v5925_v14  ;;  %v5922_v43 = vsel %vm170_vm1, %v16234_v58, 0.0 }
0x1c11   :  { %5917 = vadd.xlane.f32.xlu1 %v5916_v22 }
0x1c15   :  { %5923 = vadd.xlane.f32.xlu1 %v5922_v43 }
0x1c26   :  { %13673 = vrot.lane.b32.xlu1 %v15992_v31, %s14338_s10  ;;  %13668 = vrot.lane.b32.xlu0 %v15992_v31, %s14337_s9 }
0x1c31   :  { %v5882_v44 = vpop.xlane.xlu1 %5881 }
0x1c32   :  { %14091 = vrcp.f32 %v5882_v44 }
0x1c34   :  { %v5885_v56 = vpop.xlane.xlu0 %5884 }
0x1c35   :  { %14093 = vrcp.f32 %v5885_v56  ;;  %v5888_v0 = vpop.xlane.xlu1 %5887 }
0x1c36   :  { %14095 = vrcp.f32 %v5888_v0 }
0x1c38   :  { %v5891_v47 = vpop.xlane.xlu0 %5890 }
0x1c39   :  { %14097 = vrcp.f32 %v5891_v47 }
0x1c3c   :  { %v14092_v59 = vpop.eup %14091 }
0x1c3d   :  { %v5929_v10 = vmul.f32 %v14092_v59, %v16159_v25 }
0x1c3f   :  { %v14094_v53 = vpop.eup %14093  ;;  %12104 = vmatprep.mubr.msk.f32.mxu0 %vm170_vm1, %v5929_v10 }
0x1c40   :  { %v14096_v26 = vpop.eup %14095  ;;  %v5931_v60 = vmul.f32 %v14094_v53, %v16161_v11 }
0x1c41   :  { %v5933_v21 = vmul.f32 %v14096_v26, %v16165_v29 }
0x1c42   :  { %12105 = vmatmul.mubr.msk.f32.vlgmr.msra.gmra.mrb[76].mxu0 %vm170_vm1, %v5931_v60 }
0x1c43   :  { %v14098_v31 = vpop.eup %14097  ;;  %13041 = vmatpush3.bf16.msra.mxu0 %v13038_v63  ;;  %12107 = vmatprep.mubr.msk.f32.mxu0 %vm170_vm1, %v5933_v21 }
0x1c44   :  { %v5935_v45 = vmul.f32 %v14098_v31, %v16169_v35 }
0x1c46   :  { %12108 = vmatmul.mubr.msk.f32.gmra.mrb[78].mxu0 %vm170_vm1, %v5935_v45 }
0x1c7a   :  { %v5897_v13 = vpop.xlane.xlu0 %5896 }
0x1c7b   :  { %14099 = vrcp.f32 %v5897_v13 }
0x1c85   :  { %v14100_v4 = vpop.eup %14099 }
0x1c86   :  { %v5939_v35 = vmul.f32 %v14100_v4, %v16176_v30 }
0x1c89   :  { %v5909_v25 = vpop.xlane.xlu0 %5908 }
0x1c8d   :  { %v5894_v50 = vpop.xlane.xlu1 %5893 }
0x1c8e   :  { %14101 = vrcp.f32 %v5894_v50  ;;  %v6458_v50 = vld [vmem:[%s17433_s2 + $0x280] sm:$0xff] }
0x1c91   :  { %v5903_v37 = vpop.xlane.xlu0 %5902  ;;  %v5906_v32 = vpop.xlane.xlu1 %5905 }
0x1c92   :  { %14103 = vrcp.f32 %v5906_v32 }
0x1c93   :  { %14105 = vrcp.f32 %v5903_v37  ;;  %v6459_v37 = vld [vmem:[%s17433_s2 + $0x288] sm:$0xff] }
0x1c94   :  { %v13058_v32 = vpack.c.bf16 %v6459_v37, %v6458_v50 }
0x1c95   :  { %v5915_v11 = vpop.xlane.xlu0 %5914 }
0x1c96   :  { %v5900_v29 = vpop.xlane.xlu1 %5899 }
0x1c97   :  { %14107 = vrcp.f32 %v5900_v29 }
0x1c98   :  { %v14102_v33 = vpop.eup %14101  ;;  %14109 = vrcp.f32 %v5909_v25 }
0x1c99   :  { %v5921_v34 = vpop.xlane.xlu0 %5920  ;;  %v5937_v17 = vmul.f32 %v14102_v33, %v16193_v61 }
0x1c9a   :  { %v5912_v51 = vpop.xlane.xlu1 %5911 }
0x1c9b   :  { %12118 = vmatprep.mubr.msk.f32.mxu1 %vm170_vm1, %v5937_v17  ;;  %14111 = vrcp.f32 %v5912_v51 }
0x1c9c   :  { %12119 = vmatmul.mubr.msk.f32.vlgmr.msra.gmra.mrb[88].mxu1 %vm170_vm1, %v5939_v35  ;;  %v14104_v46 = vpop.eup %14103  ;;  %14113 = vrcp.f32 %v5915_v11 }
0x1c9d   :  { %13049 = vmatpush3.bf16.msra.mxu1 %v16207_v55  ;;  %v5927_v2 = vpop.xlane.xlu0 %5926  ;;  %v5945_v40 = vmul.f32 %v14104_v46, %v16195_v39  ;;  %v14106_v36 = vpop.eup %14105 }
0x1c9e   :  { %v5918_v42 = vpop.xlane.xlu1 %5917  ;;  %v5943_v55 = vmul.f32 %v14106_v36, %v16201_v5 }
0x1c9f   :  { %14115 = vrcp.f32 %v5918_v42  ;;  %12132 = vmatprep.mubr.msk.f32.mxu0 %vm170_vm1, %v5945_v40 }
0x1ca0   :  { %14117 = vrcp.f32 %v5921_v34 }
0x1ca1   :  { %v14108_v30 = vpop.eup %14107  ;;  %v13669_v61 = vpop.permute.xlu0 %13668 }
0x1ca2   :  { %v13671_v63 = vunpack.i.h.bf16 %v13669_v61  ;;  %v13670_v41 = vunpack.i.l.bf16 %v13669_v61  ;;  %v5924_v38 = vpop.xlane.xlu1 %5923  ;;  %v5941_v18 = vmul.f32 %v14108_v30, %v16209_v16  ;;  %v14110_v39 = vpop.eup %14109 }
0x1ca3   :  { %14119 = vrcp.f32 %v5924_v38  ;;  %v5947_v0 = vmul.f32 %v14110_v39, %v16187_v9 }
0x1ca4   :  { %14121 = vrcp.f32 %v5927_v2  ;;  %12121 = vmatprep.mubr.msk.f32.mxu1 %vm170_vm1, %v5941_v18  ;;  %v13042_v52 = vpack.c.bf16 %v13671_v63, %v13670_v41 }
0x1ca5   :  { %12122 = vmatmul.mubr.msk.f32.gmra.mrb[90].mxu1 %vm170_vm1, %v5943_v55  ;;  %v14112_v14 = vpop.eup %14111 }
0x1ca6   :  { %v13674_v22 = vpop.permute.xlu1 %13673  ;;  %13043 = vmatprep.subr.bf16.mxu0 %v13042_v52  ;;  %v14114_v56 = vpop.eup %14113  ;;  %v5949_v5 = vmul.f32 %v14112_v14, %v16218_v3 }
0x1ca7   :  { %v13676_v43 = vunpack.i.h.bf16 %v13674_v22  ;;  %v13675_v44 = vunpack.i.l.bf16 %v13674_v22  ;;  %13045 = vmatpush3.bf16.msra.mxu0 %v13042_v52  ;;  %v5951_v53 = vmul.f32 %v14114_v56, %v16212_v23 }
0x1ca9   :  { %v14116_v16 = vpop.eup %14115  ;;  %v13050_v47 = vpack.c.bf16 %v13676_v43, %v13675_v44 }
0x1caa   :  { %v14118_v59 = vpop.eup %14117  ;;  %12133 = vmatmul.mubr.msk.f32.vlgmr.msra.gmra.mrb[80].mxu0 %vm170_vm1, %v5947_v0  ;;  %v5953_v10 = vmul.f32 %v14116_v16, %v16226_v12 }
0x1cab   :  { %13051 = vmatprep.subr.bf16.mxu1 %v13050_v47  ;;  %12135 = vmatprep.mubr.msk.f32.mxu0 %vm170_vm1, %v5949_v5  ;;  %v5955_v9 = vmul.f32 %v14118_v59, %v16220_v62 }
0x1cac   :  { %13053 = vmatpush3.bf16.msra.mxu1 %v13050_v47  ;;  %12146 = vmatprep.mubr.msk.f32.mxu1 %vm170_vm1, %v5953_v10 }
0x1cad   :  { %v14120_v26 = vpop.eup %14119 }
0x1cae   :  { %v14122_v60 = vpop.eup %14121  ;;  %12136 = vmatmul.mubr.msk.f32.gmra.mrb[82].mxu0 %vm170_vm1, %v5951_v53  ;;  %v5957_v3 = vmul.f32 %v14120_v26, %v16234_v58  ;;  %v6456_v58 = vld [vmem:[%s17433_s2 + $0x270] sm:$0xff] }
0x1caf   :  { %12147 = vmatmul.mubr.msk.f32.vlgmr.msra.gmra.mrb[92].mxu1 %vm170_vm1, %v5955_v9  ;;  %v5959_v12 = vmul.f32 %v14122_v60, %v16228_v6  ;;  %v6457_v6 = vld [vmem:[%s17433_s2 + $0x278] sm:$0xff]  ;;  %v10691_v26 = vld [vmem:[%s17434_s3 + $0x15] ss:$0 sm:$0xff] }
0x1cb0   :  { %12149 = vmatprep.mubr.msk.f32.mxu1 %vm170_vm1, %v5957_v3  ;;  %v13054_v25 = vpack.c.bf16 %v6457_v6, %v6456_v58 }
0x1cb2   :  { %13055 = vmatprep.subr.bf16.mxu0 %v13054_v25 }
0x1cb3   :  { %12150 = vmatmul.mubr.msk.f32.gmra.mrb[94].mxu1 %vm170_vm1, %v5959_v12  ;;  %13057 = vmatpush3.bf16.msra.mxu0 %v13054_v25 }
0x1cb4   :  { %13059 = vmatprep.subr.bf16.mxu0 %v13058_v32 }
0x1cb7   :  { %13061 = vmatpush3.bf16.msra.mxu0 %v13058_v32 }
0x1d15   :  { %v12106_v21 = vpop.f32.mrb[76].mxu0 }
0x1d16   :  { %v6050_v31 = vpop.f32.mrb[77].mxu0 }
0x1d19   :  { %v12109_v45 = vpop.f32.mrb[78].mxu0 }
0x1d1a   :  { %v6060_v23 = vpop.f32.mrb[79].mxu0 }
0x1d6f   :  { %v12120_v13 = vpop.f32.mrb[88].mxu1 }
0x1d70   :  { %6402 = vrot.lane.b32.xlu1 %v12120_v13, %s14347_s22  ;;  %v6159_v62 = vpop.f32.mrb[89].mxu1 }
0x1d71   :  { %6400 = vrot.lane.b32.xlu0 %v6159_v62, %s14347_s22 }
0x1d78   :  { %v12123_v11 = vpop.f32.mrb[90].mxu1 }
0x1d79   :  { %v6169_v29 = vpop.f32.mrb[91].mxu1 }
0x1d7d   :  { %v12134_v4 = vpop.f32.mrb[80].mxu0 }
0x1d7e   :  { %6418 = vrot.lane.b32.xlu1 %v12134_v4, %s14348_s26  ;;  %v6268_v33 = vpop.f32.mrb[81].mxu0 }
0x1d7f   :  { %6416 = vrot.lane.b32.xlu0 %v6268_v33, %s14348_s26 }
0x1d81   :  { %v12137_v34 = vpop.f32.mrb[82].mxu0 }
0x1d82   :  { %v12148_v17 = vpop.f32.mrb[92].mxu1  ;;  %6406 = vrot.lane.b32.xlu1 %v12123_v11, %s14347_s22  ;;  %v6278_v35 = vpop.f32.mrb[83].mxu0 }
0x1d83   :  { %v6377_v51 = vpop.f32.mrb[93].mxu1  ;;  %6404 = vrot.lane.b32.xlu0 %v6169_v29, %s14347_s22 }
0x1d86   :  { %v12151_v46 = vpop.f32.mrb[94].mxu1  ;;  %6434 = vrot.lane.b32.xlu1 %v12148_v17, %s14349_s27 }
0x1d87   :  { %v6387_v2 = vpop.f32.mrb[95].mxu1  ;;  %6432 = vrot.lane.b32.xlu0 %v6377_v51, %s14349_s27 }
0x1d8a   :  { %6422 = vrot.lane.b32.xlu1 %v12137_v34, %s14348_s26 }
0x1d8b   :  { %6420 = vrot.lane.b32.xlu0 %v6278_v35, %s14348_s26 }
0x1d8e   :  { %6438 = vrot.lane.b32.xlu1 %v12151_v46, %s14349_s27 }
0x1d8f   :  { %6436 = vrot.lane.b32.xlu0 %v6387_v2, %s14349_s27 }
0x1de2   :  { %v6403_v42 = vpop.permute.xlu1 %6402 }
0x1de3   :  { %v6401_v40 = vpop.permute.xlu0 %6400  ;;  %v6445_v18 = vsel %vm284_vm2, %v12106_v21, %v6403_v42 }
0x1de4   :  { %v6444_v41 = vsel %vm284_vm2, %v6050_v31, %v6401_v40 }
0x1df0   :  { %v6419_v36 = vpop.permute.xlu1 %6418 }
0x1df1   :  { %v6417_v30 = vpop.permute.xlu0 %6416  ;;  %v6449_v39 = vsel %vm1421_vm8, %v6445_v18, %v6419_v36 }
0x1df2   :  { %v6448_v55 = vsel %vm1421_vm8, %v6444_v41, %v6417_v30  ;;  %v6636_v41 = vld [vmem:[%s17433_s2 + $0x290] sm:$0xff] }
0x1df4   :  { %v6407_v61 = vpop.permute.xlu1 %6406 }
0x1df5   :  { %v6405_v63 = vpop.permute.xlu0 %6404  ;;  %v6447_v16 = vsel %vm284_vm2, %v12109_v45, %v6407_v61 }
0x1df6   :  { %v6446_v56 = vsel %vm284_vm2, %v6060_v23, %v6405_v63 }
0x1df8   :  { %v6435_v38 = vpop.permute.xlu1 %6434 }
0x1df9   :  { %v6433_v52 = vpop.permute.xlu0 %6432  ;;  %v6453_v22 = vsel %vm1426_vm9, %v6449_v39, %v6435_v38  ;;  %v6637_v38 = vld [vmem:[%s17433_s2 + $0x298] sm:$0xff] }
0x1dfa   :  { %v6452_v14 = vsel %vm1426_vm9, %v6448_v55, %v6433_v52  ;;  %v13062_v18 = vpack.c.bf16 %v6637_v38, %v6636_v41  ;;  %v6638_v55 = vld [vmem:[%s17433_s2 + $0x2a0] sm:$0xff]  ;;  %v6639_v52 = vld [vmem:[%s17433_s2 + $0x2a8] sm:$0xff] }
0x1dfb   :  { %12160 = vmatprep.mubr.msk.f32.mxu0 %vm170_vm1, %v6452_v14  ;;  %v13066_v39 = vpack.c.bf16 %v6639_v52, %v6638_v55  ;;  %v6746_v14 = vld [vmem:[%s17433_s2 + $0x2b0] sm:$0xff]  ;;  %v6760_v52 = vld [vmem:[%s17433_s2 + $0x320] sm:$0xff] }
0x1dfc   :  { %v6423_v43 = vpop.permute.xlu1 %6422  ;;  %12161 = vmatmul.mubr.msk.f32.vlgmr.msra.gmra.mrb[84].mxu0 %vm170_vm1, %v6453_v22  ;;  %13063 = vmatprep.subr.bf16.mxu1 %v13062_v18  ;;  %v6747_v22 = vld [vmem:[%s17433_s2 + $0x2b8] sm:$0xff] }
0x1dfd   :  { %v6421_v44 = vpop.permute.xlu0 %6420  ;;  %v6451_v59 = vsel %vm1421_vm8, %v6447_v16, %v6423_v43  ;;  %13065 = vmatpush3.bf16.msra.mxu1 %v13062_v18  ;;  %v6748_v43 = vld [vmem:[%s17433_s2 + $0x2c0] sm:$0xff]  ;;  %v6750_v16 = vld [vmem:[%s17433_s2 + $0x2d0] sm:$0xff] }
0x1dfe   :  { %v6450_v47 = vsel %vm1421_vm8, %v6446_v56, %v6421_v44  ;;  %13067 = vmatprep.subr.bf16.mxu1 %v13066_v39  ;;  %v13070_v44 = vpack.c.bf16 %v6747_v22, %v6746_v14  ;;  %v6749_v56 = vld [vmem:[%s17433_s2 + $0x2c8] sm:$0xff] }
0x1e00   :  { %v6439_v0 = vpop.permute.xlu1 %6438  ;;  %13071 = vmatprep.subr.bf16.mxu0 %v13070_v44 }
0x1e01   :  { %v6437_v5 = vpop.permute.xlu0 %6436  ;;  %v6455_v53 = vsel %vm1426_vm9, %v6451_v59, %v6439_v0  ;;  %13069 = vmatpush3.bf16.msra.mxu1 %v13066_v39  ;;  %v13074_v0 = vpack.c.bf16 %v6749_v56, %v6748_v43  ;;  %13073 = vmatpush3.bf16.msra.mxu0 %v13070_v44  ;;  %v6752_v59 = vld [vmem:[%s17433_s2 + $0x2e0] sm:$0xff]  ;;  %v6761_v39 = vld [vmem:[%s17433_s2 + $0x328] sm:$0xff] }
0x1e02   :  { %v6454_v10 = vsel %vm1426_vm9, %v6450_v47, %v6437_v5  ;;  %v6751_v47 = vld [vmem:[%s17433_s2 + $0x2d8] sm:$0xff] }
0x1e03   :  { %12163 = vmatprep.mubr.msk.f32.mxu0 %vm170_vm1, %v6454_v10  ;;  %13075 = vmatprep.subr.bf16.mxu0 %v13074_v0  ;;  %v13078_v5 = vpack.c.bf16 %v6751_v47, %v6750_v16  ;;  %v6753_v10 = vld [vmem:[%s17433_s2 + $0x2e8] sm:$0xff] }
0x1e04   :  { %12164 = vmatmul.mubr.msk.f32.gmra.mrb[86].mxu0 %vm170_vm1, %v6455_v53  ;;  %v13082_v53 = vpack.c.bf16 %v6753_v10, %v6752_v59 }
0x1e05   :  { %13077 = vmatpush3.bf16.msra.mxu0 %v13074_v0 }
0x1e06   :  { %13079 = vmatprep.subr.bf16.mxu0 %v13078_v5 }
0x1e09   :  { %13081 = vmatpush3.bf16.msra.mxu0 %v13078_v5 }
0x1e0a   :  { %13083 = vmatprep.subr.bf16.mxu0 %v13082_v53 }
0x1e0d   :  { %13085 = vmatpush3.bf16.msra.mxu0 %v13082_v53 }
0x1ecf   :  { %v12162_v9 = vpop.f32.mrb[84].mxu0 }
0x1ed0   :  { %v6549_v60 = vadd.f32 %v12162_v9, %v10691_v26  ;;  %v6543_v3 = vpop.f32.mrb[85].mxu0  ;;  %v6755_v9 = vld [vmem:[%s17433_s2 + $0x2f8] sm:$0xff] }
0x1ed1   :  { %v6544_v12 = vadd.f32 %v10691_v26, %v6543_v3  ;;  %v6756_v3 = vld [vmem:[%s17433_s2 + $0x300] sm:$0xff] }
0x1ed2   :  { %v6563_v21 = vadd.f32 %v6549_v60, %v15965_v15 }
0x1ed3   :  { %v6562_v31 = vadd.f32 %v6544_v12, %v15963_v48  ;;  %v6757_v12 = vld [vmem:[%s17433_s2 + $0x308] sm:$0xff] }
0x1ed4   :  { %v6569_v45 = vsel %vm170_vm1, %v6563_v21, 0.0 }
0x1ed5   :  { %6570 = vadd.xlane.f32.xlu1 %v6569_v45  ;;  %v6566_v23 = vsel %vm170_vm1, %v6562_v31, 0.0  ;;  %v6759_v45 = vld [vmem:[%s17433_s2 + $0x318] sm:$0xff] }
0x1ed6   :  { %6567 = vadd.xlane.f32.xlu0 %v6566_v23 }
0x1ed7   :  { %v12165_v13 = vpop.f32.mrb[86].mxu0 }
0x1ed8   :  { %v6553_v62 = vpop.f32.mrb[87].mxu0  ;;  %v6559_v58 = vadd.f32 %v12165_v13, %v10691_v26 }
0x1ed9   :  { %v6554_v6 = vadd.f32 %v10691_v26, %v6553_v62  ;;  %v6754_v26 = vld [vmem:[%s17433_s2 + $0x2f0] sm:$0xff] }
0x1eda   :  { %v6565_v50 = vadd.f32 %v6559_v58, %v15975_v49  ;;  %v13086_v60 = vpack.c.bf16 %v6755_v9, %v6754_v26  ;;  %v10703_v26 = vld [vmem:[%s17434_s3 + $0x17] ss:$0 sm:$0xff] }
0x1edb   :  { %v6564_v25 = vadd.f32 %v6554_v6, %v15973_v20 }
0x1edc   :  { %v6575_v15 = vsel %vm170_vm1, %v6565_v50, 0.0  ;;  %13087 = vmatprep.subr.bf16.mxu0 %v13086_v60 }
0x1edd   :  { %v6572_v37 = vsel %vm170_vm1, %v6564_v25, 0.0  ;;  %13089 = vmatpush3.bf16.msra.mxu0 %v13086_v60 }
0x1ede   :  { %6573 = vadd.xlane.f32.xlu0 %v6572_v37 }
0x1ee2   :  { %6576 = vadd.xlane.f32.xlu0 %v6575_v15 }
0x1f62   :  { %v6571_v48 = vpop.xlane.xlu1 %6570 }
0x1f63   :  { %v6579_v32 = vmul.f32 0.03125, %v6571_v48  ;;  %v6568_v11 = vpop.xlane.xlu0 %6567 }
0x1f64   :  { %v6578_v29 = vmul.f32 0.03125, %v6568_v11 }
0x1f65   :  { %v16326_v4 = vsub.f32 %v6563_v21, %v6579_v32  ;;  %v13090_v21 = vpack.c.bf16 %v6757_v12, %v6756_v3 }
0x1f66   :  { %v16328_v33 = vsub.f32 %v6562_v31, %v6578_v29  ;;  %v6758_v31 = vld [vmem:[%s17433_s2 + $0x310] sm:$0xff] }
0x1f67   :  { %v6587_v34 = vmul.f32 %v16326_v4, %v16326_v4  ;;  %13091 = vmatprep.subr.bf16.mxu0 %v13090_v21  ;;  %v13094_v23 = vpack.c.bf16 %v6759_v45, %v6758_v31 }
0x1f68   :  { %v6586_v20 = vmul.f32 %v16328_v33, %v16328_v33  ;;  %13093 = vmatpush3.bf16.msra.mxu0 %v13090_v21 }
0x1f69   :  { %v6593_v49 = vsel %vm170_vm1, %v6587_v34, 0.0  ;;  %13095 = vmatprep.subr.bf16.mxu0 %v13094_v23  ;;  %v10696_v34 = vld [vmem:[%s17434_s3 + $0x1a] ss:$0 sm:$0xff] }
0x1f6a   :  { %6594 = vadd.xlane.f32.xlu0 %v6593_v49  ;;  %v6590_v17 = vsel %vm170_vm1, %v6586_v20, 0.0 }
0x1f6b   :  { %6591 = vadd.xlane.f32.xlu1 %v6590_v17  ;;  %v6574_v35 = vpop.xlane.xlu0 %6573 }
0x1f6c   :  { %v6580_v51 = vmul.f32 0.03125, %v6574_v35  ;;  %13097 = vmatpush3.bf16.msra.mxu0 %v13094_v23 }
0x1f6e   :  { %v16336_v46 = vsub.f32 %v6564_v25, %v6580_v51 }
0x1f6f   :  { %v6577_v2 = vpop.xlane.xlu0 %6576 }
0x1f70   :  { %v6581_v42 = vmul.f32 0.03125, %v6577_v2  ;;  %v6588_v40 = vmul.f32 %v16336_v46, %v16336_v46  ;;  %v10697_v2 = vld [vmem:[%s17434_s3 + $0x1b] ss:$0 sm:$0xff] }
0x1f72   :  { %v16340_v36 = vsub.f32 %v6565_v50, %v6581_v42  ;;  %v6596_v30 = vsel %vm170_vm1, %v6588_v40, 0.0 }
0x1f73   :  { %6597 = vadd.xlane.f32.xlu1 %v6596_v30 }
0x1f74   :  { %v6589_v61 = vmul.f32 %v16340_v36, %v16340_v36 }
0x1f76   :  { %v6599_v63 = vsel %vm170_vm1, %v6589_v61, 0.0 }
0x1f77   :  { %6600 = vadd.xlane.f32.xlu0 %v6599_v63 }
0x1ff7   :  { %v6595_v13 = vpop.xlane.xlu0 %6594 }
0x1ff8   :  { %v6603_v62 = vmul.f32 0.03125, %v6595_v13  ;;  %v6592_v58 = vpop.xlane.xlu1 %6591 }
0x1ff9   :  { %v6602_v6 = vmul.f32 0.03125, %v6592_v58 }
0x1ffa   :  { %v6607_v25 = vadd.f32 1e-05, %v6603_v62 }
0x1ffb   :  { %v6606_v50 = vadd.f32 1e-05, %v6602_v6 }
0x1ffc   :  { %14123 = vrsqrt.f32 %v6607_v25 }
0x1ffd   :  { %14125 = vrsqrt.f32 %v6606_v50 }
0x2000   :  { %v6598_v37 = vpop.xlane.xlu1 %6597 }
0x2001   :  { %v6604_v15 = vmul.f32 0.03125, %v6598_v37 }
0x2003   :  { %v6608_v48 = vadd.f32 1e-05, %v6604_v15 }
0x2004   :  { %v6601_v32 = vpop.xlane.xlu0 %6600 }
0x2005   :  { %14127 = vrsqrt.f32 %v6608_v48  ;;  %v6605_v11 = vmul.f32 0.03125, %v6601_v32 }
0x2006   :  { %v14124_v29 = vpop.eup %14123 }
0x2007   :  { %v14126_v20 = vpop.eup %14125  ;;  %v6615_v49 = vmul.f32 %v14124_v29, %v16326_v4  ;;  %v6609_v17 = vadd.f32 1e-05, %v6605_v11 }
0x2008   :  { %v6614_v35 = vmul.f32 %v14126_v20, %v16328_v33 }
0x2009   :  { %14129 = vrsqrt.f32 %v6609_v17  ;;  %v6624_v51 = vmul.f32 %v10696_v34, %v6615_v49 }
0x200a   :  { %v6623_v42 = vmul.f32 %v10696_v34, %v6614_v35 }
0x200b   :  { %v6633_v30 = vadd.f32 %v10697_v2, %v6624_v51 }
0x200c   :  { %v6632_v40 = vadd.f32 %v10697_v2, %v6623_v42 }
0x200e   :  { %12174 = vmatprep.mubr.msk.f32.mxu1 %vm170_vm1, %v6632_v40 }
0x200f   :  { %v14128_v61 = vpop.eup %14127  ;;  %12175 = vmatmul.mubr.msk.f32.vlgmr.msra.gmra.mrb[96].mxu1 %vm170_vm1, %v6633_v30 }
0x2010   :  { %v6616_v63 = vmul.f32 %v14128_v61, %v16336_v46  ;;  %v13098_v46 = vpack.c.bf16 %v6761_v39, %v6760_v52  ;;  %v6928_v39 = vld [vmem:[%s17433_s2 + $0x340] sm:$0xff] }
0x2012   :  { %v6625_v4 = vmul.f32 %v10696_v34, %v6616_v63  ;;  %13099 = vmatprep.subr.bf16.mxu0 %v13098_v46 }
0x2013   :  { %v14130_v41 = vpop.eup %14129  ;;  %13101 = vmatpush3.bf16.msra.mxu0 %v13098_v46  ;;  %v6929_v46 = vld [vmem:[%s17433_s2 + $0x348] sm:$0xff] }
0x2014   :  { %v6634_v38 = vadd.f32 %v10697_v2, %v6625_v4  ;;  %v6617_v33 = vmul.f32 %v14130_v41, %v16340_v36  ;;  %v10698_v36 = vld [vmem:[%s17434_s3 + $0x16] ss:$0 sm:$0xff] }
0x2016   :  { %12177 = vmatprep.mubr.msk.f32.mxu1 %vm170_vm1, %v6634_v38  ;;  %v6626_v18 = vmul.f32 %v10696_v34, %v6617_v33 }
0x2018   :  { %v6635_v55 = vadd.f32 %v10697_v2, %v6626_v18  ;;  %v6926_v18 = vld [vmem:[%s17433_s2 + $0x330] sm:$0xff] }
0x201a   :  { %12178 = vmatmul.mubr.msk.f32.gmra.mrb[98].mxu1 %vm170_vm1, %v6635_v55 }
0x20e2   :  { %v12176_v14 = vpop.f32.mrb[96].mxu1 }
0x20e3   :  { %v6729_v22 = vadd.f32 %v12176_v14, %v10698_v36  ;;  %v6723_v43 = vpop.f32.mrb[97].mxu1 }
0x20e4   :  { %v6724_v44 = vadd.f32 %v10698_v36, %v6723_v43 }
0x20e5   :  { %v6743_v0 = vmax.f32 %v6729_v22, 0.0 }
0x20e6   :  { %v6742_v56 = vmax.f32 %v6724_v44, 0.0 }
0x20e8   :  { %12212 = vmatprep.mubr.f32.mxu0 %v6742_v56 }
0x20e9   :  { %12213 = vmatmul.mubr.f32.vlgmr.msra.gmra.mrb[88].mxu0 %v6743_v0 }
0x20ed   :  { %v12179_v16 = vpop.f32.mrb[98].mxu1 }
0x20ee   :  { %v6739_v47 = vadd.f32 %v12179_v16, %v10698_v36  ;;  %v6733_v5 = vpop.f32.mrb[99].mxu1 }
0x20ef   :  { %v6734_v59 = vadd.f32 %v10698_v36, %v6733_v5  ;;  %v13106_v36 = vpack.c.bf16 %v6929_v46, %v6928_v39 }
0x20f0   :  { %v6745_v53 = vmax.f32 %v6739_v47, 0.0 }
0x20f1   :  { %v6744_v10 = vmax.f32 %v6734_v59, 0.0 }
0x20f3   :  { %12215 = vmatprep.mubr.f32.mxu0 %v6744_v10 }
0x20f4   :  { %12216 = vmatmul.mubr.f32.gmra.mrb[90].mxu0 %v6745_v53 }
0x21bc   :  { %v12214_v9 = vpop.f32.mrb[88].mxu0 }
0x21bd   :  { %v6839_v60 = vadd.f32 %v12214_v9, %v10703_v26  ;;  %v6833_v3 = vpop.f32.mrb[89].mxu0  ;;  %v10704_v9 = vld [vmem:[%s17434_s3 + $0x1c] ss:$0 sm:$0xff] }
0x21be   :  { %v6834_v12 = vadd.f32 %v10703_v26, %v6833_v3 }
0x21bf   :  { %v6853_v21 = vadd.f32 %v6839_v60, %v6633_v30 }
0x21c0   :  { %v6852_v31 = vadd.f32 %v6834_v12, %v6632_v40 }
0x21c1   :  { %v6859_v45 = vsel %vm170_vm1, %v6853_v21, 0.0 }
0x21c2   :  { %6860 = vadd.xlane.f32.xlu0 %v6859_v45  ;;  %v6856_v23 = vsel %vm170_vm1, %v6852_v31, 0.0 }
0x21c3   :  { %6857 = vadd.xlane.f32.xlu1 %v6856_v23 }
0x21c7   :  { %v12217_v13 = vpop.f32.mrb[90].mxu0 }
0x21c8   :  { %v6849_v62 = vadd.f32 %v12217_v13, %v10703_v26  ;;  %v6843_v58 = vpop.f32.mrb[91].mxu0 }
0x21c9   :  { %v6844_v6 = vadd.f32 %v10703_v26, %v6843_v58 }
0x21ca   :  { %v6855_v25 = vadd.f32 %v6849_v62, %v6635_v55  ;;  %v6927_v55 = vld [vmem:[%s17433_s2 + $0x338] sm:$0xff] }
0x21cb   :  { %v6854_v50 = vadd.f32 %v6844_v6, %v6634_v38  ;;  %v13102_v52 = vpack.c.bf16 %v6927_v55, %v6926_v18 }
0x21cc   :  { %v6865_v37 = vsel %vm170_vm1, %v6855_v25, 0.0 }
0x21cd   :  { %6866 = vadd.xlane.f32.xlu0 %v6865_v37  ;;  %v6862_v15 = vsel %vm170_vm1, %v6854_v50, 0.0  ;;  %13103 = vmatprep.subr.bf16.mxu1 %v13102_v52 }
0x21ce   :  { %6863 = vadd.xlane.f32.xlu1 %v6862_v15  ;;  %13105 = vmatpush3.bf16.msra.mxu1 %v13102_v52 }
0x21cf   :  { %13107 = vmatprep.subr.bf16.mxu1 %v13106_v36 }
0x21d2   :  { %13109 = vmatpush3.bf16.msra.mxu1 %v13106_v36 }
0x224f   :  { %v6861_v48 = vpop.xlane.xlu0 %6860 }
0x2250   :  { %v6869_v32 = vmul.f32 0.03125, %v6861_v48  ;;  %v6858_v11 = vpop.xlane.xlu1 %6857 }
0x2251   :  { %v6868_v29 = vmul.f32 0.03125, %v6858_v11 }
0x2252   :  { %v6873_v34 = vsub.f32 %v6853_v21, %v6869_v32  ;;  %v10706_v32 = vld [vmem:[%s17434_s3 + $0x1e] ss:$0 sm:$0xff] }
0x2253   :  { %v6872_v20 = vsub.f32 %v6852_v31, %v6868_v29  ;;  %v10705_v31 = vld [vmem:[%s17434_s3 + $0x1d] ss:$0 sm:$0xff] }
0x2254   :  { %v6877_v49 = vmul.f32 %v6873_v34, %v6873_v34 }
0x2255   :  { %v6876_v17 = vmul.f32 %v6872_v20, %v6872_v20 }
0x2256   :  { %v6883_v35 = vsel %vm170_vm1, %v6877_v49, 0.0 }
0x2257   :  { %6884 = vadd.xlane.f32.xlu0 %v6883_v35  ;;  %v6880_v51 = vsel %vm170_vm1, %v6876_v17, 0.0 }
0x2258   :  { %6881 = vadd.xlane.f32.xlu1 %v6880_v51 }
0x225a   :  { %v6867_v2 = vpop.xlane.xlu0 %6866 }
0x225b   :  { %v6871_v42 = vmul.f32 0.03125, %v6867_v2  ;;  %v6864_v40 = vpop.xlane.xlu1 %6863 }
0x225c   :  { %v6870_v30 = vmul.f32 0.03125, %v6864_v40 }
0x225d   :  { %v6875_v61 = vsub.f32 %v6855_v25, %v6871_v42 }
0x225e   :  { %v6874_v63 = vsub.f32 %v6854_v50, %v6870_v30 }
0x225f   :  { %v6879_v4 = vmul.f32 %v6875_v61, %v6875_v61 }
0x2260   :  { %v6878_v41 = vmul.f32 %v6874_v63, %v6874_v63 }
0x2261   :  { %v6889_v38 = vsel %vm170_vm1, %v6879_v4, 0.0 }
0x2262   :  { %6890 = vadd.xlane.f32.xlu0 %v6889_v38  ;;  %v6886_v33 = vsel %vm170_vm1, %v6878_v41, 0.0 }
0x2263   :  { %6887 = vadd.xlane.f32.xlu1 %v6886_v33 }
0x22e4   :  { %v6885_v14 = vpop.xlane.xlu0 %6884 }
0x22e5   :  { %v6893_v22 = vmul.f32 0.03125, %v6885_v14  ;;  %v6882_v43 = vpop.xlane.xlu1 %6881 }
0x22e6   :  { %v6892_v44 = vmul.f32 0.03125, %v6882_v43 }
0x22e7   :  { %v6897_v56 = vadd.f32 1e-05, %v6893_v22 }
0x22e8   :  { %v6896_v0 = vadd.f32 1e-05, %v6892_v44 }
0x22e9   :  { %14131 = vrsqrt.f32 %v6897_v56 }
0x22ea   :  { %14133 = vrsqrt.f32 %v6896_v0 }
0x22ef   :  { %v6891_v16 = vpop.xlane.xlu0 %6890 }
0x22f0   :  { %v6895_v47 = vmul.f32 0.03125, %v6891_v16  ;;  %v6888_v5 = vpop.xlane.xlu1 %6887 }
0x22f1   :  { %v6894_v59 = vmul.f32 0.03125, %v6888_v5 }
0x22f2   :  { %v6899_v10 = vadd.f32 1e-05, %v6895_v47 }
0x22f3   :  { %v14132_v53 = vpop.eup %14131  ;;  %v6898_v26 = vadd.f32 1e-05, %v6894_v59 }
0x22f4   :  { %v14134_v60 = vpop.eup %14133  ;;  %v6905_v3 = vmul.f32 %v14132_v53, %v6873_v34  ;;  %14135 = vrsqrt.f32 %v6899_v10 }
0x22f5   :  { %14137 = vrsqrt.f32 %v6898_v26  ;;  %v6904_v12 = vmul.f32 %v14134_v60, %v6872_v20 }
0x22f6   :  { %v6914_v21 = vmul.f32 %v10704_v9, %v6905_v3 }
0x22f7   :  { %v6913_v45 = vmul.f32 %v10704_v9, %v6904_v12 }
0x22f8   :  { %v16454_v13 = vadd.f32 %v10705_v31, %v6914_v21 }
0x22f9   :  { %v16452_v23 = vadd.f32 %v10705_v31, %v6913_v45 }
0x22fb   :  { %12226 = vmatprep.mubr.msk.f32.mxu1 %vm170_vm1, %v16452_v23 }
0x22fc   :  { %12227 = vmatmul.mubr.msk.f32.vlgmr.msra.gmra.mrb[100].mxu1 %vm170_vm1, %v16454_v13 }
0x22fe   :  { %v14136_v62 = vpop.eup %14135 }
0x22ff   :  { %v14138_v58 = vpop.eup %14137  ;;  %v6907_v6 = vmul.f32 %v14136_v62, %v6875_v61 }
0x2300   :  { %v6906_v25 = vmul.f32 %v14138_v58, %v6874_v63 }
0x2301   :  { %v6916_v50 = vmul.f32 %v10704_v9, %v6907_v6 }
0x2302   :  { %v6915_v37 = vmul.f32 %v10704_v9, %v6906_v25 }
0x2303   :  { %v16462_v48 = vadd.f32 %v10705_v31, %v6916_v50 }
0x2304   :  { %v16460_v15 = vadd.f32 %v10705_v31, %v6915_v37 }
0x2306   :  { %12229 = vmatprep.mubr.msk.f32.mxu1 %vm170_vm1, %v16460_v15 }
0x2307   :  { %12230 = vmatmul.mubr.msk.f32.gmra.mrb[102].mxu1 %vm170_vm1, %v16462_v48 }
0x23cf   :  { %v12228_v11 = vpop.f32.mrb[100].mxu1 }
0x23d0   :  { %v7019_v29 = vadd.f32 %v12228_v11, %v10706_v32  ;;  %v7013_v34 = vpop.f32.mrb[101].mxu1 }
0x23d1   :  { %v7014_v20 = vadd.f32 %v10706_v32, %v7013_v34 }
0x23d2   :  { %v7033_v30 = vmul.f32 0.35355338, %v7019_v29 }
0x23d3   :  { %v16471_v49 = vpack.i.bf16 %v7019_v29, %v7014_v20  ;;  %v7032_v17 = vmul.f32 0.35355338, %v7014_v20 }
0x23d5   :  { %13678 = vrot.lane.b32.xlu1 %v16471_v49, %s14335_s7  ;;  %12240 = vmatprep.mubr.msk.f32.mxu1 %vm284_vm2, %v7032_v17 }
0x23d9   :  { %13688 = vrot.lane.b32.xlu1 %v16471_v49, %s14336_s8 }
0x23da   :  { %v12231_v35 = vpop.f32.mrb[102].mxu1 }
0x23db   :  { %v7029_v51 = vadd.f32 %v12231_v35, %v10706_v32  ;;  %v7023_v2 = vpop.f32.mrb[103].mxu1 }
0x23dc   :  { %v7024_v42 = vadd.f32 %v10706_v32, %v7023_v2 }
0x23dd   :  { %v7035_v61 = vmul.f32 0.35355338, %v7029_v51 }
0x23de   :  { %v16478_v40 = vpack.i.bf16 %v7029_v51, %v7024_v42  ;;  %v7034_v63 = vmul.f32 0.35355338, %v7024_v42 }
0x23e0   :  { %13693 = vrot.lane.b32.xlu1 %v16478_v40, %s14336_s8  ;;  %13683 = vrot.lane.b32.xlu0 %v16478_v40, %s14335_s7 }
0x23e4   :  { %13703 = vrot.lane.b32.xlu1 %v16471_v49, %s14338_s10  ;;  %13698 = vrot.lane.b32.xlu0 %v16471_v49, %s14337_s9 }
0x23e8   :  { %7155 = vrot.lane.b32.xlu1 %v7033_v30, %s14339_s11  ;;  %7153 = vrot.lane.b32.xlu0 %v7032_v17, %s14339_s11 }
0x23ec   :  { %13713 = vrot.lane.b32.xlu1 %v16478_v40, %s14338_s10  ;;  %13708 = vrot.lane.b32.xlu0 %v16478_v40, %s14337_s9 }
0x23f0   :  { %7272 = vrot.lane.b32.xlu1 %v7033_v30, %s14340_s12  ;;  %7270 = vrot.lane.b32.xlu0 %v7032_v17, %s14340_s12 }
0x23f4   :  { %7159 = vrot.lane.b32.xlu1 %v7035_v61, %s14339_s11  ;;  %7157 = vrot.lane.b32.xlu0 %v7034_v63, %s14339_s11 }
0x23f8   :  { %7389 = vrot.lane.b32.xlu1 %v7033_v30, %s14341_s13  ;;  %7387 = vrot.lane.b32.xlu0 %v7032_v17, %s14341_s13 }
0x23fc   :  { %7276 = vrot.lane.b32.xlu1 %v7035_v61, %s14340_s12  ;;  %7274 = vrot.lane.b32.xlu0 %v7034_v63, %s14340_s12 }
0x2400   :  { %7393 = vrot.lane.b32.xlu1 %v7035_v61, %s14341_s13  ;;  %7391 = vrot.lane.b32.xlu0 %v7034_v63, %s14341_s13 }
0x2404   :  { %13718 = vrot.lane.b32.xlu1 %v16471_v49, %s14343_s15  ;;  %13723 = vrot.lane.b32.xlu0 %v16478_v40, %s14343_s15 }
0x2408   :  { %13728 = vrot.lane.b32.xlu0 %v16471_v49, %s14342_s14 }
0x2447   :  { %v13679_v4 = vpop.permute.xlu1 %13678 }
0x2448   :  { %v13681_v41 = vunpack.i.h.bf16 %v13679_v4  ;;  %v13680_v38 = vunpack.i.l.bf16 %v13679_v4 }
0x244a   :  { %v13110_v33 = vpack.c.bf16 %v13681_v41, %v13680_v38 }
0x244b   :  { %v13689_v18 = vpop.permute.xlu1 %13688 }
0x244c   :  { %13112 = vmatprep.subr.msk.bf16.mxu1 %vm14520_vm3, %v13110_v33  ;;  %v13691_v39 = vunpack.i.h.bf16 %v13689_v18  ;;  %v13690_v46 = vunpack.i.l.bf16 %v13689_v18 }
0x244d   :  { %13115 = vmatpush3.bf16.xpose.msk.msra.mxu1 %vm14520_vm3, %v13110_v33 }
0x244e   :  { %v13122_v56 = vpack.c.bf16 %v13691_v39, %v13690_v46 }
0x2452   :  { %v13694_v55 = vpop.permute.xlu1 %13693  ;;  %v13684_v52 = vpop.permute.xlu0 %13683 }
0x2453   :  { %v13686_v36 = vunpack.i.h.bf16 %v13684_v52  ;;  %v13685_v14 = vunpack.i.l.bf16 %v13684_v52  ;;  %v13696_v10 = vunpack.i.h.bf16 %v13694_v55  ;;  %v13695_v53 = vunpack.i.l.bf16 %v13694_v55 }
0x2455   :  { %v13116_v22 = vpack.c.bf16 %v13686_v36, %v13685_v14  ;;  %v13128_v60 = vpack.c.bf16 %v13696_v10, %v13695_v53 }
0x2456   :  { %v13704_v43 = vpop.permute.xlu1 %13703  ;;  %v13699_v44 = vpop.permute.xlu0 %13698 }
0x2457   :  { %v13701_v0 = vunpack.i.h.bf16 %v13699_v44  ;;  %v13700_v16 = vunpack.i.l.bf16 %v13699_v44  ;;  %13118 = vmatprep.subr.msk.bf16.mxu1 %vm14520_vm3, %v13116_v22  ;;  %v13706_v62 = vunpack.i.h.bf16 %v13704_v43  ;;  %v13705_v58 = vunpack.i.l.bf16 %v13704_v43 }
0x2458   :  { %13121 = vmatpush3.bf16.xpose.msk.msra.mxu1 %vm14520_vm3, %v13116_v22 }
0x2459   :  { %v13134_v47 = vpack.c.bf16 %v13701_v0, %v13700_v16  ;;  %13124 = vmatprep.subr.msk.bf16.mxu1 %vm14520_vm3, %v13122_v56  ;;  %v13146_v50 = vpack.c.bf16 %v13706_v62, %v13705_v58 }
0x245a   :  { %v7156_v5 = vpop.permute.xlu1 %7155  ;;  %v7154_v59 = vpop.permute.xlu0 %7153 }
0x245b   :  { %13136 = vmatprep.subr.msk.bf16.mxu0 %vm14520_vm3, %v13134_v47 }
0x245c   :  { %13139 = vmatpush3.bf16.xpose.msk.msra.mxu0 %vm14520_vm3, %v13134_v47 }
0x245e   :  { %v13714_v26 = vpop.permute.xlu1 %13713  ;;  %v13709_v9 = vpop.permute.xlu0 %13708 }
0x245f   :  { %v13711_v3 = vunpack.i.h.bf16 %v13709_v9  ;;  %v13710_v12 = vunpack.i.l.bf16 %v13709_v9  ;;  %12241 = vmatmul.mubr.msk.f32.vlgmr.msra.gmra.mrb[104].mxu1 %vm284_vm2, %v7033_v30  ;;  %v13716_v11 = vunpack.i.h.bf16 %v13714_v26  ;;  %v13715_v29 = vunpack.i.l.bf16 %v13714_v26 }
0x2460   :  { %12243 = vmatprep.mubr.msk.f32.mxu1 %vm284_vm2, %v7034_v63  ;;  %13127 = vmatpush3.bf16.xpose.msk.msra.mxu1 %vm14520_vm3, %v13122_v56 }
0x2461   :  { %v13140_v21 = vpack.c.bf16 %v13711_v3, %v13710_v12  ;;  %13130 = vmatprep.subr.msk.bf16.mxu1 %vm14520_vm3, %v13128_v60  ;;  %v13152_v17 = vpack.c.bf16 %v13716_v11, %v13715_v29 }
0x2462   :  { %v7273_v31 = vpop.permute.xlu1 %7272  ;;  %v7271_v45 = vpop.permute.xlu0 %7270 }
0x2463   :  { %12244 = vmatmul.mubr.msk.f32.gmra.mrb[106].mxu1 %vm284_vm2, %v7035_v61  ;;  %13142 = vmatprep.subr.msk.bf16.mxu0 %vm14520_vm3, %v13140_v21 }
0x2464   :  { %12268 = vmatprep.mubr.msk.f32.mxu0 %vm284_vm2, %v7271_v45  ;;  %12254 = vmatprep.mubr.msk.f32.mxu1 %vm284_vm2, %v7154_v59 }
0x2465   :  { %13145 = vmatpush3.bf16.xpose.msk.msra.mxu0 %vm14520_vm3, %v13140_v21 }
0x2466   :  { %v7160_v6 = vpop.permute.xlu1 %7159  ;;  %v7158_v25 = vpop.permute.xlu0 %7157 }
0x2468   :  { %13133 = vmatpush3.bf16.xpose.msk.msra.mxu1 %vm14520_vm3, %v13128_v60 }
0x2469   :  { %13148 = vmatprep.subr.msk.bf16.mxu1 %vm14520_vm3, %v13146_v50 }
0x246a   :  { %v7390_v37 = vpop.permute.xlu1 %7389  ;;  %v7388_v32 = vpop.permute.xlu0 %7387 }
0x246c   :  { %12269 = vmatmul.mubr.msk.f32.vlgmr.msra.gmra.mrb[92].mxu0 %vm284_vm2, %v7273_v31 }
0x246e   :  { %v7277_v34 = vpop.permute.xlu1 %7276  ;;  %v7275_v20 = vpop.permute.xlu0 %7274 }
0x246f   :  { %12255 = vmatmul.mubr.msk.f32.vlgmr.msra.gmra.mrb[108].mxu1 %vm284_vm2, %v7156_v5  ;;  %12271 = vmatprep.mubr.msk.f32.mxu0 %vm284_vm2, %v7275_v20 }
0x2470   :  { %12257 = vmatprep.mubr.msk.f32.mxu1 %vm284_vm2, %v7158_v25  ;;  %12272 = vmatmul.mubr.msk.f32.gmra.mrb[94].mxu0 %vm284_vm2, %v7277_v34 }
0x2471   :  { %13151 = vmatpush3.bf16.xpose.msk.msra.mxu1 %vm14520_vm3, %v13146_v50 }
0x2472   :  { %13154 = vmatprep.subr.msk.bf16.mxu1 %vm14520_vm3, %v13152_v17  ;;  %v7394_v35 = vpop.permute.xlu1 %7393  ;;  %v7392_v51 = vpop.permute.xlu0 %7391 }
0x2473   :  { %12258 = vmatmul.mubr.msk.f32.gmra.mrb[110].mxu1 %vm284_vm2, %v7160_v6 }
0x2474   :  { %12282 = vmatprep.mubr.msk.f32.mxu1 %vm284_vm2, %v7388_v32 }
0x2476   :  { %v13719_v2 = vpop.permute.xlu1 %13718  ;;  %v13724_v42 = vpop.permute.xlu0 %13723 }
0x2477   :  { %v13721_v30 = vunpack.i.h.bf16 %v13719_v2  ;;  %v13720_v61 = vunpack.i.l.bf16 %v13719_v2  ;;  %v13726_v63 = vunpack.i.h.bf16 %v13724_v42  ;;  %v13725_v4 = vunpack.i.l.bf16 %v13724_v42 }
0x2479   :  { %13157 = vmatpush3.bf16.xpose.msk.msra.mxu1 %vm14520_vm3, %v13152_v17  ;;  %v13158_v41 = vpack.c.bf16 %v13721_v30, %v13720_v61  ;;  %v13162_v55 = vpack.c.bf16 %v13726_v63, %v13725_v4 }
0x247a   :  { %v13729_v38 = vpop.permute.xlu0 %13728 }
0x247b   :  { %v13731_v33 = vunpack.i.h.bf16 %v13729_v38  ;;  %v13730_v18 = vunpack.i.l.bf16 %v13729_v38  ;;  %13159 = vmatprep.subr.bf16.mxu0 %v13158_v41 }
0x247c   :  { %13161 = vmatpush3.bf16.msra.mxu0 %v13158_v41 }
0x247d   :  { %13163 = vmatprep.subr.bf16.mxu0 %v13162_v55  ;;  %v16554_v52 = vpack.c.bf16 %v13731_v33, %v13730_v18 }
0x2480   :  { %12283 = vmatmul.mubr.msk.f32.vlgmr.msra.gmra.mrb[112].mxu1 %vm284_vm2, %v7390_v37  ;;  %13165 = vmatpush3.bf16.msra.mxu0 %v13162_v55 }
0x2481   :  { %12285 = vmatprep.mubr.msk.f32.mxu1 %vm284_vm2, %v7392_v51  ;;  %13167 = vmatprep.subr.bf16.mxu0 %v16554_v52 }
0x2484   :  { %12286 = vmatmul.mubr.msk.f32.gmra.mrb[114].mxu1 %vm284_vm2, %v7394_v35 }
0x2532   :  { %v12242_v39 = vpop.f32.mrb[104].mxu1 }
0x2533   :  { %v16561_v46 = vadd.f32 %v12242_v39, %v14574_v1  ;;  %v7134_v36 = vpop.f32.mrb[105].mxu1 }
0x2534   :  { %v16572_v47 = vadd.f32 %v7134_v36, %v14583_v8 }
0x2535   :  { %v7523_v14 = vsel %vm170_vm1, %v16561_v46, -inf }
0x2536   :  { %7524 = vmax.xlane.f32.xlu1 %v7523_v14  ;;  %v12245_v22 = vpop.f32.mrb[106].mxu1  ;;  %v7520_v12 = vsel %vm170_vm1, %v16572_v47, -inf }
0x2537   :  { %v7144_v43 = vpop.f32.mrb[107].mxu1  ;;  %v16582_v3 = vadd.f32 %v12245_v22, %v14606_v24 }
0x2538   :  { %v16602_v37 = vadd.f32 %v7144_v43, %v14581_v7 }
0x2539   :  { %v7529_v6 = vsel %vm170_vm1, %v16582_v3, -inf }
0x253a   :  { %v7526_v34 = vsel %vm170_vm1, %v16602_v37, -inf }
0x253f   :  { %v12270_v44 = vpop.f32.mrb[92].mxu0 }
0x2540   :  { %v16566_v56 = vadd.f32 %v12270_v44, %v14574_v1  ;;  %v7368_v0 = vpop.f32.mrb[93].mxu0 }
0x2541   :  { %v16569_v16 = vadd.f32 %v7368_v0, %v14583_v8 }
0x2542   :  { %v7547_v5 = vsel %vm170_vm1, %v16566_v56, -inf  ;;  %v12256_v59 = vpop.f32.mrb[108].mxu1 }
0x2543   :  { %7548 = vmax.xlane.f32.xlu0 %v7547_v5  ;;  %v7544_v10 = vsel %vm170_vm1, %v16569_v16, -inf  ;;  %v7251_v53 = vpop.f32.mrb[109].mxu1  ;;  %v12273_v26 = vpop.f32.mrb[94].mxu0  ;;  %v16609_v29 = vadd.f32 %v12256_v59, %v14574_v1 }
0x2544   :  { %7545 = vmax.xlane.f32.xlu1 %v7544_v10  ;;  %v7378_v9 = vpop.f32.mrb[95].mxu0  ;;  %v16587_v31 = vadd.f32 %v7251_v53, %v14583_v8  ;;  %v16592_v58 = vadd.f32 %v12273_v26, %v14606_v24 }
0x2545   :  { %v16579_v60 = vadd.f32 %v7378_v9, %v14581_v7  ;;  %v7535_v2 = vsel %vm170_vm1, %v16609_v29, -inf }
0x2546   :  { %v12259_v21 = vpop.f32.mrb[110].mxu1  ;;  %v7532_v50 = vsel %vm170_vm1, %v16587_v31, -inf  ;;  %v7553_v32 = vsel %vm170_vm1, %v16592_v58, -inf }
0x2547   :  { %7521 = vmax.xlane.f32.xlu0 %v7520_v12  ;;  %v7261_v45 = vpop.f32.mrb[111].mxu1  ;;  %v7550_v62 = vsel %vm170_vm1, %v16579_v60, -inf  ;;  %v16617_v51 = vadd.f32 %v12259_v21, %v14606_v24 }
0x2548   :  { %7551 = vmax.xlane.f32.xlu1 %v7550_v62  ;;  %v16597_v25 = vadd.f32 %v7261_v45, %v14581_v7 }
0x2549   :  { %v7541_v4 = vsel %vm170_vm1, %v16617_v51, -inf }
0x254a   :  { %v7538_v11 = vsel %vm170_vm1, %v16597_v25, -inf }
0x254b   :  { %7530 = vmax.xlane.f32.xlu0 %v7529_v6 }
0x254c   :  { %7533 = vmax.xlane.f32.xlu1 %v7532_v50 }
0x254f   :  { %7554 = vmax.xlane.f32.xlu0 %v7553_v32 }
0x2550   :  { %7539 = vmax.xlane.f32.xlu1 %v7538_v11 }
0x2553   :  { %7527 = vmax.xlane.f32.xlu0 %v7526_v34  ;;  %v12284_v20 = vpop.f32.mrb[112].mxu1 }
0x2554   :  { %v7485_v17 = vpop.f32.mrb[113].mxu1  ;;  %v16624_v63 = vadd.f32 %v12284_v20, %v14574_v1 }
0x2555   :  { %v16614_v35 = vadd.f32 %v7485_v17, %v14583_v8 }
0x2556   :  { %v7559_v38 = vsel %vm170_vm1, %v16624_v63, -inf }
0x2557   :  { %7536 = vmax.xlane.f32.xlu0 %v7535_v2  ;;  %v12287_v42 = vpop.f32.mrb[114].mxu1  ;;  %v7556_v30 = vsel %vm170_vm1, %v16614_v35, -inf }
0x2558   :  { %7557 = vmax.xlane.f32.xlu1 %v7556_v30  ;;  %v7495_v61 = vpop.f32.mrb[115].mxu1  ;;  %v16629_v41 = vadd.f32 %v12287_v42, %v14606_v24 }
0x2559   :  { %v16640_v18 = vadd.f32 %v7495_v61, %v14581_v7 }
0x255a   :  { %v7565_v33 = vsel %vm170_vm1, %v16629_v41, -inf }
0x255b   :  { %7542 = vmax.xlane.f32.xlu0 %v7541_v4  ;;  %v7562_v55 = vsel %vm170_vm1, %v16640_v18, -inf }
0x255f   :  { %7560 = vmax.xlane.f32.xlu0 %v7559_v38 }
0x2563   :  { %7566 = vmax.xlane.f32.xlu0 %v7565_v33 }
0x2569   :  { %13738 = vrot.lane.b32.xlu1 %v16471_v49, %s14346_s17 }
0x2579   :  { %13733 = vrot.lane.b32.xlu0 %v16478_v40, %s14342_s14 }
0x258d   :  { %7563 = vmax.xlane.f32.xlu1 %v7562_v55 }
0x259e   :  { %13743 = vrot.lane.b32.xlu1 %v16471_v49, %s14345_s16 }
0x25c3   :  { %v7525_v39 = vpop.xlane.xlu1 %7524 }
0x25c4   :  { %v7569_v36 = vsub.f32 %v16561_v46, %v7525_v39 }
0x25c6   :  { %v7586_v14 = vmul.f32 1.442695, %v7569_v36 }
0x25c8   :  { %14139 = vpow2.f32 %v7586_v14 }
0x25d0   :  { %v7549_v22 = vpop.xlane.xlu0 %7548 }
0x25d1   :  { %v7577_v43 = vsub.f32 %v16566_v56, %v7549_v22  ;;  %v7546_v44 = vpop.xlane.xlu1 %7545 }
0x25d2   :  { %v16648_v0 = vpop.eup %14139  ;;  %v7576_v59 = vsub.f32 %v16569_v16, %v7546_v44 }
0x25d3   :  { %v7602_v5 = vmul.f32 1.442695, %v7577_v43  ;;  %v7619_v10 = vsel %vm170_vm1, %v16648_v0, 0.0 }
0x25d4   :  { %v7522_v53 = vpop.xlane.xlu0 %7521  ;;  %7620 = vadd.xlane.f32.xlu0 %v7619_v10  ;;  %v7600_v26 = vmul.f32 1.442695, %v7576_v59 }
0x25d5   :  { %14141 = vpow2.f32 %v7602_v5  ;;  %v7568_v49 = vsub.f32 %v16572_v47, %v7522_v53  ;;  %v7552_v46 = vpop.xlane.xlu1 %7551 }
0x25d6   :  { %v7578_v50 = vsub.f32 %v16579_v60, %v7552_v46 }
0x25d7   :  { %v7584_v9 = vmul.f32 1.442695, %v7568_v49 }
0x25d8   :  { %v7531_v12 = vpop.xlane.xlu0 %7530  ;;  %v7604_v17 = vmul.f32 1.442695, %v7578_v50 }
0x25d9   :  { %14143 = vpow2.f32 %v7584_v9  ;;  %v7571_v56 = vsub.f32 %v16582_v3, %v7531_v12  ;;  %v7534_v45 = vpop.xlane.xlu1 %7533 }
0x25da   :  { %14145 = vpow2.f32 %v7600_v26  ;;  %v7572_v2 = vsub.f32 %v16587_v31, %v7534_v45 }
0x25db   :  { %v7590_v21 = vmul.f32 1.442695, %v7571_v56 }
0x25dc   :  { %v7555_v62 = vpop.xlane.xlu0 %7554 }
0x25dd   :  { %14147 = vpow2.f32 %v7590_v21  ;;  %v7579_v16 = vsub.f32 %v16592_v58, %v7555_v62  ;;  %v7540_v34 = vpop.xlane.xlu1 %7539 }
0x25de   :  { %v7574_v33 = vsub.f32 %v16597_v25, %v7540_v34 }
0x25df   :  { %v16656_v6 = vpop.eup %14141  ;;  %v7606_v32 = vmul.f32 1.442695, %v7579_v16 }
0x25e0   :  { %v7528_v47 = vpop.xlane.xlu0 %7527  ;;  %v7643_v11 = vsel %vm170_vm1, %v16656_v6, 0.0  ;;  %v7596_v25 = vmul.f32 1.442695, %v7574_v33 }
0x25e1   :  { %14149 = vpow2.f32 %v7606_v32  ;;  %v7570_v3 = vsub.f32 %v16602_v37, %v7528_v47  ;;  %7644 = vadd.xlane.f32.xlu0 %v7643_v11  ;;  %v7592_v37 = vmul.f32 1.442695, %v7572_v2 }
0x25e3   :  { %v16662_v20 = vpop.eup %14143  ;;  %v7588_v58 = vmul.f32 1.442695, %v7570_v3 }
0x25e4   :  { %v7537_v42 = vpop.xlane.xlu0 %7536  ;;  %v7616_v60 = vsel %vm170_vm1, %v16662_v20, 0.0  ;;  %v16667_v30 = vpop.eup %14145 }
0x25e5   :  { %14151 = vpow2.f32 %v7588_v58  ;;  %v7573_v61 = vsub.f32 %v16609_v29, %v7537_v42  ;;  %v7558_v4 = vpop.xlane.xlu1 %7557  ;;  %7617 = vadd.xlane.f32.xlu1 %v7616_v60  ;;  %v7640_v36 = vsel %vm170_vm1, %v16667_v30, 0.0 }
0x25e6   :  { %14153 = vpow2.f32 %v7604_v17  ;;  %v7580_v5 = vsub.f32 %v16614_v35, %v7558_v4 }
0x25e7   :  { %v16670_v38 = vpop.eup %14147  ;;  %v7594_v55 = vmul.f32 1.442695, %v7573_v61 }
0x25e8   :  { %v7543_v31 = vpop.xlane.xlu0 %7542  ;;  %v7625_v39 = vsel %vm170_vm1, %v16670_v38, 0.0  ;;  %v7608_v26 = vmul.f32 1.442695, %v7580_v5 }
0x25e9   :  { %14155 = vpow2.f32 %v7594_v55  ;;  %v7575_v14 = vsub.f32 %v16617_v51, %v7543_v31  ;;  %v13739_v29 = vpop.permute.xlu1 %13738  ;;  %7626 = vadd.xlane.f32.xlu0 %v7625_v39  ;;  %7641 = vadd.xlane.f32.xlu1 %v7640_v36 }
0x25ea   :  { %v13741_v22 = vunpack.i.h.bf16 %v13739_v29  ;;  %v13740_v43 = vunpack.i.l.bf16 %v13739_v29  ;;  %14157 = vpow2.f32 %v7592_v37 }
0x25eb   :  { %v16678_v44 = vpop.eup %14149  ;;  %v7598_v59 = vmul.f32 1.442695, %v7575_v14 }
0x25ec   :  { %v7561_v10 = vpop.xlane.xlu0 %7560  ;;  %v7649_v53 = vsel %vm170_vm1, %v16678_v44, 0.0  ;;  %v13174_v49 = vpack.c.bf16 %v13741_v22, %v13740_v43 }
0x25ed   :  { %14159 = vpow2.f32 %v7598_v59  ;;  %v7581_v51 = vsub.f32 %v16624_v63, %v7561_v10  ;;  %7650 = vadd.xlane.f32.xlu0 %v7649_v53 }
0x25ee   :  { %13175 = vmatprep.subr.bf16.mxu1 %v13174_v49  ;;  %14161 = vpow2.f32 %v7596_v25 }
0x25ef   :  { %v16684_v46 = vpop.eup %14151  ;;  %v7610_v9 = vmul.f32 1.442695, %v7581_v51  ;;  %13177 = vmatpush3.bf16.msra.mxu1 %v13174_v49 }
0x25f0   :  { %v7567_v12 = vpop.xlane.xlu0 %7566  ;;  %v7622_v35 = vsel %vm170_vm1, %v16684_v46, 0.0  ;;  %v16688_v56 = vpop.eup %14153 }
0x25f1   :  { %14163 = vpow2.f32 %v7610_v9  ;;  %v7583_v21 = vsub.f32 %v16629_v41, %v7567_v12  ;;  %7623 = vadd.xlane.f32.xlu1 %v7622_v35  ;;  %v7646_v16 = vsel %vm170_vm1, %v16688_v56, 0.0 }
0x25f2   :  { %14165 = vpow2.f32 %v7608_v26 }
0x25f3   :  { %v16691_v45 = vpop.eup %14155  ;;  %v7614_v63 = vmul.f32 1.442695, %v7583_v21 }
0x25f4   :  { %v7631_v62 = vsel %vm170_vm1, %v16691_v45, 0.0  ;;  %v16697_v50 = vpop.eup %14157  ;;  %v13734_v31 = vpop.permute.xlu0 %13733 }
0x25f5   :  { %7632 = vadd.xlane.f32.xlu0 %v7631_v62  ;;  %7647 = vadd.xlane.f32.xlu1 %v7646_v16  ;;  %14167 = vpow2.f32 %v7614_v63  ;;  %v7628_v47 = vsel %vm170_vm1, %v16697_v50, 0.0  ;;  %v13736_v5 = vunpack.i.h.bf16 %v13734_v31  ;;  %v13735_v59 = vunpack.i.l.bf16 %v13734_v31 }
0x25f7   :  { %v16699_v32 = vpop.eup %14159  ;;  %v13170_v9 = vpack.c.bf16 %v13736_v5, %v13735_v59 }
0x25f8   :  { %v7637_v41 = vsel %vm170_vm1, %v16699_v32, 0.0  ;;  %v16705_v11 = vpop.eup %14161 }
0x25f9   :  { %7638 = vadd.xlane.f32.xlu0 %v7637_v41  ;;  %7629 = vadd.xlane.f32.xlu1 %v7628_v47  ;;  %v7634_v17 = vsel %vm170_vm1, %v16705_v11, 0.0 }
0x25fb   :  { %v16707_v34 = vpop.eup %14163 }
0x25fc   :  { %v7655_v3 = vsel %vm170_vm1, %v16707_v34, 0.0  ;;  %v16713_v2 = vpop.eup %14165 }
0x25fd   :  { %7656 = vadd.xlane.f32.xlu0 %v7655_v3  ;;  %7635 = vadd.xlane.f32.xlu1 %v7634_v17  ;;  %v7652_v58 = vsel %vm170_vm1, %v16713_v2, 0.0 }
0x25ff   :  { %v16717_v42 = vpop.eup %14167 }
0x2600   :  { %v7661_v60 = vsel %vm170_vm1, %v16717_v42, 0.0 }
0x2601   :  { %7653 = vadd.xlane.f32.xlu1 %v7652_v58 }
0x2605   :  { %7662 = vadd.xlane.f32.xlu1 %v7661_v60 }
0x2613   :  { %13748 = vrot.lane.b32.xlu0 %v16478_v40, %s14346_s17 }
0x261a   :  { %v7564_v61 = vpop.xlane.xlu1 %7563 }
0x261b   :  { %v7582_v4 = vsub.f32 %v16640_v18, %v7564_v61 }
0x261d   :  { %v7612_v37 = vmul.f32 1.442695, %v7582_v4 }
0x261e   :  { %v13744_v39 = vpop.permute.xlu1 %13743 }
0x261f   :  { %14169 = vpow2.f32 %v7612_v37  ;;  %v13746_v51 = vunpack.i.h.bf16 %v13744_v39  ;;  %v13745_v26 = vunpack.i.l.bf16 %v13744_v39 }
0x2629   :  { %v16724_v33 = vpop.eup %14169 }
0x262a   :  { %v7658_v55 = vsel %vm170_vm1, %v16724_v33, 0.0 }
0x262b   :  { %7659 = vadd.xlane.f32.xlu1 %v7658_v55 }
0x263c   :  { %13753 = vrot.lane.b32.xlu1 %v16478_v40, %s14345_s16 }
0x2661   :  { %v7621_v36 = vpop.xlane.xlu0 %7620 }
0x2662   :  { %14171 = vrcp.f32 %v7621_v36 }
0x266c   :  { %v14172_v43 = vpop.eup %14171 }
0x266d   :  { %v7667_v40 = vmul.f32 %v14172_v43, %v16648_v0 }
0x266e   :  { %v7645_v29 = vpop.xlane.xlu0 %7644 }
0x2672   :  { %v7618_v14 = vpop.xlane.xlu1 %7617 }
0x2673   :  { %14173 = vrcp.f32 %v7618_v14 }
0x2676   :  { %v7642_v22 = vpop.xlane.xlu1 %7641  ;;  %v7627_v18 = vpop.xlane.xlu0 %7626 }
0x2677   :  { %14175 = vrcp.f32 %v7642_v22 }
0x2678   :  { %14177 = vrcp.f32 %v7627_v18 }
0x267a   :  { %v7651_v10 = vpop.xlane.xlu0 %7650 }
0x267d   :  { %v14174_v25 = vpop.eup %14173 }
0x267e   :  { %v7624_v53 = vpop.xlane.xlu1 %7623  ;;  %v7665_v49 = vmul.f32 %v14174_v25, %v16662_v20  ;;  %v13182_v20 = vpack.c.bf16 %v13746_v51, %v13745_v26 }
0x267f   :  { %14179 = vrcp.f32 %v7624_v53 }
0x2680   :  { %12296 = vmatprep.mubr.msk.f32.mxu0 %vm170_vm1, %v7665_v49  ;;  %14181 = vrcp.f32 %v7645_v29 }
0x2681   :  { %12297 = vmatmul.mubr.msk.f32.vlgmr.msra.gmra.mrb[96].mxu0 %vm170_vm1, %v7667_v40  ;;  %v14176_v12 = vpop.eup %14175 }
0x2682   :  { %13169 = vmatpush3.bf16.msra.mxu0 %v16554_v52  ;;  %v7633_v35 = vpop.xlane.xlu0 %7632  ;;  %v7648_v21 = vpop.xlane.xlu1 %7647  ;;  %v7681_v63 = vmul.f32 %v14176_v12, %v16667_v30 }
0x2683   :  { %13171 = vmatprep.subr.bf16.mxu0 %v13170_v9  ;;  %14183 = vrcp.f32 %v7633_v35  ;;  %v14178_v16 = vpop.eup %14177 }
0x2684   :  { %12324 = vmatprep.mubr.msk.f32.mxu1 %vm170_vm1, %v7681_v63  ;;  %v7671_v30 = vmul.f32 %v14178_v16, %v16670_v38  ;;  %v8195_v63 = vld [vmem:[%s17433_s2 + $0x368] sm:$0xff] }
0x2686   :  { %13173 = vmatpush3.bf16.msra.mxu0 %v13170_v9  ;;  %v7639_v0 = vpop.xlane.xlu0 %7638  ;;  %v7630_v62 = vpop.xlane.xlu1 %7629 }
0x2687   :  { %13183 = vmatprep.subr.bf16.mxu0 %v13182_v20  ;;  %14185 = vrcp.f32 %v7630_v62 }
0x2688   :  { %14187 = vrcp.f32 %v7648_v21 }
0x2689   :  { %v14180_v41 = vpop.eup %14179  ;;  %14189 = vrcp.f32 %v7651_v10 }
0x268a   :  { %v7657_v52 = vpop.xlane.xlu0 %7656  ;;  %v7636_v47 = vpop.xlane.xlu1 %7635  ;;  %v7669_v3 = vmul.f32 %v14180_v41, %v16684_v46  ;;  %14191 = vrcp.f32 %v7639_v0 }
0x268b   :  { %14193 = vrcp.f32 %v7636_v47  ;;  %v14182_v4 = vpop.eup %14181 }
0x268c   :  { %12299 = vmatprep.mubr.msk.f32.mxu0 %vm170_vm1, %v7669_v3  ;;  %v7683_v29 = vmul.f32 %v14182_v4, %v16656_v6 }
0x268d   :  { %12300 = vmatmul.mubr.msk.f32.gmra.mrb[98].mxu0 %vm170_vm1, %v7671_v30  ;;  %v14184_v37 = vpop.eup %14183 }
0x268e   :  { %v13749_v17 = vpop.permute.xlu0 %13748  ;;  %v7654_v58 = vpop.xlane.xlu1 %7653  ;;  %v7675_v38 = vmul.f32 %v14184_v37, %v16691_v45 }
0x268f   :  { %v13751_v60 = vunpack.i.h.bf16 %v13749_v17  ;;  %v13750_v61 = vunpack.i.l.bf16 %v13749_v17  ;;  %14195 = vrcp.f32 %v7654_v58  ;;  %v8478_v17 = vld [vmem:[%s17433_s2 + $0x390] sm:$0xff]  ;;  %v8479_v58 = vld [vmem:[%s17433_s2 + $0x398] sm:$0xff] }
0x2690   :  { %14197 = vrcp.f32 %v7657_v52 }
0x2691   :  { %v13178_v55 = vpack.c.bf16 %v13751_v60, %v13750_v61  ;;  %v14186_v31 = vpop.eup %14185  ;;  %v13206_v60 = vpack.c.bf16 %v8479_v58, %v8478_v17 }
0x2692   :  { %v14188_v39 = vpop.eup %14187  ;;  %v7673_v46 = vmul.f32 %v14186_v31, %v16697_v50 }
0x2693   :  { %13179 = vmatprep.subr.bf16.mxu1 %v13178_v55  ;;  %v14190_v36 = vpop.eup %14189  ;;  %v7685_v18 = vmul.f32 %v14188_v39, %v16688_v56  ;;  %v7663_v56 = vpop.xlane.xlu1 %7662 }
0x2694   :  { %13181 = vmatpush3.bf16.msra.mxu1 %v13178_v55  ;;  %v14192_v14 = vpop.eup %14191  ;;  %12310 = vmatprep.mubr.msk.f32.mxu0 %vm170_vm1, %v7673_v46  ;;  %v7687_v6 = vmul.f32 %v14190_v36, %v16678_v44 }
0x2695   :  { %v14194_v22 = vpop.eup %14193  ;;  %12311 = vmatmul.mubr.msk.f32.vlgmr.msra.gmra.mrb[100].mxu0 %vm170_vm1, %v7675_v38  ;;  %v7679_v45 = vmul.f32 %v14192_v14, %v16699_v32 }
0x2696   :  { %13185 = vmatpush3.bf16.msra.mxu0 %v13182_v20  ;;  %v7677_v43 = vmul.f32 %v14194_v22, %v16705_v11  ;;  %v8481_v22 = vld [vmem:[%s17433_s2 + $0x3a8] sm:$0xff] }
0x2697   :  { %12325 = vmatmul.mubr.msk.f32.vlgmr.msra.gmra.mrb[116].mxu1 %vm170_vm1, %v7683_v29  ;;  %v8480_v29 = vld [vmem:[%s17433_s2 + $0x3a0] sm:$0xff] }
0x2698   :  { %12327 = vmatprep.mubr.msk.f32.mxu1 %vm170_vm1, %v7685_v18  ;;  %12313 = vmatprep.mubr.msk.f32.mxu0 %vm170_vm1, %v7677_v43 }
0x2699   :  { %v14196_v50 = vpop.eup %14195  ;;  %12314 = vmatmul.mubr.msk.f32.gmra.mrb[102].mxu0 %vm170_vm1, %v7679_v45 }
0x269a   :  { %v7689_v25 = vmul.f32 %v14196_v50, %v16713_v2  ;;  %v14198_v53 = vpop.eup %14197 }
0x269b   :  { %12328 = vmatmul.mubr.msk.f32.gmra.mrb[118].mxu1 %vm170_vm1, %v7687_v6  ;;  %v7691_v49 = vmul.f32 %v14198_v53, %v16707_v34  ;;  %v8192_v34 = vld [vmem:[%s17433_s2 + $0x350] sm:$0xff] }
0x269c   :  { %12338 = vmatprep.mubr.msk.f32.mxu0 %vm170_vm1, %v7689_v25  ;;  %v13210_v25 = vpack.c.bf16 %v8481_v22, %v8480_v29 }
0x26b8   :  { %v7660_v11 = vpop.xlane.xlu1 %7659 }
0x26b9   :  { %14199 = vrcp.f32 %v7660_v11 }
0x26ba   :  { %14201 = vrcp.f32 %v7663_v56 }
0x26bc   :  { %v13754_v5 = vpop.permute.xlu1 %13753 }
0x26bd   :  { %v13756_v32 = vunpack.i.h.bf16 %v13754_v5  ;;  %v13755_v59 = vunpack.i.l.bf16 %v13754_v5 }
0x26bf   :  { %v13186_v10 = vpack.c.bf16 %v13756_v32, %v13755_v59 }
0x26c1   :  { %13187 = vmatprep.subr.bf16.mxu0 %v13186_v10 }
0x26c2   :  { %13189 = vmatpush3.bf16.msra.mxu0 %v13186_v10 }
0x26c3   :  { %v14200_v44 = vpop.eup %14199 }
0x26c4   :  { %v14202_v2 = vpop.eup %14201  ;;  %v7693_v40 = vmul.f32 %v14200_v44, %v16724_v33  ;;  %v8193_v33 = vld [vmem:[%s17433_s2 + $0x358] sm:$0xff] }
0x26c5   :  { %12339 = vmatmul.mubr.msk.f32.vlgmr.msra.gmra.mrb[104].mxu0 %vm170_vm1, %v7691_v49  ;;  %v7695_v51 = vmul.f32 %v14202_v2, %v16717_v42  ;;  %v8194_v42 = vld [vmem:[%s17433_s2 + $0x360] sm:$0xff]  ;;  %v13190_v21 = vpack.c.bf16 %v8193_v33, %v8192_v34 }
0x26c6   :  { %12341 = vmatprep.mubr.msk.f32.mxu0 %vm170_vm1, %v7693_v40  ;;  %v13194_v20 = vpack.c.bf16 %v8195_v63, %v8194_v42 }
0x26c7   :  { %13191 = vmatprep.subr.bf16.mxu1 %v13190_v21 }
0x26c8   :  { %13193 = vmatpush3.bf16.msra.mxu1 %v13190_v21 }
0x26c9   :  { %12342 = vmatmul.mubr.msk.f32.gmra.mrb[106].mxu0 %vm170_vm1, %v7695_v51  ;;  %13195 = vmatprep.subr.bf16.mxu1 %v13194_v20 }
0x26cc   :  { %13197 = vmatpush3.bf16.msra.mxu1 %v13194_v20 }
0x26cd   :  { %13207 = vmatprep.subr.bf16.mxu1 %v13206_v60 }
0x2754   :  { %v12298_v26 = vpop.f32.mrb[96].mxu0 }
0x2755   :  { %v7786_v9 = vpop.f32.mrb[97].mxu0 }
0x2760   :  { %v16763_v12 = vpop.f32.mrb[98].mxu0 }
0x2761   :  { %v16765_v35 = vpop.f32.mrb[99].mxu0 }
0x2768   :  { %v12312_v0 = vpop.f32.mrb[100].mxu0 }
0x2769   :  { %v7895_v62 = vpop.f32.mrb[101].mxu0 }
0x276a   :  { %v12326_v16 = vpop.f32.mrb[116].mxu1 }
0x276b   :  { %8154 = vrot.lane.b32.xlu1 %v12326_v16, %s14348_s26  ;;  %v8004_v41 = vpop.f32.mrb[117].mxu1 }
0x276c   :  { %8152 = vrot.lane.b32.xlu0 %v8004_v41, %s14348_s26  ;;  %v12315_v52 = vpop.f32.mrb[102].mxu0 }
0x276d   :  { %v7905_v47 = vpop.f32.mrb[103].mxu0 }
0x276e   :  { %v12329_v3 = vpop.f32.mrb[118].mxu1 }
0x276f   :  { %v8014_v30 = vpop.f32.mrb[119].mxu1  ;;  %8138 = vrot.lane.b32.xlu1 %v12312_v0, %s14347_s22 }
0x2770   :  { %8136 = vrot.lane.b32.xlu0 %v7895_v62, %s14347_s22 }
0x2798   :  { %v12340_v61 = vpop.f32.mrb[104].mxu0 }
0x2799   :  { %8170 = vrot.lane.b32.xlu1 %v12340_v61, %s14349_s27  ;;  %v8113_v4 = vpop.f32.mrb[105].mxu0 }
0x279a   :  { %8168 = vrot.lane.b32.xlu0 %v8113_v4, %s14349_s27 }
0x279c   :  { %v12343_v37 = vpop.f32.mrb[106].mxu0 }
0x279d   :  { %8142 = vrot.lane.b32.xlu1 %v12315_v52, %s14347_s22  ;;  %v8123_v55 = vpop.f32.mrb[107].mxu0 }
0x279e   :  { %8140 = vrot.lane.b32.xlu0 %v7905_v47, %s14347_s22 }
0x27a1   :  { %8158 = vrot.lane.b32.xlu1 %v12329_v3, %s14348_s26  ;;  %v10771_v3 = vld [vmem:[%s17434_s3 + $0x21] ss:$0 sm:$0xff] }
0x27a2   :  { %8156 = vrot.lane.b32.xlu0 %v8014_v30, %s14348_s26 }
0x27a5   :  { %8174 = vrot.lane.b32.xlu1 %v12343_v37, %s14349_s27 }
0x27a6   :  { %8172 = vrot.lane.b32.xlu0 %v8123_v55, %s14349_s27 }
0x27dd   :  { %v8155_v39 = vpop.permute.xlu1 %8154 }
0x27de   :  { %v8153_v31 = vpop.permute.xlu0 %8152 }
0x27e1   :  { %v8139_v36 = vpop.permute.xlu1 %8138 }
0x27e2   :  { %v8137_v46 = vpop.permute.xlu0 %8136  ;;  %v8181_v14 = vsel %vm284_vm2, %v12298_v26, %v8139_v36 }
0x27e3   :  { %v8180_v38 = vsel %vm284_vm2, %v7786_v9, %v8137_v46  ;;  %v8185_v50 = vsel %vm1421_vm8, %v8181_v14, %v8155_v39  ;;  %v8372_v9 = vld [vmem:[%s17433_s2 + $0x370] sm:$0xff] }
0x27e4   :  { %v8184_v43 = vsel %vm1421_vm8, %v8180_v38, %v8153_v31 }
0x280b   :  { %v8171_v18 = vpop.permute.xlu1 %8170 }
0x280c   :  { %v8169_v45 = vpop.permute.xlu0 %8168  ;;  %v8189_v56 = vsel %vm1426_vm9, %v8185_v50, %v8171_v18 }
0x280d   :  { %v8188_v6 = vsel %vm1426_vm9, %v8184_v43, %v8169_v45 }
0x280e   :  { %12352 = vmatprep.mubr.msk.f32.mxu1 %vm170_vm1, %v8188_v6 }
0x280f   :  { %v8143_v11 = vpop.permute.xlu1 %8142  ;;  %12353 = vmatmul.mubr.msk.f32.vlgmr.msra.gmra.mrb[120].mxu1 %vm170_vm1, %v8189_v56 }
0x2810   :  { %v8141_v5 = vpop.permute.xlu0 %8140  ;;  %13209 = vmatpush3.bf16.msra.mxu1 %v13206_v60  ;;  %v8183_v44 = vsel %vm284_vm2, %v16763_v12, %v8143_v11  ;;  %v8373_v12 = vld [vmem:[%s17433_s2 + $0x378] sm:$0xff] }
0x2811   :  { %13211 = vmatprep.subr.bf16.mxu1 %v13210_v25  ;;  %v8182_v10 = vsel %vm284_vm2, %v16765_v35, %v8141_v5  ;;  %v13198_v35 = vpack.c.bf16 %v8373_v12, %v8372_v9 }
0x2813   :  { %v8159_v32 = vpop.permute.xlu1 %8158  ;;  %13199 = vmatprep.subr.bf16.mxu0 %v13198_v35 }
0x2814   :  { %v8157_v59 = vpop.permute.xlu0 %8156  ;;  %13213 = vmatpush3.bf16.msra.mxu1 %v13210_v25  ;;  %v8187_v40 = vsel %vm1421_vm8, %v8183_v44, %v8159_v32  ;;  %13201 = vmatpush3.bf16.msra.mxu0 %v13198_v35 }
0x2815   :  { %v8186_v49 = vsel %vm1421_vm8, %v8182_v10, %v8157_v59 }
0x2817   :  { %v8175_v53 = vpop.permute.xlu1 %8174 }
0x2818   :  { %v8173_v2 = vpop.permute.xlu0 %8172  ;;  %v8191_v26 = vsel %vm1426_vm9, %v8187_v40, %v8175_v53 }
0x2819   :  { %v8190_v51 = vsel %vm1426_vm9, %v8186_v49, %v8173_v2 }
0x281a   :  { %12355 = vmatprep.mubr.msk.f32.mxu1 %vm170_vm1, %v8190_v51 }
0x281b   :  { %12356 = vmatmul.mubr.msk.f32.gmra.mrb[122].mxu1 %vm170_vm1, %v8191_v26 }
0x281c   :  { %12380 = vmatprep.mubr.msk.f32.mxu1 %vm170_vm1, %v15926_v57  ;;  %v8375_v57 = vld [vmem:[%s17433_s2 + $0x388] sm:$0xff] }
0x281f   :  { %12381 = vmatmul.mubr.msk.f32.vlgmr.msra.gmra.mrb[124].mxu1 %vm170_vm1, %v15917_v28  ;;  %v8374_v28 = vld [vmem:[%s17433_s2 + $0x380] sm:$0xff] }
0x2820   :  { %12383 = vmatprep.mubr.msk.f32.mxu1 %vm170_vm1, %v15945_v19  ;;  %v10759_v19 = vld [vmem:[%s17434_s3 + $0x1f] ss:$0 sm:$0xff] }
0x2823   :  { %12384 = vmatmul.mubr.msk.f32.gmra.mrb[126].mxu1 %vm170_vm1, %v15943_v27  ;;  %v13202_v27 = vpack.c.bf16 %v8375_v57, %v8374_v28 }
0x2825   :  { %13203 = vmatprep.subr.bf16.mxu0 %v13202_v27 }
0x2826   :  { %13205 = vmatpush3.bf16.msra.mxu0 %v13202_v27 }
0x28e2   :  { %v12354_v34 = vpop.f32.mrb[120].mxu1 }
0x28e3   :  { %v8285_v33 = vadd.f32 %v12354_v34, %v10759_v19  ;;  %v8279_v42 = vpop.f32.mrb[121].mxu1 }
0x28e4   :  { %v8280_v21 = vadd.f32 %v10759_v19, %v8279_v42  ;;  %v10764_v42 = vld [vmem:[%s17434_s3 + $0x25] ss:$0 sm:$0xff] }
0x28e5   :  { %v8299_v63 = vadd.f32 %v8285_v33, %v16454_v13 }
0x28e6   :  { %v8298_v20 = vadd.f32 %v8280_v21, %v16452_v23 }
0x28e7   :  { %v8305_v0 = vsel %vm170_vm1, %v8299_v63, 0.0 }
0x28e8   :  { %8306 = vadd.xlane.f32.xlu1 %v8305_v0  ;;  %v8302_v62 = vsel %vm170_vm1, %v8298_v20, 0.0 }
0x28e9   :  { %8303 = vadd.xlane.f32.xlu0 %v8302_v62 }
0x28ee   :  { %v12357_v16 = vpop.f32.mrb[122].mxu1 }
0x28ef   :  { %v8289_v41 = vpop.f32.mrb[123].mxu1  ;;  %v8295_v52 = vadd.f32 %v12357_v16, %v10759_v19 }
0x28f0   :  { %v8290_v47 = vadd.f32 %v10759_v19, %v8289_v41  ;;  %v10765_v41 = vld [vmem:[%s17434_s3 + $0x26] ss:$0 sm:$0xff] }
0x28f1   :  { %v8301_v23 = vadd.f32 %v8295_v52, %v16462_v48 }
0x28f2   :  { %v8300_v30 = vadd.f32 %v8290_v47, %v16460_v15  ;;  %v12382_v17 = vpop.f32.mrb[124].mxu1 }
0x28f3   :  { %v8559_v13 = vadd.f32 %v12382_v17, %v10771_v3  ;;  %v8553_v58 = vpop.f32.mrb[125].mxu1  ;;  %v8311_v15 = vsel %vm170_vm1, %v8301_v23, 0.0 }
0x28f4   :  { %v8554_v60 = vadd.f32 %v10771_v3, %v8553_v58  ;;  %v8308_v61 = vsel %vm170_vm1, %v8300_v30, 0.0 }
0x28f5   :  { %8309 = vadd.xlane.f32.xlu0 %v8308_v61 }
0x28f6   :  { %v12385_v4 = vpop.f32.mrb[126].mxu1  ;;  %v16854_v37 = vpack.c.bf16 %v8559_v13, %v8554_v60  ;;  %v16856_v55 = vpack.i.bf16 %v8559_v13, %v8554_v60 }
0x28f7   :  { %v8569_v31 = vadd.f32 %v12385_v4, %v10771_v3  ;;  %v8563_v39 = vpop.f32.mrb[127].mxu1 }
0x28f8   :  { %v8564_v46 = vadd.f32 %v10771_v3, %v8563_v39  ;;  %13216 = vmatprep.subr.msk.bf16.mxu0 %vm14520_vm3, %v16854_v37 }
0x28f9   :  { %8312 = vadd.xlane.f32.xlu0 %v8311_v15 }
0x28fa   :  { %v16862_v48 = vpack.i.bf16 %v8569_v31, %v8564_v46  ;;  %v16864_v36 = vpack.c.bf16 %v8569_v31, %v8564_v46 }
0x2975   :  { %v8307_v38 = vpop.xlane.xlu1 %8306 }
0x2976   :  { %v8315_v14 = vmul.f32 0.03125, %v8307_v38  ;;  %v8304_v29 = vpop.xlane.xlu0 %8303 }
0x2977   :  { %v8314_v22 = vmul.f32 0.03125, %v8304_v29 }
0x2978   :  { %v8319_v18 = vsub.f32 %v8299_v63, %v8315_v14 }
0x2979   :  { %v8318_v43 = vsub.f32 %v8298_v20, %v8314_v22 }
0x297a   :  { %v8323_v45 = vmul.f32 %v8319_v18, %v8319_v18 }
0x297b   :  { %v8322_v50 = vmul.f32 %v8318_v43, %v8318_v43 }
0x297c   :  { %v8329_v6 = vsel %vm170_vm1, %v8323_v45, 0.0 }
0x297d   :  { %8330 = vadd.xlane.f32.xlu0 %v8329_v6  ;;  %v8326_v25 = vsel %vm170_vm1, %v8322_v50, 0.0 }
0x297e   :  { %8327 = vadd.xlane.f32.xlu1 %v8326_v25 }
0x2982   :  { %v8310_v56 = vpop.xlane.xlu0 %8309 }
0x2983   :  { %v8316_v11 = vmul.f32 0.03125, %v8310_v56 }
0x2985   :  { %v16868_v5 = vsub.f32 %v8300_v30, %v8316_v11 }
0x2986   :  { %v8313_v32 = vpop.xlane.xlu0 %8312 }
0x2987   :  { %v8317_v59 = vmul.f32 0.03125, %v8313_v32  ;;  %v8324_v10 = vmul.f32 %v16868_v5, %v16868_v5 }
0x2989   :  { %v16872_v53 = vsub.f32 %v8301_v23, %v8317_v59  ;;  %v8332_v44 = vsel %vm170_vm1, %v8324_v10, 0.0 }
0x298a   :  { %8333 = vadd.xlane.f32.xlu1 %v8332_v44 }
0x298b   :  { %v8325_v49 = vmul.f32 %v16872_v53, %v16872_v53 }
0x298d   :  { %v8335_v2 = vsel %vm170_vm1, %v8325_v49, 0.0 }
0x298e   :  { %8336 = vadd.xlane.f32.xlu0 %v8335_v2 }
0x299b   :  { %13758 = vrot.lane.b32.xlu1 %v16856_v55, %s14339_s11 }
0x299f   :  { %13768 = vrot.lane.b32.xlu1 %v16856_v55, %s14340_s12 }
0x29a3   :  { %13773 = vrot.lane.b32.xlu1 %v16856_v55, %s14341_s13 }
0x29a4   :  { %13763 = vrot.lane.b32.xlu0 %v16862_v48, %s14339_s11 }
0x29a7   :  { %13783 = vrot.lane.b32.xlu1 %v16862_v48, %s14341_s13 }
0x29a8   :  { %13778 = vrot.lane.b32.xlu0 %v16862_v48, %s14340_s12 }
0x2a0a   :  { %v8331_v40 = vpop.xlane.xlu0 %8330 }
0x2a0b   :  { %v8339_v51 = vmul.f32 0.03125, %v8331_v40  ;;  %v8328_v26 = vpop.xlane.xlu1 %8327 }
0x2a0c   :  { %v8338_v9 = vmul.f32 0.03125, %v8328_v26 }
0x2a0d   :  { %v8343_v12 = vadd.f32 1e-05, %v8339_v51 }
0x2a0e   :  { %v8342_v35 = vadd.f32 1e-05, %v8338_v9 }
0x2a0f   :  { %14203 = vrsqrt.f32 %v8343_v12 }
0x2a10   :  { %14205 = vrsqrt.f32 %v8342_v35 }
0x2a17   :  { %v8334_v28 = vpop.xlane.xlu1 %8333 }
0x2a18   :  { %v8340_v57 = vmul.f32 0.03125, %v8334_v28 }
0x2a19   :  { %v14204_v27 = vpop.eup %14203 }
0x2a1a   :  { %v14206_v19 = vpop.eup %14205  ;;  %v8351_v34 = vmul.f32 %v14204_v27, %v8319_v18  ;;  %v8344_v33 = vadd.f32 1e-05, %v8340_v57 }
0x2a1b   :  { %v13759_v21 = vpop.permute.xlu1 %13758  ;;  %v8337_v63 = vpop.xlane.xlu0 %8336  ;;  %v8350_v20 = vmul.f32 %v14206_v19, %v8318_v43 }
0x2a1c   :  { %14207 = vrsqrt.f32 %v8344_v33  ;;  %v13761_v0 = vunpack.i.h.bf16 %v13759_v21  ;;  %v13760_v62 = vunpack.i.l.bf16 %v13759_v21  ;;  %v8341_v16 = vmul.f32 0.03125, %v8337_v63 }
0x2a1d   :  { %v8359_v52 = vmul.f32 %v10764_v42, %v8350_v20  ;;  %v8360_v47 = vmul.f32 %v10764_v42, %v8351_v34 }
0x2a1e   :  { %v13226_v3 = vpack.c.bf16 %v13761_v0, %v13760_v62  ;;  %v8345_v30 = vadd.f32 1e-05, %v8341_v16 }
0x2a1f   :  { %v13769_v17 = vpop.permute.xlu1 %13768  ;;  %v13764_v13 = vpop.permute.xlu0 %13763  ;;  %v16896_v58 = vadd.f32 %v10765_v41, %v8359_v52  ;;  %v16900_v60 = vadd.f32 %v10765_v41, %v8360_v47 }
0x2a20   :  { %14209 = vrsqrt.f32 %v8345_v30  ;;  %v13766_v23 = vunpack.i.h.bf16 %v13764_v13  ;;  %13228 = vmatprep.subr.msk.bf16.mxu1 %vm14520_vm3, %v13226_v3  ;;  %v13765_v61 = vunpack.i.l.bf16 %v13764_v13  ;;  %v13771_v38 = vunpack.i.h.bf16 %v13769_v17 }
0x2a21   :  { %12366 = vmatprep.mubr.msk.f32.mxu0 %vm170_vm1, %v16896_v58  ;;  %13231 = vmatpush3.bf16.xpose.msk.msra.mxu1 %vm14520_vm3, %v13226_v3  ;;  %v13770_v14 = vunpack.i.l.bf16 %v13769_v17 }
0x2a22   :  { %12367 = vmatmul.mubr.msk.f32.vlgmr.msra.gmra.mrb[108].mxu0 %vm170_vm1, %v16900_v60  ;;  %v13232_v4 = vpack.c.bf16 %v13766_v23, %v13765_v61 }
0x2a23   :  { %13219 = vmatpush3.bf16.xpose.msk.msra.mxu0 %vm14520_vm3, %v16854_v37  ;;  %v13774_v31 = vpop.permute.xlu1 %13773  ;;  %v13238_v43 = vpack.c.bf16 %v13771_v38, %v13770_v14  ;;  %v13779_v56 = vpop.permute.xlu0 %13778 }
0x2a24   :  { %v13776_v39 = vunpack.i.h.bf16 %v13774_v31  ;;  %v13775_v46 = vunpack.i.l.bf16 %v13774_v31  ;;  %13222 = vmatprep.subr.msk.bf16.mxu0 %vm14520_vm3, %v16864_v36  ;;  %13234 = vmatprep.subr.msk.bf16.mxu1 %vm14520_vm3, %v13232_v4  ;;  %v13781_v10 = vunpack.i.h.bf16 %v13779_v56 }
0x2a26   :  { %v14208_v15 = vpop.eup %14207  ;;  %v13250_v22 = vpack.c.bf16 %v13776_v39, %v13775_v46 }
0x2a27   :  { %v8352_v29 = vmul.f32 %v14208_v15, %v16868_v5  ;;  %v13784_v28 = vpop.permute.xlu1 %13783 }
0x2a28   :  { %v13786_v57 = vunpack.i.h.bf16 %v13784_v28  ;;  %v13785_v27 = vunpack.i.l.bf16 %v13784_v28 }
0x2a29   :  { %13237 = vmatpush3.bf16.xpose.msk.msra.mxu1 %vm14520_vm3, %v13232_v4  ;;  %v8361_v37 = vmul.f32 %v10764_v42, %v8352_v29 }
0x2a2a   :  { %v14210_v18 = vpop.eup %14209  ;;  %13252 = vmatprep.subr.msk.bf16.mxu1 %vm14520_vm3, %v13250_v22  ;;  %v13256_v33 = vpack.c.bf16 %v13786_v57, %v13785_v27 }
0x2a2b   :  { %13225 = vmatpush3.bf16.xpose.msk.msra.mxu0 %vm14520_vm3, %v16864_v36  ;;  %v16924_v45 = vadd.f32 %v10765_v41, %v8361_v37  ;;  %v8353_v50 = vmul.f32 %v14210_v18, %v16872_v53  ;;  %v10766_v36 = vld [vmem:[%s17434_s3 + $0x20] ss:$0 sm:$0xff]  ;;  %v13780_v53 = vunpack.i.l.bf16 %v13779_v56 }
0x2a2c   :  { %13240 = vmatprep.subr.msk.bf16.mxu0 %vm14520_vm3, %v13238_v43 }
0x2a2d   :  { %12369 = vmatprep.mubr.msk.f32.mxu0 %vm170_vm1, %v16924_v45  ;;  %v8362_v6 = vmul.f32 %v10764_v42, %v8353_v50  ;;  %v13244_v2 = vpack.c.bf16 %v13781_v10, %v13780_v53 }
0x2a2f   :  { %v16931_v25 = vadd.f32 %v10765_v41, %v8362_v6 }
0x2a31   :  { %12370 = vmatmul.mubr.msk.f32.gmra.mrb[110].mxu0 %vm170_vm1, %v16931_v25 }
0x2af5   :  { %v12368_v11 = vpop.f32.mrb[108].mxu0 }
0x2af6   :  { %v8465_v5 = vadd.f32 %v12368_v11, %v10766_v36  ;;  %v8459_v32 = vpop.f32.mrb[109].mxu0 }
0x2af7   :  { %v8460_v59 = vadd.f32 %v10766_v36, %v8459_v32 }
0x2af8   :  { %v8573_v44 = vmul.f32 0.35355338, %v8465_v5 }
0x2af9   :  { %v8572_v49 = vmul.f32 0.35355338, %v8460_v59 }
0x2afa   :  { %8687 = vrot.lane.b32.xlu1 %v8573_v44, %s14339_s11 }
0x2afb   :  { %8685 = vrot.lane.b32.xlu0 %v8572_v49, %s14339_s11  ;;  %12394 = vmatprep.mubr.msk.f32.mxu0 %vm284_vm2, %v8572_v49 }
0x2afc   :  { %12395 = vmatmul.mubr.msk.f32.vlgmr.msra.gmra.mrb[112].mxu0 %vm284_vm2, %v8573_v44 }
0x2afd   :  { %13243 = vmatpush3.bf16.xpose.msk.msra.mxu0 %vm14520_vm3, %v13238_v43 }
0x2afe   :  { %13246 = vmatprep.subr.msk.bf16.mxu0 %vm14520_vm3, %v13244_v2  ;;  %8804 = vrot.lane.b32.xlu1 %v8573_v44, %s14340_s12 }
0x2aff   :  { %8802 = vrot.lane.b32.xlu0 %v8572_v49, %s14340_s12 }
0x2b02   :  { %8921 = vrot.lane.b32.xlu1 %v8573_v44, %s14341_s13 }
0x2b03   :  { %8919 = vrot.lane.b32.xlu0 %v8572_v49, %s14341_s13 }
0x2b04   :  { %v12371_v40 = vpop.f32.mrb[110].mxu0 }
0x2b05   :  { %v8475_v51 = vadd.f32 %v12371_v40, %v10766_v36  ;;  %13249 = vmatpush3.bf16.xpose.msk.msra.mxu0 %vm14520_vm3, %v13244_v2  ;;  %v8469_v26 = vpop.f32.mrb[111].mxu0 }
0x2b06   :  { %v8470_v9 = vadd.f32 %v10766_v36, %v8469_v26 }
0x2b07   :  { %v8575_v12 = vmul.f32 0.35355338, %v8475_v51 }
0x2b08   :  { %v8574_v35 = vmul.f32 0.35355338, %v8470_v9 }
0x2b09   :  { %8691 = vrot.lane.b32.xlu1 %v8575_v12, %s14339_s11 }
0x2b0a   :  { %8689 = vrot.lane.b32.xlu0 %v8574_v35, %s14339_s11  ;;  %12397 = vmatprep.mubr.msk.f32.mxu0 %vm284_vm2, %v8574_v35 }
0x2b0b   :  { %12398 = vmatmul.mubr.msk.f32.gmra.mrb[114].mxu0 %vm284_vm2, %v8575_v12 }
0x2b0d   :  { %8808 = vrot.lane.b32.xlu1 %v8575_v12, %s14340_s12 }
0x2b0e   :  { %8806 = vrot.lane.b32.xlu0 %v8574_v35, %s14340_s12 }
0x2b11   :  { %8925 = vrot.lane.b32.xlu1 %v8575_v12, %s14341_s13 }
0x2b12   :  { %8923 = vrot.lane.b32.xlu0 %v8574_v35, %s14341_s13 }
0x2b15   :  { %13788 = vrot.lane.b32.xlu1 %v16856_v55, %s14335_s7 }
0x2b16   :  { %13793 = vrot.lane.b32.xlu0 %v16856_v55, %s14336_s8 }
0x2b19   :  { %13798 = vrot.lane.b32.xlu1 %v16862_v48, %s14335_s7 }
0x2b1d   :  { %13803 = vrot.lane.b32.xlu1 %v16862_v48, %s14336_s8 }
0x2b6c   :  { %v8688_v19 = vpop.permute.xlu1 %8687 }
0x2b6d   :  { %v8686_v34 = vpop.permute.xlu0 %8685 }
0x2b6e   :  { %12408 = vmatprep.mubr.msk.f32.mxu1 %vm284_vm2, %v8686_v34 }
0x2b6f   :  { %12409 = vmatmul.mubr.msk.f32.vlgmr.msra.gmra.mrb[128].mxu1 %vm284_vm2, %v8688_v19 }
0x2b70   :  { %13255 = vmatpush3.bf16.xpose.msk.msra.mxu1 %vm14520_vm3, %v13250_v22  ;;  %v8805_v42 = vpop.permute.xlu1 %8804 }
0x2b71   :  { %13258 = vmatprep.subr.msk.bf16.mxu1 %vm14520_vm3, %v13256_v33  ;;  %v8803_v21 = vpop.permute.xlu0 %8802 }
0x2b72   :  { %12422 = vmatprep.mubr.msk.f32.mxu0 %vm284_vm2, %v8803_v21 }
0x2b73   :  { %12423 = vmatmul.mubr.msk.f32.vlgmr.msra.gmra.mrb[116].mxu0 %vm284_vm2, %v8805_v42 }
0x2b74   :  { %v8922_v63 = vpop.permute.xlu1 %8921 }
0x2b75   :  { %v8920_v20 = vpop.permute.xlu0 %8919 }
0x2b78   :  { %13261 = vmatpush3.bf16.xpose.msk.msra.mxu1 %vm14520_vm3, %v13256_v33 }
0x2b7b   :  { %v8692_v0 = vpop.permute.xlu1 %8691 }
0x2b7c   :  { %v8690_v62 = vpop.permute.xlu0 %8689 }
0x2b7d   :  { %12411 = vmatprep.mubr.msk.f32.mxu1 %vm284_vm2, %v8690_v62 }
0x2b7e   :  { %12412 = vmatmul.mubr.msk.f32.gmra.mrb[130].mxu1 %vm284_vm2, %v8692_v0 }
0x2b7f   :  { %v8809_v16 = vpop.permute.xlu1 %8808  ;;  %12436 = vmatprep.mubr.msk.f32.mxu1 %vm284_vm2, %v8920_v20 }
0x2b80   :  { %v8807_v41 = vpop.permute.xlu0 %8806 }
0x2b81   :  { %12425 = vmatprep.mubr.msk.f32.mxu0 %vm284_vm2, %v8807_v41 }
0x2b82   :  { %12426 = vmatmul.mubr.msk.f32.gmra.mrb[118].mxu0 %vm284_vm2, %v8809_v16  ;;  %12437 = vmatmul.mubr.msk.f32.vlgmr.msra.gmra.mrb[132].mxu1 %vm284_vm2, %v8922_v63 }
0x2b83   :  { %v8926_v52 = vpop.permute.xlu1 %8925 }
0x2b84   :  { %v8924_v47 = vpop.permute.xlu0 %8923 }
0x2b85   :  { %12439 = vmatprep.mubr.msk.f32.mxu1 %vm284_vm2, %v8924_v47 }
0x2b86   :  { %12440 = vmatmul.mubr.msk.f32.gmra.mrb[134].mxu1 %vm284_vm2, %v8926_v52 }
0x2b87   :  { %v13789_v54 = vpop.permute.xlu1 %13788 }
0x2b88   :  { %v13791_v3 = vunpack.i.h.bf16 %v13789_v54  ;;  %v13790_v30 = vunpack.i.l.bf16 %v13789_v54  ;;  %v13794_v17 = vpop.permute.xlu0 %13793 }
0x2b89   :  { %v13796_v13 = vunpack.i.h.bf16 %v13794_v17  ;;  %v13795_v23 = vunpack.i.l.bf16 %v13794_v17 }
0x2b8a   :  { %v13262_v61 = vpack.c.bf16 %v13791_v3, %v13790_v30 }
0x2b8b   :  { %v13270_v4 = vpack.c.bf16 %v13796_v13, %v13795_v23  ;;  %v13799_v31 = vpop.permute.xlu1 %13798 }
0x2b8c   :  { %v13801_v39 = vunpack.i.h.bf16 %v13799_v31  ;;  %v13800_v46 = vunpack.i.l.bf16 %v13799_v31  ;;  %13263 = vmatprep.subr.bf16.mxu0 %v13262_v61 }
0x2b8d   :  { %13265 = vmatpush3.bf16.msra.mxu0 %v13262_v61  ;;  %13271 = vmatprep.subr.bf16.mxu1 %v13270_v4 }
0x2b8e   :  { %v13266_v15 = vpack.c.bf16 %v13801_v39, %v13800_v46  ;;  %13273 = vmatpush3.bf16.msra.mxu1 %v13270_v4 }
0x2b8f   :  { %v13804_v38 = vpop.permute.xlu1 %13803 }
0x2b90   :  { %v13806_v14 = vunpack.i.h.bf16 %v13804_v38  ;;  %v13805_v29 = vunpack.i.l.bf16 %v13804_v38  ;;  %13267 = vmatprep.subr.bf16.mxu0 %v13266_v15 }
0x2b91   :  { %13269 = vmatpush3.bf16.msra.mxu0 %v13266_v15 }
0x2b92   :  { %v13274_v22 = vpack.c.bf16 %v13806_v14, %v13805_v29 }
0x2b94   :  { %13275 = vmatprep.subr.bf16.mxu1 %v13274_v22 }
0x2b95   :  { %13277 = vmatpush3.bf16.msra.mxu1 %v13274_v22 }
0x2bcf   :  { %v12396_v37 = vpop.f32.mrb[112].mxu0 }
0x2bd0   :  { %v16987_v18 = vadd.f32 %v12396_v37, %v14574_v1  ;;  %v8666_v43 = vpop.f32.mrb[113].mxu0 }
0x2bd1   :  { %v16990_v50 = vadd.f32 %v8666_v43, %v14583_v8 }
0x2bd2   :  { %v9055_v6 = vsel %vm170_vm1, %v16987_v18, -inf }
0x2bd3   :  { %9056 = vmax.xlane.f32.xlu1 %v9055_v6  ;;  %v9052_v36 = vsel %vm170_vm1, %v16990_v50, -inf }
0x2bd4   :  { %9053 = vmax.xlane.f32.xlu0 %v9052_v36 }
0x2bde   :  { %v12399_v56 = vpop.f32.mrb[114].mxu0 }
0x2bdf   :  { %v16997_v11 = vadd.f32 %v12399_v56, %v14606_v24  ;;  %v8676_v5 = vpop.f32.mrb[115].mxu0 }
0x2be0   :  { %v17000_v32 = vadd.f32 %v8676_v5, %v14581_v7 }
0x2be1   :  { %v9061_v59 = vsel %vm170_vm1, %v16997_v11, -inf }
0x2be2   :  { %9062 = vmax.xlane.f32.xlu0 %v9061_v59  ;;  %v9058_v10 = vsel %vm170_vm1, %v17000_v32, -inf }
0x2be3   :  { %9059 = vmax.xlane.f32.xlu1 %v9058_v10 }
0x2c42   :  { %v12410_v53 = vpop.f32.mrb[128].mxu1 }
0x2c43   :  { %v17007_v44 = vadd.f32 %v12410_v53, %v14574_v1  ;;  %v8783_v49 = vpop.f32.mrb[129].mxu1 }
0x2c44   :  { %v17018_v12 = vadd.f32 %v8783_v49, %v14583_v8 }
0x2c45   :  { %v9067_v2 = vsel %vm170_vm1, %v17007_v44, -inf }
0x2c46   :  { %v12424_v40 = vpop.f32.mrb[116].mxu0  ;;  %9068 = vmax.xlane.f32.xlu0 %v9067_v2  ;;  %v9064_v57 = vsel %vm170_vm1, %v17018_v12, -inf }
0x2c47   :  { %v17012_v51 = vadd.f32 %v12424_v40, %v14574_v1  ;;  %v8900_v26 = vpop.f32.mrb[117].mxu0 }
0x2c48   :  { %v17015_v9 = vadd.f32 %v8900_v26, %v14583_v8 }
0x2c49   :  { %v9079_v35 = vsel %vm170_vm1, %v17012_v51, -inf }
0x2c4a   :  { %9080 = vmax.xlane.f32.xlu0 %v9079_v35  ;;  %v9076_v28 = vsel %vm170_vm1, %v17015_v9, -inf }
0x2c4b   :  { %9077 = vmax.xlane.f32.xlu1 %v9076_v28 }
0x2c4e   :  { %9065 = vmax.xlane.f32.xlu0 %v9064_v57 }
0x2c51   :  { %v12413_v27 = vpop.f32.mrb[130].mxu1 }
0x2c52   :  { %v17027_v19 = vadd.f32 %v12413_v27, %v14606_v24  ;;  %v8793_v34 = vpop.f32.mrb[131].mxu1 }
0x2c53   :  { %v17030_v33 = vadd.f32 %v8793_v34, %v14581_v7 }
0x2c54   :  { %v9073_v42 = vsel %vm170_vm1, %v17027_v19, -inf }
0x2c55   :  { %v12427_v21 = vpop.f32.mrb[118].mxu0  ;;  %9074 = vmax.xlane.f32.xlu0 %v9073_v42  ;;  %v12438_v63 = vpop.f32.mrb[132].mxu1  ;;  %v9070_v20 = vsel %vm170_vm1, %v17030_v33, -inf }
0x2c56   :  { %v17037_v0 = vadd.f32 %v12427_v21, %v14606_v24  ;;  %v8910_v62 = vpop.f32.mrb[119].mxu0  ;;  %9071 = vmax.xlane.f32.xlu1 %v9070_v20  ;;  %v9017_v16 = vpop.f32.mrb[133].mxu1  ;;  %v17043_v52 = vadd.f32 %v12438_v63, %v14574_v1 }
0x2c57   :  { %v17040_v41 = vadd.f32 %v8910_v62, %v14581_v7  ;;  %v17048_v54 = vadd.f32 %v9017_v16, %v14583_v8 }
0x2c58   :  { %v9085_v47 = vsel %vm170_vm1, %v17037_v0, -inf  ;;  %v9091_v1 = vsel %vm170_vm1, %v17043_v52, -inf }
0x2c59   :  { %9086 = vmax.xlane.f32.xlu0 %v9085_v47  ;;  %v12441_v3 = vpop.f32.mrb[134].mxu1  ;;  %v9082_v30 = vsel %vm170_vm1, %v17040_v41, -inf  ;;  %v9088_v8 = vsel %vm170_vm1, %v17048_v54, -inf }
0x2c5a   :  { %9083 = vmax.xlane.f32.xlu1 %v9082_v30  ;;  %v9027_v17 = vpop.f32.mrb[135].mxu1  ;;  %v17053_v13 = vadd.f32 %v12441_v3, %v14606_v24 }
0x2c5b   :  { %v17058_v23 = vadd.f32 %v9027_v17, %v14581_v7 }
0x2c5c   :  { %v9097_v61 = vsel %vm170_vm1, %v17053_v13, -inf }
0x2c5d   :  { %9092 = vmax.xlane.f32.xlu0 %v9091_v1  ;;  %v9094_v4 = vsel %vm170_vm1, %v17058_v23, -inf }
0x2c5e   :  { %9089 = vmax.xlane.f32.xlu1 %v9088_v8 }
0x2c60   :  { %v9057_v7 = vpop.xlane.xlu1 %9056 }
0x2c61   :  { %9098 = vmax.xlane.f32.xlu0 %v9097_v61  ;;  %v9054_v24 = vpop.xlane.xlu0 %9053  ;;  %v9101_v31 = vsub.f32 %v16987_v18, %v9057_v7 }
0x2c62   :  { %9095 = vmax.xlane.f32.xlu1 %v9094_v4  ;;  %v9100_v39 = vsub.f32 %v16990_v50, %v9054_v24 }
0x2c63   :  { %v9118_v38 = vmul.f32 1.442695, %v9101_v31 }
0x2c64   :  { %v9116_v29 = vmul.f32 1.442695, %v9100_v39 }
0x2c65   :  { %14211 = vpow2.f32 %v9118_v38 }
0x2c66   :  { %14213 = vpow2.f32 %v9116_v29 }
0x2c6f   :  { %v9063_v46 = vpop.xlane.xlu0 %9062 }
0x2c70   :  { %v9060_v15 = vpop.xlane.xlu1 %9059  ;;  %v9103_v14 = vsub.f32 %v16997_v11, %v9063_v46 }
0x2c71   :  { %v9102_v22 = vsub.f32 %v17000_v32, %v9060_v15 }
0x2c72   :  { %v9122_v37 = vmul.f32 1.442695, %v9103_v14 }
0x2c73   :  { %13813 = vrot.lane.b32.xlu1 %v16856_v55, %s14338_s10  ;;  %v9120_v43 = vmul.f32 1.442695, %v9102_v22 }
0x2c74   :  { %14215 = vpow2.f32 %v9122_v37 }
0x2c75   :  { %14217 = vpow2.f32 %v9120_v43 }
0x2c77   :  { %13808 = vrot.lane.b32.xlu0 %v16856_v55, %s14337_s9  ;;  %v17074_v55 = vpop.eup %14211 }
0x2c78   :  { %v17076_v6 = vpop.eup %14213  ;;  %v9151_v18 = vsel %vm170_vm1, %v17074_v55, 0.0 }
0x2c79   :  { %v9148_v36 = vsel %vm170_vm1, %v17076_v6, 0.0 }
0x2c7e   :  { %v17080_v50 = vpop.eup %14215 }
0x2c7f   :  { %v17084_v56 = vpop.eup %14217  ;;  %v9157_v11 = vsel %vm170_vm1, %v17080_v50, 0.0 }
0x2c80   :  { %v9154_v5 = vsel %vm170_vm1, %v17084_v56, 0.0 }
0x2c96   :  { %9152 = vadd.xlane.f32.xlu0 %v9151_v18 }
0x2c97   :  { %9149 = vadd.xlane.f32.xlu1 %v9148_v36 }
0x2c9a   :  { %9158 = vadd.xlane.f32.xlu0 %v9157_v11 }
0x2c9b   :  { %9155 = vadd.xlane.f32.xlu1 %v9154_v5 }
0x2cd3   :  { %v9069_v32 = vpop.xlane.xlu0 %9068 }
0x2cd4   :  { %v9105_v59 = vsub.f32 %v17007_v44, %v9069_v32 }
0x2cd6   :  { %v9126_v10 = vmul.f32 1.442695, %v9105_v59 }
0x2cd7   :  { %v9081_v53 = vpop.xlane.xlu0 %9080 }
0x2cd8   :  { %14219 = vpow2.f32 %v9126_v10  ;;  %v9109_v49 = vsub.f32 %v17012_v51, %v9081_v53  ;;  %v9078_v2 = vpop.xlane.xlu1 %9077 }
0x2cd9   :  { %v9108_v26 = vsub.f32 %v17015_v9, %v9078_v2 }
0x2cda   :  { %v9134_v40 = vmul.f32 1.442695, %v9109_v49 }
0x2cdb   :  { %v9066_v35 = vpop.xlane.xlu0 %9065  ;;  %v9132_v57 = vmul.f32 1.442695, %v9108_v26 }
0x2cdc   :  { %14221 = vpow2.f32 %v9134_v40  ;;  %v9104_v28 = vsub.f32 %v17018_v12, %v9066_v35 }
0x2cde   :  { %v9124_v27 = vmul.f32 1.442695, %v9104_v28 }
0x2ce0   :  { %14223 = vpow2.f32 %v9124_v27 }
0x2ce1   :  { %14225 = vpow2.f32 %v9132_v57 }
0x2ce2   :  { %v17094_v34 = vpop.eup %14219  ;;  %v9075_v44 = vpop.xlane.xlu0 %9074 }
0x2ce3   :  { %v9107_v42 = vsub.f32 %v17027_v19, %v9075_v44  ;;  %v9072_v21 = vpop.xlane.xlu1 %9071  ;;  %v9163_v51 = vsel %vm170_vm1, %v17094_v34, 0.0 }
0x2ce4   :  { %v9106_v63 = vsub.f32 %v17030_v33, %v9072_v21  ;;  %9164 = vadd.xlane.f32.xlu0 %v9163_v51 }
0x2ce5   :  { %v9130_v9 = vmul.f32 1.442695, %v9107_v42 }
0x2ce6   :  { %v17100_v20 = vpop.eup %14221  ;;  %v9128_v12 = vmul.f32 1.442695, %v9106_v63  ;;  %v9087_v62 = vpop.xlane.xlu0 %9086 }
0x2ce7   :  { %14227 = vpow2.f32 %v9130_v9  ;;  %v9111_v16 = vsub.f32 %v17037_v0, %v9087_v62  ;;  %v9084_v47 = vpop.xlane.xlu1 %9083  ;;  %v9175_v3 = vsel %vm170_vm1, %v17100_v20, 0.0 }
0x2ce8   :  { %14229 = vpow2.f32 %v9128_v12  ;;  %v9110_v19 = vsub.f32 %v17040_v41, %v9084_v47  ;;  %9176 = vadd.xlane.f32.xlu0 %v9175_v3 }
0x2ce9   :  { %v9138_v30 = vmul.f32 1.442695, %v9111_v16 }
0x2cea   :  { %v17106_v17 = vpop.eup %14223  ;;  %v9136_v33 = vmul.f32 1.442695, %v9110_v19  ;;  %v9093_v1 = vpop.xlane.xlu0 %9092 }
0x2ceb   :  { %14231 = vpow2.f32 %v9138_v30  ;;  %v9113_v8 = vsub.f32 %v17043_v52, %v9093_v1  ;;  %v9090_v61 = vpop.xlane.xlu1 %9089  ;;  %v9160_v0 = vsel %vm170_vm1, %v17106_v17, 0.0  ;;  %v17111_v4 = vpop.eup %14225 }
0x2cec   :  { %14233 = vpow2.f32 %v9136_v33  ;;  %v9112_v7 = vsub.f32 %v17048_v54, %v9090_v61  ;;  %9161 = vadd.xlane.f32.xlu1 %v9160_v0  ;;  %v9172_v52 = vsel %vm170_vm1, %v17111_v4, 0.0 }
0x2ced   :  { %v9142_v41 = vmul.f32 1.442695, %v9113_v8 }
0x2cee   :  { %v9140_v24 = vmul.f32 1.442695, %v9112_v7  ;;  %v9099_v31 = vpop.xlane.xlu0 %9098 }
0x2cef   :  { %14235 = vpow2.f32 %v9142_v41  ;;  %v9115_v39 = vsub.f32 %v17053_v13, %v9099_v31  ;;  %v9096_v46 = vpop.xlane.xlu1 %9095 }
0x2cf0   :  { %14237 = vpow2.f32 %v9140_v24  ;;  %v9114_v15 = vsub.f32 %v17058_v23, %v9096_v46  ;;  %9173 = vadd.xlane.f32.xlu1 %v9172_v52 }
0x2cf1   :  { %v17118_v38 = vpop.eup %14227  ;;  %v9146_v14 = vmul.f32 1.442695, %v9115_v39 }
0x2cf2   :  { %v17120_v29 = vpop.eup %14229  ;;  %v9144_v54 = vmul.f32 1.442695, %v9114_v15  ;;  %v13809_v22 = vpop.permute.xlu0 %13808  ;;  %v9169_v37 = vsel %vm170_vm1, %v17118_v38, 0.0 }
0x2cf3   :  { %14239 = vpow2.f32 %v9146_v14  ;;  %v13811_v13 = vunpack.i.h.bf16 %v13809_v22  ;;  %v13810_v43 = vunpack.i.l.bf16 %v13809_v22  ;;  %9170 = vadd.xlane.f32.xlu0 %v9169_v37  ;;  %v13814_v18 = vpop.permute.xlu1 %13813  ;;  %v9166_v36 = vsel %vm170_vm1, %v17120_v29, 0.0 }
0x2cf4   :  { %14241 = vpow2.f32 %v9144_v54  ;;  %v13816_v23 = vunpack.i.h.bf16 %v13814_v18  ;;  %v13815_v11 = vunpack.i.l.bf16 %v13814_v18  ;;  %9167 = vadd.xlane.f32.xlu1 %v9166_v36 }
0x2cf5   :  { %v17126_v5 = vpop.eup %14231  ;;  %v13278_v32 = vpack.c.bf16 %v13811_v13, %v13810_v43 }
0x2cf6   :  { %v17128_v59 = vpop.eup %14233  ;;  %v17130_v10 = vpack.c.bf16 %v13816_v23, %v13815_v11  ;;  %v9181_v53 = vsel %vm170_vm1, %v17126_v5, 0.0 }
0x2cf7   :  { %9182 = vadd.xlane.f32.xlu0 %v9181_v53  ;;  %13279 = vmatprep.subr.bf16.mxu0 %v13278_v32  ;;  %v9178_v49 = vsel %vm170_vm1, %v17128_v59, 0.0 }
0x2cf8   :  { %9179 = vadd.xlane.f32.xlu1 %v9178_v49  ;;  %13287 = vmatprep.subr.bf16.mxu1 %v17130_v10 }
0x2cf9   :  { %v17137_v2 = vpop.eup %14235 }
0x2cfa   :  { %v17139_v40 = vpop.eup %14237  ;;  %v9187_v26 = vsel %vm170_vm1, %v17137_v2, 0.0 }
0x2cfb   :  { %9188 = vadd.xlane.f32.xlu0 %v9187_v26  ;;  %v9184_v35 = vsel %vm170_vm1, %v17139_v40, 0.0 }
0x2cfc   :  { %9185 = vadd.xlane.f32.xlu1 %v9184_v35 }
0x2cfd   :  { %v17145_v28 = vpop.eup %14239 }
0x2cfe   :  { %v17147_v57 = vpop.eup %14241  ;;  %v9193_v27 = vsel %vm170_vm1, %v17145_v28, 0.0 }
0x2cff   :  { %9194 = vadd.xlane.f32.xlu0 %v9193_v27  ;;  %v9190_v44 = vsel %vm170_vm1, %v17147_v57, 0.0 }
0x2d00   :  { %9191 = vadd.xlane.f32.xlu1 %v9190_v44 }
0x2d11   :  { %13823 = vrot.lane.b32.xlu1 %v16862_v48, %s14338_s10 }
0x2d15   :  { %13818 = vrot.lane.b32.xlu0 %v16862_v48, %s14337_s9 }
0x2d23   :  { %v9153_v42 = vpop.xlane.xlu0 %9152 }
0x2d24   :  { %14243 = vrcp.f32 %v9153_v42  ;;  %v9150_v21 = vpop.xlane.xlu1 %9149 }
0x2d25   :  { %14245 = vrcp.f32 %v9150_v21 }
0x2d27   :  { %v9159_v51 = vpop.xlane.xlu0 %9158 }
0x2d28   :  { %14247 = vrcp.f32 %v9159_v51  ;;  %v9156_v63 = vpop.xlane.xlu1 %9155 }
0x2d29   :  { %14249 = vrcp.f32 %v9156_v63 }
0x2d2e   :  { %v14244_v9 = vpop.eup %14243 }
0x2d2f   :  { %v14246_v12 = vpop.eup %14245  ;;  %v9199_v16 = vmul.f32 %v14244_v9, %v17074_v55 }
0x2d30   :  { %v9197_v62 = vmul.f32 %v14246_v12, %v17076_v6 }
0x2d32   :  { %v14248_v47 = vpop.eup %14247  ;;  %12450 = vmatprep.mubr.msk.f32.mxu0 %vm170_vm1, %v9197_v62 }
0x2d33   :  { %v14250_v3 = vpop.eup %14249  ;;  %12451 = vmatmul.mubr.msk.f32.vlgmr.msra.gmra.mrb[120].mxu0 %vm170_vm1, %v9199_v16  ;;  %v9203_v19 = vmul.f32 %v14248_v47, %v17080_v50  ;;  %v9726_v16 = vld [vmem:[%s17433_s2 + $0x3c0] sm:$0xff]  ;;  %v9727_v47 = vld [vmem:[%s17433_s2 + $0x3c8] sm:$0xff] }
0x2d34   :  { %13281 = vmatpush3.bf16.msra.mxu0 %v13278_v32  ;;  %v9201_v48 = vmul.f32 %v14250_v3, %v17084_v56  ;;  %v13298_v3 = vpack.c.bf16 %v9727_v47, %v9726_v16 }
0x2d36   :  { %12453 = vmatprep.mubr.msk.f32.mxu0 %vm170_vm1, %v9201_v48 }
0x2d37   :  { %12454 = vmatmul.mubr.msk.f32.gmra.mrb[122].mxu0 %vm170_vm1, %v9203_v19 }
0x2d71   :  { %v9165_v30 = vpop.xlane.xlu0 %9164 }
0x2d72   :  { %14251 = vrcp.f32 %v9165_v30 }
0x2d75   :  { %v9177_v55 = vpop.xlane.xlu0 %9176 }
0x2d79   :  { %v9162_v6 = vpop.xlane.xlu1 %9161 }
0x2d7a   :  { %14253 = vrcp.f32 %v9162_v6 }
0x2d7c   :  { %v14252_v61 = vpop.eup %14251 }
0x2d7d   :  { %v9174_v33 = vpop.xlane.xlu1 %9173  ;;  %v9207_v41 = vmul.f32 %v14252_v61, %v17094_v34 }
0x2d7e   :  { %14255 = vrcp.f32 %v9174_v33 }
0x2d80   :  { %v9171_v1 = vpop.xlane.xlu0 %9170 }
0x2d81   :  { %14257 = vrcp.f32 %v9171_v1  ;;  %v9168_v8 = vpop.xlane.xlu1 %9167 }
0x2d82   :  { %14259 = vrcp.f32 %v9168_v8 }
0x2d83   :  { %14261 = vrcp.f32 %v9177_v55 }
0x2d84   :  { %v14254_v0 = vpop.eup %14253  ;;  %v9183_v56 = vpop.xlane.xlu0 %9182 }
0x2d85   :  { %v9180_v7 = vpop.xlane.xlu1 %9179  ;;  %v9205_v50 = vmul.f32 %v14254_v0, %v17106_v17 }
0x2d86   :  { %14263 = vrcp.f32 %v9180_v7 }
0x2d87   :  { %12464 = vmatprep.mubr.msk.f32.mxu1 %vm170_vm1, %v9205_v50 }
0x2d88   :  { %v14256_v24 = vpop.eup %14255  ;;  %v9189_v31 = vpop.xlane.xlu0 %9188  ;;  %12465 = vmatmul.mubr.msk.f32.vlgmr.msra.gmra.mrb[136].mxu1 %vm170_vm1, %v9207_v41 }
0x2d89   :  { %13289 = vmatpush3.bf16.msra.mxu1 %v17130_v10  ;;  %v9186_v39 = vpop.xlane.xlu1 %9185  ;;  %v9213_v46 = vmul.f32 %v14256_v24, %v17111_v4 }
0x2d8a   :  { %14265 = vrcp.f32 %v9186_v39 }
0x2d8b   :  { %v14258_v52 = vpop.eup %14257  ;;  %14267 = vrcp.f32 %v9189_v31  ;;  %12478 = vmatprep.mubr.msk.f32.mxu0 %vm170_vm1, %v9213_v46 }
0x2d8c   :  { %v14260_v17 = vpop.eup %14259  ;;  %v9195_v34 = vpop.xlane.xlu0 %9194  ;;  %14269 = vrcp.f32 %v9183_v56  ;;  %v9211_v54 = vmul.f32 %v14258_v52, %v17118_v38 }
0x2d8d   :  { %v9192_v15 = vpop.xlane.xlu1 %9191  ;;  %v9209_v14 = vmul.f32 %v14260_v17, %v17120_v29  ;;  %v14262_v43 = vpop.eup %14261 }
0x2d8e   :  { %14271 = vrcp.f32 %v9192_v15  ;;  %v9215_v49 = vmul.f32 %v14262_v43, %v17100_v20 }
0x2d8f   :  { %14273 = vrcp.f32 %v9195_v34  ;;  %12467 = vmatprep.mubr.msk.f32.mxu1 %vm170_vm1, %v9209_v14 }
0x2d90   :  { %v13819_v22 = vpop.permute.xlu0 %13818  ;;  %12468 = vmatmul.mubr.msk.f32.gmra.mrb[138].mxu1 %vm170_vm1, %v9211_v54  ;;  %v14264_v23 = vpop.eup %14263 }
0x2d91   :  { %v13821_v4 = vunpack.i.h.bf16 %v13819_v22  ;;  %v13820_v37 = vunpack.i.l.bf16 %v13819_v22  ;;  %v13824_v13 = vpop.permute.xlu1 %13823  ;;  %v9217_v27 = vmul.f32 %v14264_v23, %v17128_v59 }
0x2d92   :  { %v13826_v18 = vunpack.i.h.bf16 %v13824_v13  ;;  %v13825_v36 = vunpack.i.l.bf16 %v13824_v13 }
0x2d93   :  { %v13282_v11 = vpack.c.bf16 %v13821_v4, %v13820_v37 }
0x2d94   :  { %v14266_v32 = vpop.eup %14265  ;;  %v13290_v10 = vpack.c.bf16 %v13826_v18, %v13825_v36 }
0x2d95   :  { %v14268_v29 = vpop.eup %14267  ;;  %13283 = vmatprep.subr.bf16.mxu0 %v13282_v11  ;;  %v9221_v38 = vmul.f32 %v14266_v32, %v17139_v40 }
0x2d96   :  { %13285 = vmatpush3.bf16.msra.mxu0 %v13282_v11  ;;  %13291 = vmatprep.subr.bf16.mxu1 %v13290_v10  ;;  %v14270_v53 = vpop.eup %14269  ;;  %v9223_v35 = vmul.f32 %v14268_v29, %v17137_v2  ;;  %v10824_v11 = vld [vmem:[%s17434_s3 + $0x22] ss:$0 sm:$0xff] }
0x2d97   :  { %13293 = vmatpush3.bf16.msra.mxu1 %v13290_v10  ;;  %12492 = vmatprep.mubr.msk.f32.mxu1 %vm170_vm1, %v9221_v38  ;;  %v9219_v20 = vmul.f32 %v14270_v53, %v17126_v5  ;;  %v9724_v5 = vld [vmem:[%s17433_s2 + $0x3b0] sm:$0xff] }
0x2d98   :  { %v14272_v26 = vpop.eup %14271 }
0x2d99   :  { %v14274_v44 = vpop.eup %14273  ;;  %12479 = vmatmul.mubr.msk.f32.vlgmr.msra.gmra.mrb[124].mxu0 %vm170_vm1, %v9215_v49  ;;  %v9225_v42 = vmul.f32 %v14272_v26, %v17147_v57 }
0x2d9a   :  { %12481 = vmatprep.mubr.msk.f32.mxu0 %vm170_vm1, %v9217_v27  ;;  %12493 = vmatmul.mubr.msk.f32.vlgmr.msra.gmra.mrb[140].mxu1 %vm170_vm1, %v9223_v35  ;;  %v9227_v40 = vmul.f32 %v14274_v44, %v17145_v28  ;;  %v9725_v28 = vld [vmem:[%s17433_s2 + $0x3b8] sm:$0xff] }
0x2d9b   :  { %12495 = vmatprep.mubr.msk.f32.mxu1 %vm170_vm1, %v9225_v42  ;;  %v13294_v62 = vpack.c.bf16 %v9725_v28, %v9724_v5 }
0x2d9d   :  { %12482 = vmatmul.mubr.msk.f32.gmra.mrb[126].mxu0 %vm170_vm1, %v9219_v20  ;;  %13295 = vmatprep.subr.bf16.mxu0 %v13294_v62 }
0x2d9e   :  { %12496 = vmatmul.mubr.msk.f32.gmra.mrb[142].mxu1 %vm170_vm1, %v9227_v40  ;;  %13297 = vmatpush3.bf16.msra.mxu0 %v13294_v62 }
0x2d9f   :  { %13299 = vmatprep.subr.bf16.mxu0 %v13298_v3 }
0x2da2   :  { %13301 = vmatpush3.bf16.msra.mxu0 %v13298_v3 }
0x2e06   :  { %v12452_v59 = vpop.f32.mrb[120].mxu0 }
0x2e07   :  { %v9318_v2 = vpop.f32.mrb[121].mxu0 }
0x2e0a   :  { %v12455_v21 = vpop.f32.mrb[122].mxu0 }
0x2e0b   :  { %v9328_v51 = vpop.f32.mrb[123].mxu0 }
0x2e5b   :  { %v12466_v63 = vpop.f32.mrb[136].mxu1 }
0x2e5c   :  { %9670 = vrot.lane.b32.xlu1 %v12466_v63, %s14347_s22  ;;  %v9427_v57 = vpop.f32.mrb[137].mxu1 }
0x2e5d   :  { %9668 = vrot.lane.b32.xlu0 %v9427_v57, %s14347_s22 }
0x2e63   :  { %v12469_v9 = vpop.f32.mrb[138].mxu1 }
0x2e64   :  { %v9437_v12 = vpop.f32.mrb[139].mxu1 }
0x2e6c   :  { %v12480_v48 = vpop.f32.mrb[124].mxu0 }
0x2e6d   :  { %9686 = vrot.lane.b32.xlu1 %v12480_v48, %s14348_s26  ;;  %v9536_v19 = vpop.f32.mrb[125].mxu0  ;;  %v12494_v30 = vpop.f32.mrb[140].mxu1 }
0x2e6e   :  { %9684 = vrot.lane.b32.xlu0 %v9536_v19, %s14348_s26  ;;  %v9645_v6 = vpop.f32.mrb[141].mxu1 }
0x2e70   :  { %v12483_v55 = vpop.f32.mrb[126].mxu0 }
0x2e71   :  { %9674 = vrot.lane.b32.xlu1 %v12469_v9, %s14347_s22  ;;  %v9546_v33 = vpop.f32.mrb[127].mxu0  ;;  %v12497_v1 = vpop.f32.mrb[142].mxu1 }
0x2e72   :  { %9672 = vrot.lane.b32.xlu0 %v9437_v12, %s14347_s22  ;;  %v9655_v8 = vpop.f32.mrb[143].mxu1 }
0x2e75   :  { %9690 = vrot.lane.b32.xlu1 %v12483_v55, %s14348_s26 }
0x2e76   :  { %9688 = vrot.lane.b32.xlu0 %v9546_v33, %s14348_s26  ;;  %v9904_v33 = vld [vmem:[%s17433_s2 + $0x3d0] sm:$0xff] }
0x2e79   :  { %9702 = vrot.lane.b32.xlu1 %v12494_v30, %s14349_s27 }
0x2e7a   :  { %9700 = vrot.lane.b32.xlu0 %v9645_v6, %s14349_s27 }
0x2e7d   :  { %9706 = vrot.lane.b32.xlu1 %v12497_v1, %s14349_s27  ;;  %v9905_v1 = vld [vmem:[%s17433_s2 + $0x3d8] sm:$0xff] }
0x2e7e   :  { %9704 = vrot.lane.b32.xlu0 %v9655_v8, %s14349_s27  ;;  %v13302_v8 = vpack.c.bf16 %v9905_v1, %v9904_v33 }
0x2e80   :  { %13303 = vmatprep.subr.bf16.mxu1 %v13302_v8 }
0x2e81   :  { %13305 = vmatpush3.bf16.msra.mxu1 %v13302_v8 }
0x2ece   :  { %v9671_v61 = vpop.permute.xlu1 %9670 }
0x2ecf   :  { %v9669_v0 = vpop.permute.xlu0 %9668  ;;  %v9713_v52 = vsel %vm284_vm2, %v12452_v59, %v9671_v61  ;;  %v9906_v61 = vld [vmem:[%s17433_s2 + $0x3e0] sm:$0xff] }
0x2ed0   :  { %v9712_v39 = vsel %vm284_vm2, %v9318_v2, %v9669_v0  ;;  %v9907_v0 = vld [vmem:[%s17433_s2 + $0x3e8] sm:$0xff] }
0x2edf   :  { %v9687_v56 = vpop.permute.xlu1 %9686 }
0x2ee0   :  { %v9685_v7 = vpop.permute.xlu0 %9684  ;;  %v9717_v15 = vsel %vm1421_vm8, %v9713_v52, %v9687_v56  ;;  %v13306_v56 = vpack.c.bf16 %v9907_v0, %v9906_v61  ;;  %v10019_v52 = vld [vmem:[%s17433_s2 + $0x418] sm:$0xff] }
0x2ee1   :  { %v9716_v17 = vsel %vm1421_vm8, %v9712_v39, %v9685_v7  ;;  %v10014_v7 = vld [vmem:[%s17433_s2 + $0x3f0] sm:$0xff] }
0x2ee2   :  { %13307 = vmatprep.subr.bf16.mxu1 %v13306_v56 }
0x2ee3   :  { %v9675_v50 = vpop.permute.xlu1 %9674  ;;  %13309 = vmatpush3.bf16.msra.mxu1 %v13306_v56 }
0x2ee4   :  { %v9673_v41 = vpop.permute.xlu0 %9672  ;;  %v9715_v37 = vsel %vm284_vm2, %v12455_v21, %v9675_v50  ;;  %v10015_v50 = vld [vmem:[%s17433_s2 + $0x3f8] sm:$0xff] }
0x2ee5   :  { %v9714_v22 = vsel %vm284_vm2, %v9328_v51, %v9673_v41  ;;  %v10016_v41 = vld [vmem:[%s17433_s2 + $0x400] sm:$0xff] }
0x2ee7   :  { %v9691_v24 = vpop.permute.xlu1 %9690 }
0x2ee8   :  { %v9689_v31 = vpop.permute.xlu0 %9688  ;;  %v9719_v18 = vsel %vm1421_vm8, %v9715_v37, %v9691_v24  ;;  %v13310_v24 = vpack.c.bf16 %v10015_v50, %v10014_v7  ;;  %v10024_v37 = vld [vmem:[%s17433_s2 + $0x440] sm:$0xff] }
0x2ee9   :  { %v9718_v13 = vsel %vm1421_vm8, %v9714_v22, %v9689_v31  ;;  %v10017_v31 = vld [vmem:[%s17433_s2 + $0x408] sm:$0xff]  ;;  %v10023_v22 = vld [vmem:[%s17433_s2 + $0x438] sm:$0xff] }
0x2eea   :  { %v13314_v39 = vpack.c.bf16 %v10017_v31, %v10016_v41  ;;  %13311 = vmatprep.subr.bf16.mxu0 %v13310_v24 }
0x2eeb   :  { %v9703_v46 = vpop.permute.xlu1 %9702 }
0x2eec   :  { %v9701_v34 = vpop.permute.xlu0 %9700  ;;  %v9721_v54 = vsel %vm1426_vm9, %v9717_v15, %v9703_v46  ;;  %v10018_v46 = vld [vmem:[%s17433_s2 + $0x410] sm:$0xff]  ;;  %v10021_v15 = vld [vmem:[%s17433_s2 + $0x428] sm:$0xff] }
0x2eed   :  { %v9720_v14 = vsel %vm1426_vm9, %v9716_v17, %v9701_v34  ;;  %v13318_v17 = vpack.c.bf16 %v10019_v52, %v10018_v46  ;;  %v10020_v34 = vld [vmem:[%s17433_s2 + $0x420] sm:$0xff] }
0x2eee   :  { %12506 = vmatprep.mubr.msk.f32.mxu0 %vm170_vm1, %v9720_v14  ;;  %v13322_v14 = vpack.c.bf16 %v10021_v15, %v10020_v34 }
0x2eef   :  { %12507 = vmatmul.mubr.msk.f32.vlgmr.msra.gmra.mrb[128].mxu0 %vm170_vm1, %v9721_v54  ;;  %v9707_v4 = vpop.permute.xlu1 %9706  ;;  %v10022_v54 = vld [vmem:[%s17433_s2 + $0x430] sm:$0xff] }
0x2ef0   :  { %v9705_v43 = vpop.permute.xlu0 %9704  ;;  %v9723_v23 = vsel %vm1426_vm9, %v9719_v18, %v9707_v4  ;;  %13313 = vmatpush3.bf16.msra.mxu0 %v13310_v24  ;;  %v13326_v4 = vpack.c.bf16 %v10023_v22, %v10022_v54  ;;  %v10026_v18 = vld [vmem:[%s17433_s2 + $0x450] sm:$0xff]  ;;  %v10836_v24 = vld [vmem:[%s17434_s3 + $0x24] ss:$0 sm:$0xff] }
0x2ef1   :  { %v9722_v36 = vsel %vm1426_vm9, %v9718_v13, %v9705_v43  ;;  %13315 = vmatprep.subr.bf16.mxu0 %v13314_v39  ;;  %v10025_v13 = vld [vmem:[%s17433_s2 + $0x448] sm:$0xff] }
0x2ef2   :  { %12509 = vmatprep.mubr.msk.f32.mxu0 %vm170_vm1, %v9722_v36  ;;  %v13330_v43 = vpack.c.bf16 %v10025_v13, %v10024_v37  ;;  %v10027_v36 = vld [vmem:[%s17433_s2 + $0x458] sm:$0xff] }
0x2ef3   :  { %12510 = vmatmul.mubr.msk.f32.gmra.mrb[130].mxu0 %vm170_vm1, %v9723_v23  ;;  %v13334_v23 = vpack.c.bf16 %v10027_v36, %v10026_v18 }
0x2ef4   :  { %13317 = vmatpush3.bf16.msra.mxu0 %v13314_v39 }
0x2ef5   :  { %13319 = vmatprep.subr.bf16.mxu0 %v13318_v17 }
0x2ef8   :  { %13321 = vmatpush3.bf16.msra.mxu0 %v13318_v17 }
0x2ef9   :  { %13323 = vmatprep.subr.bf16.mxu0 %v13322_v14 }
0x2efc   :  { %13325 = vmatpush3.bf16.msra.mxu0 %v13322_v14 }
0x2efd   :  { %13327 = vmatprep.subr.bf16.mxu0 %v13326_v4 }
0x2f00   :  { %13329 = vmatpush3.bf16.msra.mxu0 %v13326_v4 }
0x2f01   :  { %13331 = vmatprep.subr.bf16.mxu0 %v13330_v43 }
0x2f04   :  { %13333 = vmatpush3.bf16.msra.mxu0 %v13330_v43 }
0x2f05   :  { %13335 = vmatprep.subr.bf16.mxu0 %v13334_v23 }
0x2f08   :  { %13337 = vmatpush3.bf16.msra.mxu0 %v13334_v23 }
0x2fc2   :  { %v12508_v32 = vpop.f32.mrb[128].mxu0 }
0x2fc3   :  { %v9817_v10 = vadd.f32 %v12508_v32, %v10824_v11  ;;  %v9811_v29 = vpop.f32.mrb[129].mxu0 }
0x2fc4   :  { %v9812_v38 = vadd.f32 %v10824_v11, %v9811_v29 }
0x2fc5   :  { %v9831_v53 = vadd.f32 %v9817_v10, %v16900_v60 }
0x2fc6   :  { %v9830_v49 = vadd.f32 %v9812_v38, %v16896_v58  ;;  %v12511_v26 = vpop.f32.mrb[130].mxu0 }
0x2fc7   :  { %v9821_v35 = vpop.f32.mrb[131].mxu0  ;;  %v9837_v27 = vsel %vm170_vm1, %v9831_v53, 0.0  ;;  %v9827_v44 = vadd.f32 %v12511_v26, %v10824_v11 }
0x2fc8   :  { %v9822_v42 = vadd.f32 %v10824_v11, %v9821_v35  ;;  %9838 = vadd.xlane.f32.xlu1 %v9837_v27  ;;  %v9834_v20 = vsel %vm170_vm1, %v9830_v49, 0.0 }
0x2fc9   :  { %9835 = vadd.xlane.f32.xlu0 %v9834_v20  ;;  %v9833_v59 = vadd.f32 %v9827_v44, %v16931_v25 }
0x2fca   :  { %v9832_v40 = vadd.f32 %v9822_v42, %v16924_v45 }
0x2fcb   :  { %v9843_v60 = vsel %vm170_vm1, %v9833_v59, 0.0 }
0x2fcc   :  { %v9840_v2 = vsel %vm170_vm1, %v9832_v40, 0.0 }
0x2fcd   :  { %9841 = vadd.xlane.f32.xlu0 %v9840_v2 }
0x2fd1   :  { %9844 = vadd.xlane.f32.xlu0 %v9843_v60 }
0x3055   :  { %v9839_v58 = vpop.xlane.xlu1 %9838 }
0x3056   :  { %v9847_v21 = vmul.f32 0.03125, %v9839_v58  ;;  %v9836_v51 = vpop.xlane.xlu0 %9835 }
0x3057   :  { %v9846_v63 = vmul.f32 0.03125, %v9836_v51 }
0x3058   :  { %v17241_v57 = vsub.f32 %v9831_v53, %v9847_v21  ;;  %v10830_v21 = vld [vmem:[%s17434_s3 + $0x28] ss:$0 sm:$0xff] }
0x3059   :  { %v17243_v9 = vsub.f32 %v9830_v49, %v9846_v63 }
0x305a   :  { %v9842_v12 = vpop.xlane.xlu0 %9841  ;;  %v9855_v45 = vmul.f32 %v17241_v57, %v17241_v57 }
0x305b   :  { %v9848_v5 = vmul.f32 0.03125, %v9842_v12  ;;  %v9854_v25 = vmul.f32 %v17243_v9, %v17243_v9 }
0x305c   :  { %v9861_v28 = vsel %vm170_vm1, %v9855_v45, 0.0 }
0x305d   :  { %v17250_v62 = vsub.f32 %v9832_v40, %v9848_v5  ;;  %9862 = vadd.xlane.f32.xlu0 %v9861_v28  ;;  %v9858_v16 = vsel %vm170_vm1, %v9854_v25, 0.0  ;;  %v10829_v40 = vld [vmem:[%s17434_s3 + $0x27] ss:$0 sm:$0xff] }
0x305e   :  { %9859 = vadd.xlane.f32.xlu1 %v9858_v16  ;;  %v9845_v47 = vpop.xlane.xlu0 %9844 }
0x305f   :  { %v9849_v3 = vmul.f32 0.03125, %v9845_v47  ;;  %v9856_v48 = vmul.f32 %v17250_v62, %v17250_v62 }
0x3061   :  { %v17255_v19 = vsub.f32 %v9833_v59, %v9849_v3  ;;  %v9864_v30 = vsel %vm170_vm1, %v9856_v48, 0.0  ;;  %v10029_v3 = vld [vmem:[%s17433_s2 + $0x468] sm:$0xff] }
0x3062   :  { %9865 = vadd.xlane.f32.xlu1 %v9864_v30 }
0x3063   :  { %v9857_v6 = vmul.f32 %v17255_v19, %v17255_v19 }
0x3065   :  { %v9867_v55 = vsel %vm170_vm1, %v9857_v6, 0.0 }
0x3066   :  { %9868 = vadd.xlane.f32.xlu0 %v9867_v55 }
0x30ea   :  { %v9863_v11 = vpop.xlane.xlu0 %9862 }
0x30eb   :  { %v9871_v32 = vmul.f32 0.03125, %v9863_v11  ;;  %v9860_v10 = vpop.xlane.xlu1 %9859 }
0x30ec   :  { %v9870_v29 = vmul.f32 0.03125, %v9860_v10 }
0x30ed   :  { %v9875_v38 = vadd.f32 1e-05, %v9871_v32 }
0x30ee   :  { %v9874_v53 = vadd.f32 1e-05, %v9870_v29 }
0x30ef   :  { %14275 = vrsqrt.f32 %v9875_v38  ;;  %v9866_v49 = vpop.xlane.xlu1 %9865 }
0x30f0   :  { %14277 = vrsqrt.f32 %v9874_v53  ;;  %v9872_v26 = vmul.f32 0.03125, %v9866_v49 }
0x30f2   :  { %v9876_v35 = vadd.f32 1e-05, %v9872_v26 }
0x30f3   :  { %v9869_v27 = vpop.xlane.xlu0 %9868 }
0x30f4   :  { %14279 = vrsqrt.f32 %v9876_v35  ;;  %v9873_v44 = vmul.f32 0.03125, %v9869_v27 }
0x30f6   :  { %v9877_v42 = vadd.f32 1e-05, %v9873_v44 }
0x30f8   :  { %14281 = vrsqrt.f32 %v9877_v42 }
0x30f9   :  { %v14276_v20 = vpop.eup %14275 }
0x30fa   :  { %v14278_v59 = vpop.eup %14277  ;;  %v9883_v2 = vmul.f32 %v14276_v20, %v17241_v57 }
0x30fb   :  { %v9882_v60 = vmul.f32 %v14278_v59, %v17243_v9 }
0x30fc   :  { %v9892_v58 = vmul.f32 %v10829_v40, %v9883_v2 }
0x30fd   :  { %v9891_v51 = vmul.f32 %v10829_v40, %v9882_v60 }
0x30fe   :  { %v14280_v63 = vpop.eup %14279  ;;  %v9901_v5 = vadd.f32 %v10830_v21, %v9892_v58 }
0x30ff   :  { %v9900_v12 = vadd.f32 %v10830_v21, %v9891_v51  ;;  %v9884_v45 = vmul.f32 %v14280_v63, %v17250_v62  ;;  %v10028_v62 = vld [vmem:[%s17433_s2 + $0x460] sm:$0xff]  ;;  %v10194_v51 = vld [vmem:[%s17433_s2 + $0x470] sm:$0xff]  ;;  %v10195_v63 = vld [vmem:[%s17433_s2 + $0x478] sm:$0xff] }
0x3100   :  { %v13338_v48 = vpack.c.bf16 %v10029_v3, %v10028_v62 }
0x3101   :  { %12520 = vmatprep.mubr.msk.f32.mxu1 %vm170_vm1, %v9900_v12  ;;  %v9893_v25 = vmul.f32 %v10829_v40, %v9884_v45  ;;  %v10196_v45 = vld [vmem:[%s17433_s2 + $0x480] sm:$0xff] }
0x3102   :  { %v14282_v28 = vpop.eup %14281  ;;  %12521 = vmatmul.mubr.msk.f32.vlgmr.msra.gmra.mrb[144].mxu1 %vm170_vm1, %v9901_v5  ;;  %13339 = vmatprep.subr.bf16.mxu0 %v13338_v48 }
0x3103   :  { %v9902_v57 = vadd.f32 %v10830_v21, %v9893_v25  ;;  %v9885_v9 = vmul.f32 %v14282_v28, %v17255_v19  ;;  %13341 = vmatpush3.bf16.msra.mxu0 %v13338_v48  ;;  %v10831_v19 = vld [vmem:[%s17434_s3 + $0x23] ss:$0 sm:$0xff] }
0x3105   :  { %12523 = vmatprep.mubr.msk.f32.mxu1 %vm170_vm1, %v9902_v57  ;;  %v9894_v16 = vmul.f32 %v10829_v40, %v9885_v9 }
0x3107   :  { %v9903_v47 = vadd.f32 %v10830_v21, %v9894_v16 }
0x3109   :  { %12524 = vmatmul.mubr.msk.f32.gmra.mrb[146].mxu1 %vm170_vm1, %v9903_v47 }
0x31d5   :  { %v12522_v30 = vpop.f32.mrb[144].mxu1 }
0x31d6   :  { %v9997_v6 = vadd.f32 %v12522_v30, %v10831_v19  ;;  %v9991_v55 = vpop.f32.mrb[145].mxu1 }
0x31d7   :  { %v9992_v33 = vadd.f32 %v10831_v19, %v9991_v55 }
0x31d8   :  { %v10011_v8 = vmax.f32 %v9997_v6, 0.0 }
0x31d9   :  { %v10010_v1 = vmax.f32 %v9992_v33, 0.0 }
0x31db   :  { %12558 = vmatprep.mubr.f32.mxu0 %v10010_v1  ;;  %v10837_v1 = vld [vmem:[%s17434_s3 + $0x29] ss:$0 sm:$0xff] }
0x31dc   :  { %v12525_v61 = vpop.f32.mrb[146].mxu1  ;;  %12559 = vmatmul.mubr.f32.vlgmr.msra.gmra.mrb[132].mxu0 %v10011_v8 }
0x31dd   :  { %v10007_v0 = vadd.f32 %v12525_v61, %v10831_v19  ;;  %v10001_v56 = vpop.f32.mrb[147].mxu1 }
0x31de   :  { %v10002_v7 = vadd.f32 %v10831_v19, %v10001_v56 }
0x31df   :  { %v10013_v41 = vmax.f32 %v10007_v0, 0.0 }
0x31e0   :  { %v10012_v50 = vmax.f32 %v10002_v7, 0.0  ;;  %v10838_v7 = vld [vmem:[%s17434_s3 + $0x2a] ss:$0 sm:$0xff] }
0x31e2   :  { %12561 = vmatprep.mubr.f32.mxu0 %v10012_v50 }
0x31e3   :  { %12562 = vmatmul.mubr.f32.gmra.mrb[134].mxu0 %v10013_v41 }
0x32af   :  { %v12560_v31 = vpop.f32.mrb[132].mxu0 }
0x32b0   :  { %v10107_v39 = vadd.f32 %v12560_v31, %v10836_v24  ;;  %v10101_v46 = vpop.f32.mrb[133].mxu0 }
0x32b1   :  { %v10102_v52 = vadd.f32 %v10836_v24, %v10101_v46 }
0x32b2   :  { %v10121_v17 = vadd.f32 %v10107_v39, %v9901_v5  ;;  %v10197_v5 = vld [vmem:[%s17433_s2 + $0x488] sm:$0xff] }
0x32b3   :  { %v10120_v34 = vadd.f32 %v10102_v52, %v9900_v12  ;;  %v13342_v12 = vpack.c.bf16 %v10195_v63, %v10194_v51  ;;  %v13346_v25 = vpack.c.bf16 %v10197_v5, %v10196_v45 }
0x32b4   :  { %v10127_v15 = vsel %vm170_vm1, %v10121_v17, 0.0 }
0x32b5   :  { %10128 = vadd.xlane.f32.xlu0 %v10127_v15  ;;  %v10124_v14 = vsel %vm170_vm1, %v10120_v34, 0.0  ;;  %13343 = vmatprep.subr.bf16.mxu1 %v13342_v12 }
0x32b6   :  { %10125 = vadd.xlane.f32.xlu1 %v10124_v14  ;;  %v12563_v54 = vpop.f32.mrb[134].mxu0  ;;  %13345 = vmatpush3.bf16.msra.mxu1 %v13342_v12 }
0x32b7   :  { %v10117_v22 = vadd.f32 %v12563_v54, %v10836_v24  ;;  %v10111_v4 = vpop.f32.mrb[135].mxu0  ;;  %13347 = vmatprep.subr.bf16.mxu1 %v13346_v25 }
0x32b8   :  { %v10112_v37 = vadd.f32 %v10836_v24, %v10111_v4 }
0x32b9   :  { %v10123_v13 = vadd.f32 %v10117_v22, %v9903_v47 }
0x32ba   :  { %v10122_v43 = vadd.f32 %v10112_v37, %v9902_v57  ;;  %13349 = vmatpush3.bf16.msra.mxu1 %v13346_v25 }
0x32bb   :  { %v10133_v18 = vsel %vm170_vm1, %v10123_v13, 0.0 }
0x32bc   :  { %10134 = vadd.xlane.f32.xlu0 %v10133_v18  ;;  %v10130_v36 = vsel %vm170_vm1, %v10122_v43, 0.0 }
0x32bd   :  { %10131 = vadd.xlane.f32.xlu1 %v10130_v36 }
0x3342   :  { %v10129_v23 = vpop.xlane.xlu0 %10128 }
0x3343   :  { %v10137_v11 = vmul.f32 0.03125, %v10129_v23  ;;  %v10126_v32 = vpop.xlane.xlu1 %10125 }
0x3344   :  { %v10136_v10 = vmul.f32 0.03125, %v10126_v32 }
0x3345   :  { %v10141_v29 = vsub.f32 %v10121_v17, %v10137_v11 }
0x3346   :  { %v10140_v38 = vsub.f32 %v10120_v34, %v10136_v10 }
0x3347   :  { %v10145_v53 = vmul.f32 %v10141_v29, %v10141_v29 }
0x3348   :  { %v10144_v49 = vmul.f32 %v10140_v38, %v10140_v38 }
0x3349   :  { %v10135_v26 = vpop.xlane.xlu0 %10134  ;;  %v10151_v35 = vsel %vm170_vm1, %v10145_v53, 0.0 }
0x334a   :  { %v10139_v27 = vmul.f32 0.03125, %v10135_v26  ;;  %v10132_v44 = vpop.xlane.xlu1 %10131  ;;  %10152 = vadd.xlane.f32.xlu0 %v10151_v35  ;;  %v10148_v42 = vsel %vm170_vm1, %v10144_v49, 0.0 }
0x334b   :  { %v10138_v20 = vmul.f32 0.03125, %v10132_v44  ;;  %10149 = vadd.xlane.f32.xlu1 %v10148_v42 }
0x334c   :  { %v10143_v40 = vsub.f32 %v10123_v13, %v10139_v27 }
0x334d   :  { %v10142_v59 = vsub.f32 %v10122_v43, %v10138_v20 }
0x334e   :  { %v10147_v2 = vmul.f32 %v10143_v40, %v10143_v40 }
0x334f   :  { %v10146_v60 = vmul.f32 %v10142_v59, %v10142_v59 }
0x3350   :  { %v10157_v58 = vsel %vm170_vm1, %v10147_v2, 0.0 }
0x3351   :  { %10158 = vadd.xlane.f32.xlu0 %v10157_v58  ;;  %v10154_v21 = vsel %vm170_vm1, %v10146_v60, 0.0 }
0x3352   :  { %10155 = vadd.xlane.f32.xlu1 %v10154_v21 }
0x33d7   :  { %v10153_v28 = vpop.xlane.xlu0 %10152 }
0x33d8   :  { %v10161_v57 = vmul.f32 0.03125, %v10153_v28  ;;  %v10150_v9 = vpop.xlane.xlu1 %10149 }
0x33d9   :  { %v10160_v16 = vmul.f32 0.03125, %v10150_v9 }
0x33da   :  { %v10165_v47 = vadd.f32 1e-05, %v10161_v57 }
0x33db   :  { %v10164_v62 = vadd.f32 1e-05, %v10160_v16 }
0x33dc   :  { %14283 = vrsqrt.f32 %v10165_v47 }
0x33dd   :  { %14285 = vrsqrt.f32 %v10164_v62 }
0x33de   :  { %v10159_v3 = vpop.xlane.xlu0 %10158 }
0x33df   :  { %v10163_v48 = vmul.f32 0.03125, %v10159_v3  ;;  %v10156_v19 = vpop.xlane.xlu1 %10155 }
0x33e0   :  { %v10162_v30 = vmul.f32 0.03125, %v10156_v19 }
0x33e1   :  { %v10167_v6 = vadd.f32 1e-05, %v10163_v48 }
0x33e2   :  { %v10166_v55 = vadd.f32 1e-05, %v10162_v30 }
0x33e3   :  { %14287 = vrsqrt.f32 %v10167_v6 }
0x33e4   :  { %14289 = vrsqrt.f32 %v10166_v55 }
0x33e6   :  { %v14284_v33 = vpop.eup %14283 }
0x33e7   :  { %v14286_v8 = vpop.eup %14285  ;;  %v10173_v61 = vmul.f32 %v14284_v33, %v10141_v29 }
0x33e8   :  { %v10172_v0 = vmul.f32 %v14286_v8, %v10140_v38 }
0x33e9   :  { %v10182_v56 = vmul.f32 %v10837_v1, %v10173_v61 }
0x33ea   :  { %v10181_v50 = vmul.f32 %v10837_v1, %v10172_v0 }
0x33eb   :  { %v10191_v31 = vadd.f32 %v10838_v7, %v10182_v56 }
0x33ec   :  { %v10190_v41 = vadd.f32 %v10838_v7, %v10181_v50 }
0x33ed   :  { %v14288_v24 = vpop.eup %14287 }
0x33ee   :  { %v14290_v39 = vpop.eup %14289  ;;  %12572 = vmatprep.mubr.msk.f32.mxu1 %vm170_vm1, %v10190_v41  ;;  %v10175_v46 = vmul.f32 %v14288_v24, %v10143_v40 }
0x33ef   :  { %12573 = vmatmul.mubr.msk.f32.vlgmr.msra.gmra.mrb[148].mxu1 %vm170_vm1, %v10191_v31  ;;  %v10174_v52 = vmul.f32 %v14290_v39, %v10142_v59 }
0x33f0   :  { %v10184_v17 = vmul.f32 %v10837_v1, %v10175_v46 }
0x33f1   :  { %v10183_v34 = vmul.f32 %v10837_v1, %v10174_v52 }
0x33f2   :  { %v10193_v14 = vadd.f32 %v10838_v7, %v10184_v17 }
0x33f3   :  { %v10192_v15 = vadd.f32 %v10838_v7, %v10183_v34 }
0x33f5   :  { %12575 = vmatprep.mubr.msk.f32.mxu1 %vm170_vm1, %v10192_v15 }
0x33f6   :  { %12576 = vmatmul.mubr.msk.f32.gmra.mrb[150].mxu1 %vm170_vm1, %v10193_v14 }
0x33f7   :  { %14322 = shalt.err (!%p14319_p4)
}
0x33f8   :  { %s14323_s20 = scalar_lea.hbm %s17436_s5, 512 }
0x33f9   :  { %p14324_p5 = scmp.ne.s32.totalorder %s17436_s5, %s14323_s20  ;;  %p14327_p6 = scmp.lt.u32.totalorder %s14323_s20, %s17436_s5 }
0x33fb   :  { %p14329_p7 = pnand %p14327_p6, %p14324_p5 }
0x33fd   :  { %14332 = shalt.err (!%p14329_p7)
}
0x33fe   :  { %s14351_s8 = smov 128   ;;  %v10839_v54 = vld [vmem:[%s17434_s3 + $0x2b] ss:$0 sm:$0xff] }
0x33ff   :  { %10425 = dma.vmem_to_hbm [thread:$0]  %s10420_s30, 512, %s17436_s5, [#allocation3], %s14351_s8, %s14351_s8, %s14347_s22  }
0x34c2   :  { %v12574_v22 = vpop.f32.mrb[148].mxu1 }
0x34c3   :  { %v17387_v4 = vadd.f32 %v12574_v22, %v10839_v54  ;;  %v10281_v37 = vpop.f32.mrb[149].mxu1 }
0x34c4   :  { %v17389_v13 = vadd.f32 %v10839_v54, %v10281_v37 }
0x34c5   :  { %v17392_v43 = vmul.f32 0.70710677, %v17387_v4 }
0x34c6   :  { %v17395_v18 = vmul.f32 0.70710677, %v17389_v13 }
0x34c7   :  { %v10305_v36 = vand.u32 2147483647, %v17392_v43  ;;  %vm10385_vm10 = vcmp.ge.f32.partialorder %v17392_v43, 0.0 }
0x34c8   :  { %v10304_v23 = vand.u32 2147483647, %v17395_v18  ;;  %vm10384_vm11 = vcmp.ge.f32.partialorder %v17395_v18, 0.0 }
0x34c9   :  { %v10309_v11 = vmul.f32 0.3275911, %v10305_v36  ;;  %v12577_v32 = vpop.f32.mrb[150].mxu1  ;;  %v10361_v2 = vsub.f32 0.0, %v10305_v36 }
0x34ca   :  { %v10308_v10 = vmul.f32 0.3275911, %v10304_v23  ;;  %v17399_v29 = vadd.f32 %v12577_v32, %v10839_v54  ;;  %v10291_v38 = vpop.f32.mrb[151].mxu1  ;;  %v10360_v58 = vsub.f32 0.0, %v10304_v23 }
0x34cb   :  { %v10313_v53 = vadd.f32 1.0, %v10309_v11  ;;  %v17401_v49 = vadd.f32 %v10839_v54, %v10291_v38  ;;  %v10365_v51 = vmul.f32 %v10361_v2, %v10305_v36 }
0x34cc   :  { %v10312_v26 = vadd.f32 1.0, %v10308_v10  ;;  %v17404_v35 = vmul.f32 0.70710677, %v17399_v29  ;;  %v10364_v45 = vmul.f32 %v10360_v58, %v10304_v23 }
0x34cd   :  { %14291 = vrcp.f32 %v10313_v53  ;;  %v17407_v27 = vmul.f32 0.70710677, %v17401_v49  ;;  %v10370_v57 = vmul.f32 1.442695, %v10365_v51 }
0x34ce   :  { %14293 = vrcp.f32 %v10312_v26  ;;  %v10307_v44 = vand.u32 2147483647, %v17404_v35  ;;  %v10368_v62 = vmul.f32 1.442695, %v10364_v45  ;;  %vm10387_vm12 = vcmp.ge.f32.partialorder %v17404_v35, 0.0 }
0x34cf   :  { %v10306_v42 = vand.u32 2147483647, %v17407_v27  ;;  %vm10386_vm13 = vcmp.ge.f32.partialorder %v17407_v27, 0.0 }
0x34d0   :  { %v10311_v20 = vmul.f32 0.3275911, %v10307_v44  ;;  %v10363_v28 = vsub.f32 0.0, %v10307_v44 }
0x34d1   :  { %v10310_v40 = vmul.f32 0.3275911, %v10306_v42  ;;  %v10362_v16 = vsub.f32 0.0, %v10306_v42 }
0x34d2   :  { %v10315_v59 = vadd.f32 1.0, %v10311_v20  ;;  %v10367_v30 = vmul.f32 %v10363_v28, %v10307_v44 }
0x34d3   :  { %v10314_v60 = vadd.f32 1.0, %v10310_v40  ;;  %v10366_v1 = vmul.f32 %v10362_v16, %v10306_v42 }
0x34d4   :  { %14295 = vrcp.f32 %v10315_v59  ;;  %v10374_v50 = vmul.f32 1.442695, %v10367_v30 }
0x34d5   :  { %14297 = vrcp.f32 %v10314_v60  ;;  %v10372_v39 = vmul.f32 1.442695, %v10366_v1 }
0x34d6   :  { %14299 = vpow2.f32 %v10370_v57 }
0x34d7   :  { %v14292_v21 = vpop.eup %14291  ;;  %14301 = vpow2.f32 %v10368_v62 }
0x34d8   :  { %v14294_v63 = vpop.eup %14293  ;;  %v10325_v12 = vmul.f32 1.0614054, %v14292_v21  ;;  %14303 = vpow2.f32 %v10374_v50 }
0x34d9   :  { %v10324_v5 = vmul.f32 1.0614054, %v14294_v63  ;;  %14305 = vpow2.f32 %v10372_v39 }
0x34da   :  { %v10329_v25 = vadd.f32 -1.4531521, %v10325_v12 }
0x34db   :  { %v10328_v9 = vadd.f32 -1.4531521, %v10324_v5  ;;  %v10397_v5 = vmul.f32 0.5, %v17387_v4 }
0x34dc   :  { %v10333_v47 = vmul.f32 %v14292_v21, %v10329_v25 }
0x34dd   :  { %v10332_v3 = vmul.f32 %v14294_v63, %v10328_v9  ;;  %v10396_v9 = vmul.f32 0.5, %v17389_v13  ;;  %v10399_v13 = vmul.f32 0.5, %v17399_v29 }
0x34de   :  { %v14296_v48 = vpop.eup %14295  ;;  %v10337_v19 = vadd.f32 1.4214138, %v10333_v47 }
0x34df   :  { %v14298_v6 = vpop.eup %14297  ;;  %v10336_v55 = vadd.f32 1.4214138, %v10332_v3  ;;  %v10327_v33 = vmul.f32 1.0614054, %v14296_v48 }
0x34e0   :  { %v10341_v8 = vmul.f32 %v14292_v21, %v10337_v19  ;;  %v10326_v61 = vmul.f32 1.0614054, %v14298_v6  ;;  %v14300_v23 = vpop.eup %14299 }
0x34e1   :  { %v10340_v0 = vmul.f32 %v14294_v63, %v10336_v55  ;;  %v10331_v56 = vadd.f32 -1.4531521, %v10327_v33  ;;  %v14302_v10 = vpop.eup %14301  ;;  %v10398_v55 = vmul.f32 0.5, %v17401_v49 }
0x34e2   :  { %v10345_v7 = vadd.f32 -0.28449672, %v10341_v8  ;;  %v10330_v41 = vadd.f32 -1.4531521, %v10326_v61 }
0x34e3   :  { %v10344_v24 = vadd.f32 -0.28449672, %v10340_v0  ;;  %v10335_v31 = vmul.f32 %v14296_v48, %v10331_v56 }
0x34e4   :  { %v10349_v46 = vmul.f32 %v14292_v21, %v10345_v7  ;;  %v10334_v52 = vmul.f32 %v14298_v6, %v10330_v41 }
0x34e5   :  { %v10348_v17 = vmul.f32 %v14294_v63, %v10344_v24  ;;  %v10339_v34 = vadd.f32 1.4214138, %v10335_v31 }
0x34e6   :  { %v10353_v15 = vadd.f32 0.2548296, %v10349_v46  ;;  %v10338_v14 = vadd.f32 1.4214138, %v10334_v52 }
0x34e7   :  { %v10352_v54 = vadd.f32 0.2548296, %v10348_v17  ;;  %v10343_v22 = vmul.f32 %v14296_v48, %v10339_v34 }
0x34e8   :  { %v10357_v37 = vmul.f32 %v14292_v21, %v10353_v15  ;;  %v10342_v36 = vmul.f32 %v14298_v6, %v10338_v14  ;;  %v14304_v21 = vpop.eup %14303 }
0x34e9   :  { %v10356_v11 = vmul.f32 %v14294_v63, %v10352_v54  ;;  %v10347_v32 = vadd.f32 -0.28449672, %v10343_v22  ;;  %v14306_v45 = vpop.eup %14305 }
0x34ea   :  { %v10377_v38 = vmul.f32 %v14300_v23, %v10357_v37  ;;  %v10346_v53 = vadd.f32 -0.28449672, %v10342_v36 }
0x34eb   :  { %v10376_v26 = vmul.f32 %v14302_v10, %v10356_v11  ;;  %v10351_v44 = vmul.f32 %v14296_v48, %v10347_v32 }
0x34ec   :  { %v10381_v42 = vsub.f32 1.0, %v10377_v38  ;;  %v10350_v20 = vmul.f32 %v14298_v6, %v10346_v53 }
0x34ed   :  { %v10380_v40 = vsub.f32 1.0, %v10376_v26  ;;  %v10355_v59 = vadd.f32 0.2548296, %v10351_v44 }
0x34ee   :  { %v10389_v2 = vsub.f32 0.0, %v10381_v42  ;;  %v10354_v60 = vadd.f32 0.2548296, %v10350_v20 }
0x34ef   :  { %v10388_v58 = vsub.f32 0.0, %v10380_v40  ;;  %v10359_v51 = vmul.f32 %v14296_v48, %v10355_v59 }
0x34f0   :  { %v10393_v12 = vsel %vm10385_vm10, %v10381_v42, %v10389_v2  ;;  %v10358_v63 = vmul.f32 %v14298_v6, %v10354_v60 }
0x34f1   :  { %v10401_v25 = vadd.f32 1.0, %v10393_v12  ;;  %v10392_v28 = vsel %vm10384_vm11, %v10380_v40, %v10388_v58  ;;  %v10379_v57 = vmul.f32 %v14304_v21, %v10359_v51 }
0x34f2   :  { %v10400_v16 = vadd.f32 1.0, %v10392_v28  ;;  %v10378_v47 = vmul.f32 %v14306_v45, %v10358_v63 }
0x34f3   :  { %v10405_v62 = vmul.f32 %v10401_v25, %v10397_v5  ;;  %v10383_v3 = vsub.f32 1.0, %v10379_v57 }
0x34f4   :  { %v10404_v43 = vmul.f32 %v10400_v16, %v10396_v9  ;;  %v10382_v19 = vsub.f32 1.0, %v10378_v47 }
0x34f5   :  { %10409 = vst [vmem:[%s17435_s4 + $0x8] sm:$0xff] %v10405_v62  ;;  %v10391_v18 = vsub.f32 0.0, %v10383_v3 }
0x34f6   :  { %10408 = vst [vmem:[%s17435_s4] sm:$0xff] %v10404_v43  ;;  %v10390_v4 = vsub.f32 0.0, %v10382_v19 }
0x34f7   :  { %v10395_v48 = vsel %vm10387_vm12, %v10383_v3, %v10391_v18 }
0x34f8   :  { %v10403_v30 = vadd.f32 1.0, %v10395_v48  ;;  %v10394_v6 = vsel %vm10386_vm13, %v10382_v19, %v10390_v4 }
0x34f9   :  { %v10402_v33 = vadd.f32 1.0, %v10394_v6 }
0x34fa   :  { %v10407_v1 = vmul.f32 %v10403_v30, %v10399_v13 }
0x34fb   :  { %v10406_v8 = vmul.f32 %v10402_v33, %v10398_v55 }
0x34fc   :  { %10411 = vst [vmem:[%s17435_s4 + $0x18] sm:$0xff] %v10407_v1 }
0x34fd   :  { %10410 = vst [vmem:[%s17435_s4 + $0x10] sm:$0xff] %v10406_v8 }
0x34fe   :  { %14333 = dma.done.wait [#allocation3], 512  }
0x34ff   :  { %14334 = vsyncadd [#allocation3], 4294966784 }
0x3500   :  { %10431 = vsyncpa [#allocation3], 1 }

</bundles_post_ra>
